<compile_context>
chip_gen: v6e
topology: v6e:2x2x1
jax: 0.10.0
libtpu: 0.0.40
codegen_flags: <defaults>
</compile_context>

<pallas_src>
import jax
import jax.numpy as jnp
from jax.experimental import pallas as pl
from jax.experimental.pallas import tpu as pltpu

INPUT_CH = 67
PAD_CH = 128            # INPUT_CH zero-padded to one full 128-lane vreg
FEATURE_CH = 512
MLP_CH = 1024
EDGE_NUM = 1
L = EDGE_NUM + 1        # Conv1d spatial length (mlp_in = L * FEATURE_CH)


def _round_up(x, m):
    return ((x + m - 1) // m) * m


def _cdiv(a, b):
    return -(-a // b)


def _critic_kernel(x_ref,
                   wc0_ref, bc0_ref, wc1_ref, bc1_ref,
                   wc2_ref, bc2_ref, wc3_ref, bc3_ref,
                   wm0_ref, bm0_ref,
                   wm1_ref, bm1_ref,
                   wm2_ref, bm2_ref,
                   o_ref):
    f32 = jnp.float32
    bf16 = jnp.bfloat16
    tb = o_ref.shape[-1]                                  # rows per batch tile

    def dense_relu(a, w_ref, b_ref, out_dtype):
        # bf16 x bf16 MXU matmul, f32 accumulation; bias + ReLU on the VPU.
        y = jnp.dot(a, w_ref[...], preferred_element_type=f32)
        return jnp.maximum(y + b_ref[...], 0.0).astype(out_dtype)

    # Both Conv1d positions stacked on the sublane (M) axis in the wrapper:
    # run the conv stack ONCE on a doubled-M slab (rows [0,tb) = l=0, [tb,2tb) = l=1).
    h = x_ref[0]                                          # (2*tb, PAD_CH) bf16
    h = dense_relu(h, wc0_ref, bc0_ref, bf16)
    h = dense_relu(h, wc1_ref, bc1_ref, bf16)
    h = dense_relu(h, wc2_ref, bc2_ref, bf16)
    h = dense_relu(h, wc3_ref, bc3_ref, bf16)             # (2*tb, FEATURE_CH)

    # Lane-concat the two position halves (both 512 lanes, tile-aligned -> cheap
    # placement); wm0 rows were re-ordered in the wrapper to match this layout,
    # so a single (tb,1024)@(1024,1024) dot replaces the split pair.
    z_in = jnp.concatenate([h[:tb], h[tb:]], axis=-1)     # (tb, 2*FEATURE_CH) bf16
    z = dense_relu(z_in, wm0_ref, bm0_ref, bf16)          # (tb, MLP_CH) bf16
    z = dense_relu(z, wm1_ref, bm1_ref, f32)              # (tb, MLP_CH) f32

    # Final (MLP_CH -> 1) layer: VPU multiply + XLU lane-reduce (no N=1 matmul),
    # then a tiny (tb,1)->(1,tb) transpose (idle XLU slot) for a lane-dense store.
    w_last = wm2_ref[...].astype(f32)                     # (1, MLP_CH)
    v_col = jnp.sum(z * w_last, axis=-1, keepdims=True) + bm2_ref[...]   # (tb, 1)
    o_ref[0] = jnp.transpose(v_col)                       # (1, tb) unmasked vst


def critic_forward(obs, params, *, tile_rows=256):
    """obs: (B, INPUT_CH, L) float32 (PyTorch NCL layout). Returns (B, 1) values."""
    B = obs.shape[0]
    assert obs.shape[1] == INPUT_CH and obs.shape[2] == L

    # --- tile selection -----------------------------------------------------
    # Balanced tiles: tb = ceil(B / n_tiles) so awkward B never pads up to a
    # near-empty extra tile; >= 2 tiles once B is non-trivial (v7x has 2 TCs);
    # 16-row granularity (bf16 sublane tile); 128-multiples for large tiles so
    # the MXU M dimension stays full.
    n_tiles = _cdiv(B, tile_rows)
    if B > 16:
        n_tiles = max(n_tiles, 2)
    tb = _round_up(_cdiv(B, n_tiles), 16)
    if tb >= 256:
        tb = _round_up(tb, 128)
    n_tiles = _cdiv(B, tb)
    b_pad = n_tiles * tb

    f32 = jnp.float32
    bf16 = jnp.bfloat16

    # --- input prep ---------------------------------------------------------
    # (B, C, L) -> (L, B, C) position-major; pad batch & channels; cast to bf16
    # (halves the only streamed DMA); group rows per batch tile so the kernel
    # sees a ready-made (2*tb, PAD_CH) slab with NO in-kernel reshape:
    # tile i, rows [0,tb) = position l=0, rows [tb,2tb) = position l=1.
    x = jnp.transpose(obs.astype(f32), (2, 0, 1))
    x = jnp.pad(x, ((0, 0), (0, b_pad - B), (0, PAD_CH - INPUT_CH)))
    x = x.astype(bf16)
    x = x.reshape(L, n_tiles, tb, PAD_CH).transpose(1, 0, 2, 3)
    x = x.reshape(n_tiles, L * tb, PAD_CH)

    # --- weight prep (bf16 weights, f32 biases) ------------------------------
    # NOTE: params here are stored (in, out) as produced by init_params. Real
    # PyTorch Linear weights are (out, in) and Conv1d weights (out, in, 1);
    # transpose/squeeze them to (in, out) before using this wrapper.
    wc0 = jnp.pad(params["wc0"], ((0, PAD_CH - INPUT_CH), (0, 0))).astype(bf16)
    wc1 = params["wc1"].astype(bf16)
    wc2 = params["wc2"].astype(bf16)
    wc3 = params["wc3"].astype(bf16)
    # PyTorch flatten of (B, C, L) indexes rows as c*L + l; re-order wm0 so rows
    # [0,512) multiply the l=0 half and rows [512,1024) the l=1 half of the
    # lane-concatenated activation.
    wm0s = jnp.concatenate(
        [params["wm0"][0::L, :], params["wm0"][1::L, :]], axis=0).astype(bf16)
    wm1 = params["wm1"].astype(bf16)
    wm2_row = params["wm2"].T.astype(bf16)                # (1, MLP_CH)

    weights = (
        wc0, params["bc0"], wc1, params["bc1"],
        wc2, params["bc2"], wc3, params["bc3"],
        wm0s, params["bm0"],
        wm1, params["bm1"],
        wm2_row, params["bm2"],
    )

    def const_spec(shape):
        nd = len(shape)
        # Constant block index -> stays VMEM-resident across grid steps;
        # single-buffered so resident weights are not doubled in VMEM.
        return pl.BlockSpec(shape, lambda i, _n=nd: (0,) * _n,
                            pipeline_mode=pl.Buffered(1))

    in_specs = [pl.BlockSpec((1, L * tb, PAD_CH), lambda i: (i, 0, 0))]
    in_specs += [const_spec(w.shape) for w in weights]
    # Lane-dense output: one (1, tb) row per tile -> unmasked full-width stores.
    out_spec = pl.BlockSpec((1, 1, tb), lambda i: (i, 0, 0))

    out = pl.pallas_call(
        _critic_kernel,
        out_shape=jax.ShapeDtypeStruct((n_tiles, 1, tb), jnp.float32),
        grid_spec=pltpu.PrefetchScalarGridSpec(
            num_scalar_prefetch=0,
            grid=(n_tiles,),
            in_specs=in_specs,
            out_specs=out_spec,
        ),
        compiler_params=pltpu.CompilerParams(
            dimension_semantics=("parallel",),        # megacore-shardable batch
            vmem_limit_bytes=48 * 1024 * 1024,        # fits v7x's 64 MiB VMEM
        ),
    )(x, *weights)
    return out.reshape(b_pad)[:B, None]


def _uniform(key, shape, fan_in):
    bound = 1.0 / (fan_in ** 0.5)
    return jax.random.uniform(key, shape, jnp.float32, -bound, bound)


def init_params(key):
    """Deterministic params. Weights stored as (in, out) for `x @ W`."""
    keys = jax.random.split(key, 16)
    p = {}
    p["wc0"] = _uniform(keys[0], (INPUT_CH, FEATURE_CH), INPUT_CH)
    p["bc0"] = _uniform(keys[1], (1, FEATURE_CH), INPUT_CH)
    for i in range(1, 4):
        p[f"wc{i}"] = _uniform(keys[2 * i], (FEATURE_CH, FEATURE_CH), FEATURE_CH)
        p[f"bc{i}"] = _uniform(keys[2 * i + 1], (1, FEATURE_CH), FEATURE_CH)
    mlp_in = L * FEATURE_CH
    p["wm0"] = _uniform(keys[8], (mlp_in, MLP_CH), mlp_in)      # rows in c*L+l order
    p["bm0"] = _uniform(keys[9], (1, MLP_CH), mlp_in)
    p["wm1"] = _uniform(keys[10], (MLP_CH, MLP_CH), MLP_CH)
    p["bm1"] = _uniform(keys[11], (1, MLP_CH), MLP_CH)
    p["wm2"] = _uniform(keys[12], (MLP_CH, 1), MLP_CH)
    p["bm2"] = _uniform(keys[13], (1, 1), MLP_CH)
    return p


def reference_forward(obs, params):
    """Pure-JAX replica of the module forward with the same bf16-weight /
    f32-accumulation numerics used inside the kernel."""
    bf16, f32 = jnp.bfloat16, jnp.float32
    B = obs.shape[0]

    def dense(a, w, b):
        return jnp.dot(a.astype(bf16), w.astype(bf16),
                       preferred_element_type=f32) + b

    h = jnp.transpose(obs.astype(f32), (0, 2, 1))              # (B, L, 67)
    h = jax.nn.relu(dense(h, params["wc0"], params["bc0"]))
    for i in range(1, 4):
        h = jax.nn.relu(dense(h, params[f"wc{i}"], params[f"bc{i}"]))
    # PyTorch flatten of (B, C, L): channel-major, index = c*L + l.
    flat = jnp.transpose(h, (0, 2, 1)).reshape(B, FEATURE_CH * L)
    z = jax.nn.relu(dense(flat, params["wm0"], params["bm0"]))
    z = jax.nn.relu(dense(z, params["wm1"], params["bm1"]))
    w_last = params["wm2"].astype(bf16).astype(f32)            # (MLP_CH, 1)
    return jnp.dot(z, w_last,
                   precision=jax.lax.Precision.HIGHEST) + params["bm2"]


if __name__ == "__main__":
    key = jax.random.PRNGKey(0)
    pkey, xkey = jax.random.split(key)
    params = init_params(pkey)

    B = 2
    obs = jax.random.normal(xkey, (B, INPUT_CH, L), jnp.float32)   # NCL, like PyTorch
    # TODO(synk): the torch.tensor()/.cuda() host plumbing in mec_net.forward has
    # no kernel equivalent; inputs are assumed to already be device arrays.

    v = jax.block_until_ready(critic_forward(obs, params))
    v_ref = jax.block_until_ready(reference_forward(obs, params))

    assert v.shape == (B, 1)
    assert jnp.allclose(v, v_ref, rtol=2e-3, atol=2e-3), (v, v_ref)

    print("KERNEL_OK")
</pallas_src>

<mosaic_0001>
module attributes {stable_mosaic.version = 11 : i64} {
  func.func @_critic_kernel(%arg0: i32, %arg1: memref<1x32x128xbf16, #tpu.memory_space<vmem>>, %arg2: memref<128x512xbf16, #tpu.memory_space<vmem>>, %arg3: memref<1x512xf32, #tpu.memory_space<vmem>>, %arg4: memref<512x512xbf16, #tpu.memory_space<vmem>>, %arg5: memref<1x512xf32, #tpu.memory_space<vmem>>, %arg6: memref<512x512xbf16, #tpu.memory_space<vmem>>, %arg7: memref<1x512xf32, #tpu.memory_space<vmem>>, %arg8: memref<512x512xbf16, #tpu.memory_space<vmem>>, %arg9: memref<1x512xf32, #tpu.memory_space<vmem>>, %arg10: memref<1024x1024xbf16, #tpu.memory_space<vmem>>, %arg11: memref<1x1024xf32, #tpu.memory_space<vmem>>, %arg12: memref<1024x1024xbf16, #tpu.memory_space<vmem>>, %arg13: memref<1x1024xf32, #tpu.memory_space<vmem>>, %arg14: memref<1x1024xbf16, #tpu.memory_space<vmem>>, %arg15: memref<1x1xf32, #tpu.memory_space<vmem>>, %arg16: memref<1x1x16xf32, #tpu.memory_space<vmem>>) attributes {dimension_semantics = [#tpu.dimension_semantics<parallel>], iteration_bounds = array<i64: 1>, scalar_prefetch = 0 : i64, scratch_operands = 0 : i64, tpu.core_type = #tpu.core_type<tc>, window_params = [{transform_indices = @transform_0, window_bounds = array<i64: 1, 32, 128>}, {pipeline_mode = #tpu.pipeline_mode<synchronous>, transform_indices = @transform_1, window_bounds = array<i64: 128, 512>}, {pipeline_mode = #tpu.pipeline_mode<synchronous>, transform_indices = @transform_2, window_bounds = array<i64: 1, 512>}, {pipeline_mode = #tpu.pipeline_mode<synchronous>, transform_indices = @transform_3, window_bounds = array<i64: 512, 512>}, {pipeline_mode = #tpu.pipeline_mode<synchronous>, transform_indices = @transform_4, window_bounds = array<i64: 1, 512>}, {pipeline_mode = #tpu.pipeline_mode<synchronous>, transform_indices = @transform_5, window_bounds = array<i64: 512, 512>}, {pipeline_mode = #tpu.pipeline_mode<synchronous>, transform_indices = @transform_6, window_bounds = array<i64: 1, 512>}, {pipeline_mode = #tpu.pipeline_mode<synchronous>, transform_indices = @transform_7, window_bounds = array<i64: 512, 512>}, {pipeline_mode = #tpu.pipeline_mode<synchronous>, transform_indices = @transform_8, window_bounds = array<i64: 1, 512>}, {pipeline_mode = #tpu.pipeline_mode<synchronous>, transform_indices = @transform_9, window_bounds = array<i64: 1024, 1024>}, {pipeline_mode = #tpu.pipeline_mode<synchronous>, transform_indices = @transform_10, window_bounds = array<i64: 1, 1024>}, {pipeline_mode = #tpu.pipeline_mode<synchronous>, transform_indices = @transform_11, window_bounds = array<i64: 1024, 1024>}, {pipeline_mode = #tpu.pipeline_mode<synchronous>, transform_indices = @transform_12, window_bounds = array<i64: 1, 1024>}, {pipeline_mode = #tpu.pipeline_mode<synchronous>, transform_indices = @transform_13, window_bounds = array<i64: 1, 1024>}, {pipeline_mode = #tpu.pipeline_mode<synchronous>, transform_indices = @transform_14, window_bounds = array<i64: 1, 1>}, {transform_indices = @transform_15, window_bounds = array<i64: 1, 1, 16>}]} {
    %c0 = arith.constant 0 : index
    %c0_0 = arith.constant 0 : index
    %c0_1 = arith.constant 0 : index
    %0 = vector.load %arg1[%c0, %c0_0, %c0_1] : memref<1x32x128xbf16, #tpu.memory_space<vmem>>, vector<1x32x128xbf16>
    %1 = vector.shape_cast %0 : vector<1x32x128xbf16> to vector<32x128xbf16>
    %c0_2 = arith.constant 0 : index
    %c0_3 = arith.constant 0 : index
    %2 = vector.load %arg2[%c0_2, %c0_3] : memref<128x512xbf16, #tpu.memory_space<vmem>>, vector<128x512xbf16>
    %cst = arith.constant dense<0.000000e+00> : vector<32x512xf32>
    %3 = tpu.matmul %1, %2, %cst {dimension_numbers = #tpu.dot_dimension_numbers<[1], [0], [0], [1], [0, 0, 1, 1], [], []>} : vector<32x128xbf16>, vector<128x512xbf16>, vector<32x512xf32> -> vector<32x512xf32>
    %c0_4 = arith.constant 0 : index
    %c0_5 = arith.constant 0 : index
    %4 = vector.load %arg3[%c0_4, %c0_5] : memref<1x512xf32, #tpu.memory_space<vmem>>, vector<1x512xf32>
    %5 = vector.broadcast %4 : vector<1x512xf32> to vector<32x512xf32>
    %6 = arith.addf %3, %5 : vector<32x512xf32>
    %cst_6 = arith.constant 0.000000e+00 : f32
    %7 = vector.broadcast %cst_6 : f32 to vector<32x512xf32>
    %8 = arith.maximumf %6, %7 : vector<32x512xf32>
    %9 = arith.truncf %8 : vector<32x512xf32> to vector<32x512xbf16>
    %c0_7 = arith.constant 0 : index
    %c0_8 = arith.constant 0 : index
    %10 = vector.load %arg4[%c0_7, %c0_8] : memref<512x512xbf16, #tpu.memory_space<vmem>>, vector<512x512xbf16>
    %cst_9 = arith.constant dense<0.000000e+00> : vector<32x512xf32>
    %11 = tpu.matmul %9, %10, %cst_9 {dimension_numbers = #tpu.dot_dimension_numbers<[1], [0], [0], [1], [0, 0, 1, 1], [], []>} : vector<32x512xbf16>, vector<512x512xbf16>, vector<32x512xf32> -> vector<32x512xf32>
    %c0_10 = arith.constant 0 : index
    %c0_11 = arith.constant 0 : index
    %12 = vector.load %arg5[%c0_10, %c0_11] : memref<1x512xf32, #tpu.memory_space<vmem>>, vector<1x512xf32>
    %13 = vector.broadcast %12 : vector<1x512xf32> to vector<32x512xf32>
    %14 = arith.addf %11, %13 : vector<32x512xf32>
    %cst_12 = arith.constant 0.000000e+00 : f32
    %15 = vector.broadcast %cst_12 : f32 to vector<32x512xf32>
    %16 = arith.maximumf %14, %15 : vector<32x512xf32>
    %17 = arith.truncf %16 : vector<32x512xf32> to vector<32x512xbf16>
    %c0_13 = arith.constant 0 : index
    %c0_14 = arith.constant 0 : index
    %18 = vector.load %arg6[%c0_13, %c0_14] : memref<512x512xbf16, #tpu.memory_space<vmem>>, vector<512x512xbf16>
    %cst_15 = arith.constant dense<0.000000e+00> : vector<32x512xf32>
    %19 = tpu.matmul %17, %18, %cst_15 {dimension_numbers = #tpu.dot_dimension_numbers<[1], [0], [0], [1], [0, 0, 1, 1], [], []>} : vector<32x512xbf16>, vector<512x512xbf16>, vector<32x512xf32> -> vector<32x512xf32>
    %c0_16 = arith.constant 0 : index
    %c0_17 = arith.constant 0 : index
    %20 = vector.load %arg7[%c0_16, %c0_17] : memref<1x512xf32, #tpu.memory_space<vmem>>, vector<1x512xf32>
    %21 = vector.broadcast %20 : vector<1x512xf32> to vector<32x512xf32>
    %22 = arith.addf %19, %21 : vector<32x512xf32>
    %cst_18 = arith.constant 0.000000e+00 : f32
    %23 = vector.broadcast %cst_18 : f32 to vector<32x512xf32>
    %24 = arith.maximumf %22, %23 : vector<32x512xf32>
    %25 = arith.truncf %24 : vector<32x512xf32> to vector<32x512xbf16>
    %c0_19 = arith.constant 0 : index
    %c0_20 = arith.constant 0 : index
    %26 = vector.load %arg8[%c0_19, %c0_20] : memref<512x512xbf16, #tpu.memory_space<vmem>>, vector<512x512xbf16>
    %cst_21 = arith.constant dense<0.000000e+00> : vector<32x512xf32>
    %27 = tpu.matmul %25, %26, %cst_21 {dimension_numbers = #tpu.dot_dimension_numbers<[1], [0], [0], [1], [0, 0, 1, 1], [], []>} : vector<32x512xbf16>, vector<512x512xbf16>, vector<32x512xf32> -> vector<32x512xf32>
    %c0_22 = arith.constant 0 : index
    %c0_23 = arith.constant 0 : index
    %28 = vector.load %arg9[%c0_22, %c0_23] : memref<1x512xf32, #tpu.memory_space<vmem>>, vector<1x512xf32>
    %29 = vector.broadcast %28 : vector<1x512xf32> to vector<32x512xf32>
    %30 = arith.addf %27, %29 : vector<32x512xf32>
    %cst_24 = arith.constant 0.000000e+00 : f32
    %31 = vector.broadcast %cst_24 : f32 to vector<32x512xf32>
    %32 = arith.maximumf %30, %31 : vector<32x512xf32>
    %33 = arith.truncf %32 : vector<32x512xf32> to vector<32x512xbf16>
    %34 = vector.extract_strided_slice %33 {offsets = [0, 0], sizes = [16, 512], strides = [1, 1]} : vector<32x512xbf16> to vector<16x512xbf16>
    %35 = vector.extract_strided_slice %33 {offsets = [16, 0], sizes = [16, 512], strides = [1, 1]} : vector<32x512xbf16> to vector<16x512xbf16>
    %36 = tpu.concatenate %34, %35 in 1 : vector<16x512xbf16>, vector<16x512xbf16> -> vector<16x1024xbf16>
    %c0_25 = arith.constant 0 : index
    %c0_26 = arith.constant 0 : index
    %37 = vector.load %arg10[%c0_25, %c0_26] : memref<1024x1024xbf16, #tpu.memory_space<vmem>>, vector<1024x1024xbf16>
    %cst_27 = arith.constant dense<0.000000e+00> : vector<16x1024xf32>
    %38 = tpu.matmul %36, %37, %cst_27 {dimension_numbers = #tpu.dot_dimension_numbers<[1], [0], [0], [1], [0, 0, 1, 1], [], []>} : vector<16x1024xbf16>, vector<1024x1024xbf16>, vector<16x1024xf32> -> vector<16x1024xf32>
    %c0_28 = arith.constant 0 : index
    %c0_29 = arith.constant 0 : index
    %39 = vector.load %arg11[%c0_28, %c0_29] : memref<1x1024xf32, #tpu.memory_space<vmem>>, vector<1x1024xf32>
    %40 = vector.broadcast %39 : vector<1x1024xf32> to vector<16x1024xf32>
    %41 = arith.addf %38, %40 : vector<16x1024xf32>
    %cst_30 = arith.constant 0.000000e+00 : f32
    %42 = vector.broadcast %cst_30 : f32 to vector<16x1024xf32>
    %43 = arith.maximumf %41, %42 : vector<16x1024xf32>
    %44 = arith.truncf %43 : vector<16x1024xf32> to vector<16x1024xbf16>
    %c0_31 = arith.constant 0 : index
    %c0_32 = arith.constant 0 : index
    %45 = vector.load %arg12[%c0_31, %c0_32] : memref<1024x1024xbf16, #tpu.memory_space<vmem>>, vector<1024x1024xbf16>
    %cst_33 = arith.constant dense<0.000000e+00> : vector<16x1024xf32>
    %46 = tpu.matmul %44, %45, %cst_33 {dimension_numbers = #tpu.dot_dimension_numbers<[1], [0], [0], [1], [0, 0, 1, 1], [], []>} : vector<16x1024xbf16>, vector<1024x1024xbf16>, vector<16x1024xf32> -> vector<16x1024xf32>
    %c0_34 = arith.constant 0 : index
    %c0_35 = arith.constant 0 : index
    %47 = vector.load %arg13[%c0_34, %c0_35] : memref<1x1024xf32, #tpu.memory_space<vmem>>, vector<1x1024xf32>
    %48 = vector.broadcast %47 : vector<1x1024xf32> to vector<16x1024xf32>
    %49 = arith.addf %46, %48 : vector<16x1024xf32>
    %cst_36 = arith.constant 0.000000e+00 : f32
    %50 = vector.broadcast %cst_36 : f32 to vector<16x1024xf32>
    %51 = arith.maximumf %49, %50 : vector<16x1024xf32>
    %c0_37 = arith.constant 0 : index
    %c0_38 = arith.constant 0 : index
    %52 = vector.load %arg14[%c0_37, %c0_38] : memref<1x1024xbf16, #tpu.memory_space<vmem>>, vector<1x1024xbf16>
    %53 = arith.extf %52 : vector<1x1024xbf16> to vector<1x1024xf32>
    %54 = vector.broadcast %53 : vector<1x1024xf32> to vector<16x1024xf32>
    %55 = arith.mulf %51, %54 : vector<16x1024xf32>
    %cst_39 = arith.constant dense<0.000000e+00> : vector<16xf32>
    %56 = vector.multi_reduction <add>, %55, %cst_39 [1] : vector<16x1024xf32> to vector<16xf32>
    %57 = vector.shape_cast %56 : vector<16xf32> to vector<16x1xf32>
    %c0_40 = arith.constant 0 : index
    %c0_41 = arith.constant 0 : index
    %58 = vector.load %arg15[%c0_40, %c0_41] : memref<1x1xf32, #tpu.memory_space<vmem>>, vector<1x1xf32>
    %59 = vector.broadcast %58 : vector<1x1xf32> to vector<16x1xf32>
    %60 = arith.addf %57, %59 : vector<16x1xf32>
    %61 = tpu.transpose %60, [1, 0] : vector<16x1xf32> -> vector<1x16xf32>
    %c0_42 = arith.constant 0 : index
    %c0_43 = arith.constant 0 : index
    %c0_44 = arith.constant 0 : index
    %62 = vector.load %arg16[%c0_42, %c0_43, %c0_44] : memref<1x1x16xf32, #tpu.memory_space<vmem>>, vector<1x1x16xf32>
    %63 = vector.shape_cast %62 : vector<1x1x16xf32> to vector<1x16xf32>
    %64 = vector.shape_cast %61 : vector<1x16xf32> to vector<1x1x16xf32>
    tpu.vector_store %arg16[%c0_42, %c0_43, %c0_44], %64 {strides = array<i32>} : memref<1x1x16xf32, #tpu.memory_space<vmem>>, vector<1x1x16xf32>,
    return
  }
  func.func @transform_0(%arg0: i32) -> (i32, i32, i32) {
    %c0_i32 = arith.constant 0 : i32
    %c0_i32_0 = arith.constant 0 : i32
    %c0_i32_1 = arith.constant 0 : i32
    return %arg0, %c0_i32, %c0_i32_0 : i32, i32, i32
  }
  func.func @transform_1(%arg0: i32) -> (i32, i32) {
    %c0_i32 = arith.constant 0 : i32
    %c0_i32_0 = arith.constant 0 : i32
    %c0_i32_1 = arith.constant 0 : i32
    return %c0_i32, %c0_i32_0 : i32, i32
  }
  func.func @transform_2(%arg0: i32) -> (i32, i32) {
    %c0_i32 = arith.constant 0 : i32
    %c0_i32_0 = arith.constant 0 : i32
    %c0_i32_1 = arith.constant 0 : i32
    return %c0_i32, %c0_i32_0 : i32, i32
  }
  func.func @transform_3(%arg0: i32) -> (i32, i32) {
    %c0_i32 = arith.constant 0 : i32
    %c0_i32_0 = arith.constant 0 : i32
    %c0_i32_1 = arith.constant 0 : i32
    return %c0_i32, %c0_i32_0 : i32, i32
  }
  func.func @transform_4(%arg0: i32) -> (i32, i32) {
    %c0_i32 = arith.constant 0 : i32
    %c0_i32_0 = arith.constant 0 : i32
    %c0_i32_1 = arith.constant 0 : i32
    return %c0_i32, %c0_i32_0 : i32, i32
  }
  func.func @transform_5(%arg0: i32) -> (i32, i32) {
    %c0_i32 = arith.constant 0 : i32
    %c0_i32_0 = arith.constant 0 : i32
    %c0_i32_1 = arith.constant 0 : i32
    return %c0_i32, %c0_i32_0 : i32, i32
  }
  func.func @transform_6(%arg0: i32) -> (i32, i32) {
    %c0_i32 = arith.constant 0 : i32
    %c0_i32_0 = arith.constant 0 : i32
    %c0_i32_1 = arith.constant 0 : i32
    return %c0_i32, %c0_i32_0 : i32, i32
  }
  func.func @transform_7(%arg0: i32) -> (i32, i32) {
    %c0_i32 = arith.constant 0 : i32
    %c0_i32_0 = arith.constant 0 : i32
    %c0_i32_1 = arith.constant 0 : i32
    return %c0_i32, %c0_i32_0 : i32, i32
  }
  func.func @transform_8(%arg0: i32) -> (i32, i32) {
    %c0_i32 = arith.constant 0 : i32
    %c0_i32_0 = arith.constant 0 : i32
    %c0_i32_1 = arith.constant 0 : i32
    return %c0_i32, %c0_i32_0 : i32, i32
  }
  func.func @transform_9(%arg0: i32) -> (i32, i32) {
    %c0_i32 = arith.constant 0 : i32
    %c0_i32_0 = arith.constant 0 : i32
    %c0_i32_1 = arith.constant 0 : i32
    return %c0_i32, %c0_i32_0 : i32, i32
  }
  func.func @transform_10(%arg0: i32) -> (i32, i32) {
    %c0_i32 = arith.constant 0 : i32
    %c0_i32_0 = arith.constant 0 : i32
    %c0_i32_1 = arith.constant 0 : i32
    return %c0_i32, %c0_i32_0 : i32, i32
  }
  func.func @transform_11(%arg0: i32) -> (i32, i32) {
    %c0_i32 = arith.constant 0 : i32
    %c0_i32_0 = arith.constant 0 : i32
    %c0_i32_1 = arith.constant 0 : i32
    return %c0_i32, %c0_i32_0 : i32, i32
  }
  func.func @transform_12(%arg0: i32) -> (i32, i32) {
    %c0_i32 = arith.constant 0 : i32
    %c0_i32_0 = arith.constant 0 : i32
    %c0_i32_1 = arith.constant 0 : i32
    return %c0_i32, %c0_i32_0 : i32, i32
  }
  func.func @transform_13(%arg0: i32) -> (i32, i32) {
    %c0_i32 = arith.constant 0 : i32
    %c0_i32_0 = arith.constant 0 : i32
    %c0_i32_1 = arith.constant 0 : i32
    return %c0_i32, %c0_i32_0 : i32, i32
  }
  func.func @transform_14(%arg0: i32) -> (i32, i32) {
    %c0_i32 = arith.constant 0 : i32
    %c0_i32_0 = arith.constant 0 : i32
    %c0_i32_1 = arith.constant 0 : i32
    return %c0_i32, %c0_i32_0 : i32, i32
  }
  func.func @transform_15(%arg0: i32) -> (i32, i32, i32) {
    %c0_i32 = arith.constant 0 : i32
    %c0_i32_0 = arith.constant 0 : i32
    %c0_i32_1 = arith.constant 0 : i32
    return %arg0, %c0_i32, %c0_i32_0 : i32, i32, i32
  }
}

</mosaic_0001>

<bundles_post_ra>
// kernel: tpu_custom_call.1
= control target key start
LH: loop header
LB: loop body
LE: loop exit
PB: predicated region body
PF: predicated region fallthrough
CT: control target
= control target key end

     0   :  { %s14561_s0 = inlined_call_operand.hbm [shape: bf16[1,32,128], index: 0, kind: input, shape index: {}]   ;;  %s14562_s1 = inlined_call_operand.hbm [shape: bf16[128,512], index: 1, kind: input, shape index: {}]   ;;  %s14563_s2 = inlined_call_operand.hbm [shape: f32[1,512], index: 2, kind: input, shape index: {}]   ;;  %s14564_s3 = inlined_call_operand.hbm [shape: bf16[512,512], index: 3, kind: input, shape index: {}]   ;;  %s14565_s4 = inlined_call_operand.hbm [shape: f32[1,512], index: 4, kind: input, shape index: {}]   ;;  %s14566_s5 = inlined_call_operand.hbm [shape: bf16[512,512], index: 5, kind: input, shape index: {}]   ;;  %s14567_s6 = inlined_call_operand.hbm [shape: f32[1,512], index: 6, kind: input, shape index: {}]   ;;  %s14568_s7 = inlined_call_operand.hbm [shape: bf16[512,512], index: 7, kind: input, shape index: {}]   ;;  %s14569_s8 = inlined_call_operand.hbm [shape: f32[1,512], index: 8, kind: input, shape index: {}]   ;;  %s14570_s9 = inlined_call_operand.hbm [shape: bf16[1024,1024], index: 9, kind: input, shape index: {}]   ;;  %s14571_s10 = inlined_call_operand.hbm [shape: f32[1,1024], index: 10, kind: input, shape index: {}]   ;;  %s14572_s11 = inlined_call_operand.hbm [shape: bf16[1024,1024], index: 11, kind: input, shape index: {}]   ;;  %s14573_s12 = inlined_call_operand.hbm [shape: f32[1,1024], index: 12, kind: input, shape index: {}]   ;;  %s14574_s13 = inlined_call_operand.hbm [shape: bf16[1,1024], index: 13, kind: input, shape index: {}]   ;;  %s14575_s14 = inlined_call_operand.<no memory space> [shape: f32[1,1], index: 14, kind: input, shape index: {}]   ;;  %s14576_s15 = inlined_call_operand.hbm [shape: f32[1,1,16], index: 15, kind: output, shape index: {}]  }
   0x1   :  { %v20_v0 = vstv %s14575_s14 }
   0x2   :  { %21 = vst [vmem:[#allocation2] sm:$0x1] %v20_v0 }
   0x3   :  { %22 = vsyncpa [#allocation4], 0 }
   0x4   :  { %23 = vsyncpa [#allocation7], 0 }
   0x5   :  { %24 = vsyncpa [#allocation10], 0 }
   0x6   :  { %25 = vsyncpa [#allocation13], 0 }
   0x7   :  { %26 = vsyncpa [#allocation16], 0 }
   0x8   :  { %27 = vsyncpa [#allocation19], 0 }
   0x9   :  { %28 = vsyncpa [#allocation22], 0 }
   0xa   :  { %29 = vsyncpa [#allocation25], 0 }
   0xb   :  { %30 = vsyncpa [#allocation5], 0  ;;  %s13900_s20 = smov [#allocation6]  }
   0xc   :  { %s48_s21 = sshll.u32 %s13900_s20, 4  ;;  %s49_s21 = int_to_ptr.vmem [resolvable:$true] %s48_s21 }
   0xd   :  { %s13590_s22 = scalar_lea.vmem %s49_s21, 4096  ;;  %p13595_p1 = scmp.lt.s32.totalorder %s49_s21, %s49_s21 }
   0xe   :  { %p13591_p0 = scmp.ne.s32.totalorder %s49_s21, %s13590_s22  ;;  %p13596_p2 = scmp.lt.s32.totalorder %s13590_s22, %s13590_s22 }
  0x10   :  { %p13597_p3 = por %p13596_p2, %p13595_p1 }
  0x12   :  { %p13598_p4 = pnand %p13597_p3, %p13591_p0 }
  0x14   :  { %13601 = shalt.err (!%p13598_p4)
}
  0x15   :  { %s13901_s14 = smov 256   ;;  %s13902_s23 = smov 16  }
  0x16   :  { %54 = dma.hbm_to_vmem [thread:$0]  %s14562_s1, 4096, %s49_s21, [#allocation7], %s13901_s14, %s13901_s14, %s13902_s23  }
  0x17   :  { %s13903_s26 = smov [#allocation9]   ;;  %s13904_s28 = smov [#allocation12]  }
  0x18   :  { %s70_s27 = sshll.u32 %s13903_s26, 4  ;;  %s92_s29 = sshll.u32 %s13904_s28, 4  ;;  %s71_s27 = int_to_ptr.vmem [resolvable:$true] %s70_s27  ;;  %s93_s29 = int_to_ptr.vmem [resolvable:$true] %s92_s29 }
  0x19   :  { %s13610_s30 = scalar_lea.vmem %s71_s27, 16384  ;;  %p13615_p6 = scmp.lt.s32.totalorder %s71_s27, %s71_s27 }
  0x1a   :  { %p13611_p5 = scmp.ne.s32.totalorder %s71_s27, %s13610_s30  ;;  %p13616_p7 = scmp.lt.s32.totalorder %s13610_s30, %s13610_s30 }
  0x1c   :  { %p13617_p8 = por %p13616_p7, %p13615_p6 }
  0x1e   :  { %p13618_p9 = pnand %p13617_p8, %p13611_p5 }
  0x20   :  { %13621 = shalt.err (!%p13618_p9)
}
  0x21   :  { %76 = dma.hbm_to_vmem [thread:$0]  %s14564_s3, 16384, %s71_s27, [#allocation10], %s13901_s14, %s13901_s14, %s13902_s23  }
  0x22   :  { %s13630_s1 = scalar_lea.vmem %s93_s29, 16384  ;;  %p13635_p11 = scmp.lt.s32.totalorder %s93_s29, %s93_s29 }
  0x23   :  { %p13631_p10 = scmp.ne.s32.totalorder %s93_s29, %s13630_s1  ;;  %p13636_p12 = scmp.lt.s32.totalorder %s13630_s1, %s13630_s1 }
  0x25   :  { %p13637_p13 = por %p13636_p12, %p13635_p11 }
  0x27   :  { %p13638_p0 = pnand %p13637_p13, %p13631_p10 }
  0x29   :  { %13641 = shalt.err (!%p13638_p0)
}
  0x2a   :  { %98 = dma.hbm_to_vmem [thread:$0]  %s14566_s5, 16384, %s93_s29, [#allocation13], %s13901_s14, %s13901_s14, %s13902_s23  }
  0x2b   :  { %s13905_s20 = smov [#allocation15]   ;;  %s13906_s22 = smov [#allocation18]  }
  0x2c   :  { %s114_s21 = sshll.u32 %s13905_s20, 4  ;;  %s136_s3 = sshll.u32 %s13906_s22, 4  ;;  %s115_s21 = int_to_ptr.vmem [resolvable:$true] %s114_s21  ;;  %s137_s3 = int_to_ptr.vmem [resolvable:$true] %s136_s3 }
  0x2d   :  { %s13650_s24 = scalar_lea.vmem %s115_s21, 16384  ;;  %p13655_p2 = scmp.lt.s32.totalorder %s115_s21, %s115_s21 }
  0x2e   :  { %p13651_p1 = scmp.ne.s32.totalorder %s115_s21, %s13650_s24  ;;  %p13656_p3 = scmp.lt.s32.totalorder %s13650_s24, %s13650_s24 }
  0x30   :  { %p13657_p4 = por %p13656_p3, %p13655_p2 }
  0x32   :  { %p13658_p5 = pnand %p13657_p4, %p13651_p1 }
  0x34   :  { %13661 = shalt.err (!%p13658_p5)
}
  0x35   :  { %120 = dma.hbm_to_vmem [thread:$0]  %s14568_s7, 16384, %s115_s21, [#allocation16], %s13901_s14, %s13901_s14, %s13902_s23  }
  0x36   :  { %s13670_s5 = scalar_lea.vmem %s137_s3, 65536  ;;  %p13675_p7 = scmp.lt.s32.totalorder %s137_s3, %s137_s3 }
  0x37   :  { %p13671_p6 = scmp.ne.s32.totalorder %s137_s3, %s13670_s5  ;;  %p13676_p8 = scmp.lt.s32.totalorder %s13670_s5, %s13670_s5 }
  0x39   :  { %p13677_p9 = por %p13676_p8, %p13675_p7 }
  0x3b   :  { %p13678_p10 = pnand %p13677_p9, %p13671_p6 }
  0x3d   :  { %13681 = shalt.err (!%p13678_p10)
}
  0x3e   :  { %s13907_s27 = smov 512   ;;  %s13908_s28 = smov 32  }
  0x3f   :  { %142 = dma.hbm_to_vmem [thread:$0]  %s14570_s9, 65536, %s137_s3, [#allocation19], %s13907_s27, %s13907_s27, %s13908_s28  }
  0x40   :  { %s13909_s16 = smov [#allocation21]   ;;  %s13910_s1 = smov [#allocation3]  }
  0x41   :  { %s158_s17 = sshll.u32 %s13909_s16, 4  ;;  %s36_s18 = sshll.u32 %s13910_s1, 4  ;;  %s159_s17 = int_to_ptr.vmem [resolvable:$true] %s158_s17  ;;  %s37_s18 = int_to_ptr.vmem [resolvable:$true] %s36_s18 }
  0x42   :  { %s13690_s7 = scalar_lea.vmem %s159_s17, 65536  ;;  %p13695_p12 = scmp.lt.s32.totalorder %s159_s17, %s159_s17 }
  0x43   :  { %p13691_p11 = scmp.ne.s32.totalorder %s159_s17, %s13690_s7  ;;  %p13696_p13 = scmp.lt.s32.totalorder %s13690_s7, %s13690_s7 }
  0x45   :  { %p13697_p0 = por %p13696_p13, %p13695_p12 }
  0x47   :  { %p13698_p1 = pnand %p13697_p0, %p13691_p11 }
  0x49   :  { %13701 = shalt.err (!%p13698_p1)
}
  0x4a   :  { %164 = dma.hbm_to_vmem [thread:$0]  %s14572_s11, 65536, %s159_s17, [#allocation22], %s13907_s27, %s13907_s27, %s13908_s28  }
  0x4b   :  { %s13710_s19 = scalar_lea.vmem %s37_s18, 256  ;;  %p13715_p3 = scmp.lt.s32.totalorder %s37_s18, %s37_s18 }
  0x4c   :  { %p13711_p2 = scmp.ne.s32.totalorder %s37_s18, %s13710_s19  ;;  %p13716_p4 = scmp.lt.s32.totalorder %s13710_s19, %s13710_s19 }
  0x4e   :  { %p13717_p5 = por %p13716_p4, %p13715_p3 }
  0x50   :  { %p13718_p6 = pnand %p13717_p5, %p13711_p2 }
  0x52   :  { %13721 = shalt.err (!%p13718_p6)
}
  0x53   :  { %s13911_s9 = smov 64   ;;  %s13912_s20 = smov 4  }
  0x54   :  { %42 = dma.hbm_to_vmem [thread:$0]  %s14561_s0, 256, %s37_s18, [#allocation4], %s13911_s9, %s13911_s9, %s13912_s20  }
  0x55   :  { %s13913_s3 = smov [#allocation8]   ;;  %s13914_s25 = smov [#allocation11]  }
  0x56   :  { %s61_s24 = sshll.u32 %s13913_s3, 4  ;;  %s83_s26 = sshll.u32 %s13914_s25, 4  ;;  %s62_s24 = int_to_ptr.vmem [resolvable:$true] %s61_s24  ;;  %s84_s26 = int_to_ptr.vmem [resolvable:$true] %s83_s26 }
  0x57   :  { %s13730_s11 = scalar_lea.vmem %s62_s24, 64  ;;  %p13735_p8 = scmp.lt.s32.totalorder %s62_s24, %s62_s24 }
  0x58   :  { %p13731_p7 = scmp.ne.s32.totalorder %s62_s24, %s13730_s11  ;;  %p13736_p9 = scmp.lt.s32.totalorder %s13730_s11, %s13730_s11 }
  0x5a   :  { %p13737_p10 = por %p13736_p9, %p13735_p8 }
  0x5c   :  { %p13738_p11 = pnand %p13737_p10, %p13731_p7 }
  0x5e   :  { %13741 = shalt.err (!%p13738_p11)
}
  0x5f   :  { %64 = dma.hbm_to_vmem [thread:$0]  %s14563_s2, 64, %s62_s24, [#allocation7]  }
  0x60   :  { %s13750_s28 = scalar_lea.vmem %s84_s26, 64  ;;  %p13755_p13 = scmp.lt.s32.totalorder %s84_s26, %s84_s26 }
  0x61   :  { %p13751_p12 = scmp.ne.s32.totalorder %s84_s26, %s13750_s28  ;;  %p13756_p0 = scmp.lt.s32.totalorder %s13750_s28, %s13750_s28 }
  0x63   :  { %p13757_p1 = por %p13756_p0, %p13755_p13 }
  0x65   :  { %p13758_p2 = pnand %p13757_p1, %p13751_p12 }
  0x67   :  { %13761 = shalt.err (!%p13758_p2)
}
  0x68   :  { %86 = dma.hbm_to_vmem [thread:$0]  %s14565_s4, 64, %s84_s26, [#allocation10]  }
  0x69   :  { %s13915_s30 = smov [#allocation14]   ;;  %s13916_s17 = smov [#allocation17]  }
  0x6a   :  { %s105_s16 = sshll.u32 %s13915_s30, 4  ;;  %s127_s1 = sshll.u32 %s13916_s17, 4  ;;  %s106_s16 = int_to_ptr.vmem [resolvable:$true] %s105_s16  ;;  %s128_s1 = int_to_ptr.vmem [resolvable:$true] %s127_s1 }
  0x6b   :  { %s13770_s18 = scalar_lea.vmem %s106_s16, 64  ;;  %p13775_p4 = scmp.lt.s32.totalorder %s106_s16, %s106_s16 }
  0x6c   :  { %p13771_p3 = scmp.ne.s32.totalorder %s106_s16, %s13770_s18  ;;  %p13776_p5 = scmp.lt.s32.totalorder %s13770_s18, %s13770_s18 }
  0x6e   :  { %p13777_p6 = por %p13776_p5, %p13775_p4 }
  0x70   :  { %p13778_p7 = pnand %p13777_p6, %p13771_p3 }
  0x72   :  { %13781 = shalt.err (!%p13778_p7)
}
  0x73   :  { %108 = dma.hbm_to_vmem [thread:$0]  %s14567_s6, 64, %s106_s16, [#allocation13]  }
  0x74   :  { %s13790_s14 = scalar_lea.vmem %s128_s1, 64  ;;  %p13795_p9 = scmp.lt.s32.totalorder %s128_s1, %s128_s1 }
  0x75   :  { %p13791_p8 = scmp.ne.s32.totalorder %s128_s1, %s13790_s14  ;;  %p13796_p10 = scmp.lt.s32.totalorder %s13790_s14, %s13790_s14 }
  0x77   :  { %p13797_p11 = por %p13796_p10, %p13795_p9 }
  0x79   :  { %p13798_p12 = pnand %p13797_p11, %p13791_p8 }
  0x7b   :  { %13801 = shalt.err (!%p13798_p12)
}
  0x7c   :  { %130 = dma.hbm_to_vmem [thread:$0]  %s14569_s8, 64, %s128_s1, [#allocation16]  }
  0x7d   :  { %s13917_s19 = smov [#allocation20]   ;;  %s13918_s20 = smov [#allocation23]  }
  0x7e   :  { %s149_s9 = sshll.u32 %s13917_s19, 4  ;;  %s171_s21 = sshll.u32 %s13918_s20, 4  ;;  %s150_s9 = int_to_ptr.vmem [resolvable:$true] %s149_s9  ;;  %s172_s21 = int_to_ptr.vmem [resolvable:$true] %s171_s21 }
  0x7f   :  { %s13810_s22 = scalar_lea.vmem %s150_s9, 128  ;;  %p13815_p0 = scmp.lt.s32.totalorder %s150_s9, %s150_s9 }
  0x80   :  { %p13811_p13 = scmp.ne.s32.totalorder %s150_s9, %s13810_s22  ;;  %p13816_p1 = scmp.lt.s32.totalorder %s13810_s22, %s13810_s22 }
  0x82   :  { %p13817_p2 = por %p13816_p1, %p13815_p0 }
  0x84   :  { %p13818_p3 = pnand %p13817_p2, %p13811_p13 }
  0x86   :  { %13821 = shalt.err (!%p13818_p3)
}
  0x87   :  { %152 = dma.hbm_to_vmem [thread:$0]  %s14571_s10, 128, %s150_s9, [#allocation19]  }
  0x88   :  { %s13830_s24 = scalar_lea.vmem %s172_s21, 128  ;;  %p13835_p5 = scmp.lt.s32.totalorder %s172_s21, %s172_s21 }
  0x89   :  { %p13831_p4 = scmp.ne.s32.totalorder %s172_s21, %s13830_s24  ;;  %p13836_p6 = scmp.lt.s32.totalorder %s13830_s24, %s13830_s24 }
  0x8b   :  { %p13837_p7 = por %p13836_p6, %p13835_p5 }
  0x8d   :  { %p13838_p8 = pnand %p13837_p7, %p13831_p4 }
  0x8f   :  { %13841 = shalt.err (!%p13838_p8)
}
  0x90   :  { %174 = dma.hbm_to_vmem [thread:$0]  %s14573_s12, 128, %s172_s21, [#allocation22]  }
  0x91   :  { %s13919_s26 = smov [#allocation24]  }
  0x92   :  { %s181_s11 = sshll.u32 %s13919_s26, 4  ;;  %s182_s11 = int_to_ptr.vmem [resolvable:$true] %s181_s11 }
  0x93   :  { %s13850_s5 = scalar_lea.vmem %s182_s11, 128  ;;  %p13855_p10 = scmp.lt.s32.totalorder %s182_s11, %s182_s11 }
  0x94   :  { %p13851_p9 = scmp.ne.s32.totalorder %s182_s11, %s13850_s5  ;;  %p13856_p11 = scmp.lt.s32.totalorder %s13850_s5, %s13850_s5 }
  0x96   :  { %p13857_p12 = por %p13856_p11, %p13855_p10 }
  0x98   :  { %p13858_p13 = pnand %p13857_p12, %p13851_p9 }
  0x9a   :  { %13861 = shalt.err (!%p13858_p13)
}
  0x9b   :  { %184 = dma.hbm_to_vmem [thread:$0]  %s14574_s13, 128, %s182_s11, [#allocation25]  }
  0x9c   :  { %13882 = dma.done.wait [#allocation4], 256  }
  0x9d   :  { %13883 = vsyncadd [#allocation4], 4294967040 }
  0x9e   :  { %13884 = dma.done.wait [#allocation7], 4160  }
  0x9f   :  { %13885 = vsyncadd [#allocation7], 4294963136 }
  0xa0   :  { %13886 = dma.done.wait [#allocation10], 16448  }
  0xa1   :  { %13887 = vsyncadd [#allocation10], 4294950848 }
  0xa2   :  { %13888 = dma.done.wait [#allocation13], 16448  }
  0xa3   :  { %13889 = vsyncadd [#allocation13], 4294950848 }
  0xa4   :  { %13890 = dma.done.wait [#allocation16], 16448  }
  0xa5   :  { %13891 = vsyncadd [#allocation16], 4294950848 }
  0xa6   :  { %13892 = dma.done.wait [#allocation19], 65664  }
  0xa7   :  { %13893 = vsyncadd [#allocation19], 4294901632 }
  0xa8   :  { %13894 = dma.done.wait [#allocation22], 65664  }
  0xa9   :  { %13895 = vsyncadd [#allocation22], 4294901632 }
  0xaa   :  { %13896 = dma.done.wait [#allocation25], 128  }
  0xab   :  { %13897 = vsyncadd [#allocation25], 4294967168  ;;  %v13920_v1 = vmov 0   ;;  %v12954_v2 = vld [vmem:[#allocation6 + $0xe4] ss:$16 sps:$4 sm:$0xff]   ;;  %v13003_v45 = vld [vmem:[#allocation3 + $0x8] sm:$0xff]  }
  0xac   :  { %492 = vmatprep.mubr.bf16.mxu0 %v13920_v1  ;;  %545 = vmatprep.mubr.bf16.mxu1 %v13920_v1  ;;  %v12956_v3 = vld [vmem:[#allocation6 + $0xec] ss:$16 sps:$4 sm:$0xff]   ;;  %v12958_v4 = vld [vmem:[#allocation6 + $0xe0] ss:$16 sps:$4 sm:$0xff]   ;;  %v12959_v5 = vld [vmem:[#allocation6 + $0xe8] ss:$16 sps:$4 sm:$0xff]  }
  0xad   :  { %460 = vmatprep.subr.bf16.mxu0 %v12954_v2  ;;  %513 = vmatprep.subr.bf16.mxu1 %v12956_v3  ;;  %v12960_v6 = vld [vmem:[#allocation6 + $0xc4] ss:$16 sps:$4 sm:$0xff]   ;;  %v12962_v7 = vld [vmem:[#allocation6 + $0xcc] ss:$16 sps:$4 sm:$0xff]   ;;  %v12964_v8 = vld [vmem:[#allocation6 + $0xc0] ss:$16 sps:$4 sm:$0xff]  }
  0xae   :  { %461 = vmatpush1.bf16.msra.mxu0 %v12958_v4  ;;  %514 = vmatpush1.bf16.msra.mxu1 %v12959_v5  ;;  %v12965_v9 = vld [vmem:[#allocation6 + $0xc8] ss:$16 sps:$4 sm:$0xff]   ;;  %v12966_v10 = vld [vmem:[#allocation6 + $0xa4] ss:$16 sps:$4 sm:$0xff]   ;;  %v12968_v11 = vld [vmem:[#allocation6 + $0xac] ss:$16 sps:$4 sm:$0xff]  }
  0xaf   :  { %462 = vmatprep.subr.bf16.mxu0 %v12960_v6  ;;  %515 = vmatprep.subr.bf16.mxu1 %v12962_v7  ;;  %v12970_v12 = vld [vmem:[#allocation6 + $0xa0] ss:$16 sps:$4 sm:$0xff]   ;;  %v12971_v13 = vld [vmem:[#allocation6 + $0xa8] ss:$16 sps:$4 sm:$0xff]   ;;  %v12972_v14 = vld [vmem:[#allocation6 + $0x84] ss:$16 sps:$4 sm:$0xff]  }
  0xb0   :  { %v12974_v15 = vld [vmem:[#allocation6 + $0x8c] ss:$16 sps:$4 sm:$0xff]   ;;  %v12976_v16 = vld [vmem:[#allocation6 + $0x80] ss:$16 sps:$4 sm:$0xff]   ;;  %v12977_v17 = vld [vmem:[#allocation6 + $0x88] ss:$16 sps:$4 sm:$0xff]  }
  0xb1   :  { %v12978_v18 = vld [vmem:[#allocation6 + $0x64] ss:$16 sps:$4 sm:$0xff]   ;;  %v12980_v19 = vld [vmem:[#allocation6 + $0x6c] ss:$16 sps:$4 sm:$0xff]   ;;  %v12982_v20 = vld [vmem:[#allocation6 + $0x60] ss:$16 sps:$4 sm:$0xff]  }
  0xb2   :  { %463 = vmatpush1.bf16.msra.mxu0 %v12964_v8  ;;  %516 = vmatpush1.bf16.msra.mxu1 %v12965_v9  ;;  %v12983_v21 = vld [vmem:[#allocation6 + $0x68] ss:$16 sps:$4 sm:$0xff]   ;;  %v12984_v22 = vld [vmem:[#allocation6 + $0x44] ss:$16 sps:$4 sm:$0xff]   ;;  %v12986_v23 = vld [vmem:[#allocation6 + $0x4c] ss:$16 sps:$4 sm:$0xff]  }
  0xb3   :  { %464 = vmatprep.subr.bf16.mxu0 %v12966_v10  ;;  %517 = vmatprep.subr.bf16.mxu1 %v12968_v11  ;;  %v12988_v24 = vld [vmem:[#allocation6 + $0x40] ss:$16 sps:$4 sm:$0xff]   ;;  %v12989_v25 = vld [vmem:[#allocation6 + $0x48] ss:$16 sps:$4 sm:$0xff]   ;;  %v12990_v26 = vld [vmem:[#allocation6 + $0x24] ss:$16 sps:$4 sm:$0xff]  }
  0xb4   :  { %v12992_v27 = vld [vmem:[#allocation6 + $0x2c] ss:$16 sps:$4 sm:$0xff]   ;;  %v12994_v28 = vld [vmem:[#allocation6 + $0x20] ss:$16 sps:$4 sm:$0xff]   ;;  %v12995_v29 = vld [vmem:[#allocation6 + $0x28] ss:$16 sps:$4 sm:$0xff]  }
  0xb5   :  { %v12996_v30 = vld [vmem:[#allocation6 + $0x4] ss:$16 sps:$4 sm:$0xff]   ;;  %v12998_v31 = vld [vmem:[#allocation6 + $0xc] ss:$16 sps:$4 sm:$0xff]   ;;  %v13000_v32 = vld [vmem:[#allocation6] ss:$16 sps:$4 sm:$0xff]  }
  0xb6   :  { %465 = vmatpush1.bf16.msra.mxu0 %v12970_v12  ;;  %518 = vmatpush1.bf16.msra.mxu1 %v12971_v13  ;;  %v13001_v33 = vld [vmem:[#allocation6 + $0x8] ss:$16 sps:$4 sm:$0xff]   ;;  %v13002_v36 = vld [vmem:[#allocation3] sm:$0xff]   ;;  %s13921_s12 = smov [#allocation26]   ;;  %vm11464_vm0 = vcmask 122880  }
  0xb7   :  { %466 = vmatprep.subr.bf16.mxu0 %v12972_v14  ;;  %519 = vmatprep.subr.bf16.mxu1 %v12974_v15  ;;  %v13006_v34 = vld [vmem:[#allocation9 + $0xe4] ss:$16 sps:$4 sm:$0xff]   ;;  %v13004_v37 = vld [vmem:[#allocation9 + $0xe0] ss:$16 sps:$4 sm:$0xff]   ;;  %s11472_s13 = sshll.u32 %s13921_s12, 4  ;;  %s11473_s13 = int_to_ptr.vmem [resolvable:$true] %s11472_s13 }
  0xb8   :  { %v13009_v35 = vld [vmem:[#allocation9 + $0x2e4] ss:$16 sps:$4 sm:$0xff]   ;;  %v13007_v38 = vld [vmem:[#allocation9 + $0x2e0] ss:$16 sps:$4 sm:$0xff]   ;;  %s13862_s28 = scalar_lea.vmem %s11473_s13, 16  ;;  %s13866_s0 = scalar_lea.vmem %s11473_s13, 32 }
  0xb9   :  { %v13012_v39 = vld [vmem:[#allocation9 + $0xc4] ss:$16 sps:$4 sm:$0xff]   ;;  %v13010_v41 = vld [vmem:[#allocation9 + $0xc0] ss:$16 sps:$4 sm:$0xff]   ;;  %p13863_p0 = scmp.ne.s32.totalorder %s11473_s13, %s13862_s28  ;;  %p13867_p1 = scmp.lt.s32.totalorder %s11473_s13, %s11473_s13 }
  0xba   :  { %467 = vmatpush1.bf16.msra.mxu0 %v12976_v16  ;;  %520 = vmatpush1.bf16.msra.mxu1 %v12977_v17  ;;  %v13015_v40 = vld [vmem:[#allocation9 + $0x2c4] ss:$16 sps:$4 sm:$0xff]   ;;  %v13013_v42 = vld [vmem:[#allocation9 + $0x2c0] ss:$16 sps:$4 sm:$0xff]   ;;  %p13868_p2 = scmp.lt.s32.totalorder %s13866_s0, %s13862_s28 }
  0xbb   :  { %468 = vmatprep.subr.bf16.mxu0 %v12978_v18  ;;  %521 = vmatprep.subr.bf16.mxu1 %v12980_v19  ;;  %v13018_v43 = vld [vmem:[#allocation9 + $0xa4] ss:$16 sps:$4 sm:$0xff]   ;;  %v13016_v46 = vld [vmem:[#allocation9 + $0xa0] ss:$16 sps:$4 sm:$0xff]  }
  0xbc   :  { %v13021_v44 = vld [vmem:[#allocation9 + $0x2a4] ss:$16 sps:$4 sm:$0xff]   ;;  %v13019_v47 = vld [vmem:[#allocation9 + $0x2a0] ss:$16 sps:$4 sm:$0xff]   ;;  %p13869_p3 = por %p13868_p2, %p13867_p1 }
  0xbd   :  { %v13024_v48 = vld [vmem:[#allocation9 + $0x84] ss:$16 sps:$4 sm:$0xff]   ;;  %v13022_v50 = vld [vmem:[#allocation9 + $0x80] ss:$16 sps:$4 sm:$0xff]  }
  0xbe   :  { %469 = vmatpush1.bf16.msra.mxu0 %v12982_v20  ;;  %522 = vmatpush1.bf16.msra.mxu1 %v12983_v21  ;;  %v13027_v49 = vld [vmem:[#allocation9 + $0x284] ss:$16 sps:$4 sm:$0xff]   ;;  %v13025_v51 = vld [vmem:[#allocation9 + $0x280] ss:$16 sps:$4 sm:$0xff]   ;;  %p13870_p4 = pnand %p13869_p3, %p13863_p0 }
  0xbf   :  { %470 = vmatprep.subr.bf16.mxu0 %v12984_v22  ;;  %523 = vmatprep.subr.bf16.mxu1 %v12986_v23  ;;  %v13030_v52 = vld [vmem:[#allocation9 + $0x64] ss:$16 sps:$4 sm:$0xff]   ;;  %v13028_v54 = vld [vmem:[#allocation9 + $0x60] ss:$16 sps:$4 sm:$0xff]  }
  0xc0   :  { %v13033_v53 = vld [vmem:[#allocation9 + $0x264] ss:$16 sps:$4 sm:$0xff]   ;;  %v13031_v55 = vld [vmem:[#allocation9 + $0x260] ss:$16 sps:$4 sm:$0xff]  }
  0xc1   :  { %v13036_v56 = vld [vmem:[#allocation9 + $0x44] ss:$16 sps:$4 sm:$0xff]   ;;  %v13034_v58 = vld [vmem:[#allocation9 + $0x40] ss:$16 sps:$4 sm:$0xff]  }
  0xc2   :  { %471 = vmatpush1.bf16.msra.mxu0 %v12988_v24  ;;  %524 = vmatpush1.bf16.msra.mxu1 %v12989_v25  ;;  %v13039_v57 = vld [vmem:[#allocation9 + $0x244] ss:$16 sps:$4 sm:$0xff]   ;;  %v13037_v59 = vld [vmem:[#allocation9 + $0x240] ss:$16 sps:$4 sm:$0xff]  }
  0xc3   :  { %472 = vmatprep.subr.bf16.mxu0 %v12990_v26  ;;  %525 = vmatprep.subr.bf16.mxu1 %v12992_v27  ;;  %v13042_v60 = vld [vmem:[#allocation9 + $0x24] ss:$16 sps:$4 sm:$0xff]   ;;  %v13040_v62 = vld [vmem:[#allocation9 + $0x20] ss:$16 sps:$4 sm:$0xff]  }
  0xc4   :  { %v13045_v61 = vld [vmem:[#allocation9 + $0x224] ss:$16 sps:$4 sm:$0xff]   ;;  %v13043_v63 = vld [vmem:[#allocation9 + $0x220] ss:$16 sps:$4 sm:$0xff]  }
  0xc5   :  { %v13048_v0 = vld [vmem:[#allocation9 + $0x4] ss:$16 sps:$4 sm:$0xff]   ;;  %v13046_v2 = vld [vmem:[#allocation9] ss:$16 sps:$4 sm:$0xff]  }
  0xc6   :  { %473 = vmatpush1.bf16.msra.mxu0 %v12994_v28  ;;  %526 = vmatpush1.bf16.msra.mxu1 %v12995_v29  ;;  %v13049_v3 = vld [vmem:[#allocation9 + $0x200] ss:$16 sps:$4 sm:$0xff]   ;;  %v13054_v4 = vld [vmem:[#allocation9 + $0x1e4] ss:$16 sps:$4 sm:$0xff]  }
  0xc7   :  { %474 = vmatprep.subr.bf16.mxu0 %v12996_v30  ;;  %527 = vmatprep.subr.bf16.mxu1 %v12998_v31  ;;  %v13057_v5 = vld [vmem:[#allocation9 + $0x3e4] ss:$16 sps:$4 sm:$0xff]   ;;  %v13052_v6 = vld [vmem:[#allocation9 + $0x1e0] ss:$16 sps:$4 sm:$0xff]  }
  0xc8   :  { %v13055_v7 = vld [vmem:[#allocation9 + $0x3e0] ss:$16 sps:$4 sm:$0xff]   ;;  %v13060_v8 = vld [vmem:[#allocation9 + $0x1c4] ss:$16 sps:$4 sm:$0xff]  }
  0xc9   :  { %v13063_v9 = vld [vmem:[#allocation9 + $0x3c4] ss:$16 sps:$4 sm:$0xff]   ;;  %v13058_v10 = vld [vmem:[#allocation9 + $0x1c0] ss:$16 sps:$4 sm:$0xff]  }
  0xca   :  { %475 = vmatpush1.bf16.msra.mxu0 %v13000_v32  ;;  %528 = vmatpush1.bf16.msra.mxu1 %v13001_v33  ;;  %v13061_v11 = vld [vmem:[#allocation9 + $0x3c0] ss:$16 sps:$4 sm:$0xff]   ;;  %v13066_v12 = vld [vmem:[#allocation9 + $0x1a4] ss:$16 sps:$4 sm:$0xff]  }
  0xcb   :  { %1380 = vmatprep.subr.bf16.mxu0 %v13006_v34  ;;  %1433 = vmatprep.subr.bf16.mxu1 %v13009_v35  ;;  %v13069_v13 = vld [vmem:[#allocation9 + $0x3a4] ss:$16 sps:$4 sm:$0xff]   ;;  %v13064_v14 = vld [vmem:[#allocation9 + $0x1a0] ss:$16 sps:$4 sm:$0xff]  }
  0xcc   :  { %v13067_v15 = vld [vmem:[#allocation9 + $0x3a0] ss:$16 sps:$4 sm:$0xff]   ;;  %v13072_v16 = vld [vmem:[#allocation9 + $0x184] ss:$16 sps:$4 sm:$0xff]  }
  0xcd   :  { %493 = vmatmul.mubr.bf16.vlgmr.msra.gmra.mxu0 %v13002_v36  ;;  %546 = vmatmul.mubr.bf16.vlgmr.msra.gmra.mxu1 %v13002_v36  ;;  %v13075_v17 = vld [vmem:[#allocation9 + $0x384] ss:$16 sps:$4 sm:$0xff]   ;;  %v13070_v18 = vld [vmem:[#allocation9 + $0x180] ss:$16 sps:$4 sm:$0xff]   ;;  %v13102_v36 = vld [vmem:[#allocation9 + $0xec] ss:$16 sps:$4 sm:$0xff]  }
  0xce   :  { %502 = vmatprep.mubr.bf16.mxu0 %v13920_v1  ;;  %555 = vmatprep.mubr.bf16.mxu1 %v13920_v1  ;;  %v13051_v1 = vld [vmem:[#allocation9 + $0x204] ss:$16 sps:$4 sm:$0xff]   ;;  %v13073_v19 = vld [vmem:[#allocation9 + $0x380] ss:$16 sps:$4 sm:$0xff]  }
  0xcf   :  { %1381 = vmatpush1.bf16.msra.mxu0 %v13004_v37  ;;  %1434 = vmatpush1.bf16.msra.mxu1 %v13007_v38  ;;  %v13078_v20 = vld [vmem:[#allocation9 + $0x164] ss:$16 sps:$4 sm:$0xff]   ;;  %v13076_v22 = vld [vmem:[#allocation9 + $0x160] ss:$16 sps:$4 sm:$0xff]   ;;  %v13105_v37 = vld [vmem:[#allocation9 + $0x2ec] ss:$16 sps:$4 sm:$0xff]   ;;  %v268_v38 = vlaneseq }
  0xd0   :  { %1382 = vmatprep.subr.bf16.mxu0 %v13012_v39  ;;  %1435 = vmatprep.subr.bf16.mxu1 %v13015_v40  ;;  %v13081_v21 = vld [vmem:[#allocation9 + $0x364] ss:$16 sps:$4 sm:$0xff]   ;;  %v13079_v23 = vld [vmem:[#allocation9 + $0x360] ss:$16 sps:$4 sm:$0xff]  }
  0xd1   :  { %v13084_v24 = vld [vmem:[#allocation9 + $0x144] ss:$16 sps:$4 sm:$0xff]   ;;  %v13082_v26 = vld [vmem:[#allocation9 + $0x140] ss:$16 sps:$4 sm:$0xff]   ;;  %v14063_v39 = vshrl.u32 %v268_v38, 7 }
  0xd2   :  { %v13087_v25 = vld [vmem:[#allocation9 + $0x344] ss:$16 sps:$4 sm:$0xff]   ;;  %v13085_v27 = vld [vmem:[#allocation9 + $0x340] ss:$16 sps:$4 sm:$0xff]  }
  0xd3   :  { %1383 = vmatpush1.bf16.msra.mxu0 %v13010_v41  ;;  %1436 = vmatpush1.bf16.msra.mxu1 %v13013_v42  ;;  %v13090_v28 = vld [vmem:[#allocation9 + $0x124] ss:$16 sps:$4 sm:$0xff]   ;;  %v13088_v30 = vld [vmem:[#allocation9 + $0x120] ss:$16 sps:$4 sm:$0xff]   ;;  %v14066_v40 = vsub.s32 1, %v14063_v39  ;;  %v14069_v41 = vsub.s32 3, %v14063_v39 }
  0xd4   :  { %1384 = vmatprep.subr.bf16.mxu0 %v13018_v43  ;;  %1437 = vmatprep.subr.bf16.mxu1 %v13021_v44  ;;  %v13093_v29 = vld [vmem:[#allocation9 + $0x324] ss:$16 sps:$4 sm:$0xff]   ;;  %v13091_v31 = vld [vmem:[#allocation9 + $0x320] ss:$16 sps:$4 sm:$0xff]   ;;  %v14072_v42 = vsub.s32 0, %v14063_v39  ;;  %v14075_v43 = vsub.s32 2, %v14063_v39 }
  0xd5   :  { %503 = vmatmul.mubr.bf16.gmra.mxu0 %v13003_v45  ;;  %556 = vmatmul.mubr.bf16.gmra.mxu1 %v13003_v45  ;;  %v13096_v32 = vld [vmem:[#allocation9 + $0x104] ss:$16 sps:$4 sm:$0xff]   ;;  %v13094_v34 = vld [vmem:[#allocation9 + $0x100] ss:$16 sps:$4 sm:$0xff]   ;;  %v266_v44 = vld [vmem:[#allocation8] sm:$0xf] }
  0xd6   :  { %v13099_v33 = vld [vmem:[#allocation9 + $0x304] ss:$16 sps:$4 sm:$0xff]   ;;  %v13097_v35 = vld [vmem:[#allocation9 + $0x300] ss:$16 sps:$4 sm:$0xff]  }
  0xd7   :  { %1385 = vmatpush1.bf16.msra.mxu0 %v13016_v46  ;;  %1438 = vmatpush1.bf16.msra.mxu1 %v13019_v47  ;;  %v275_v47 = vrot.slane %v266_v44, %v14066_v40 }
  0xd8   :  { %1386 = vmatprep.subr.bf16.mxu0 %v13024_v48  ;;  %1439 = vmatprep.subr.bf16.mxu1 %v13027_v49  ;;  %v283_v48 = vrot.slane %v266_v44, %v14069_v41  ;;  %v271_v49 = vrot.slane %v266_v44, %v14072_v42 }
  0xdb   :  { %1387 = vmatpush1.bf16.msra.mxu0 %v13022_v50  ;;  %1440 = vmatpush1.bf16.msra.mxu1 %v13025_v51  ;;  %v279_v50 = vrot.slane %v266_v44, %v14075_v43  ;;  %v13106_v44 = vld [vmem:[#allocation9 + $0xc8] ss:$16 sps:$4 sm:$0xff]  }
  0xdc   :  { %1388 = vmatprep.subr.bf16.mxu0 %v13030_v52  ;;  %1441 = vmatprep.subr.bf16.mxu1 %v13033_v53 }
  0xdf   :  { %1389 = vmatpush1.bf16.msra.mxu0 %v13028_v54  ;;  %1442 = vmatpush1.bf16.msra.mxu1 %v13031_v55 }
  0xe0   :  { %1390 = vmatprep.subr.bf16.mxu0 %v13036_v56  ;;  %1443 = vmatprep.subr.bf16.mxu1 %v13039_v57 }
  0xe3   :  { %1391 = vmatpush1.bf16.msra.mxu0 %v13034_v58  ;;  %1444 = vmatpush1.bf16.msra.mxu1 %v13037_v59 }
  0xe4   :  { %1392 = vmatprep.subr.bf16.mxu0 %v13042_v60  ;;  %1445 = vmatprep.subr.bf16.mxu1 %v13045_v61 }
  0xe7   :  { %1393 = vmatpush1.bf16.msra.mxu0 %v13040_v62  ;;  %1446 = vmatpush1.bf16.msra.mxu1 %v13043_v63 }
  0xe8   :  { %1394 = vmatprep.subr.bf16.mxu0 %v13048_v0  ;;  %1447 = vmatprep.subr.bf16.mxu1 %v13051_v1 }
  0xeb   :  { %1395 = vmatpush1.bf16.msra.mxu0 %v13046_v2  ;;  %1448 = vmatpush1.bf16.msra.mxu1 %v13049_v3 }
  0xec   :  { %1396 = vmatprep.subr.bf16.mxu0 %v13054_v4  ;;  %1449 = vmatprep.subr.bf16.mxu1 %v13057_v5 }
  0xef   :  { %1397 = vmatpush2.bf16.msra.mxu0 %v13052_v6  ;;  %1450 = vmatpush2.bf16.msra.mxu1 %v13055_v7 }
  0xf0   :  { %1398 = vmatprep.subr.bf16.mxu0 %v13060_v8  ;;  %1451 = vmatprep.subr.bf16.mxu1 %v13063_v9 }
  0xf3   :  { %1399 = vmatpush2.bf16.msra.mxu0 %v13058_v10  ;;  %1452 = vmatpush2.bf16.msra.mxu1 %v13061_v11 }
  0xf4   :  { %1400 = vmatprep.subr.bf16.mxu0 %v13066_v12  ;;  %1453 = vmatprep.subr.bf16.mxu1 %v13069_v13 }
  0xf7   :  { %1401 = vmatpush2.bf16.msra.mxu0 %v13064_v14  ;;  %1454 = vmatpush2.bf16.msra.mxu1 %v13067_v15 }
  0xf8   :  { %1402 = vmatprep.subr.bf16.mxu0 %v13072_v16  ;;  %1455 = vmatprep.subr.bf16.mxu1 %v13075_v17 }
  0xfb   :  { %1403 = vmatpush2.bf16.msra.mxu0 %v13070_v18  ;;  %1456 = vmatpush2.bf16.msra.mxu1 %v13073_v19  ;;  %v13100_v19 = vld [vmem:[#allocation9 + $0xe8] ss:$16 sps:$4 sm:$0xff]  }
  0xfc   :  { %1404 = vmatprep.subr.bf16.mxu0 %v13078_v20  ;;  %1457 = vmatprep.subr.bf16.mxu1 %v13081_v21  ;;  %v13103_v20 = vld [vmem:[#allocation9 + $0x2e8] ss:$16 sps:$4 sm:$0xff]  }
  0xff   :  { %1405 = vmatpush2.bf16.msra.mxu0 %v13076_v22  ;;  %1458 = vmatpush2.bf16.msra.mxu1 %v13079_v23 }
 0x100   :  { %1406 = vmatprep.subr.bf16.mxu0 %v13084_v24  ;;  %1459 = vmatprep.subr.bf16.mxu1 %v13087_v25  ;;  %v13108_v25 = vld [vmem:[#allocation9 + $0xcc] ss:$16 sps:$4 sm:$0xff]  }
 0x103   :  { %1407 = vmatpush2.bf16.msra.mxu0 %v13082_v26  ;;  %1460 = vmatpush2.bf16.msra.mxu1 %v13085_v27  ;;  %v13111_v26 = vld [vmem:[#allocation9 + $0x2cc] ss:$16 sps:$4 sm:$0xff]  }
 0x104   :  { %1408 = vmatprep.subr.bf16.mxu0 %v13090_v28  ;;  %1461 = vmatprep.subr.bf16.mxu1 %v13093_v29 }
 0x107   :  { %1409 = vmatpush2.bf16.msra.mxu0 %v13088_v30  ;;  %1462 = vmatpush2.bf16.msra.mxu1 %v13091_v31 }
 0x108   :  { %1410 = vmatprep.subr.bf16.mxu0 %v13096_v32  ;;  %1463 = vmatprep.subr.bf16.mxu1 %v13099_v33 }
 0x10b   :  { %1411 = vmatpush2.bf16.msra.mxu0 %v13094_v34  ;;  %1464 = vmatpush2.bf16.msra.mxu1 %v13097_v35 }
 0x10c   :  { %1486 = vmatprep.subr.bf16.mxu0 %v13102_v36  ;;  %1539 = vmatprep.subr.bf16.mxu1 %v13105_v37 }
 0x18d   :  { %v494_v45 = vpop.f32.mrf.mxu0  ;;  %v547_v46 = vpop.f32.mrf.mxu1 }
 0x18e   :  { %v495_v59 = vadd.f32 %v494_v45, %v271_v49  ;;  %v548_v60 = vadd.f32 %v547_v46, %v279_v50  ;;  %v13109_v45 = vld [vmem:[#allocation9 + $0x2c8] ss:$16 sps:$4 sm:$0xff]   ;;  %v13114_v46 = vld [vmem:[#allocation9 + $0xac] ss:$16 sps:$4 sm:$0xff]  }
 0x18f   :  { %v496_v51 = vpop.f32.mrf.mxu0  ;;  %v549_v52 = vpop.f32.mrf.mxu1 }
 0x190   :  { %v497_v55 = vadd.f32 %v496_v51, %v275_v47  ;;  %v550_v56 = vadd.f32 %v549_v52, %v283_v48  ;;  %v566_v9 = vmax.f32 %v495_v59, 0.0  ;;  %v568_v10 = vmax.f32 %v548_v60, 0.0  ;;  %v13121_v59 = vld [vmem:[#allocation9 + $0x288] ss:$16 sps:$4 sm:$0xff]   ;;  %v13126_v60 = vld [vmem:[#allocation9 + $0x6c] ss:$16 sps:$4 sm:$0xff]  }
 0x191   :  { %v498_v53 = vpop.f32.mrf.mxu0  ;;  %v551_v54 = vpop.f32.mrf.mxu1 }
 0x192   :  { %v499_v57 = vadd.f32 %v498_v53, %v271_v49  ;;  %v552_v58 = vadd.f32 %v551_v54, %v279_v50  ;;  %v567_v5 = vmax.f32 %v497_v55, 0.0  ;;  %v569_v6 = vmax.f32 %v550_v56, 0.0  ;;  %v13115_v55 = vld [vmem:[#allocation9 + $0x2a8] ss:$16 sps:$4 sm:$0xff]   ;;  %v13120_v56 = vld [vmem:[#allocation9 + $0x8c] ss:$16 sps:$4 sm:$0xff]  }
 0x193   :  { %v500_v61 = vpop.f32.mrf.mxu0  ;;  %v553_v62 = vpop.f32.mrf.mxu1 }
 0x194   :  { %v501_v63 = vadd.f32 %v500_v61, %v275_v47  ;;  %v554_v0 = vadd.f32 %v553_v62, %v283_v48  ;;  %v570_v1 = vmax.f32 %v499_v57, 0.0  ;;  %v572_v2 = vmax.f32 %v552_v58, 0.0  ;;  %v13123_v57 = vld [vmem:[#allocation9 + $0x28c] ss:$16 sps:$4 sm:$0xff]   ;;  %v13118_v58 = vld [vmem:[#allocation9 + $0x88] ss:$16 sps:$4 sm:$0xff]  }
 0x195   :  { %v504_v3 = vpop.f32.mrf.mxu0  ;;  %v557_v4 = vpop.f32.mrf.mxu1  ;;  %v13129_v61 = vld [vmem:[#allocation9 + $0x26c] ss:$16 sps:$4 sm:$0xff]   ;;  %v13124_v62 = vld [vmem:[#allocation9 + $0x68] ss:$16 sps:$4 sm:$0xff]  }
 0x196   :  { %v571_v7 = vmax.f32 %v501_v63, 0.0  ;;  %v573_v8 = vmax.f32 %v554_v0, 0.0  ;;  %v505_v11 = vadd.f32 %v504_v3, %v271_v49  ;;  %v558_v12 = vadd.f32 %v557_v4, %v279_v50  ;;  %v13127_v63 = vld [vmem:[#allocation9 + $0x268] ss:$16 sps:$4 sm:$0xff]   ;;  %v13132_v0 = vld [vmem:[#allocation9 + $0x4c] ss:$16 sps:$4 sm:$0xff]  }
 0x197   :  { %v506_v13 = vpop.f32.mrf.mxu0  ;;  %v559_v14 = vpop.f32.mrf.mxu1  ;;  %v14081_v21 = vpack.c.bf16 %v570_v1, %v566_v9  ;;  %v14083_v22 = vpack.c.bf16 %v572_v2, %v568_v10  ;;  %v13135_v1 = vld [vmem:[#allocation9 + $0x24c] ss:$16 sps:$4 sm:$0xff]   ;;  %v13130_v2 = vld [vmem:[#allocation9 + $0x48] ss:$16 sps:$4 sm:$0xff]  }
 0x198   :  { %v507_v15 = vadd.f32 %v506_v13, %v275_v47  ;;  %v560_v16 = vadd.f32 %v559_v14, %v283_v48  ;;  %v583_v17 = vpack.c.bf16 %v571_v7, %v567_v5  ;;  %v585_v18 = vpack.c.bf16 %v573_v8, %v569_v6  ;;  %v13133_v3 = vld [vmem:[#allocation9 + $0x248] ss:$16 sps:$4 sm:$0xff]   ;;  %v13138_v4 = vld [vmem:[#allocation9 + $0x2c] ss:$16 sps:$4 sm:$0xff]  }
 0x199   :  { %v508_v23 = vpop.f32.mrf.mxu0  ;;  %v561_v24 = vpop.f32.mrf.mxu1  ;;  %v574_v29 = vmax.f32 %v505_v11, 0.0  ;;  %v576_v30 = vmax.f32 %v558_v12, 0.0  ;;  %v13141_v5 = vld [vmem:[#allocation9 + $0x22c] ss:$16 sps:$4 sm:$0xff]   ;;  %v13136_v6 = vld [vmem:[#allocation9 + $0x28] ss:$16 sps:$4 sm:$0xff]  }
 0x19a   :  { %v509_v27 = vadd.f32 %v508_v23, %v271_v49  ;;  %v562_v28 = vadd.f32 %v561_v24, %v279_v50  ;;  %1412 = vmatprep.mubr.bf16.mxu0 %v583_v17  ;;  %1465 = vmatprep.mubr.bf16.mxu1 %v585_v18  ;;  %v575_v31 = vmax.f32 %v507_v15, 0.0  ;;  %v577_v32 = vmax.f32 %v560_v16, 0.0  ;;  %v13117_v49 = vld [vmem:[#allocation9 + $0x2ac] ss:$16 sps:$4 sm:$0xff]   ;;  %v13139_v7 = vld [vmem:[#allocation9 + $0x228] ss:$16 sps:$4 sm:$0xff]  }
 0x19b   :  { %v510_v33 = vpop.f32.mrf.mxu0  ;;  %v563_v34 = vpop.f32.mrf.mxu1  ;;  %1413 = vmatmul.mubr.bf16.vlgmr.msra.gmra.mxu0 %v14081_v21  ;;  %1466 = vmatmul.mubr.bf16.vlgmr.msra.gmra.mxu1 %v14083_v22  ;;  %v13144_v8 = vld [vmem:[#allocation9 + $0xc] ss:$16 sps:$4 sm:$0xff]   ;;  %v13142_v10 = vld [vmem:[#allocation9 + $0x8] ss:$16 sps:$4 sm:$0xff]  }
 0x19c   :  { %v578_v35 = vmax.f32 %v509_v27, 0.0  ;;  %v580_v36 = vmax.f32 %v562_v28, 0.0  ;;  %v511_v37 = vadd.f32 %v510_v33, %v275_v47  ;;  %v564_v38 = vadd.f32 %v563_v34, %v283_v48  ;;  %1487 = vmatpush1.bf16.msra.mxu0 %v13100_v19  ;;  %1540 = vmatpush1.bf16.msra.mxu1 %v13103_v20  ;;  %v13112_v48 = vld [vmem:[#allocation9 + $0xa8] ss:$16 sps:$4 sm:$0xff]   ;;  %v13147_v9 = vld [vmem:[#allocation9 + $0x20c] ss:$16 sps:$4 sm:$0xff]  }
 0x19d   :  { %1488 = vmatprep.subr.bf16.mxu0 %v13108_v25  ;;  %1541 = vmatprep.subr.bf16.mxu1 %v13111_v26  ;;  %v13145_v11 = vld [vmem:[#allocation9 + $0x208] ss:$16 sps:$4 sm:$0xff]   ;;  %v13150_v12 = vld [vmem:[#allocation9 + $0x1ec] ss:$16 sps:$4 sm:$0xff]  }
 0x19e   :  { %v579_v50 = vmax.f32 %v511_v37, 0.0  ;;  %v581_v51 = vmax.f32 %v564_v38, 0.0  ;;  %v14087_v52 = vpack.c.bf16 %v578_v35, %v574_v29  ;;  %v14089_v53 = vpack.c.bf16 %v580_v36, %v576_v30  ;;  %v13153_v13 = vld [vmem:[#allocation9 + $0x3ec] ss:$16 sps:$4 sm:$0xff]   ;;  %v13148_v14 = vld [vmem:[#allocation9 + $0x1e8] ss:$16 sps:$4 sm:$0xff]  }
 0x19f   :  { %v13151_v15 = vld [vmem:[#allocation9 + $0x3e8] ss:$16 sps:$4 sm:$0xff]   ;;  %v13156_v16 = vld [vmem:[#allocation9 + $0x1cc] ss:$16 sps:$4 sm:$0xff]  }
 0x1a0   :  { %1489 = vmatpush1.bf16.msra.mxu0 %v13106_v44  ;;  %1542 = vmatpush1.bf16.msra.mxu1 %v13109_v45  ;;  %v14091_v54 = vpack.c.bf16 %v579_v50, %v575_v31  ;;  %v14093_v47 = vpack.c.bf16 %v581_v51, %v577_v32  ;;  %v13157_v19 = vld [vmem:[#allocation9 + $0x3c8] ss:$16 sps:$4 sm:$0xff]   ;;  %v13162_v20 = vld [vmem:[#allocation9 + $0x1ac] ss:$16 sps:$4 sm:$0xff]  }
 0x1a1   :  { %1490 = vmatprep.subr.bf16.mxu0 %v13114_v46  ;;  %1543 = vmatprep.subr.bf16.mxu1 %v13117_v49  ;;  %v13165_v23 = vld [vmem:[#allocation9 + $0x3ac] ss:$16 sps:$4 sm:$0xff]   ;;  %v13160_v24 = vld [vmem:[#allocation9 + $0x1a8] ss:$16 sps:$4 sm:$0xff]  }
 0x1a2   :  { %1422 = vmatprep.mubr.bf16.mxu0 %v14091_v54  ;;  %1475 = vmatprep.mubr.bf16.mxu1 %v14093_v47  ;;  %v13163_v25 = vld [vmem:[#allocation9 + $0x3a8] ss:$16 sps:$4 sm:$0xff]   ;;  %v13168_v26 = vld [vmem:[#allocation9 + $0x18c] ss:$16 sps:$4 sm:$0xff]  }
 0x1a3   :  { %1423 = vmatmul.mubr.bf16.gmra.mxu0 %v14087_v52  ;;  %1476 = vmatmul.mubr.bf16.gmra.mxu1 %v14089_v53  ;;  %v13171_v27 = vld [vmem:[#allocation9 + $0x38c] ss:$16 sps:$4 sm:$0xff]   ;;  %v13166_v28 = vld [vmem:[#allocation9 + $0x188] ss:$16 sps:$4 sm:$0xff]  }
 0x1a4   :  { %1491 = vmatpush1.bf16.msra.mxu0 %v13112_v48  ;;  %1544 = vmatpush1.bf16.msra.mxu1 %v13115_v55  ;;  %v13169_v29 = vld [vmem:[#allocation9 + $0x388] ss:$16 sps:$4 sm:$0xff]   ;;  %v13174_v30 = vld [vmem:[#allocation9 + $0x16c] ss:$16 sps:$4 sm:$0xff]  }
 0x1a5   :  { %1518 = vmatprep.mubr.bf16.mxu0 %v583_v17  ;;  %1571 = vmatprep.mubr.bf16.mxu1 %v585_v18  ;;  %v13159_v17 = vld [vmem:[#allocation9 + $0x3cc] ss:$16 sps:$4 sm:$0xff]   ;;  %v13154_v18 = vld [vmem:[#allocation9 + $0x1c8] ss:$16 sps:$4 sm:$0xff]  }
 0x1a6   :  { %1492 = vmatprep.subr.bf16.mxu0 %v13120_v56  ;;  %1545 = vmatprep.subr.bf16.mxu1 %v13123_v57  ;;  %v13177_v31 = vld [vmem:[#allocation9 + $0x36c] ss:$16 sps:$4 sm:$0xff]   ;;  %v13172_v32 = vld [vmem:[#allocation9 + $0x168] ss:$16 sps:$4 sm:$0xff]   ;;  %v13196_v56 = vld [vmem:[#allocation12 + $0xe0] ss:$16 sps:$4 sm:$0xff]  }
 0x1a7   :  { %v13175_v33 = vld [vmem:[#allocation9 + $0x368] ss:$16 sps:$4 sm:$0xff]   ;;  %v13180_v34 = vld [vmem:[#allocation9 + $0x14c] ss:$16 sps:$4 sm:$0xff]  }
 0x1a8   :  { %1493 = vmatpush1.bf16.msra.mxu0 %v13118_v58  ;;  %1546 = vmatpush1.bf16.msra.mxu1 %v13121_v59  ;;  %v13183_v35 = vld [vmem:[#allocation9 + $0x34c] ss:$16 sps:$4 sm:$0xff]   ;;  %v13178_v36 = vld [vmem:[#allocation9 + $0x148] ss:$16 sps:$4 sm:$0xff]   ;;  %v13199_v58 = vld [vmem:[#allocation12 + $0xc0] ss:$16 sps:$4 sm:$0xff]  }
 0x1a9   :  { %1494 = vmatprep.subr.bf16.mxu0 %v13126_v60  ;;  %1547 = vmatprep.subr.bf16.mxu1 %v13129_v61  ;;  %v13181_v37 = vld [vmem:[#allocation9 + $0x348] ss:$16 sps:$4 sm:$0xff]   ;;  %v13186_v38 = vld [vmem:[#allocation9 + $0x12c] ss:$16 sps:$4 sm:$0xff]   ;;  %v13202_v60 = vld [vmem:[#allocation12 + $0xa0] ss:$16 sps:$4 sm:$0xff]  }
 0x1aa   :  { %v13189_v44 = vld [vmem:[#allocation9 + $0x32c] ss:$16 sps:$4 sm:$0xff]   ;;  %v13184_v45 = vld [vmem:[#allocation9 + $0x128] ss:$16 sps:$4 sm:$0xff]  }
 0x1ab   :  { %v13187_v46 = vld [vmem:[#allocation9 + $0x328] ss:$16 sps:$4 sm:$0xff]   ;;  %v13192_v49 = vld [vmem:[#allocation9 + $0x10c] ss:$16 sps:$4 sm:$0xff]  }
 0x1ac   :  { %1495 = vmatpush1.bf16.msra.mxu0 %v13124_v62  ;;  %1548 = vmatpush1.bf16.msra.mxu1 %v13127_v63  ;;  %v13195_v50 = vld [vmem:[#allocation9 + $0x30c] ss:$16 sps:$4 sm:$0xff]   ;;  %v13190_v51 = vld [vmem:[#allocation9 + $0x108] ss:$16 sps:$4 sm:$0xff]  }
 0x1ad   :  { %1496 = vmatprep.subr.bf16.mxu0 %v13132_v0  ;;  %1549 = vmatprep.subr.bf16.mxu1 %v13135_v1  ;;  %v13193_v48 = vld [vmem:[#allocation9 + $0x308] ss:$16 sps:$4 sm:$0xff]   ;;  %v13211_v1 = vld [vmem:[#allocation12 + $0x40] ss:$16 sps:$4 sm:$0xff]  }
 0x1ae   :  { %v13198_v55 = vld [vmem:[#allocation12 + $0xe4] ss:$16 sps:$4 sm:$0xff]  }
 0x1af   :  { %v13201_v57 = vld [vmem:[#allocation12 + $0xc4] ss:$16 sps:$4 sm:$0xff]  }
 0x1b0   :  { %1497 = vmatpush1.bf16.msra.mxu0 %v13130_v2  ;;  %1550 = vmatpush1.bf16.msra.mxu1 %v13133_v3  ;;  %v13204_v59 = vld [vmem:[#allocation12 + $0xa4] ss:$16 sps:$4 sm:$0xff]   ;;  %v13250_v2 = vld [vmem:[#allocation12 + $0x2c0] ss:$16 sps:$4 sm:$0xff]  }
 0x1b1   :  { %1498 = vmatprep.subr.bf16.mxu0 %v13138_v4  ;;  %1551 = vmatprep.subr.bf16.mxu1 %v13141_v5  ;;  %v13207_v61 = vld [vmem:[#allocation12 + $0x84] ss:$16 sps:$4 sm:$0xff]   ;;  %v13214_v4 = vld [vmem:[#allocation12 + $0x20] ss:$16 sps:$4 sm:$0xff]  }
 0x1b2   :  { %v13246_v62 = vld [vmem:[#allocation12 + $0x2e4] ss:$16 sps:$4 sm:$0xff]  }
 0x1b3   :  { %v13213_v63 = vld [vmem:[#allocation12 + $0x44] ss:$16 sps:$4 sm:$0xff]  }
 0x1b4   :  { %1499 = vmatpush1.bf16.msra.mxu0 %v13136_v6  ;;  %1552 = vmatpush1.bf16.msra.mxu1 %v13139_v7  ;;  %v13252_v0 = vld [vmem:[#allocation12 + $0x2c4] ss:$16 sps:$4 sm:$0xff]   ;;  %v13262_v6 = vld [vmem:[#allocation12 + $0x280] ss:$16 sps:$4 sm:$0xff]  }
 0x1b5   :  { %1500 = vmatprep.subr.bf16.mxu0 %v13144_v8  ;;  %1553 = vmatprep.subr.bf16.mxu1 %v13147_v9  ;;  %v13258_v3 = vld [vmem:[#allocation12 + $0x2a4] ss:$16 sps:$4 sm:$0xff]   ;;  %v13217_v8 = vld [vmem:[#allocation12] ss:$16 sps:$4 sm:$0xff]  }
 0x1b6   :  { %v13219_v5 = vld [vmem:[#allocation12 + $0x4] ss:$16 sps:$4 sm:$0xff]  }
 0x1b7   :  { %v13264_v7 = vld [vmem:[#allocation12 + $0x284] ss:$16 sps:$4 sm:$0xff]  }
 0x1b8   :  { %1501 = vmatpush1.bf16.msra.mxu0 %v13142_v10  ;;  %1554 = vmatpush1.bf16.msra.mxu1 %v13145_v11  ;;  %v13222_v9 = vld [vmem:[#allocation12 + $0x1e4] ss:$16 sps:$4 sm:$0xff]   ;;  %v13268_v10 = vld [vmem:[#allocation12 + $0x260] ss:$16 sps:$4 sm:$0xff]  }
 0x1b9   :  { %1502 = vmatprep.subr.bf16.mxu0 %v13150_v12  ;;  %1555 = vmatprep.subr.bf16.mxu1 %v13153_v13  ;;  %v13270_v11 = vld [vmem:[#allocation12 + $0x264] ss:$16 sps:$4 sm:$0xff]   ;;  %v13220_v12 = vld [vmem:[#allocation12 + $0x1e0] ss:$16 sps:$4 sm:$0xff]  }
 0x1ba   :  { %v13225_v13 = vld [vmem:[#allocation12 + $0x1c4] ss:$16 sps:$4 sm:$0xff]  }
 0x1bc   :  { %1503 = vmatpush2.bf16.msra.mxu0 %v13148_v14  ;;  %1556 = vmatpush2.bf16.msra.mxu1 %v13151_v15  ;;  %v13274_v14 = vld [vmem:[#allocation12 + $0x240] ss:$16 sps:$4 sm:$0xff]   ;;  %v13276_v15 = vld [vmem:[#allocation12 + $0x244] ss:$16 sps:$4 sm:$0xff]  }
 0x1bd   :  { %1504 = vmatprep.subr.bf16.mxu0 %v13156_v16  ;;  %1557 = vmatprep.subr.bf16.mxu1 %v13159_v17  ;;  %v13223_v16 = vld [vmem:[#allocation12 + $0x1c0] ss:$16 sps:$4 sm:$0xff]   ;;  %v13228_v17 = vld [vmem:[#allocation12 + $0x1a4] ss:$16 sps:$4 sm:$0xff]  }
 0x1c0   :  { %1505 = vmatpush2.bf16.msra.mxu0 %v13154_v18  ;;  %1558 = vmatpush2.bf16.msra.mxu1 %v13157_v19  ;;  %v13280_v18 = vld [vmem:[#allocation12 + $0x220] ss:$16 sps:$4 sm:$0xff]   ;;  %v13282_v19 = vld [vmem:[#allocation12 + $0x224] ss:$16 sps:$4 sm:$0xff]  }
 0x1c1   :  { %1506 = vmatprep.subr.bf16.mxu0 %v13162_v20  ;;  %1559 = vmatprep.subr.bf16.mxu1 %v13165_v23  ;;  %v13226_v20 = vld [vmem:[#allocation12 + $0x1a0] ss:$16 sps:$4 sm:$0xff]   ;;  %v13231_v23 = vld [vmem:[#allocation12 + $0x184] ss:$16 sps:$4 sm:$0xff]  }
 0x1c4   :  { %1507 = vmatpush2.bf16.msra.mxu0 %v13160_v24  ;;  %1560 = vmatpush2.bf16.msra.mxu1 %v13163_v25  ;;  %v13286_v24 = vld [vmem:[#allocation12 + $0x200] ss:$16 sps:$4 sm:$0xff]   ;;  %v13288_v25 = vld [vmem:[#allocation12 + $0x204] ss:$16 sps:$4 sm:$0xff]  }
 0x1c5   :  { %1508 = vmatprep.subr.bf16.mxu0 %v13168_v26  ;;  %1561 = vmatprep.subr.bf16.mxu1 %v13171_v27  ;;  %v13229_v26 = vld [vmem:[#allocation12 + $0x180] ss:$16 sps:$4 sm:$0xff]   ;;  %v13234_v27 = vld [vmem:[#allocation12 + $0x164] ss:$16 sps:$4 sm:$0xff]  }
 0x1c8   :  { %1509 = vmatpush2.bf16.msra.mxu0 %v13166_v28  ;;  %1562 = vmatpush2.bf16.msra.mxu1 %v13169_v29  ;;  %v13292_v28 = vld [vmem:[#allocation12 + $0x3e0] ss:$16 sps:$4 sm:$0xff]   ;;  %v13294_v29 = vld [vmem:[#allocation12 + $0x3e4] ss:$16 sps:$4 sm:$0xff]  }
 0x1c9   :  { %1510 = vmatprep.subr.bf16.mxu0 %v13174_v30  ;;  %1563 = vmatprep.subr.bf16.mxu1 %v13177_v31  ;;  %v13232_v30 = vld [vmem:[#allocation12 + $0x160] ss:$16 sps:$4 sm:$0xff]   ;;  %v13237_v31 = vld [vmem:[#allocation12 + $0x144] ss:$16 sps:$4 sm:$0xff]  }
 0x1cc   :  { %1511 = vmatpush2.bf16.msra.mxu0 %v13172_v32  ;;  %1564 = vmatpush2.bf16.msra.mxu1 %v13175_v33  ;;  %v13298_v32 = vld [vmem:[#allocation12 + $0x3c0] ss:$16 sps:$4 sm:$0xff]   ;;  %v13300_v33 = vld [vmem:[#allocation12 + $0x3c4] ss:$16 sps:$4 sm:$0xff]  }
 0x1cd   :  { %1512 = vmatprep.subr.bf16.mxu0 %v13180_v34  ;;  %1565 = vmatprep.subr.bf16.mxu1 %v13183_v35  ;;  %v13235_v34 = vld [vmem:[#allocation12 + $0x140] ss:$16 sps:$4 sm:$0xff]   ;;  %v13240_v35 = vld [vmem:[#allocation12 + $0x124] ss:$16 sps:$4 sm:$0xff]  }
 0x1d0   :  { %1513 = vmatpush2.bf16.msra.mxu0 %v13178_v36  ;;  %1566 = vmatpush2.bf16.msra.mxu1 %v13181_v37  ;;  %v13304_v36 = vld [vmem:[#allocation12 + $0x3a0] ss:$16 sps:$4 sm:$0xff]   ;;  %v13306_v37 = vld [vmem:[#allocation12 + $0x3a4] ss:$16 sps:$4 sm:$0xff]  }
 0x1d1   :  { %1514 = vmatprep.subr.bf16.mxu0 %v13186_v38  ;;  %1567 = vmatprep.subr.bf16.mxu1 %v13189_v44  ;;  %v13238_v38 = vld [vmem:[#allocation12 + $0x120] ss:$16 sps:$4 sm:$0xff]   ;;  %v13243_v44 = vld [vmem:[#allocation12 + $0x104] ss:$16 sps:$4 sm:$0xff]  }
 0x1d4   :  { %1515 = vmatpush2.bf16.msra.mxu0 %v13184_v45  ;;  %1568 = vmatpush2.bf16.msra.mxu1 %v13187_v46  ;;  %v13310_v45 = vld [vmem:[#allocation12 + $0x380] ss:$16 sps:$4 sm:$0xff]   ;;  %v13312_v46 = vld [vmem:[#allocation12 + $0x384] ss:$16 sps:$4 sm:$0xff]  }
 0x1d5   :  { %1516 = vmatprep.subr.bf16.mxu0 %v13192_v49  ;;  %1569 = vmatprep.subr.bf16.mxu1 %v13195_v50  ;;  %v13241_v49 = vld [vmem:[#allocation12 + $0x100] ss:$16 sps:$4 sm:$0xff]   ;;  %v13249_v50 = vld [vmem:[#allocation12 + $0xec] ss:$16 sps:$4 sm:$0xff]  }
 0x1d8   :  { %1517 = vmatpush2.bf16.msra.mxu0 %v13190_v51  ;;  %1570 = vmatpush2.bf16.msra.mxu1 %v13193_v48  ;;  %v13316_v51 = vld [vmem:[#allocation12 + $0x360] ss:$16 sps:$4 sm:$0xff]   ;;  %v13318_v48 = vld [vmem:[#allocation12 + $0x364] ss:$16 sps:$4 sm:$0xff]  }
 0x1d9   :  { %2406 = vmatprep.subr.bf16.mxu0 %v13198_v55  ;;  %2459 = vmatprep.subr.bf16.mxu1 %v13246_v62  ;;  %v13324_v55 = vld [vmem:[#allocation12 + $0x344] ss:$16 sps:$4 sm:$0xff]  }
 0x1db   :  { %1519 = vmatmul.mubr.bf16.vlgmr.msra.gmra.mxu0 %v14081_v21  ;;  %1572 = vmatmul.mubr.bf16.vlgmr.msra.gmra.mxu1 %v14083_v22  ;;  %v13205_v21 = vld [vmem:[#allocation12 + $0x80] ss:$16 sps:$4 sm:$0xff]   ;;  %v13210_v22 = vld [vmem:[#allocation12 + $0x64] ss:$16 sps:$4 sm:$0xff]  }
 0x1dc   :  { %1528 = vmatprep.mubr.bf16.mxu0 %v14091_v54  ;;  %1581 = vmatprep.mubr.bf16.mxu1 %v14093_v47  ;;  %v13208_v54 = vld [vmem:[#allocation12 + $0x60] ss:$16 sps:$4 sm:$0xff]  }
 0x1dd   :  { %2407 = vmatpush1.bf16.msra.mxu0 %v13196_v56  ;;  %v13244_v47 = vld [vmem:[#allocation12 + $0x2e0] ss:$16 sps:$4 sm:$0xff]  }
 0x1de   :  { %2408 = vmatprep.subr.bf16.mxu0 %v13201_v57  ;;  %2460 = vmatpush1.bf16.msra.mxu1 %v13244_v47  ;;  %v13322_v56 = vld [vmem:[#allocation12 + $0x340] ss:$16 sps:$4 sm:$0xff]   ;;  %v13330_v57 = vld [vmem:[#allocation12 + $0x324] ss:$16 sps:$4 sm:$0xff]  }
 0x1df   :  { %2461 = vmatprep.subr.bf16.mxu1 %v13252_v0 }
 0x1e1   :  { %2409 = vmatpush1.bf16.msra.mxu0 %v13199_v58  ;;  %v13328_v58 = vld [vmem:[#allocation12 + $0x320] ss:$16 sps:$4 sm:$0xff]  }
 0x1e2   :  { %2410 = vmatprep.subr.bf16.mxu0 %v13204_v59  ;;  %2462 = vmatpush1.bf16.msra.mxu1 %v13250_v2  ;;  %v13336_v59 = vld [vmem:[#allocation12 + $0x304] ss:$16 sps:$4 sm:$0xff]  }
 0x1e3   :  { %1529 = vmatmul.mubr.bf16.gmra.mxu0 %v14087_v52  ;;  %1582 = vmatmul.mubr.bf16.gmra.mxu1 %v14089_v53  ;;  %v13216_v52 = vld [vmem:[#allocation12 + $0x24] ss:$16 sps:$4 sm:$0xff]   ;;  %v13256_v53 = vld [vmem:[#allocation12 + $0x2a0] ss:$16 sps:$4 sm:$0xff]  }
 0x1e4   :  { %2463 = vmatprep.subr.bf16.mxu1 %v13258_v3 }
 0x1e5   :  { %2411 = vmatpush1.bf16.msra.mxu0 %v13202_v60  ;;  %v13334_v60 = vld [vmem:[#allocation12 + $0x300] ss:$16 sps:$4 sm:$0xff]  }
 0x1e6   :  { %2412 = vmatprep.subr.bf16.mxu0 %v13207_v61  ;;  %2464 = vmatpush1.bf16.msra.mxu1 %v13256_v53  ;;  %v13342_v61 = vld [vmem:[#allocation12 + $0x2ec] ss:$16 sps:$4 sm:$0xff]  }
 0x1e7   :  { %2465 = vmatprep.subr.bf16.mxu1 %v13264_v7 }
 0x1e9   :  { %2413 = vmatpush1.bf16.msra.mxu0 %v13205_v21  ;;  %v14105_v21 = vld [vmem:[#allocation11] sm:$0xf] }
 0x1ea   :  { %2414 = vmatprep.subr.bf16.mxu0 %v13210_v22  ;;  %2466 = vmatpush1.bf16.msra.mxu1 %v13262_v6  ;;  %v727_v22 = vrot.slane %v14105_v21, %v14066_v40  ;;  %v723_v62 = vrot.slane %v14105_v21, %v14072_v42 }
 0x1eb   :  { %2467 = vmatprep.subr.bf16.mxu1 %v13270_v11 }
 0x1ed   :  { %2415 = vmatpush1.bf16.msra.mxu0 %v13208_v54 }
 0x1ee   :  { %2416 = vmatprep.subr.bf16.mxu0 %v13213_v63  ;;  %2468 = vmatpush1.bf16.msra.mxu1 %v13268_v10 }
 0x1ef   :  { %2469 = vmatprep.subr.bf16.mxu1 %v13276_v15 }
 0x1f1   :  { %2417 = vmatpush1.bf16.msra.mxu0 %v13211_v1 }
 0x1f2   :  { %2418 = vmatprep.subr.bf16.mxu0 %v13216_v52  ;;  %2470 = vmatpush1.bf16.msra.mxu1 %v13274_v14 }
 0x1f3   :  { %2471 = vmatprep.subr.bf16.mxu1 %v13282_v19 }
 0x1f5   :  { %2419 = vmatpush1.bf16.msra.mxu0 %v13214_v4 }
 0x1f6   :  { %2420 = vmatprep.subr.bf16.mxu0 %v13219_v5  ;;  %2472 = vmatpush1.bf16.msra.mxu1 %v13280_v18 }
 0x1f7   :  { %2473 = vmatprep.subr.bf16.mxu1 %v13288_v25 }
 0x1f9   :  { %2421 = vmatpush1.bf16.msra.mxu0 %v13217_v8 }
 0x1fa   :  { %2422 = vmatprep.subr.bf16.mxu0 %v13222_v9  ;;  %2474 = vmatpush1.bf16.msra.mxu1 %v13286_v24 }
 0x1fb   :  { %2475 = vmatprep.subr.bf16.mxu1 %v13294_v29  ;;  %v13247_v29 = vld [vmem:[#allocation12 + $0xe8] ss:$16 sps:$4 sm:$0xff]  }
 0x1fd   :  { %2423 = vmatpush2.bf16.msra.mxu0 %v13220_v12 }
 0x1fe   :  { %2424 = vmatprep.subr.bf16.mxu0 %v13225_v13  ;;  %2476 = vmatpush2.bf16.msra.mxu1 %v13292_v28 }
 0x1ff   :  { %2477 = vmatprep.subr.bf16.mxu1 %v13300_v33  ;;  %v13255_v33 = vld [vmem:[#allocation12 + $0xcc] ss:$16 sps:$4 sm:$0xff]  }
 0x201   :  { %2425 = vmatpush2.bf16.msra.mxu0 %v13223_v16 }
 0x202   :  { %2426 = vmatprep.subr.bf16.mxu0 %v13228_v17  ;;  %2478 = vmatpush2.bf16.msra.mxu1 %v13298_v32 }
 0x203   :  { %2479 = vmatprep.subr.bf16.mxu1 %v13306_v37 }
 0x205   :  { %2427 = vmatpush2.bf16.msra.mxu0 %v13226_v20 }
 0x206   :  { %2428 = vmatprep.subr.bf16.mxu0 %v13231_v23  ;;  %2480 = vmatpush2.bf16.msra.mxu1 %v13304_v36 }
 0x207   :  { %2481 = vmatprep.subr.bf16.mxu1 %v13312_v46  ;;  %v13261_v46 = vld [vmem:[#allocation12 + $0xac] ss:$16 sps:$4 sm:$0xff]  }
 0x209   :  { %2429 = vmatpush2.bf16.msra.mxu0 %v13229_v26 }
 0x20a   :  { %2430 = vmatprep.subr.bf16.mxu0 %v13234_v27  ;;  %2482 = vmatpush2.bf16.msra.mxu1 %v13310_v45  ;;  %v13253_v45 = vld [vmem:[#allocation12 + $0xc8] ss:$16 sps:$4 sm:$0xff]  }
 0x20b   :  { %2483 = vmatprep.subr.bf16.mxu1 %v13318_v48  ;;  %v13259_v48 = vld [vmem:[#allocation12 + $0xa8] ss:$16 sps:$4 sm:$0xff]  }
 0x20d   :  { %2431 = vmatpush2.bf16.msra.mxu0 %v13232_v30 }
 0x20e   :  { %2432 = vmatprep.subr.bf16.mxu0 %v13237_v31  ;;  %2484 = vmatpush2.bf16.msra.mxu1 %v13316_v51 }
 0x20f   :  { %2485 = vmatprep.subr.bf16.mxu1 %v13324_v55  ;;  %v13267_v55 = vld [vmem:[#allocation12 + $0x8c] ss:$16 sps:$4 sm:$0xff]  }
 0x211   :  { %2433 = vmatpush2.bf16.msra.mxu0 %v13235_v34 }
 0x212   :  { %2434 = vmatprep.subr.bf16.mxu0 %v13240_v35  ;;  %2486 = vmatpush2.bf16.msra.mxu1 %v13322_v56  ;;  %v13265_v56 = vld [vmem:[#allocation12 + $0x88] ss:$16 sps:$4 sm:$0xff]  }
 0x213   :  { %2487 = vmatprep.subr.bf16.mxu1 %v13330_v57  ;;  %v13273_v57 = vld [vmem:[#allocation12 + $0x6c] ss:$16 sps:$4 sm:$0xff]  }
 0x215   :  { %2435 = vmatpush2.bf16.msra.mxu0 %v13238_v38 }
 0x216   :  { %2436 = vmatprep.subr.bf16.mxu0 %v13243_v44  ;;  %2488 = vmatpush2.bf16.msra.mxu1 %v13328_v58  ;;  %v13271_v58 = vld [vmem:[#allocation12 + $0x68] ss:$16 sps:$4 sm:$0xff]  }
 0x217   :  { %2489 = vmatprep.subr.bf16.mxu1 %v13336_v59  ;;  %v13279_v59 = vld [vmem:[#allocation12 + $0x4c] ss:$16 sps:$4 sm:$0xff]  }
 0x219   :  { %2437 = vmatpush2.bf16.msra.mxu0 %v13241_v49 }
 0x21a   :  { %2512 = vmatprep.subr.bf16.mxu0 %v13249_v50  ;;  %2490 = vmatpush2.bf16.msra.mxu1 %v13334_v60  ;;  %v13277_v60 = vld [vmem:[#allocation12 + $0x48] ss:$16 sps:$4 sm:$0xff]  }
 0x21b   :  { %2565 = vmatprep.subr.bf16.mxu1 %v13342_v61  ;;  %v13285_v61 = vld [vmem:[#allocation12 + $0x2c] ss:$16 sps:$4 sm:$0xff]  }
 0x25b   :  { %v1414_v54 = vpop.f32.mrf.mxu0  ;;  %v1467_v47 = vpop.f32.mrf.mxu1 }
 0x25c   :  { %v1415_v2 = vadd.f32 %v1414_v54, %v723_v62  ;;  %v13289_v54 = vld [vmem:[#allocation12 + $0x8] ss:$16 sps:$4 sm:$0xff]  }
 0x25d   :  { %v1416_v63 = vpop.f32.mrf.mxu0  ;;  %v1469_v0 = vpop.f32.mrf.mxu1 }
 0x25e   :  { %v1417_v1 = vadd.f32 %v1416_v63, %v727_v22  ;;  %v1468_v9 = vadd.f32 %v1467_v47, %v1415_v2  ;;  %v13297_v47 = vld [vmem:[#allocation12 + $0x1ec] ss:$16 sps:$4 sm:$0xff]   ;;  %v13295_v63 = vld [vmem:[#allocation12 + $0x1e8] ss:$16 sps:$4 sm:$0xff]  }
 0x25f   :  { %v1418_v52 = vpop.f32.mrf.mxu0  ;;  %v1471_v53 = vpop.f32.mrf.mxu1  ;;  %v13309_v2 = vld [vmem:[#allocation12 + $0x1ac] ss:$16 sps:$4 sm:$0xff]  }
 0x260   :  { %v1419_v3 = vadd.f32 %v1418_v52, %v723_v62  ;;  %v1470_v6 = vadd.f32 %v1469_v0, %v1417_v1  ;;  %v1592_v20 = vmax.f32 %v1468_v9, 0.0  ;;  %v13303_v0 = vld [vmem:[#allocation12 + $0x1cc] ss:$16 sps:$4 sm:$0xff]   ;;  %v13301_v1 = vld [vmem:[#allocation12 + $0x1c8] ss:$16 sps:$4 sm:$0xff]  }
 0x261   :  { %v1420_v4 = vpop.f32.mrf.mxu0  ;;  %v1473_v5 = vpop.f32.mrf.mxu1  ;;  %v13307_v52 = vld [vmem:[#allocation12 + $0x1a8] ss:$16 sps:$4 sm:$0xff]  }
 0x262   :  { %v1472_v7 = vadd.f32 %v1471_v53, %v1419_v3  ;;  %v1421_v8 = vadd.f32 %v1420_v4, %v727_v22  ;;  %v1593_v17 = vmax.f32 %v1470_v6, 0.0  ;;  %v13315_v53 = vld [vmem:[#allocation12 + $0x18c] ss:$16 sps:$4 sm:$0xff]   ;;  %v13313_v3 = vld [vmem:[#allocation12 + $0x188] ss:$16 sps:$4 sm:$0xff]  }
 0x263   :  { %v1424_v10 = vpop.f32.mrf.mxu0  ;;  %v1477_v11 = vpop.f32.mrf.mxu1  ;;  %v13321_v4 = vld [vmem:[#allocation12 + $0x16c] ss:$16 sps:$4 sm:$0xff]  }
 0x264   :  { %v1474_v12 = vadd.f32 %v1473_v5, %v1421_v8  ;;  %v1425_v13 = vadd.f32 %v1424_v10, %v723_v62  ;;  %v1596_v14 = vmax.f32 %v1472_v7, 0.0  ;;  %v13319_v5 = vld [vmem:[#allocation12 + $0x168] ss:$16 sps:$4 sm:$0xff]   ;;  %v13327_v6 = vld [vmem:[#allocation12 + $0x14c] ss:$16 sps:$4 sm:$0xff]   ;;  %v735_v7 = vrot.slane %v14105_v21, %v14069_v41 }
 0x265   :  { %v1426_v15 = vpop.f32.mrf.mxu0  ;;  %v1479_v16 = vpop.f32.mrf.mxu1  ;;  %v731_v8 = vrot.slane %v14105_v21, %v14075_v43 }
 0x266   :  { %v1597_v18 = vmax.f32 %v1474_v12, 0.0  ;;  %v1427_v19 = vadd.f32 %v1426_v15, %v727_v22  ;;  %v1478_v23 = vadd.f32 %v1477_v11, %v1425_v13  ;;  %v14111_v30 = vpack.c.bf16 %v1596_v14, %v1592_v20  ;;  %v13325_v11 = vld [vmem:[#allocation12 + $0x148] ss:$16 sps:$4 sm:$0xff]   ;;  %v13333_v14 = vld [vmem:[#allocation12 + $0x12c] ss:$16 sps:$4 sm:$0xff]  }
 0x267   :  { %v1428_v24 = vpop.f32.mrf.mxu0  ;;  %v1481_v25 = vpop.f32.mrf.mxu1  ;;  %v13331_v20 = vld [vmem:[#allocation12 + $0x128] ss:$16 sps:$4 sm:$0xff]  }
 0x268   :  { %v1609_v26 = vpack.c.bf16 %v1597_v18, %v1593_v17  ;;  %v1429_v27 = vadd.f32 %v1428_v24, %v723_v62  ;;  %v1480_v28 = vadd.f32 %v1479_v16, %v1427_v19  ;;  %v1600_v36 = vmax.f32 %v1478_v23, 0.0  ;;  %v13291_v62 = vld [vmem:[#allocation12 + $0xc] ss:$16 sps:$4 sm:$0xff]  }
 0x269   :  { %v1430_v31 = vpop.f32.mrf.mxu0  ;;  %v1483_v32 = vpop.f32.mrf.mxu1 }
 0x26a   :  { %v1431_v34 = vadd.f32 %v1430_v31, %v727_v22  ;;  %v1482_v35 = vadd.f32 %v1481_v25, %v1429_v27  ;;  %2438 = vmatprep.mubr.bf16.mxu0 %v1609_v26  ;;  %v1601_v37 = vmax.f32 %v1480_v28, 0.0  ;;  %v13283_v22 = vld [vmem:[#allocation12 + $0x28] ss:$16 sps:$4 sm:$0xff]   ;;  %v13339_v25 = vld [vmem:[#allocation12 + $0x10c] ss:$16 sps:$4 sm:$0xff]  }
 0x26b   :  { %2439 = vmatmul.mubr.bf16.vlgmr.msra.gmra.mxu0 %v14111_v30 }
 0x26c   :  { %v1604_v38 = vmax.f32 %v1482_v35, 0.0  ;;  %v1484_v44 = vadd.f32 %v1483_v32, %v1431_v34  ;;  %2513 = vmatpush1.bf16.msra.mxu0 %v13247_v29 }
 0x26d   :  { %2514 = vmatprep.subr.bf16.mxu0 %v13255_v33  ;;  %v13337_v33 = vld [vmem:[#allocation12 + $0x108] ss:$16 sps:$4 sm:$0xff]  }
 0x26e   :  { %v1605_v49 = vmax.f32 %v1484_v44, 0.0  ;;  %v14114_v50 = vpack.c.bf16 %v1604_v38, %v1600_v36 }
 0x270   :  { %v14116_v51 = vpack.c.bf16 %v1605_v49, %v1601_v37  ;;  %2515 = vmatpush1.bf16.msra.mxu0 %v13253_v45 }
 0x271   :  { %2516 = vmatprep.subr.bf16.mxu0 %v13261_v46 }
 0x272   :  { %2448 = vmatprep.mubr.bf16.mxu0 %v14116_v51 }
 0x273   :  { %2449 = vmatmul.mubr.bf16.gmra.mxu0 %v14114_v50 }
 0x274   :  { %2517 = vmatpush1.bf16.msra.mxu0 %v13259_v48  ;;  %2544 = vmatprep.mubr.bf16.mxu0 %v1609_v26 }
 0x275   :  { %2518 = vmatprep.subr.bf16.mxu0 %v13267_v55 }
 0x278   :  { %2519 = vmatpush1.bf16.msra.mxu0 %v13265_v56 }
 0x279   :  { %2520 = vmatprep.subr.bf16.mxu0 %v13273_v57  ;;  %v13340_v57 = vld [vmem:[#allocation12 + $0x2e8] ss:$16 sps:$4 sm:$0xff]  }
 0x27c   :  { %2521 = vmatpush1.bf16.msra.mxu0 %v13271_v58 }
 0x27d   :  { %2522 = vmatprep.subr.bf16.mxu0 %v13279_v59 }
 0x280   :  { %2523 = vmatpush1.bf16.msra.mxu0 %v13277_v60  ;;  %v13345_v60 = vld [vmem:[#allocation12 + $0x2cc] ss:$16 sps:$4 sm:$0xff]  }
 0x281   :  { %2524 = vmatprep.subr.bf16.mxu0 %v13285_v61 }
 0x284   :  { %2525 = vmatpush1.bf16.msra.mxu0 %v13283_v22 }
 0x285   :  { %2526 = vmatprep.subr.bf16.mxu0 %v13291_v62 }
 0x288   :  { %2527 = vmatpush1.bf16.msra.mxu0 %v13289_v54 }
 0x289   :  { %2528 = vmatprep.subr.bf16.mxu0 %v13297_v47 }
 0x28c   :  { %2529 = vmatpush2.bf16.msra.mxu0 %v13295_v63 }
 0x28d   :  { %2530 = vmatprep.subr.bf16.mxu0 %v13303_v0  ;;  %v13343_v0 = vld [vmem:[#allocation12 + $0x2c8] ss:$16 sps:$4 sm:$0xff]  }
 0x290   :  { %2531 = vmatpush2.bf16.msra.mxu0 %v13301_v1 }
 0x291   :  { %2532 = vmatprep.subr.bf16.mxu0 %v13309_v2  ;;  %v13348_v2 = vld [vmem:[#allocation12 + $0x2ac] ss:$16 sps:$4 sm:$0xff]  }
 0x294   :  { %2533 = vmatpush2.bf16.msra.mxu0 %v13307_v52 }
 0x295   :  { %2534 = vmatprep.subr.bf16.mxu0 %v13315_v53 }
 0x298   :  { %2535 = vmatpush2.bf16.msra.mxu0 %v13313_v3 }
 0x299   :  { %2536 = vmatprep.subr.bf16.mxu0 %v13321_v4 }
 0x29b   :  { %v1520_v9 = vpop.f32.mrf.mxu0  ;;  %v1573_v10 = vpop.f32.mrf.mxu1 }
 0x29c   :  { %2537 = vmatpush2.bf16.msra.mxu0 %v13319_v5  ;;  %v1521_v16 = vadd.f32 %v1520_v9, %v731_v8  ;;  %v13346_v5 = vld [vmem:[#allocation12 + $0x2a8] ss:$16 sps:$4 sm:$0xff]  }
 0x29d   :  { %v1522_v12 = vpop.f32.mrf.mxu0  ;;  %v1575_v13 = vpop.f32.mrf.mxu1  ;;  %2538 = vmatprep.subr.bf16.mxu0 %v13327_v6  ;;  %v13349_v9 = vld [vmem:[#allocation12 + $0x288] ss:$16 sps:$4 sm:$0xff]  }
 0x29e   :  { %v1523_v15 = vadd.f32 %v1522_v12, %v735_v7  ;;  %v1574_v28 = vadd.f32 %v1573_v10, %v1521_v16  ;;  %v13354_v10 = vld [vmem:[#allocation12 + $0x26c] ss:$16 sps:$4 sm:$0xff]   ;;  %v13396_v12 = vld [vmem:[#allocation15 + $0xa4] ss:$16 sps:$4 sm:$0xff]  }
 0x29f   :  { %v1524_v17 = vpop.f32.mrf.mxu0  ;;  %v1577_v18 = vpop.f32.mrf.mxu1  ;;  %v13399_v16 = vld [vmem:[#allocation15 + $0x84] ss:$16 sps:$4 sm:$0xff]  }
 0x2a0   :  { %v1525_v19 = vadd.f32 %v1524_v17, %v731_v8  ;;  %2539 = vmatpush2.bf16.msra.mxu0 %v13325_v11  ;;  %v1576_v21 = vadd.f32 %v1575_v13, %v1523_v15  ;;  %v1594_v45 = vmax.f32 %v1574_v28, 0.0  ;;  %v13391_v11 = vld [vmem:[#allocation15 + $0xc0] ss:$16 sps:$4 sm:$0xff]   ;;  %v13352_v13 = vld [vmem:[#allocation12 + $0x268] ss:$16 sps:$4 sm:$0xff]  }
 0x2a1   :  { %v1526_v23 = vpop.f32.mrf.mxu0  ;;  %v1579_v24 = vpop.f32.mrf.mxu1  ;;  %2540 = vmatprep.subr.bf16.mxu0 %v13333_v14  ;;  %v13357_v14 = vld [vmem:[#allocation12 + $0x24c] ss:$16 sps:$4 sm:$0xff]   ;;  %v13394_v15 = vld [vmem:[#allocation15 + $0xa0] ss:$16 sps:$4 sm:$0xff]   ;;  %v13408_v28 = vld [vmem:[#allocation15 + $0x24] ss:$16 sps:$4 sm:$0xff]  }
 0x2a2   :  { %v1578_v26 = vadd.f32 %v1577_v18, %v1525_v19  ;;  %v1527_v27 = vadd.f32 %v1526_v23, %v735_v7  ;;  %v1595_v37 = vmax.f32 %v1576_v21, 0.0  ;;  %v13360_v17 = vld [vmem:[#allocation12 + $0x22c] ss:$16 sps:$4 sm:$0xff]   ;;  %v13397_v18 = vld [vmem:[#allocation15 + $0x80] ss:$16 sps:$4 sm:$0xff]  }
 0x2a3   :  { %v1530_v29 = vpop.f32.mrf.mxu0  ;;  %v1583_v31 = vpop.f32.mrf.mxu1  ;;  %v13402_v19 = vld [vmem:[#allocation15 + $0x64] ss:$16 sps:$4 sm:$0xff]   ;;  %v13363_v23 = vld [vmem:[#allocation12 + $0x20c] ss:$16 sps:$4 sm:$0xff]  }
 0x2a4   :  { %v1580_v32 = vadd.f32 %v1579_v24, %v1527_v27  ;;  %2541 = vmatpush2.bf16.msra.mxu0 %v13331_v20  ;;  %v1598_v34 = vmax.f32 %v1578_v26, 0.0  ;;  %v1531_v46 = vadd.f32 %v1530_v29, %v731_v8  ;;  %v13358_v20 = vld [vmem:[#allocation12 + $0x228] ss:$16 sps:$4 sm:$0xff]   ;;  %v13400_v24 = vld [vmem:[#allocation15 + $0x60] ss:$16 sps:$4 sm:$0xff]  }
 0x2a5   :  { %v1532_v35 = vpop.f32.mrf.mxu0  ;;  %v1585_v36 = vpop.f32.mrf.mxu1  ;;  %2542 = vmatprep.subr.bf16.mxu0 %v13339_v25  ;;  %v13405_v25 = vld [vmem:[#allocation15 + $0x44] ss:$16 sps:$4 sm:$0xff]   ;;  %v13366_v26 = vld [vmem:[#allocation12 + $0x3ec] ss:$16 sps:$4 sm:$0xff]   ;;  %v13403_v27 = vld [vmem:[#allocation15 + $0x40] ss:$16 sps:$4 sm:$0xff]  }
 0x2a6   :  { %v1599_v38 = vmax.f32 %v1580_v32, 0.0  ;;  %v1533_v44 = vadd.f32 %v1532_v35, %v735_v7  ;;  %v14124_v58 = vpack.c.bf16 %v1598_v34, %v1594_v45  ;;  %v1584_v54 = vadd.f32 %v1583_v31, %v1531_v46  ;;  %v13361_v21 = vld [vmem:[#allocation12 + $0x208] ss:$16 sps:$4 sm:$0xff]   ;;  %v13369_v31 = vld [vmem:[#allocation12 + $0x3cc] ss:$16 sps:$4 sm:$0xff]  }
 0x2a7   :  { %v1534_v49 = vpop.f32.mrf.mxu0  ;;  %v1587_v48 = vpop.f32.mrf.mxu1  ;;  %v13364_v29 = vld [vmem:[#allocation12 + $0x3e8] ss:$16 sps:$4 sm:$0xff]   ;;  %v13406_v32 = vld [vmem:[#allocation15 + $0x20] ss:$16 sps:$4 sm:$0xff]   ;;  %v13372_v35 = vld [vmem:[#allocation12 + $0x3ac] ss:$16 sps:$4 sm:$0xff]  }
 0x2a8   :  { %v1611_v55 = vpack.c.bf16 %v1599_v38, %v1595_v37  ;;  %v1535_v56 = vadd.f32 %v1534_v49, %v731_v8  ;;  %2543 = vmatpush2.bf16.msra.mxu0 %v13337_v33  ;;  %v1586_v61 = vadd.f32 %v1585_v36, %v1533_v44  ;;  %v1602_v3 = vmax.f32 %v1584_v54, 0.0  ;;  %v13390_v8 = vld [vmem:[#allocation15 + $0xe4] ss:$16 sps:$4 sm:$0xff]   ;;  %v13409_v36 = vld [vmem:[#allocation15] ss:$16 sps:$4 sm:$0xff]  }
 0x2a9   :  { %v1536_v59 = vpop.f32.mrf.mxu0  ;;  %v1589_v47 = vpop.f32.mrf.mxu1  ;;  %3432 = vmatprep.subr.bf16.mxu0 %v13390_v8  ;;  %v13411_v33 = vld [vmem:[#allocation15 + $0x4] ss:$16 sps:$4 sm:$0xff]   ;;  %v13375_v44 = vld [vmem:[#allocation12 + $0x38c] ss:$16 sps:$4 sm:$0xff]   ;;  %v13412_v45 = vld [vmem:[#allocation15 + $0x1e0] ss:$16 sps:$4 sm:$0xff]  }
 0x2aa   :  { %v1588_v22 = vadd.f32 %v1587_v48, %v1535_v56  ;;  %v1537_v62 = vadd.f32 %v1536_v59, %v735_v7  ;;  %2491 = vmatprep.mubr.bf16.mxu1 %v1611_v55  ;;  %v1603_v52 = vmax.f32 %v1586_v61, 0.0  ;;  %v13351_v7 = vld [vmem:[#allocation12 + $0x28c] ss:$16 sps:$4 sm:$0xff]   ;;  %v13367_v34 = vld [vmem:[#allocation12 + $0x3c8] ss:$16 sps:$4 sm:$0xff]  }
 0x2ab   :  { %2492 = vmatmul.mubr.bf16.vlgmr.msra.gmra.mxu1 %v14124_v58  ;;  %2545 = vmatmul.mubr.bf16.vlgmr.msra.gmra.mxu0 %v14111_v30  ;;  %v13388_v30 = vld [vmem:[#allocation15 + $0xe0] ss:$16 sps:$4 sm:$0xff]   ;;  %v13414_v37 = vld [vmem:[#allocation15 + $0x1e4] ss:$16 sps:$4 sm:$0xff]   ;;  %v13378_v48 = vld [vmem:[#allocation12 + $0x36c] ss:$16 sps:$4 sm:$0xff]  }
 0x2ac   :  { %v1590_v63 = vadd.f32 %v1589_v47, %v1537_v62  ;;  %2566 = vmatpush1.bf16.msra.mxu1 %v13340_v57  ;;  %2554 = vmatprep.mubr.bf16.mxu0 %v14116_v51  ;;  %v1606_v1 = vmax.f32 %v1588_v22, 0.0  ;;  %v13393_v51 = vld [vmem:[#allocation15 + $0xc4] ss:$16 sps:$4 sm:$0xff]   ;;  %v13381_v59 = vld [vmem:[#allocation12 + $0x34c] ss:$16 sps:$4 sm:$0xff]  }
 0x2ad   :  { %2567 = vmatprep.subr.bf16.mxu1 %v13345_v60  ;;  %3433 = vmatpush1.bf16.msra.mxu0 %v13388_v30  ;;  %v13370_v38 = vld [vmem:[#allocation12 + $0x3a8] ss:$16 sps:$4 sm:$0xff]   ;;  %v13418_v60 = vld [vmem:[#allocation15 + $0x1a0] ss:$16 sps:$4 sm:$0xff]   ;;  %v13384_v62 = vld [vmem:[#allocation12 + $0x32c] ss:$16 sps:$4 sm:$0xff]  }
 0x2ae   :  { %v1607_v53 = vmax.f32 %v1590_v63, 0.0  ;;  %v14131_v6 = vpack.c.bf16 %v1606_v1, %v1602_v3  ;;  %3434 = vmatprep.subr.bf16.mxu0 %v13393_v51  ;;  %v13417_v46 = vld [vmem:[#allocation15 + $0x1c4] ss:$16 sps:$4 sm:$0xff]   ;;  %v13421_v54 = vld [vmem:[#allocation15 + $0x180] ss:$16 sps:$4 sm:$0xff]  }
 0x2af   :  { %v13373_v49 = vld [vmem:[#allocation12 + $0x388] ss:$16 sps:$4 sm:$0xff]   ;;  %v13424_v1 = vld [vmem:[#allocation15 + $0x160] ss:$16 sps:$4 sm:$0xff]  }
 0x2b0   :  { %v14129_v4 = vpack.c.bf16 %v1607_v53, %v1603_v52  ;;  %2568 = vmatpush1.bf16.msra.mxu1 %v13343_v0  ;;  %v13420_v56 = vld [vmem:[#allocation15 + $0x1a4] ss:$16 sps:$4 sm:$0xff]   ;;  %v13387_v0 = vld [vmem:[#allocation12 + $0x30c] ss:$16 sps:$4 sm:$0xff]   ;;  %v13427_v53 = vld [vmem:[#allocation15 + $0x140] ss:$16 sps:$4 sm:$0xff]  }
 0x2b1   :  { %2569 = vmatprep.subr.bf16.mxu1 %v13348_v2  ;;  %3435 = vmatpush1.bf16.msra.mxu0 %v13391_v11  ;;  %v13376_v57 = vld [vmem:[#allocation12 + $0x368] ss:$16 sps:$4 sm:$0xff]   ;;  %v13433_v30 = vld [vmem:[#allocation15 + $0x100] ss:$16 sps:$4 sm:$0xff]  }
 0x2b2   :  { %2501 = vmatprep.mubr.bf16.mxu1 %v14129_v4  ;;  %3436 = vmatprep.subr.bf16.mxu0 %v13396_v12  ;;  %v13423_v61 = vld [vmem:[#allocation15 + $0x184] ss:$16 sps:$4 sm:$0xff]   ;;  %v13436_v51 = vld [vmem:[#allocation15 + $0x2e0] ss:$16 sps:$4 sm:$0xff]  }
 0x2b3   :  { %2502 = vmatmul.mubr.bf16.gmra.mxu1 %v14131_v6  ;;  %2555 = vmatmul.mubr.bf16.gmra.mxu0 %v14114_v50  ;;  %v13355_v50 = vld [vmem:[#allocation12 + $0x248] ss:$16 sps:$4 sm:$0xff]   ;;  %v13454_v12 = vld [vmem:[#allocation15 + $0x280] ss:$16 sps:$4 sm:$0xff]  }
 0x2b4   :  { %2570 = vmatpush1.bf16.msra.mxu1 %v13346_v5  ;;  %2597 = vmatprep.mubr.bf16.mxu1 %v1611_v55  ;;  %v13415_v55 = vld [vmem:[#allocation15 + $0x1c0] ss:$16 sps:$4 sm:$0xff]   ;;  %v13379_v22 = vld [vmem:[#allocation12 + $0x348] ss:$16 sps:$4 sm:$0xff]  }
 0x2b5   :  { %2571 = vmatprep.subr.bf16.mxu1 %v13351_v7  ;;  %3437 = vmatpush1.bf16.msra.mxu0 %v13394_v15  ;;  %v13426_v47 = vld [vmem:[#allocation15 + $0x164] ss:$16 sps:$4 sm:$0xff]   ;;  %v13430_v5 = vld [vmem:[#allocation15 + $0x120] ss:$16 sps:$4 sm:$0xff]  }
 0x2b6   :  { %3438 = vmatprep.subr.bf16.mxu0 %v13399_v16  ;;  %v13382_v63 = vld [vmem:[#allocation12 + $0x328] ss:$16 sps:$4 sm:$0xff]   ;;  %v13466_v15 = vld [vmem:[#allocation15 + $0x240] ss:$16 sps:$4 sm:$0xff]  }
 0x2b7   :  { %v13385_v2 = vld [vmem:[#allocation12 + $0x308] ss:$16 sps:$4 sm:$0xff]  }
 0x2b8   :  { %2572 = vmatpush1.bf16.msra.mxu1 %v13349_v9  ;;  %v13429_v52 = vld [vmem:[#allocation15 + $0x144] ss:$16 sps:$4 sm:$0xff]   ;;  %v13441_v9 = vld [vmem:[#allocation15 + $0xec] ss:$16 sps:$4 sm:$0xff]  }
 0x2b9   :  { %2573 = vmatprep.subr.bf16.mxu1 %v13354_v10  ;;  %3439 = vmatpush1.bf16.msra.mxu0 %v13397_v18  ;;  %v13432_v3 = vld [vmem:[#allocation15 + $0x124] ss:$16 sps:$4 sm:$0xff]   ;;  %v13448_v10 = vld [vmem:[#allocation15 + $0x2a0] ss:$16 sps:$4 sm:$0xff]  }
 0x2ba   :  { %3440 = vmatprep.subr.bf16.mxu0 %v13402_v19  ;;  %v13435_v7 = vld [vmem:[#allocation15 + $0x104] ss:$16 sps:$4 sm:$0xff]   ;;  %v13478_v18 = vld [vmem:[#allocation15 + $0x200] ss:$16 sps:$4 sm:$0xff]  }
 0x2bb   :  { %v13438_v8 = vld [vmem:[#allocation15 + $0x2e4] ss:$16 sps:$4 sm:$0xff]  }
 0x2bc   :  { %2574 = vmatpush1.bf16.msra.mxu1 %v13352_v13  ;;  %v13450_v11 = vld [vmem:[#allocation15 + $0x2a4] ss:$16 sps:$4 sm:$0xff]   ;;  %v13460_v13 = vld [vmem:[#allocation15 + $0x260] ss:$16 sps:$4 sm:$0xff]  }
 0x2bd   :  { %2575 = vmatprep.subr.bf16.mxu1 %v13357_v14  ;;  %3441 = vmatpush1.bf16.msra.mxu0 %v13400_v24  ;;  %v13462_v14 = vld [vmem:[#allocation15 + $0x264] ss:$16 sps:$4 sm:$0xff]   ;;  %v13490_v24 = vld [vmem:[#allocation15 + $0x3c0] ss:$16 sps:$4 sm:$0xff]  }
 0x2be   :  { %3442 = vmatprep.subr.bf16.mxu0 %v13405_v25  ;;  %v13468_v16 = vld [vmem:[#allocation15 + $0x244] ss:$16 sps:$4 sm:$0xff]  }
 0x2bf   :  { %v13480_v19 = vld [vmem:[#allocation15 + $0x204] ss:$16 sps:$4 sm:$0xff]  }
 0x2c0   :  { %2576 = vmatpush1.bf16.msra.mxu1 %v13355_v50  ;;  %v13472_v50 = vld [vmem:[#allocation15 + $0x220] ss:$16 sps:$4 sm:$0xff]   ;;  %v13492_v25 = vld [vmem:[#allocation15 + $0x3c4] ss:$16 sps:$4 sm:$0xff]  }
 0x2c1   :  { %2577 = vmatprep.subr.bf16.mxu1 %v13360_v17  ;;  %3443 = vmatpush1.bf16.msra.mxu0 %v13403_v27  ;;  %v13474_v17 = vld [vmem:[#allocation15 + $0x224] ss:$16 sps:$4 sm:$0xff]   ;;  %v13502_v27 = vld [vmem:[#allocation15 + $0x380] ss:$16 sps:$4 sm:$0xff]  }
 0x2c2   :  { %3444 = vmatprep.subr.bf16.mxu0 %v13408_v28  ;;  %v13504_v28 = vld [vmem:[#allocation15 + $0x384] ss:$16 sps:$4 sm:$0xff]  }
 0x2c4   :  { %2578 = vmatpush1.bf16.msra.mxu1 %v13358_v20  ;;  %v13484_v20 = vld [vmem:[#allocation15 + $0x3e0] ss:$16 sps:$4 sm:$0xff]  }
 0x2c5   :  { %2579 = vmatprep.subr.bf16.mxu1 %v13363_v23  ;;  %3445 = vmatpush1.bf16.msra.mxu0 %v13406_v32  ;;  %v13486_v23 = vld [vmem:[#allocation15 + $0x3e4] ss:$16 sps:$4 sm:$0xff]  }
 0x2c6   :  { %3446 = vmatprep.subr.bf16.mxu0 %v13411_v33  ;;  %v13516_v32 = vld [vmem:[#allocation15 + $0x344] ss:$16 sps:$4 sm:$0xff]   ;;  %v13514_v33 = vld [vmem:[#allocation15 + $0x340] ss:$16 sps:$4 sm:$0xff]  }
 0x2c8   :  { %2580 = vmatpush1.bf16.msra.mxu1 %v13361_v21  ;;  %v13496_v21 = vld [vmem:[#allocation15 + $0x3a0] ss:$16 sps:$4 sm:$0xff]  }
 0x2c9   :  { %2581 = vmatprep.subr.bf16.mxu1 %v13366_v26  ;;  %3447 = vmatpush1.bf16.msra.mxu0 %v13409_v36  ;;  %v13498_v26 = vld [vmem:[#allocation15 + $0x3a4] ss:$16 sps:$4 sm:$0xff]  }
 0x2ca   :  { %3448 = vmatprep.subr.bf16.mxu0 %v13414_v37  ;;  %v13528_v36 = vld [vmem:[#allocation15 + $0x304] ss:$16 sps:$4 sm:$0xff]   ;;  %v13526_v37 = vld [vmem:[#allocation15 + $0x300] ss:$16 sps:$4 sm:$0xff]  }
 0x2cc   :  { %2582 = vmatpush2.bf16.msra.mxu1 %v13364_v29  ;;  %v13508_v29 = vld [vmem:[#allocation15 + $0x360] ss:$16 sps:$4 sm:$0xff]  }
 0x2cd   :  { %2583 = vmatprep.subr.bf16.mxu1 %v13369_v31  ;;  %3449 = vmatpush2.bf16.msra.mxu0 %v13412_v45  ;;  %v13510_v31 = vld [vmem:[#allocation15 + $0x364] ss:$16 sps:$4 sm:$0xff]  }
 0x2ce   :  { %3450 = vmatprep.subr.bf16.mxu0 %v13417_v46 }
 0x2d0   :  { %2584 = vmatpush2.bf16.msra.mxu1 %v13367_v34  ;;  %v13522_v34 = vld [vmem:[#allocation15 + $0x324] ss:$16 sps:$4 sm:$0xff]  }
 0x2d1   :  { %2585 = vmatprep.subr.bf16.mxu1 %v13372_v35  ;;  %3451 = vmatpush2.bf16.msra.mxu0 %v13415_v55  ;;  %v13520_v35 = vld [vmem:[#allocation15 + $0x320] ss:$16 sps:$4 sm:$0xff]  }
 0x2d2   :  { %3452 = vmatprep.subr.bf16.mxu0 %v13420_v56 }
 0x2d4   :  { %2586 = vmatpush2.bf16.msra.mxu1 %v13370_v38  ;;  %v13534_v38 = vld [vmem:[#allocation15 + $0x2ec] ss:$16 sps:$4 sm:$0xff]  }
 0x2d5   :  { %2587 = vmatprep.subr.bf16.mxu1 %v13375_v44  ;;  %3453 = vmatpush2.bf16.msra.mxu0 %v13418_v60 }
 0x2d6   :  { %3454 = vmatprep.subr.bf16.mxu0 %v13423_v61 }
 0x2d8   :  { %2588 = vmatpush2.bf16.msra.mxu1 %v13373_v49 }
 0x2d9   :  { %2589 = vmatprep.subr.bf16.mxu1 %v13378_v48  ;;  %3455 = vmatpush2.bf16.msra.mxu0 %v13421_v54  ;;  %v14139_v48 = vld [vmem:[#allocation14] sm:$0xf] }
 0x2da   :  { %3456 = vmatprep.subr.bf16.mxu0 %v13426_v47  ;;  %v1753_v56 = vrot.slane %v14139_v48, %v14066_v40 }
 0x2dc   :  { %2590 = vmatpush2.bf16.msra.mxu1 %v13376_v57  ;;  %v1749_v57 = vrot.slane %v14139_v48, %v14072_v42 }
 0x2dd   :  { %2591 = vmatprep.subr.bf16.mxu1 %v13381_v59  ;;  %3457 = vmatpush2.bf16.msra.mxu0 %v13424_v1 }
 0x2de   :  { %3458 = vmatprep.subr.bf16.mxu0 %v13429_v52 }
 0x2e0   :  { %2592 = vmatpush2.bf16.msra.mxu1 %v13379_v22 }
 0x2e1   :  { %2593 = vmatprep.subr.bf16.mxu1 %v13384_v62  ;;  %3459 = vmatpush2.bf16.msra.mxu0 %v13427_v53 }
 0x2e2   :  { %3460 = vmatprep.subr.bf16.mxu0 %v13432_v3 }
 0x2e4   :  { %2594 = vmatpush2.bf16.msra.mxu1 %v13382_v63 }
 0x2e5   :  { %2595 = vmatprep.subr.bf16.mxu1 %v13387_v0  ;;  %3461 = vmatpush2.bf16.msra.mxu0 %v13430_v5 }
 0x2e6   :  { %3462 = vmatprep.subr.bf16.mxu0 %v13435_v7 }
 0x2e8   :  { %2596 = vmatpush2.bf16.msra.mxu1 %v13385_v2 }
 0x2e9   :  { %3463 = vmatpush2.bf16.msra.mxu0 %v13433_v30  ;;  %3485 = vmatprep.subr.bf16.mxu1 %v13438_v8 }
 0x2ea   :  { %3538 = vmatprep.subr.bf16.mxu0 %v13441_v9 }
 0x2eb   :  { %2598 = vmatmul.mubr.bf16.vlgmr.msra.gmra.mxu1 %v14124_v58  ;;  %v13444_v58 = vld [vmem:[#allocation15 + $0x2c4] ss:$16 sps:$4 sm:$0xff]  }
 0x2ec   :  { %2607 = vmatprep.mubr.bf16.mxu1 %v14129_v4  ;;  %3486 = vmatpush1.bf16.msra.mxu1 %v13436_v51  ;;  %v13442_v4 = vld [vmem:[#allocation15 + $0x2c0] ss:$16 sps:$4 sm:$0xff]  }
 0x2ed   :  { %3487 = vmatprep.subr.bf16.mxu1 %v13444_v58 }
 0x2f0   :  { %3488 = vmatpush1.bf16.msra.mxu1 %v13442_v4 }
 0x2f1   :  { %3489 = vmatprep.subr.bf16.mxu1 %v13450_v11 }
 0x2f3   :  { %2608 = vmatmul.mubr.bf16.gmra.mxu1 %v14131_v6  ;;  %v13456_v6 = vld [vmem:[#allocation15 + $0x284] ss:$16 sps:$4 sm:$0xff]  }
 0x2f4   :  { %3490 = vmatpush1.bf16.msra.mxu1 %v13448_v10 }
 0x2f5   :  { %3491 = vmatprep.subr.bf16.mxu1 %v13456_v6 }
 0x2f8   :  { %3492 = vmatpush1.bf16.msra.mxu1 %v13454_v12  ;;  %v13439_v12 = vld [vmem:[#allocation15 + $0xe8] ss:$16 sps:$4 sm:$0xff]  }
 0x2f9   :  { %3493 = vmatprep.subr.bf16.mxu1 %v13462_v14 }
 0x2fc   :  { %3494 = vmatpush1.bf16.msra.mxu1 %v13460_v13 }
 0x2fd   :  { %3495 = vmatprep.subr.bf16.mxu1 %v13468_v16 }
 0x300   :  { %3496 = vmatpush1.bf16.msra.mxu1 %v13466_v15  ;;  %v13447_v15 = vld [vmem:[#allocation15 + $0xcc] ss:$16 sps:$4 sm:$0xff]  }
 0x301   :  { %3497 = vmatprep.subr.bf16.mxu1 %v13474_v17 }
 0x304   :  { %3498 = vmatpush1.bf16.msra.mxu1 %v13472_v50 }
 0x305   :  { %3499 = vmatprep.subr.bf16.mxu1 %v13480_v19 }
 0x308   :  { %3500 = vmatpush1.bf16.msra.mxu1 %v13478_v18 }
 0x309   :  { %3501 = vmatprep.subr.bf16.mxu1 %v13486_v23  ;;  %v13445_v23 = vld [vmem:[#allocation15 + $0xc8] ss:$16 sps:$4 sm:$0xff]  }
 0x30c   :  { %3502 = vmatpush2.bf16.msra.mxu1 %v13484_v20 }
 0x30d   :  { %3503 = vmatprep.subr.bf16.mxu1 %v13492_v25  ;;  %v13453_v25 = vld [vmem:[#allocation15 + $0xac] ss:$16 sps:$4 sm:$0xff]  }
 0x310   :  { %3504 = vmatpush2.bf16.msra.mxu1 %v13490_v24 }
 0x311   :  { %3505 = vmatprep.subr.bf16.mxu1 %v13498_v26 }
 0x314   :  { %3506 = vmatpush2.bf16.msra.mxu1 %v13496_v21 }
 0x315   :  { %3507 = vmatprep.subr.bf16.mxu1 %v13504_v28 }
 0x318   :  { %3508 = vmatpush2.bf16.msra.mxu1 %v13502_v27 }
 0x319   :  { %3509 = vmatprep.subr.bf16.mxu1 %v13510_v31 }
 0x31c   :  { %3510 = vmatpush2.bf16.msra.mxu1 %v13508_v29  ;;  %v13451_v29 = vld [vmem:[#allocation15 + $0xa8] ss:$16 sps:$4 sm:$0xff]  }
 0x31d   :  { %3511 = vmatprep.subr.bf16.mxu1 %v13516_v32  ;;  %v13459_v32 = vld [vmem:[#allocation15 + $0x8c] ss:$16 sps:$4 sm:$0xff]  }
 0x320   :  { %3512 = vmatpush2.bf16.msra.mxu1 %v13514_v33  ;;  %v13457_v33 = vld [vmem:[#allocation15 + $0x88] ss:$16 sps:$4 sm:$0xff]  }
 0x321   :  { %3513 = vmatprep.subr.bf16.mxu1 %v13522_v34  ;;  %v13465_v34 = vld [vmem:[#allocation15 + $0x6c] ss:$16 sps:$4 sm:$0xff]  }
 0x324   :  { %3514 = vmatpush2.bf16.msra.mxu1 %v13520_v35  ;;  %v13463_v35 = vld [vmem:[#allocation15 + $0x68] ss:$16 sps:$4 sm:$0xff]  }
 0x325   :  { %3515 = vmatprep.subr.bf16.mxu1 %v13528_v36  ;;  %v13471_v36 = vld [vmem:[#allocation15 + $0x4c] ss:$16 sps:$4 sm:$0xff]  }
 0x328   :  { %3516 = vmatpush2.bf16.msra.mxu1 %v13526_v37  ;;  %v13469_v37 = vld [vmem:[#allocation15 + $0x48] ss:$16 sps:$4 sm:$0xff]  }
 0x329   :  { %3591 = vmatprep.subr.bf16.mxu1 %v13534_v38  ;;  %v13477_v38 = vld [vmem:[#allocation15 + $0x2c] ss:$16 sps:$4 sm:$0xff]  }
 0x32b   :  { %v2440_v44 = vpop.f32.mrf.mxu0 }
 0x32c   :  { %v2441_v54 = vadd.f32 %v2440_v44, %v1749_v57  ;;  %v13475_v44 = vld [vmem:[#allocation15 + $0x28] ss:$16 sps:$4 sm:$0xff]  }
 0x32d   :  { %v2442_v45 = vpop.f32.mrf.mxu0 }
 0x32e   :  { %v2443_v22 = vadd.f32 %v2442_v45, %v1753_v56  ;;  %v13483_v45 = vld [vmem:[#allocation15 + $0xc] ss:$16 sps:$4 sm:$0xff]  }
 0x32f   :  { %v2444_v46 = vpop.f32.mrf.mxu0 }
 0x330   :  { %v2445_v62 = vadd.f32 %v2444_v46, %v1749_v57  ;;  %v13481_v46 = vld [vmem:[#allocation15 + $0x8] ss:$16 sps:$4 sm:$0xff]  }
 0x331   :  { %v2446_v49 = vpop.f32.mrf.mxu0 }
 0x332   :  { %v2447_v63 = vadd.f32 %v2446_v49, %v1753_v56  ;;  %v13489_v49 = vld [vmem:[#allocation15 + $0x1ec] ss:$16 sps:$4 sm:$0xff]  }
 0x333   :  { %v2450_v55 = vpop.f32.mrf.mxu0 }
 0x334   :  { %v2451_v6 = vadd.f32 %v2450_v55, %v1749_v57  ;;  %v13487_v55 = vld [vmem:[#allocation15 + $0x1e8] ss:$16 sps:$4 sm:$0xff]  }
 0x335   :  { %v2452_v60 = vpop.f32.mrf.mxu0 }
 0x336   :  { %v2453_v4 = vadd.f32 %v2452_v60, %v1753_v56  ;;  %v13501_v60 = vld [vmem:[#allocation15 + $0x1ac] ss:$16 sps:$4 sm:$0xff]  }
 0x337   :  { %v2454_v2 = vpop.f32.mrf.mxu0 }
 0x338   :  { %v2455_v10 = vadd.f32 %v2454_v2, %v1749_v57  ;;  %v13519_v2 = vld [vmem:[#allocation15 + $0x14c] ss:$16 sps:$4 sm:$0xff]  }
 0x339   :  { %v2456_v51 = vpop.f32.mrf.mxu0 }
 0x33a   :  { %v2457_v16 = vadd.f32 %v2456_v51, %v1753_v56  ;;  %v13495_v56 = vld [vmem:[#allocation15 + $0x1cc] ss:$16 sps:$4 sm:$0xff]  }
 0x36b   :  { %v2493_v59 = vpop.f32.mrf.mxu1  ;;  %v2546_v57 = vpop.f32.mrf.mxu0 }
 0x36c   :  { %v2494_v52 = vadd.f32 %v2493_v59, %v2441_v54  ;;  %v13493_v59 = vld [vmem:[#allocation15 + $0x1c8] ss:$16 sps:$4 sm:$0xff]  }
 0x36d   :  { %v2495_v61 = vpop.f32.mrf.mxu1 }
 0x36e   :  { %v2496_v0 = vadd.f32 %v2495_v61, %v2443_v22  ;;  %v2618_v9 = vmax.f32 %v2494_v52, 0.0  ;;  %v2548_v61 = vpop.f32.mrf.mxu0  ;;  %v13499_v22 = vld [vmem:[#allocation15 + $0x1a8] ss:$16 sps:$4 sm:$0xff]  }
 0x36f   :  { %v2497_v47 = vpop.f32.mrf.mxu1 }
 0x370   :  { %v2498_v1 = vadd.f32 %v2497_v47, %v2445_v62  ;;  %v2619_v30 = vmax.f32 %v2496_v0, 0.0  ;;  %v13507_v62 = vld [vmem:[#allocation15 + $0x18c] ss:$16 sps:$4 sm:$0xff]   ;;  %v2550_v54 = vpop.f32.mrf.mxu0  ;;  %v13505_v47 = vld [vmem:[#allocation15 + $0x188] ss:$16 sps:$4 sm:$0xff]  }
 0x371   :  { %v2499_v53 = vpop.f32.mrf.mxu1 }
 0x372   :  { %v2500_v3 = vadd.f32 %v2499_v53, %v2447_v63  ;;  %v2622_v5 = vmax.f32 %v2498_v1, 0.0  ;;  %v13513_v63 = vld [vmem:[#allocation15 + $0x16c] ss:$16 sps:$4 sm:$0xff]   ;;  %v2552_v0 = vpop.f32.mrf.mxu0  ;;  %v13511_v1 = vld [vmem:[#allocation15 + $0x168] ss:$16 sps:$4 sm:$0xff]   ;;  %v1761_v53 = vrot.slane %v14139_v48, %v14069_v41 }
 0x373   :  { %v2503_v7 = vpop.f32.mrf.mxu1 }
 0x374   :  { %v2623_v8 = vmax.f32 %v2500_v3, 0.0  ;;  %v14145_v13 = vpack.c.bf16 %v2622_v5, %v2618_v9  ;;  %v2504_v18 = vadd.f32 %v2503_v7, %v2451_v6  ;;  %v2556_v52 = vpop.f32.mrf.mxu0  ;;  %v13517_v3 = vld [vmem:[#allocation15 + $0x148] ss:$16 sps:$4 sm:$0xff]   ;;  %v1757_v5 = vrot.slane %v14139_v48, %v14075_v43 }
 0x375   :  { %v2505_v58 = vpop.f32.mrf.mxu1  ;;  %v2549_v9 = vadd.f32 %v2548_v61, %v1761_v53  ;;  %v2553_v6 = vadd.f32 %v2552_v0, %v1761_v53  ;;  %v3724_v0 = vld [vmem:[#allocation18 + $0x1c0] sm:$0xff] }
 0x376   :  { %v2635_v11 = vpack.c.bf16 %v2623_v8, %v2619_v30  ;;  %v2506_v50 = vadd.f32 %v2505_v58, %v2453_v4  ;;  %v2626_v27 = vmax.f32 %v2504_v18, 0.0  ;;  %v13525_v30 = vld [vmem:[#allocation15 + $0x12c] ss:$16 sps:$4 sm:$0xff]   ;;  %v2558_v8 = vpop.f32.mrf.mxu0  ;;  %v2551_v58 = vadd.f32 %v2550_v54, %v1757_v5  ;;  %v13523_v4 = vld [vmem:[#allocation15 + $0x128] ss:$16 sps:$4 sm:$0xff]  }
 0x377   :  { %v2507_v14 = vpop.f32.mrf.mxu1  ;;  %v13529_v18 = vld [vmem:[#allocation15 + $0x108] ss:$16 sps:$4 sm:$0xff]  }
 0x378   :  { %v2508_v17 = vadd.f32 %v2507_v14, %v2455_v10  ;;  %3464 = vmatprep.mubr.bf16.mxu0 %v2635_v11  ;;  %v2627_v21 = vmax.f32 %v2506_v50, 0.0  ;;  %v2547_v10 = vadd.f32 %v2546_v57, %v1757_v5  ;;  %v13538_v54 = vld [vmem:[#allocation15 + $0x2a8] ss:$16 sps:$4 sm:$0xff]  }
 0x379   :  { %v2509_v19 = vpop.f32.mrf.mxu1  ;;  %3465 = vmatmul.mubr.bf16.vlgmr.msra.gmra.mxu0 %v14145_v13 }
 0x37a   :  { %v2510_v20 = vadd.f32 %v2509_v19, %v2457_v16  ;;  %3539 = vmatpush1.bf16.msra.mxu0 %v13439_v12  ;;  %v2630_v24 = vmax.f32 %v2508_v17, 0.0  ;;  %v13531_v12 = vld [vmem:[#allocation15 + $0x10c] ss:$16 sps:$4 sm:$0xff]   ;;  %v2560_v16 = vpop.f32.mrf.mxu0 }
 0x37b   :  { %3540 = vmatprep.subr.bf16.mxu0 %v13447_v15 }
 0x37c   :  { %v2631_v26 = vmax.f32 %v2510_v20, 0.0  ;;  %v14150_v31 = vpack.c.bf16 %v2630_v24, %v2626_v27  ;;  %v2559_v27 = vadd.f32 %v2558_v8, %v1761_v53 }
 0x37e   :  { %v14148_v28 = vpack.c.bf16 %v2631_v26, %v2627_v21  ;;  %3541 = vmatpush1.bf16.msra.mxu0 %v13445_v23 }
 0x37f   :  { %3542 = vmatprep.subr.bf16.mxu0 %v13453_v25  ;;  %v2562_v25 = vpop.f32.mrf.mxu0 }
 0x380   :  { %3474 = vmatprep.mubr.bf16.mxu0 %v14148_v28 }
 0x381   :  { %3475 = vmatmul.mubr.bf16.gmra.mxu0 %v14150_v31 }
 0x382   :  { %3543 = vmatpush1.bf16.msra.mxu0 %v13451_v29  ;;  %3570 = vmatprep.mubr.bf16.mxu0 %v2635_v11  ;;  %v2561_v29 = vadd.f32 %v2560_v16, %v1757_v5  ;;  %v3696_v16 = vld [vmem:[#allocation18 + $0xe0] sm:$0xff] }
 0x383   :  { %3544 = vmatprep.subr.bf16.mxu0 %v13459_v32 }
 0x386   :  { %3545 = vmatpush1.bf16.msra.mxu0 %v13457_v33  ;;  %v13532_v33 = vld [vmem:[#allocation15 + $0x2e8] ss:$16 sps:$4 sm:$0xff]  }
 0x387   :  { %3546 = vmatprep.subr.bf16.mxu0 %v13465_v34  ;;  %v2557_v34 = vadd.f32 %v2556_v52, %v1757_v5  ;;  %v13544_v52 = vld [vmem:[#allocation15 + $0x268] ss:$16 sps:$4 sm:$0xff]  }
 0x388   :  { %v3716_v5 = vld [vmem:[#allocation18 + $0x180] sm:$0xff] }
 0x38a   :  { %3547 = vmatpush1.bf16.msra.mxu0 %v13463_v35 }
 0x38b   :  { %3548 = vmatprep.subr.bf16.mxu0 %v13471_v36 }
 0x38e   :  { %3549 = vmatpush1.bf16.msra.mxu0 %v13469_v37  ;;  %v13537_v37 = vld [vmem:[#allocation15 + $0x2cc] ss:$16 sps:$4 sm:$0xff]  }
 0x38f   :  { %3550 = vmatprep.subr.bf16.mxu0 %v13477_v38  ;;  %v2563_v38 = vadd.f32 %v2562_v25, %v1761_v53 }
 0x392   :  { %3551 = vmatpush1.bf16.msra.mxu0 %v13475_v44 }
 0x393   :  { %3552 = vmatprep.subr.bf16.mxu0 %v13483_v45 }
 0x396   :  { %3553 = vmatpush1.bf16.msra.mxu0 %v13481_v46 }
 0x397   :  { %3554 = vmatprep.subr.bf16.mxu0 %v13489_v49 }
 0x39a   :  { %3555 = vmatpush2.bf16.msra.mxu0 %v13487_v55 }
 0x39b   :  { %3556 = vmatprep.subr.bf16.mxu0 %v13495_v56  ;;  %v13535_v56 = vld [vmem:[#allocation15 + $0x2c8] ss:$16 sps:$4 sm:$0xff]  }
 0x39e   :  { %3557 = vmatpush2.bf16.msra.mxu0 %v13493_v59  ;;  %v13540_v59 = vld [vmem:[#allocation15 + $0x2ac] ss:$16 sps:$4 sm:$0xff]  }
 0x39f   :  { %3558 = vmatprep.subr.bf16.mxu0 %v13501_v60 }
 0x3a2   :  { %3559 = vmatpush2.bf16.msra.mxu0 %v13499_v22 }
 0x3a3   :  { %3560 = vmatprep.subr.bf16.mxu0 %v13507_v62 }
 0x3a6   :  { %3561 = vmatpush2.bf16.msra.mxu0 %v13505_v47 }
 0x3a7   :  { %3562 = vmatprep.subr.bf16.mxu0 %v13513_v63  ;;  %v13543_v63 = vld [vmem:[#allocation15 + $0x28c] ss:$16 sps:$4 sm:$0xff]  }
 0x3aa   :  { %3563 = vmatpush2.bf16.msra.mxu0 %v13511_v1  ;;  %v3728_v1 = vld [vmem:[#allocation18 + $0x1e0] sm:$0xff] }
 0x3ab   :  { %v2599_v7 = vpop.f32.mrf.mxu1  ;;  %3564 = vmatprep.subr.bf16.mxu0 %v13519_v2  ;;  %v11963_v2 = vcombine.high %v3724_v0, %v3728_v1  ;;  %v11962_v53 = vcombine.low %v3724_v0, %v3728_v1  ;;  %v3772_v0 = vld [vmem:[#allocation18 + $0x340] sm:$0xff] }
 0x3ac   :  { %v2600_v50 = vadd.f32 %v2599_v7, %v2547_v10  ;;  %v3720_v7 = vld [vmem:[#allocation18 + $0x1a0] sm:$0xff] }
 0x3ad   :  { %v2601_v51 = vpop.f32.mrf.mxu1  ;;  %v11954_v8 = vcombine.low %v3716_v5, %v3720_v7  ;;  %v3704_v10 = vld [vmem:[#allocation18 + $0x120] sm:$0xff] }
 0x3ae   :  { %3565 = vmatpush2.bf16.msra.mxu0 %v13517_v3  ;;  %v2602_v14 = vadd.f32 %v2601_v51, %v2549_v9  ;;  %v2620_v21 = vmax.f32 %v2600_v50, 0.0  ;;  %v13549_v3 = vld [vmem:[#allocation15 + $0x24c] ss:$16 sps:$4 sm:$0xff]   ;;  %v3712_v51 = vld [vmem:[#allocation18 + $0x160] sm:$0xff] }
 0x3af   :  { %v2603_v11 = vpop.f32.mrf.mxu1  ;;  %3566 = vmatprep.subr.bf16.mxu0 %v13525_v30  ;;  %v3708_v30 = vld [vmem:[#allocation18 + $0x140] sm:$0xff]  ;;  %v13555_v50 = vld [vmem:[#allocation15 + $0x20c] ss:$16 sps:$4 sm:$0xff]  }
 0x3b0   :  { %v2604_v15 = vadd.f32 %v2603_v11, %v2551_v58  ;;  %v2621_v23 = vmax.f32 %v2602_v14, 0.0  ;;  %v13547_v9 = vld [vmem:[#allocation15 + $0x248] ss:$16 sps:$4 sm:$0xff]   ;;  %v11947_v58 = vcombine.high %v3708_v30, %v3712_v51  ;;  %v13552_v11 = vld [vmem:[#allocation15 + $0x22c] ss:$16 sps:$4 sm:$0xff]  }
 0x3b1   :  { %v2605_v17 = vpop.f32.mrf.mxu1  ;;  %v13550_v14 = vld [vmem:[#allocation15 + $0x228] ss:$16 sps:$4 sm:$0xff]  }
 0x3b2   :  { %v2606_v48 = vadd.f32 %v2605_v17, %v2553_v6  ;;  %3567 = vmatpush2.bf16.msra.mxu0 %v13523_v4  ;;  %v2624_v19 = vmax.f32 %v2604_v15, 0.0  ;;  %v3700_v4 = vld [vmem:[#allocation18 + $0x100] sm:$0xff] }
 0x3b3   :  { %v2609_v20 = vpop.f32.mrf.mxu1  ;;  %3568 = vmatprep.subr.bf16.mxu0 %v13531_v12  ;;  %v11946_v12 = vcombine.low %v3708_v30, %v3712_v51  ;;  %v11939_v6 = vcombine.high %v3700_v4, %v3704_v10  ;;  %v3692_v15 = vld [vmem:[#allocation18 + $0xc0] sm:$0xff]  ;;  %v11938_v17 = vcombine.low %v3700_v4, %v3704_v10  ;;  %v13576_v30 = vld [vmem:[#allocation15 + $0x32c] ss:$16 sps:$4 sm:$0xff]  }
 0x3b4   :  { %v2625_v24 = vmax.f32 %v2606_v48, 0.0  ;;  %v14158_v35 = vpack.c.bf16 %v2624_v19, %v2620_v21  ;;  %v2610_v46 = vadd.f32 %v2609_v20, %v2557_v34  ;;  %v11931_v48 = vcombine.high %v3692_v15, %v3696_v16  ;;  %v3684_v19 = vld [vmem:[#allocation18 + $0x80] sm:$0xff]  ;;  %v13579_v4 = vld [vmem:[#allocation15 + $0x30c] ss:$16 sps:$4 sm:$0xff]  }
 0x3b5   :  { %v2611_v26 = vpop.f32.mrf.mxu1  ;;  %v3688_v20 = vld [vmem:[#allocation18 + $0xa0] sm:$0xff] }
 0x3b6   :  { %v2637_v32 = vpack.c.bf16 %v2625_v24, %v2621_v23  ;;  %3569 = vmatpush2.bf16.msra.mxu0 %v13529_v18  ;;  %v2612_v44 = vadd.f32 %v2611_v26, %v2559_v27  ;;  %v2628_v22 = vmax.f32 %v2610_v46, 0.0  ;;  %v13553_v18 = vld [vmem:[#allocation15 + $0x208] ss:$16 sps:$4 sm:$0xff]   ;;  %v13558_v23 = vld [vmem:[#allocation15 + $0x3ec] ss:$16 sps:$4 sm:$0xff]   ;;  %v11930_v24 = vcombine.low %v3692_v15, %v3696_v16 }
 0x3b7   :  { %v2613_v36 = vpop.f32.mrf.mxu1  ;;  %6782 = vmatprep.subr.bf16.mxu0 %v11963_v2  ;;  %v11923_v25 = vcombine.high %v3684_v19, %v3688_v20  ;;  %v13556_v21 = vld [vmem:[#allocation15 + $0x3e8] ss:$16 sps:$4 sm:$0xff]   ;;  %v13573_v2 = vld [vmem:[#allocation15 + $0x34c] ss:$16 sps:$4 sm:$0xff]  }
 0x3b8   :  { %v2614_v45 = vadd.f32 %v2613_v36, %v2561_v29  ;;  %3517 = vmatprep.mubr.bf16.mxu1 %v2637_v32  ;;  %v2629_v60 = vmax.f32 %v2612_v44, 0.0  ;;  %v3676_v26 = vld [vmem:[#allocation18 + $0x40] sm:$0xff]  ;;  %v13561_v29 = vld [vmem:[#allocation15 + $0x3cc] ss:$16 sps:$4 sm:$0xff]  }
 0x3b9   :  { %v2615_v49 = vpop.f32.mrf.mxu1  ;;  %3518 = vmatmul.mubr.bf16.vlgmr.msra.gmra.mxu1 %v14158_v35  ;;  %3571 = vmatmul.mubr.bf16.vlgmr.msra.gmra.mxu0 %v14145_v13  ;;  %v13541_v13 = vld [vmem:[#allocation15 + $0x288] ss:$16 sps:$4 sm:$0xff]  }
 0x3ba   :  { %v2616_v55 = vadd.f32 %v2615_v49, %v2563_v38  ;;  %3592 = vmatpush1.bf16.msra.mxu1 %v13532_v33  ;;  %3580 = vmatprep.mubr.bf16.mxu0 %v14148_v28  ;;  %v2632_v57 = vmax.f32 %v2614_v45, 0.0  ;;  %v13546_v28 = vld [vmem:[#allocation15 + $0x26c] ss:$16 sps:$4 sm:$0xff]   ;;  %v3680_v27 = vld [vmem:[#allocation18 + $0x60] sm:$0xff] }
 0x3bb   :  { %3593 = vmatprep.subr.bf16.mxu1 %v13537_v37  ;;  %6783 = vmatpush1.bf16.msra.mxu0 %v11962_v53  ;;  %v11915_v33 = vcombine.high %v3676_v26, %v3680_v27  ;;  %v13559_v34 = vld [vmem:[#allocation15 + $0x3c8] ss:$16 sps:$4 sm:$0xff]   ;;  %v13564_v38 = vld [vmem:[#allocation15 + $0x3ac] ss:$16 sps:$4 sm:$0xff]   ;;  %v11914_v44 = vcombine.low %v3676_v26, %v3680_v27 }
 0x3bc   :  { %v2633_v61 = vmax.f32 %v2616_v55, 0.0  ;;  %v14165_v47 = vpack.c.bf16 %v2632_v57, %v2628_v22  ;;  %v3668_v36 = vld [vmem:[#allocation18] sm:$0xff] }
 0x3bd   :  { %v3672_v37 = vld [vmem:[#allocation18 + $0x20] sm:$0xff] }
 0x3be   :  { %v14163_v62 = vpack.c.bf16 %v2633_v61, %v2629_v60  ;;  %3594 = vmatpush1.bf16.msra.mxu1 %v13535_v56  ;;  %v11907_v45 = vcombine.high %v3668_v36, %v3672_v37  ;;  %v13562_v46 = vld [vmem:[#allocation15 + $0x3a8] ss:$16 sps:$4 sm:$0xff]   ;;  %v13567_v56 = vld [vmem:[#allocation15 + $0x38c] ss:$16 sps:$4 sm:$0xff]   ;;  %v11906_v57 = vcombine.low %v3668_v36, %v3672_v37 }
 0x3bf   :  { %3595 = vmatprep.subr.bf16.mxu1 %v13540_v59  ;;  %v3788_v49 = vld [vmem:[#allocation18 + $0x3c0] sm:$0xff] }
 0x3c0   :  { %3527 = vmatprep.mubr.bf16.mxu1 %v14163_v62  ;;  %v3792_v55 = vld [vmem:[#allocation18 + $0x3e0] sm:$0xff] }
 0x3c1   :  { %3528 = vmatmul.mubr.bf16.gmra.mxu1 %v14165_v47  ;;  %3581 = vmatmul.mubr.bf16.gmra.mxu0 %v14150_v31  ;;  %v11955_v31 = vcombine.high %v3716_v5, %v3720_v7  ;;  %v12027_v59 = vcombine.high %v3788_v49, %v3792_v55  ;;  %v13565_v60 = vld [vmem:[#allocation15 + $0x388] ss:$16 sps:$4 sm:$0xff]  }
 0x3c2   :  { %3596 = vmatpush1.bf16.msra.mxu1 %v13538_v54  ;;  %3623 = vmatprep.mubr.bf16.mxu1 %v2637_v32  ;;  %v11922_v32 = vcombine.low %v3684_v19, %v3688_v20  ;;  %v3780_v61 = vld [vmem:[#allocation18 + $0x380] sm:$0xff]  ;;  %v13570_v54 = vld [vmem:[#allocation15 + $0x36c] ss:$16 sps:$4 sm:$0xff]  }
 0x3c3   :  { %3597 = vmatprep.subr.bf16.mxu1 %v13543_v63  ;;  %6784 = vmatprep.subr.bf16.mxu0 %v11955_v31  ;;  %v3784_v22 = vld [vmem:[#allocation18 + $0x3a0] sm:$0xff]  ;;  %v12026_v63 = vcombine.low %v3788_v49, %v3792_v55 }
 0x3c4   :  { %6785 = vmatpush1.bf16.msra.mxu0 %v11954_v8  ;;  %v3776_v1 = vld [vmem:[#allocation18 + $0x360] sm:$0xff] }
 0x3c5   :  { %6786 = vmatprep.subr.bf16.mxu0 %v11947_v58  ;;  %v12011_v53 = vcombine.high %v3772_v0, %v3776_v1  ;;  %v3764_v5 = vld [vmem:[#allocation18 + $0x300] sm:$0xff]  ;;  %v12010_v8 = vcombine.low %v3772_v0, %v3776_v1 }
 0x3c6   :  { %3598 = vmatpush1.bf16.msra.mxu1 %v13541_v13  ;;  %v12019_v13 = vcombine.high %v3780_v61, %v3784_v22  ;;  %v3768_v7 = vld [vmem:[#allocation18 + $0x320] sm:$0xff] }
 0x3c7   :  { %3599 = vmatprep.subr.bf16.mxu1 %v13546_v28  ;;  %v13568_v28 = vld [vmem:[#allocation15 + $0x368] ss:$16 sps:$4 sm:$0xff]   ;;  %v12003_v31 = vcombine.high %v3764_v5, %v3768_v7  ;;  %v12002_v10 = vcombine.low %v3764_v5, %v3768_v7 }
 0x3c8   :  { %6787 = vmatpush1.bf16.msra.mxu0 %v11946_v12  ;;  %v13574_v51 = vld [vmem:[#allocation15 + $0x328] ss:$16 sps:$4 sm:$0xff]  }
 0x3c9   :  { %6788 = vmatprep.subr.bf16.mxu0 %v11939_v6  ;;  %v3760_v58 = vld [vmem:[#allocation18 + $0x2e0] sm:$0xff] }
 0x3ca   :  { %3600 = vmatpush1.bf16.msra.mxu1 %v13544_v52  ;;  %v12018_v52 = vcombine.low %v3780_v61, %v3784_v22  ;;  %v13577_v12 = vld [vmem:[#allocation15 + $0x308] ss:$16 sps:$4 sm:$0xff]  }
 0x3cb   :  { %3601 = vmatprep.subr.bf16.mxu1 %v13549_v3  ;;  %v13571_v3 = vld [vmem:[#allocation15 + $0x348] ss:$16 sps:$4 sm:$0xff]  }
 0x3cc   :  { %6789 = vmatpush1.bf16.msra.mxu0 %v11938_v17  ;;  %v3752_v15 = vld [vmem:[#allocation18 + $0x2a0] sm:$0xff] }
 0x3cd   :  { %6790 = vmatprep.subr.bf16.mxu0 %v11931_v48  ;;  %v3740_v17 = vld [vmem:[#allocation18 + $0x240] sm:$0xff] }
 0x3ce   :  { %3602 = vmatpush1.bf16.msra.mxu1 %v13547_v9  ;;  %v3756_v9 = vld [vmem:[#allocation18 + $0x2c0] sm:$0xff] }
 0x3cf   :  { %3603 = vmatprep.subr.bf16.mxu1 %v13552_v11  ;;  %v11995_v11 = vcombine.high %v3756_v9, %v3760_v58  ;;  %v11994_v6 = vcombine.low %v3756_v9, %v3760_v58  ;;  %v3744_v48 = vld [vmem:[#allocation18 + $0x260] sm:$0xff] }
 0x3d0   :  { %6791 = vmatpush1.bf16.msra.mxu0 %v11930_v24  ;;  %v11978_v19 = vcombine.low %v3740_v17, %v3744_v48  ;;  %v3732_v20 = vld [vmem:[#allocation18 + $0x200] sm:$0xff] }
 0x3d1   :  { %6792 = vmatprep.subr.bf16.mxu0 %v11923_v25  ;;  %v14173_v26 = vld [vmem:[#allocation18 + $0x9c0] sm:$0xff] }
 0x3d2   :  { %3604 = vmatpush1.bf16.msra.mxu1 %v13550_v14  ;;  %v3748_v14 = vld [vmem:[#allocation18 + $0x280] sm:$0xff] }
 0x3d3   :  { %3605 = vmatprep.subr.bf16.mxu1 %v13555_v50  ;;  %v11987_v16 = vcombine.high %v3748_v14, %v3752_v15  ;;  %v11986_v50 = vcombine.low %v3748_v14, %v3752_v15  ;;  %v14175_v27 = vld [vmem:[#allocation18 + $0x9e0] sm:$0xff] }
 0x3d4   :  { %6793 = vmatpush1.bf16.msra.mxu0 %v11922_v32  ;;  %v12219_v32 = vcombine.high %v14173_v26, %v14175_v27  ;;  %v3828_v49 = vld [vmem:[#allocation18 + $0x500] sm:$0xff] }
 0x3d5   :  { %6794 = vmatprep.subr.bf16.mxu0 %v11915_v33  ;;  %v12218_v33 = vcombine.low %v14173_v26, %v14175_v27  ;;  %v3832_v55 = vld [vmem:[#allocation18 + $0x520] sm:$0xff] }
 0x3d6   :  { %3606 = vmatpush1.bf16.msra.mxu1 %v13553_v18  ;;  %v11979_v18 = vcombine.high %v3740_v17, %v3744_v48  ;;  %v3804_v0 = vld [vmem:[#allocation18 + $0x440] sm:$0xff] }
 0x3d7   :  { %3607 = vmatprep.subr.bf16.mxu1 %v13558_v23  ;;  %v3736_v23 = vld [vmem:[#allocation18 + $0x220] sm:$0xff] }
 0x3d8   :  { %6795 = vmatpush1.bf16.msra.mxu0 %v11914_v44  ;;  %v11971_v24 = vcombine.high %v3732_v20, %v3736_v23  ;;  %v11970_v25 = vcombine.low %v3732_v20, %v3736_v23  ;;  %v3840_v44 = vld [vmem:[#allocation18 + $0x560] sm:$0xff] }
 0x3d9   :  { %6796 = vmatprep.subr.bf16.mxu0 %v11907_v45  ;;  %v3808_v1 = vld [vmem:[#allocation18 + $0x460] sm:$0xff] }
 0x3da   :  { %3608 = vmatpush2.bf16.msra.mxu1 %v13556_v21  ;;  %v3856_v21 = vld [vmem:[#allocation18 + $0x5e0] sm:$0xff] }
 0x3db   :  { %3609 = vmatprep.subr.bf16.mxu1 %v13561_v29  ;;  %v3908_v9 = vld [vmem:[#allocation18 + $0x780] sm:$0xff] }
 0x3dc   :  { %6797 = vmatpush1.bf16.msra.mxu0 %v11906_v57  ;;  %v12067_v57 = vcombine.high %v3828_v49, %v3832_v55  ;;  %v3912_v58 = vld [vmem:[#allocation18 + $0x7a0] sm:$0xff] }
 0x3dd   :  { %6798 = vmatprep.subr.bf16.mxu0 %v12027_v59  ;;  %v3820_v59 = vld [vmem:[#allocation18 + $0x4c0] sm:$0xff] }
 0x3de   :  { %3610 = vmatpush2.bf16.msra.mxu1 %v13559_v34  ;;  %v3848_v34 = vld [vmem:[#allocation18 + $0x5a0] sm:$0xff] }
 0x3df   :  { %3611 = vmatprep.subr.bf16.mxu1 %v13564_v38  ;;  %v3836_v38 = vld [vmem:[#allocation18 + $0x540] sm:$0xff] }
 0x3e0   :  { %6799 = vmatpush2.bf16.msra.mxu0 %v12026_v63  ;;  %v12074_v45 = vcombine.low %v3836_v38, %v3840_v44  ;;  %v3816_v63 = vld [vmem:[#allocation18 + $0x4a0] sm:$0xff] }
 0x3e1   :  { %6800 = vmatprep.subr.bf16.mxu0 %v12019_v13  ;;  %v3892_v15 = vld [vmem:[#allocation18 + $0x700] sm:$0xff] }
 0x3e2   :  { %3612 = vmatpush2.bf16.msra.mxu1 %v13562_v46  ;;  %v12075_v46 = vcombine.high %v3836_v38, %v3840_v44  ;;  %v3884_v48 = vld [vmem:[#allocation18 + $0x6c0] sm:$0xff] }
 0x3e3   :  { %3613 = vmatprep.subr.bf16.mxu1 %v13567_v56  ;;  %v12066_v56 = vcombine.low %v3828_v49, %v3832_v55  ;;  %v3876_v23 = vld [vmem:[#allocation18 + $0x680] sm:$0xff] }
 0x3e4   :  { %6801 = vmatpush2.bf16.msra.mxu0 %v12018_v52  ;;  %v12043_v52 = vcombine.high %v3804_v0, %v3808_v1  ;;  %v14181_v38 = vld [vmem:[#allocation18 + $0xdc0] sm:$0xff] }
 0x3e5   :  { %6802 = vmatprep.subr.bf16.mxu0 %v12011_v53  ;;  %v3796_v53 = vld [vmem:[#allocation18 + $0x400] sm:$0xff] }
 0x3e6   :  { %3614 = vmatpush2.bf16.msra.mxu1 %v13565_v60  ;;  %v3824_v60 = vld [vmem:[#allocation18 + $0x4e0] sm:$0xff] }
 0x3e7   :  { %3615 = vmatprep.subr.bf16.mxu1 %v13570_v54  ;;  %v12058_v61 = vcombine.low %v3820_v59, %v3824_v60  ;;  %v12059_v22 = vcombine.high %v3820_v59, %v3824_v60  ;;  %v3812_v54 = vld [vmem:[#allocation18 + $0x480] sm:$0xff]  ;;  %v14189_v59 = vld [vmem:[#allocation17] sm:$0xf] }
 0x3e8   :  { %6803 = vmatpush2.bf16.msra.mxu0 %v12010_v8  ;;  %v12050_v13 = vcombine.low %v3812_v54, %v3816_v63  ;;  %v3920_v8 = vld [vmem:[#allocation18 + $0x7e0] sm:$0xff] }
 0x3e9   :  { %6804 = vmatprep.subr.bf16.mxu0 %v12003_v31  ;;  %v14183_v44 = vld [vmem:[#allocation18 + $0xde0] sm:$0xff] }
 0x3ea   :  { %3616 = vmatpush2.bf16.msra.mxu1 %v13568_v28  ;;  %v12051_v28 = vcombine.high %v3812_v54, %v3816_v63 }
 0x3eb   :  { %3617 = vmatprep.subr.bf16.mxu1 %v13573_v2  ;;  %v12042_v2 = vcombine.low %v3804_v0, %v3808_v1 }
 0x3ec   :  { %6805 = vmatpush2.bf16.msra.mxu0 %v12002_v10  ;;  %v12147_v10 = vcombine.high %v3908_v9, %v3912_v58 }
 0x3ed   :  { %6806 = vmatprep.subr.bf16.mxu0 %v11995_v11  ;;  %v3900_v11 = vld [vmem:[#allocation18 + $0x740] sm:$0xff] }
 0x3ee   :  { %3618 = vmatpush2.bf16.msra.mxu1 %v13571_v3  ;;  %v3800_v3 = vld [vmem:[#allocation18 + $0x420] sm:$0xff] }
 0x3ef   :  { %3619 = vmatprep.subr.bf16.mxu1 %v13576_v30  ;;  %v12034_v5 = vcombine.low %v3796_v53, %v3800_v3  ;;  %v12035_v7 = vcombine.high %v3796_v53, %v3800_v3  ;;  %v3916_v30 = vld [vmem:[#allocation18 + $0x7c0] sm:$0xff] }
 0x3f0   :  { %6807 = vmatpush2.bf16.msra.mxu0 %v11994_v6  ;;  %v12154_v31 = vcombine.low %v3916_v30, %v3920_v8 }
 0x3f1   :  { %6808 = vmatprep.subr.bf16.mxu0 %v11987_v16  ;;  %v3896_v16 = vld [vmem:[#allocation18 + $0x720] sm:$0xff] }
 0x3f2   :  { %3620 = vmatpush2.bf16.msra.mxu1 %v13574_v51  ;;  %v12155_v51 = vcombine.high %v3916_v30, %v3920_v8  ;;  %v12131_v17 = vcombine.high %v3892_v15, %v3896_v16 }
 0x3f3   :  { %3621 = vmatprep.subr.bf16.mxu1 %v13579_v4  ;;  %v12146_v4 = vcombine.low %v3908_v9, %v3912_v58 }
 0x3f4   :  { %6809 = vmatpush2.bf16.msra.mxu0 %v11986_v50  ;;  %v12130_v50 = vcombine.low %v3892_v15, %v3896_v16 }
 0x3f5   :  { %6810 = vmatprep.subr.bf16.mxu0 %v11979_v18  ;;  %v3888_v18 = vld [vmem:[#allocation18 + $0x6e0] sm:$0xff] }
 0x3f6   :  { %3622 = vmatpush2.bf16.msra.mxu1 %v13577_v12  ;;  %v3904_v12 = vld [vmem:[#allocation18 + $0x760] sm:$0xff]  ;;  %v12123_v20 = vcombine.high %v3884_v48, %v3888_v18 }
 0x3f7   :  { %v12138_v6 = vcombine.low %v3900_v11, %v3904_v12  ;;  %v12139_v14 = vcombine.high %v3900_v11, %v3904_v12 }
 0x3f8   :  { %6811 = vmatpush2.bf16.msra.mxu0 %v11978_v19  ;;  %v12122_v19 = vcombine.low %v3884_v48, %v3888_v18 }
 0x3f9   :  { %3624 = vmatmul.mubr.bf16.vlgmr.msra.gmra.mxu1 %v14158_v35  ;;  %6812 = vmatprep.subr.bf16.mxu0 %v11971_v24  ;;  %v3852_v35 = vld [vmem:[#allocation18 + $0x5c0] sm:$0xff] }
 0x3fa   :  { %3633 = vmatprep.mubr.bf16.mxu1 %v14163_v62  ;;  %v12091_v62 = vcombine.high %v3852_v35, %v3856_v21  ;;  %v12090_v29 = vcombine.low %v3852_v35, %v3856_v21  ;;  %v3880_v24 = vld [vmem:[#allocation18 + $0x6a0] sm:$0xff] }
 0x3fb   :  { %v12114_v35 = vcombine.low %v3876_v23, %v3880_v24  ;;  %v3868_v21 = vld [vmem:[#allocation18 + $0x640] sm:$0xff] }
 0x3fc   :  { %6813 = vmatpush2.bf16.msra.mxu0 %v11970_v25  ;;  %6825 = vmatprep.subr.bf16.mxu1 %v12091_v62  ;;  %v12115_v25 = vcombine.high %v3876_v23, %v3880_v24  ;;  %v3872_v62 = vld [vmem:[#allocation18 + $0x660] sm:$0xff] }
 0x3fd   :  { %6826 = vmatpush1.bf16.msra.mxu1 %v12090_v29  ;;  %6868 = vmatprep.subr.bf16.mxu0 %v12219_v32  ;;  %v12107_v29 = vcombine.high %v3868_v21, %v3872_v62  ;;  %v12106_v32 = vcombine.low %v3868_v21, %v3872_v62 }
 0x401   :  { %3634 = vmatmul.mubr.bf16.gmra.mxu1 %v14165_v47  ;;  %v3844_v47 = vld [vmem:[#allocation18 + $0x580] sm:$0xff] }
 0x402   :  { %v12083_v36 = vcombine.high %v3844_v47, %v3848_v34  ;;  %v12082_v37 = vcombine.low %v3844_v47, %v3848_v34  ;;  %v3860_v47 = vld [vmem:[#allocation18 + $0x600] sm:$0xff] }
 0x403   :  { %v3864_v34 = vld [vmem:[#allocation18 + $0x620] sm:$0xff] }
 0x404   :  { %6827 = vmatprep.subr.bf16.mxu1 %v12083_v36  ;;  %v12099_v36 = vcombine.high %v3860_v47, %v3864_v34 }
 0x405   :  { %6828 = vmatpush1.bf16.msra.mxu1 %v12082_v37  ;;  %v12098_v37 = vcombine.low %v3860_v47, %v3864_v34 }
 0x406   :  { %6829 = vmatprep.subr.bf16.mxu1 %v12075_v46  ;;  %v12346_v46 = vcombine.low %v14181_v38, %v14183_v44 }
 0x409   :  { %6830 = vmatpush1.bf16.msra.mxu1 %v12074_v45  ;;  %v12347_v45 = vcombine.high %v14181_v38, %v14183_v44 }
 0x40a   :  { %6831 = vmatprep.subr.bf16.mxu1 %v12067_v57 }
 0x40d   :  { %6832 = vmatpush1.bf16.msra.mxu1 %v12066_v56 }
 0x40e   :  { %6833 = vmatprep.subr.bf16.mxu1 %v12059_v22  ;;  %v14197_v22 = vrot.slane %v14189_v59, %v14072_v42 }
 0x411   :  { %6834 = vmatpush1.bf16.msra.mxu1 %v12058_v61  ;;  %v2779_v61 = vrot.slane %v14189_v59, %v14066_v40 }
 0x412   :  { %6835 = vmatprep.subr.bf16.mxu1 %v12051_v28 }
 0x415   :  { %6836 = vmatpush1.bf16.msra.mxu1 %v12050_v13 }
 0x416   :  { %6837 = vmatprep.subr.bf16.mxu1 %v12043_v52 }
 0x419   :  { %6838 = vmatpush1.bf16.msra.mxu1 %v12042_v2 }
 0x41a   :  { %6839 = vmatprep.subr.bf16.mxu1 %v12035_v7 }
 0x41d   :  { %6840 = vmatpush1.bf16.msra.mxu1 %v12034_v5 }
 0x41e   :  { %6841 = vmatprep.subr.bf16.mxu1 %v12155_v51 }
 0x421   :  { %6842 = vmatpush2.bf16.msra.mxu1 %v12154_v31 }
 0x422   :  { %6843 = vmatprep.subr.bf16.mxu1 %v12147_v10  ;;  %v3976_v10 = vld [vmem:[#allocation18 + $0x9a0] sm:$0xff] }
 0x425   :  { %6844 = vmatpush2.bf16.msra.mxu1 %v12146_v4  ;;  %v3972_v4 = vld [vmem:[#allocation18 + $0x980] sm:$0xff] }
 0x426   :  { %6845 = vmatprep.subr.bf16.mxu1 %v12139_v14 }
 0x429   :  { %6846 = vmatpush2.bf16.msra.mxu1 %v12138_v6 }
 0x42a   :  { %6847 = vmatprep.subr.bf16.mxu1 %v12131_v17  ;;  %v12211_v17 = vcombine.high %v3972_v4, %v3976_v10 }
 0x42d   :  { %6848 = vmatpush2.bf16.msra.mxu1 %v12130_v50 }
 0x42e   :  { %6849 = vmatprep.subr.bf16.mxu1 %v12123_v20  ;;  %v3968_v20 = vld [vmem:[#allocation18 + $0x960] sm:$0xff] }
 0x431   :  { %6850 = vmatpush2.bf16.msra.mxu1 %v12122_v19  ;;  %v3964_v19 = vld [vmem:[#allocation18 + $0x940] sm:$0xff] }
 0x432   :  { %6851 = vmatprep.subr.bf16.mxu1 %v12115_v25  ;;  %v12210_v25 = vcombine.low %v3972_v4, %v3976_v10  ;;  %v12202_v34 = vcombine.low %v3964_v19, %v3968_v20 }
 0x435   :  { %6852 = vmatpush2.bf16.msra.mxu1 %v12114_v35  ;;  %v12203_v35 = vcombine.high %v3964_v19, %v3968_v20  ;;  %v4016_v19 = vld [vmem:[#allocation18 + $0xae0] sm:$0xff] }
 0x436   :  { %6853 = vmatprep.subr.bf16.mxu1 %v12107_v29  ;;  %v3956_v29 = vld [vmem:[#allocation18 + $0x900] sm:$0xff] }
 0x439   :  { %6854 = vmatpush2.bf16.msra.mxu1 %v12106_v32  ;;  %v3466_v49 = vpop.f32.mrf.mxu0  ;;  %v3960_v32 = vld [vmem:[#allocation18 + $0x920] sm:$0xff] }
 0x43a   :  { %6855 = vmatprep.subr.bf16.mxu1 %v12099_v36  ;;  %v3467_v1 = vadd.f32 %v3466_v49, %v14197_v22  ;;  %v12195_v36 = vcombine.high %v3956_v29, %v3960_v32  ;;  %v12194_v26 = vcombine.low %v3956_v29, %v3960_v32  ;;  %v3944_v49 = vld [vmem:[#allocation18 + $0x8a0] sm:$0xff] }
 0x43b   :  { %v3468_v55 = vpop.f32.mrf.mxu0  ;;  %v3996_v32 = vld [vmem:[#allocation18 + $0xa40] sm:$0xff] }
 0x43c   :  { %v3469_v28 = vadd.f32 %v3468_v55, %v2779_v61 }
 0x43d   :  { %6856 = vmatpush2.bf16.msra.mxu1 %v12098_v37  ;;  %v3470_v56 = vpop.f32.mrf.mxu0  ;;  %v3948_v37 = vld [vmem:[#allocation18 + $0x8c0] sm:$0xff] }
 0x43e   :  { %6911 = vmatprep.subr.bf16.mxu1 %v12347_v45  ;;  %v3471_v0 = vadd.f32 %v3470_v56, %v14197_v22  ;;  %v3952_v45 = vld [vmem:[#allocation18 + $0x8e0] sm:$0xff] }
 0x43f   :  { %v3472_v57 = vpop.f32.mrf.mxu0  ;;  %v12187_v27 = vcombine.high %v3948_v37, %v3952_v45  ;;  %v12186_v55 = vcombine.low %v3948_v37, %v3952_v45  ;;  %v2787_v37 = vrot.slane %v14189_v59, %v14069_v41 }
 0x440   :  { %v3473_v52 = vadd.f32 %v3472_v57, %v2779_v61  ;;  %v3932_v57 = vld [vmem:[#allocation18 + $0x840] sm:$0xff] }
 0x441   :  { %v14191_v60 = vpop.f32.mrf.mxu0 }
 0x443   :  { %v3478_v63 = vpop.f32.mrf.mxu0 }
 0x444   :  { %v3479_v14 = vadd.f32 %v3478_v63, %v2779_v61 }
 0x445   :  { %v14201_v5 = vpop.f32.mrf.mxu0 }
 0x447   :  { %v3482_v11 = vpop.f32.mrf.mxu0 }
 0x448   :  { %v3483_v48 = vadd.f32 %v3482_v11, %v2779_v61  ;;  %v3936_v61 = vld [vmem:[#allocation18 + $0x860] sm:$0xff] }
 0x449   :  { %v12171_v63 = vcombine.high %v3932_v57, %v3936_v61 }
 0x479   :  { %v3519_v54 = vpop.f32.mrf.mxu1  ;;  %v3572_v4 = vpop.f32.mrf.mxu0 }
 0x47a   :  { %v3520_v7 = vadd.f32 %v3519_v54, %v3467_v1 }
 0x47b   :  { %v3521_v13 = vpop.f32.mrf.mxu1 }
 0x47c   :  { %v3522_v53 = vadd.f32 %v3521_v13, %v3469_v28  ;;  %v3644_v12 = vmax.f32 %v3520_v7, 0.0  ;;  %v3924_v13 = vld [vmem:[#allocation18 + $0x800] sm:$0xff] }
 0x47d   :  { %v3523_v2 = vpop.f32.mrf.mxu1  ;;  %v3928_v28 = vld [vmem:[#allocation18 + $0x820] sm:$0xff] }
 0x47e   :  { %v3524_v3 = vadd.f32 %v3523_v2, %v3471_v0  ;;  %v3645_v9 = vmax.f32 %v3522_v53, 0.0  ;;  %v12170_v0 = vcombine.low %v3932_v57, %v3936_v61  ;;  %v12163_v1 = vcombine.high %v3924_v13, %v3928_v28  ;;  %v4044_v2 = vld [vmem:[#allocation18 + $0xbc0] sm:$0xff] }
 0x47f   :  { %v3525_v30 = vpop.f32.mrf.mxu1  ;;  %v12162_v53 = vcombine.low %v3924_v13, %v3928_v28  ;;  %v4036_v7 = vld [vmem:[#allocation18 + $0xb80] sm:$0xff]  ;;  %v3477_v28 = vadd.f32 %v14191_v60, %v14197_v22 }
 0x480   :  { %v3526_v8 = vadd.f32 %v3525_v30, %v3473_v52  ;;  %v3648_v31 = vmax.f32 %v3524_v3, 0.0  ;;  %v4048_v52 = vld [vmem:[#allocation18 + $0xbe0] sm:$0xff] }
 0x481   :  { %v14203_v51 = vpop.f32.mrf.mxu1  ;;  %v12283_v3 = vcombine.high %v4044_v2, %v4048_v52  ;;  %v4040_v30 = vld [vmem:[#allocation18 + $0xba0] sm:$0xff] }
 0x482   :  { %v3649_v58 = vmax.f32 %v3526_v8, 0.0  ;;  %v14207_v16 = vpack.c.bf16 %v3648_v31, %v3644_v12  ;;  %v12282_v8 = vcombine.low %v4044_v2, %v4048_v52  ;;  %v12275_v31 = vcombine.high %v4036_v7, %v4040_v30  ;;  %v4020_v12 = vld [vmem:[#allocation18 + $0xb00] sm:$0xff] }
 0x483   :  { %v3531_v6 = vpop.f32.mrf.mxu1  ;;  %v12274_v10 = vcombine.low %v4036_v7, %v4040_v30  ;;  %v3729_v7 = vld [vmem:[#allocation18 + $0x1e8] sm:$0xff]  ;;  %v3530_v30 = vadd.f32 %v14203_v51, %v3477_v28 }
 0x484   :  { %v14205_v15 = vpack.c.bf16 %v3649_v58, %v3645_v9  ;;  %v3532_v18 = vadd.f32 %v3531_v6, %v3479_v14  ;;  %v4028_v9 = vld [vmem:[#allocation18 + $0xb40] sm:$0xff]  ;;  %v3574_v14 = vpop.f32.mrf.mxu0 }
 0x485   :  { %v14209_v50 = vpop.f32.mrf.mxu1  ;;  %v4032_v58 = vld [vmem:[#allocation18 + $0xb60] sm:$0xff] }
 0x486   :  { %6814 = vmatprep.mubr.bf16.mxu0 %v14205_v15  ;;  %v3653_v21 = vmax.f32 %v3532_v18, 0.0  ;;  %v12267_v11 = vcombine.high %v4028_v9, %v4032_v58  ;;  %v4024_v6 = vld [vmem:[#allocation18 + $0xb20] sm:$0xff]  ;;  %v3576_v20 = vpop.f32.mrf.mxu0 }
 0x487   :  { %v3535_v23 = vpop.f32.mrf.mxu1  ;;  %6815 = vmatmul.mubr.bf16.vlgmr.msra.gmra.mxu0 %v14207_v16  ;;  %v4012_v18 = vld [vmem:[#allocation18 + $0xac0] sm:$0xff] }
 0x488   :  { %v3536_v24 = vadd.f32 %v3535_v23, %v3483_v48  ;;  %6869 = vmatpush1.bf16.msra.mxu0 %v12218_v33  ;;  %v3940_v33 = vld [vmem:[#allocation18 + $0x880] sm:$0xff]  ;;  %v12259_v48 = vcombine.high %v4020_v12, %v4024_v6  ;;  %v12258_v23 = vcombine.low %v4020_v12, %v4024_v6 }
 0x489   :  { %6870 = vmatprep.subr.bf16.mxu0 %v12211_v17  ;;  %v12179_v56 = vcombine.high %v3940_v33, %v3944_v49  ;;  %v12178_v54 = vcombine.low %v3940_v33, %v3944_v49  ;;  %v12266_v17 = vcombine.low %v4028_v9, %v4032_v58  ;;  %v3988_v49 = vld [vmem:[#allocation18 + $0xa00] sm:$0xff] }
 0x48a   :  { %v3657_v62 = vmax.f32 %v3536_v24, 0.0  ;;  %v12251_v24 = vcombine.high %v4012_v18, %v4016_v19  ;;  %v4100_v6 = vld [vmem:[#allocation18 + $0xd80] sm:$0xff] }
 0x48c   :  { %v14216_v47 = vpack.c.bf16 %v3657_v62, %v3653_v21  ;;  %6871 = vmatpush1.bf16.msra.mxu0 %v12210_v25  ;;  %v4004_v25 = vld [vmem:[#allocation18 + $0xa80] sm:$0xff]  ;;  %v3578_v21 = vpop.f32.mrf.mxu0  ;;  %v12250_v62 = vcombine.low %v4012_v18, %v4016_v19  ;;  %v3717_v19 = vld [vmem:[#allocation18 + $0x188] sm:$0xff] }
 0x48d   :  { %6872 = vmatprep.subr.bf16.mxu0 %v12203_v35  ;;  %v4008_v35 = vld [vmem:[#allocation18 + $0xaa0] sm:$0xff]  ;;  %v3579_v52 = vadd.f32 %v3578_v21, %v2787_v37 }
 0x48e   :  { %6900 = vmatprep.mubr.bf16.mxu0 %v14216_v47  ;;  %v12243_v29 = vcombine.high %v4004_v25, %v4008_v35  ;;  %v12242_v45 = vcombine.low %v4004_v25, %v4008_v35 }
 0x490   :  { %6873 = vmatpush1.bf16.msra.mxu0 %v12202_v34  ;;  %v4000_v34 = vld [vmem:[#allocation18 + $0xa60] sm:$0xff] }
 0x491   :  { %6874 = vmatprep.subr.bf16.mxu0 %v12195_v36  ;;  %v14219_v36 = vpop.f32.mrf.mxu0  ;;  %v12235_v33 = vcombine.high %v3996_v32, %v4000_v34  ;;  %v12234_v13 = vcombine.low %v3996_v32, %v4000_v34  ;;  %v4092_v32 = vld [vmem:[#allocation18 + $0xd40] sm:$0xff] }
 0x493   :  { %v3584_v57 = vpop.f32.mrf.mxu0 }
 0x494   :  { %6875 = vmatpush1.bf16.msra.mxu0 %v12194_v26  ;;  %v14225_v26 = vrot.slane %v14189_v59, %v14075_v43 }
 0x495   :  { %6876 = vmatprep.subr.bf16.mxu0 %v12187_v27 }
 0x496   :  { %v3573_v59 = vadd.f32 %v3572_v4, %v14225_v26 }
 0x498   :  { %6877 = vmatpush1.bf16.msra.mxu0 %v12186_v55  ;;  %v3992_v55 = vld [vmem:[#allocation18 + $0xa20] sm:$0xff] }
 0x499   :  { %6878 = vmatprep.subr.bf16.mxu0 %v12179_v56  ;;  %v3481_v56 = vadd.f32 %v14201_v5, %v14197_v22  ;;  %v12227_v2 = vcombine.high %v3988_v49, %v3992_v55  ;;  %v12226_v60 = vcombine.low %v3988_v49, %v3992_v55  ;;  %v3709_v49 = vld [vmem:[#allocation18 + $0x148] sm:$0xff] }
 0x49a   :  { %v3713_v55 = vld [vmem:[#allocation18 + $0x168] sm:$0xff] }
 0x49b   :  { %v11948_v44 = vcombine.low %v3709_v49, %v3713_v55 }
 0x49c   :  { %6879 = vmatpush1.bf16.msra.mxu0 %v12178_v54  ;;  %v3575_v54 = vadd.f32 %v3574_v14, %v2787_v37  ;;  %v4104_v14 = vld [vmem:[#allocation18 + $0xda0] sm:$0xff] }
 0x49d   :  { %6880 = vmatprep.subr.bf16.mxu0 %v12171_v63  ;;  %v3577_v63 = vadd.f32 %v3576_v20, %v14225_v26  ;;  %v3721_v20 = vld [vmem:[#allocation18 + $0x1a8] sm:$0xff] }
 0x4a0   :  { %6881 = vmatpush1.bf16.msra.mxu0 %v12170_v0  ;;  %v3534_v0 = vadd.f32 %v14209_v50, %v3481_v56 }
 0x4a1   :  { %6882 = vmatprep.subr.bf16.mxu0 %v12163_v1 }
 0x4a2   :  { %v3656_v22 = vmax.f32 %v3534_v0, 0.0  ;;  %v4088_v0 = vld [vmem:[#allocation18 + $0xd20] sm:$0xff] }
 0x4a4   :  { %6883 = vmatpush1.bf16.msra.mxu0 %v12162_v53 }
 0x4a5   :  { %6884 = vmatprep.subr.bf16.mxu0 %v12283_v3  ;;  %v3725_v3 = vld [vmem:[#allocation18 + $0x1c8] sm:$0xff] }
 0x4a6   :  { %v11964_v25 = vcombine.low %v3725_v3, %v3729_v7 }
 0x4a8   :  { %6885 = vmatpush2.bf16.msra.mxu0 %v12282_v8  ;;  %v14235_v8 = vpop.f32.mrf.mxu0 }
 0x4a9   :  { %6886 = vmatprep.subr.bf16.mxu0 %v12275_v31 }
 0x4ac   :  { %6887 = vmatpush2.bf16.msra.mxu0 %v12274_v10  ;;  %v11965_v10 = vcombine.high %v3725_v3, %v3729_v7  ;;  %v4080_v3 = vld [vmem:[#allocation18 + $0xce0] sm:$0xff]  ;;  %v3693_v7 = vld [vmem:[#allocation18 + $0xc8] sm:$0xff] }
 0x4ad   :  { %6888 = vmatprep.subr.bf16.mxu0 %v12267_v11 }
 0x4b0   :  { %6889 = vmatpush2.bf16.msra.mxu0 %v12266_v17  ;;  %v3652_v17 = vmax.f32 %v3530_v30, 0.0  ;;  %v3697_v30 = vld [vmem:[#allocation18 + $0xe8] sm:$0xff] }
 0x4b1   :  { %6890 = vmatprep.subr.bf16.mxu0 %v12259_v48  ;;  %v3588_v48 = vpop.f32.mrf.mxu0 }
 0x4b2   :  { %v14241_v35 = vpack.c.bf16 %v3656_v22, %v3652_v17  ;;  %v3589_v34 = vadd.f32 %v3588_v48, %v2787_v37  ;;  %v4068_v22 = vld [vmem:[#allocation18 + $0xc80] sm:$0xff] }
 0x4b3   :  { %v4060_v48 = vld [vmem:[#allocation18 + $0xc40] sm:$0xff] }
 0x4b4   :  { %6891 = vmatpush2.bf16.msra.mxu0 %v12258_v23  ;;  %v3585_v23 = vadd.f32 %v3584_v57, %v2787_v37  ;;  %v11956_v37 = vcombine.low %v3717_v19, %v3721_v20 }
 0x4b5   :  { %6892 = vmatprep.subr.bf16.mxu0 %v12251_v24 }
 0x4b8   :  { %6893 = vmatpush2.bf16.msra.mxu0 %v12250_v62 }
 0x4b9   :  { %v3625_v27 = vpop.f32.mrf.mxu1  ;;  %6894 = vmatprep.subr.bf16.mxu0 %v12243_v29  ;;  %v12339_v29 = vcombine.high %v4100_v6, %v4104_v14 }
 0x4ba   :  { %v3626_v31 = vadd.f32 %v3625_v27, %v3573_v59  ;;  %v11957_v27 = vcombine.high %v3717_v19, %v3721_v20  ;;  %v3681_v19 = vld [vmem:[#allocation18 + $0x68] sm:$0xff] }
 0x4bb   :  { %v3627_v61 = vpop.f32.mrf.mxu1 }
 0x4bc   :  { %6895 = vmatpush2.bf16.msra.mxu0 %v12242_v45  ;;  %v3628_v53 = vadd.f32 %v3627_v61, %v3575_v54  ;;  %v3646_v51 = vmax.f32 %v3626_v31, 0.0  ;;  %v12338_v61 = vcombine.low %v4100_v6, %v4104_v14  ;;  %v11932_v6 = vcombine.low %v3693_v7, %v3697_v30 }
 0x4bd   :  { %v3629_v1 = vpop.f32.mrf.mxu1  ;;  %6896 = vmatprep.subr.bf16.mxu0 %v12235_v33  ;;  %v4096_v33 = vld [vmem:[#allocation18 + $0xd60] sm:$0xff] }
 0x4be   :  { %v3630_v5 = vadd.f32 %v3629_v1, %v3577_v63  ;;  %v3647_v11 = vmax.f32 %v3628_v53, 0.0  ;;  %v12331_v54 = vcombine.high %v4092_v32, %v4096_v33  ;;  %v11949_v63 = vcombine.high %v3709_v49, %v3713_v55  ;;  %v3701_v1 = vld [vmem:[#allocation18 + $0x108] sm:$0xff] }
 0x4bf   :  { %v3631_v9 = vpop.f32.mrf.mxu1  ;;  %v12330_v38 = vcombine.low %v4092_v32, %v4096_v33  ;;  %v4052_v32 = vld [vmem:[#allocation18 + $0xc00] sm:$0xff] }
 0x4c0   :  { %v3632_v58 = vadd.f32 %v3631_v9, %v3579_v52  ;;  %6897 = vmatpush2.bf16.msra.mxu0 %v12234_v13  ;;  %v3650_v4 = vmax.f32 %v3630_v5, 0.0  ;;  %v4084_v13 = vld [vmem:[#allocation18 + $0xd00] sm:$0xff] }
 0x4c1   :  { %v14237_v50 = vpop.f32.mrf.mxu1  ;;  %6898 = vmatprep.subr.bf16.mxu0 %v12227_v2  ;;  %v3705_v2 = vld [vmem:[#allocation18 + $0x128] sm:$0xff]  ;;  %v4076_v5 = vld [vmem:[#allocation18 + $0xcc0] sm:$0xff]  ;;  %v12322_v31 = vcombine.low %v4084_v13, %v4088_v0 }
 0x4c2   :  { %v3651_v12 = vmax.f32 %v3632_v58, 0.0  ;;  %v14243_v21 = vpack.c.bf16 %v3650_v4, %v3646_v51  ;;  %v11941_v53 = vcombine.high %v3701_v1, %v3705_v2  ;;  %v11940_v9 = vcombine.low %v3701_v1, %v3705_v2  ;;  %v4072_v4 = vld [vmem:[#allocation18 + $0xca0] sm:$0xff]  ;;  %v3781_v2 = vld [vmem:[#allocation18 + $0x388] sm:$0xff] }
 0x4c3   :  { %v3637_v18 = vpop.f32.mrf.mxu1  ;;  %v12315_v58 = vcombine.high %v4076_v5, %v4080_v3  ;;  %v12307_v14 = vcombine.high %v4068_v22, %v4072_v4  ;;  %v4064_v51 = vld [vmem:[#allocation18 + $0xc60] sm:$0xff]  ;;  %v12306_v20 = vcombine.low %v4068_v22, %v4072_v4 }
 0x4c4   :  { %v14239_v24 = vpack.c.bf16 %v3651_v12, %v3647_v11  ;;  %6899 = vmatpush2.bf16.msra.mxu0 %v12226_v60  ;;  %v3638_v45 = vadd.f32 %v3637_v18, %v3585_v23  ;;  %v11933_v60 = vcombine.high %v3693_v7, %v3697_v30  ;;  %v3689_v11 = vld [vmem:[#allocation18 + $0xa8] sm:$0xff]  ;;  %v12314_v12 = vcombine.low %v4076_v5, %v4080_v3  ;;  %v4168_v1 = vld [vmem:[#allocation18 + $0xfa0] sm:$0xff] }
 0x4c5   :  { %v14245_v62 = vpop.f32.mrf.mxu1  ;;  %6954 = vmatprep.subr.bf16.mxu0 %v11965_v10  ;;  %v3685_v10 = vld [vmem:[#allocation18 + $0x88] sm:$0xff]  ;;  %v12298_v33 = vcombine.low %v4060_v48, %v4064_v51  ;;  %v4156_v3 = vld [vmem:[#allocation18 + $0xf40] sm:$0xff] }
 0x4c6   :  { %6857 = vmatprep.mubr.bf16.mxu1 %v14239_v24  ;;  %v3655_v28 = vmax.f32 %v3638_v45, 0.0  ;;  %v11925_v17 = vcombine.high %v3685_v10, %v3689_v11  ;;  %v3677_v18 = vld [vmem:[#allocation18 + $0x48] sm:$0xff]  ;;  %v11924_v23 = vcombine.low %v3685_v10, %v3689_v11  ;;  %v4160_v7 = vld [vmem:[#allocation18 + $0xf60] sm:$0xff] }
 0x4c7   :  { %v3641_v56 = vpop.f32.mrf.mxu1  ;;  %6858 = vmatmul.mubr.bf16.vlgmr.msra.gmra.mxu1 %v14243_v21  ;;  %6901 = vmatmul.mubr.bf16.vlgmr.msra.gmra.mxu0 %v14241_v35  ;;  %v3669_v45 = vld [vmem:[#allocation18 + $0x8] sm:$0xff]  ;;  %v11916_v49 = vcombine.low %v3677_v18, %v3681_v19  ;;  %v4148_v4 = vld [vmem:[#allocation18 + $0xf00] sm:$0xff] }
 0x4c8   :  { %v3642_v57 = vadd.f32 %v3641_v56, %v3589_v34  ;;  %6912 = vmatpush1.bf16.msra.mxu1 %v12346_v46  ;;  %6955 = vmatpush1.bf16.msra.mxu0 %v11964_v25  ;;  %v12323_v46 = vcombine.high %v4084_v13, %v4088_v0  ;;  %v12299_v25 = vcombine.high %v4060_v48, %v4064_v51  ;;  %v4056_v34 = vld [vmem:[#allocation18 + $0xc20] sm:$0xff]  ;;  %v3773_v30 = vld [vmem:[#allocation18 + $0x348] sm:$0xff] }
 0x4c9   :  { %6986 = vmatprep.mubr.bf16.mxu0 %v14205_v15  ;;  %6913 = vmatprep.subr.bf16.mxu1 %v12339_v29  ;;  %v11917_v29 = vcombine.high %v3677_v18, %v3681_v19  ;;  %v12291_v55 = vcombine.high %v4052_v32, %v4056_v34  ;;  %v4164_v0 = vld [vmem:[#allocation18 + $0xf80] sm:$0xff]  ;;  %v3765_v11 = vld [vmem:[#allocation18 + $0x308] sm:$0xff] }
 0x4ca   :  { %v3659_v59 = vmax.f32 %v3642_v57, 0.0  ;;  %6956 = vmatprep.subr.bf16.mxu0 %v11957_v27  ;;  %v3673_v27 = vld [vmem:[#allocation18 + $0x28] sm:$0xff]  ;;  %v4172_v57 = vld [vmem:[#allocation18 + $0xfc0] sm:$0xff] }
 0x4cb   :  { %v11909_v56 = vcombine.high %v3669_v45, %v3673_v27  ;;  %v11908_v13 = vcombine.low %v3669_v45, %v3673_v27  ;;  %v4152_v10 = vld [vmem:[#allocation18 + $0xf20] sm:$0xff]  ;;  %v3757_v19 = vld [vmem:[#allocation18 + $0x2c8] sm:$0xff] }
 0x4cc   :  { %v14254_v52 = vpack.c.bf16 %v3659_v59, %v3655_v28  ;;  %6914 = vmatpush1.bf16.msra.mxu1 %v12338_v61  ;;  %6957 = vmatpush1.bf16.msra.mxu0 %v11956_v37  ;;  %v4176_v61 = vld [vmem:[#allocation18 + $0xfe0] sm:$0xff]  ;;  %v3789_v37 = vld [vmem:[#allocation18 + $0x3c8] sm:$0xff] }
 0x4cd   :  { %6915 = vmatprep.subr.bf16.mxu1 %v12331_v54  ;;  %6958 = vmatprep.subr.bf16.mxu0 %v11949_v63  ;;  %v3793_v54 = vld [vmem:[#allocation18 + $0x3e8] sm:$0xff]  ;;  %v12290_v63 = vcombine.low %v4052_v32, %v4056_v34  ;;  %v12411_v28 = vcombine.high %v4172_v57, %v4176_v61  ;;  %v4140_v51 = vld [vmem:[#allocation18 + $0xec0] sm:$0xff] }
 0x4ce   :  { %6943 = vmatprep.mubr.bf16.mxu1 %v14254_v52  ;;  %v12029_v59 = vcombine.high %v3789_v37, %v3793_v54  ;;  %v4144_v18 = vld [vmem:[#allocation18 + $0xee0] sm:$0xff]  ;;  %v3749_v27 = vld [vmem:[#allocation18 + $0x288] sm:$0xff] }
 0x4cf   :  { %v4132_v34 = vld [vmem:[#allocation18 + $0xe80] sm:$0xff] }
 0x4d0   :  { %6916 = vmatpush1.bf16.msra.mxu1 %v12330_v38  ;;  %6959 = vmatpush1.bf16.msra.mxu0 %v11948_v44  ;;  %v3785_v38 = vld [vmem:[#allocation18 + $0x3a8] sm:$0xff]  ;;  %v12410_v44 = vcombine.low %v4172_v57, %v4176_v61  ;;  %v4136_v45 = vld [vmem:[#allocation18 + $0xea0] sm:$0xff] }
 0x4d1   :  { %6917 = vmatprep.subr.bf16.mxu1 %v12323_v46  ;;  %6960 = vmatprep.subr.bf16.mxu0 %v11941_v53  ;;  %v12028_v46 = vcombine.low %v3789_v37, %v3793_v54  ;;  %v12403_v53 = vcombine.high %v4164_v0, %v4168_v1  ;;  %v12021_v5 = vcombine.high %v3781_v2, %v3785_v38  ;;  %v4124_v61 = vld [vmem:[#allocation18 + $0xe40] sm:$0xff]  ;;  %v3741_v54 = vld [vmem:[#allocation18 + $0x248] sm:$0xff] }
 0x4d2   :  { %v4128_v37 = vld [vmem:[#allocation18 + $0xe60] sm:$0xff] }
 0x4d4   :  { %6918 = vmatpush1.bf16.msra.mxu1 %v12322_v31  ;;  %6961 = vmatpush1.bf16.msra.mxu0 %v11940_v9  ;;  %v3777_v31 = vld [vmem:[#allocation18 + $0x368] sm:$0xff]  ;;  %v12402_v9 = vcombine.low %v4164_v0, %v4168_v1  ;;  %v4116_v1 = vld [vmem:[#allocation18 + $0xe00] sm:$0xff] }
 0x4d5   :  { %6919 = vmatprep.subr.bf16.mxu1 %v12315_v58  ;;  %6962 = vmatprep.subr.bf16.mxu0 %v11933_v60  ;;  %v12020_v58 = vcombine.low %v3781_v2, %v3785_v38  ;;  %v12395_v60 = vcombine.high %v4156_v3, %v4160_v7  ;;  %v12013_v22 = vcombine.high %v3773_v30, %v3777_v31  ;;  %v4120_v2 = vld [vmem:[#allocation18 + $0xe20] sm:$0xff]  ;;  %v3733_v38 = vld [vmem:[#allocation18 + $0x208] sm:$0xff] }
 0x4d8   :  { %6920 = vmatpush1.bf16.msra.mxu1 %v12314_v12  ;;  %6963 = vmatpush1.bf16.msra.mxu0 %v11932_v6  ;;  %v3769_v12 = vld [vmem:[#allocation18 + $0x328] sm:$0xff]  ;;  %v12394_v6 = vcombine.low %v4156_v3, %v4160_v7  ;;  %v12355_v3 = vcombine.high %v4116_v1, %v4120_v2  ;;  %v3583_v7 = vadd.f32 %v14219_v36, %v14225_v26 }
 0x4d9   :  { %6921 = vmatprep.subr.bf16.mxu1 %v12307_v14  ;;  %6964 = vmatprep.subr.bf16.mxu0 %v11925_v17  ;;  %v12012_v14 = vcombine.low %v3773_v30, %v3777_v31  ;;  %v12387_v17 = vcombine.high %v4148_v4, %v4152_v10  ;;  %v12005_v48 = vcombine.high %v3765_v11, %v3769_v12 }
 0x4dc   :  { %6922 = vmatpush1.bf16.msra.mxu1 %v12306_v20  ;;  %6965 = vmatpush1.bf16.msra.mxu0 %v11924_v23  ;;  %v3761_v20 = vld [vmem:[#allocation18 + $0x2e8] sm:$0xff]  ;;  %v12386_v23 = vcombine.low %v4148_v4, %v4152_v10  ;;  %v3636_v4 = vadd.f32 %v14237_v50, %v3583_v7 }
 0x4dd   :  { %6923 = vmatprep.subr.bf16.mxu1 %v12299_v25  ;;  %6966 = vmatprep.subr.bf16.mxu0 %v11917_v29  ;;  %v12004_v25 = vcombine.low %v3765_v11, %v3769_v12  ;;  %v12379_v29 = vcombine.high %v4140_v51, %v4144_v18  ;;  %v11997_v32 = vcombine.high %v3757_v19, %v3761_v20 }
 0x4e0   :  { %6924 = vmatpush1.bf16.msra.mxu1 %v12298_v33  ;;  %6967 = vmatpush1.bf16.msra.mxu0 %v11916_v49  ;;  %v3753_v33 = vld [vmem:[#allocation18 + $0x2a8] sm:$0xff]  ;;  %v12378_v49 = vcombine.low %v4140_v51, %v4144_v18 }
 0x4e1   :  { %6925 = vmatprep.subr.bf16.mxu1 %v12291_v55  ;;  %6968 = vmatprep.subr.bf16.mxu0 %v11909_v56  ;;  %v11996_v55 = vcombine.low %v3757_v19, %v3761_v20  ;;  %v12371_v56 = vcombine.high %v4132_v34, %v4136_v45  ;;  %v11989_v57 = vcombine.high %v3749_v27, %v3753_v33  ;;  %v3837_v20 = vld [vmem:[#allocation18 + $0x548] sm:$0xff] }
 0x4e4   :  { %6926 = vmatpush1.bf16.msra.mxu1 %v12290_v63  ;;  %6969 = vmatpush1.bf16.msra.mxu0 %v11908_v13  ;;  %v3745_v63 = vld [vmem:[#allocation18 + $0x268] sm:$0xff]  ;;  %v12370_v13 = vcombine.low %v4132_v34, %v4136_v45 }
 0x4e5   :  { %6927 = vmatprep.subr.bf16.mxu1 %v12411_v28  ;;  %6970 = vmatprep.subr.bf16.mxu0 %v12029_v59  ;;  %v11988_v28 = vcombine.low %v3749_v27, %v3753_v33  ;;  %v12363_v59 = vcombine.high %v4124_v61, %v4128_v37  ;;  %v11981_v0 = vcombine.high %v3741_v54, %v3745_v63  ;;  %v3829_v33 = vld [vmem:[#allocation18 + $0x508] sm:$0xff] }
 0x4e8   :  { %6928 = vmatpush2.bf16.msra.mxu1 %v12410_v44  ;;  %6971 = vmatpush2.bf16.msra.mxu0 %v12028_v46  ;;  %v3737_v44 = vld [vmem:[#allocation18 + $0x228] sm:$0xff]  ;;  %v3587_v46 = vadd.f32 %v14235_v8, %v14225_v26  ;;  %v12354_v8 = vcombine.low %v4116_v1, %v4120_v2 }
 0x4e9   :  { %6929 = vmatprep.subr.bf16.mxu1 %v12403_v53  ;;  %6972 = vmatprep.subr.bf16.mxu0 %v12021_v5  ;;  %v12362_v53 = vcombine.low %v4124_v61, %v4128_v37  ;;  %v11980_v5 = vcombine.low %v3741_v54, %v3745_v63  ;;  %v11973_v31 = vcombine.high %v3733_v38, %v3737_v44  ;;  %v3845_v26 = vld [vmem:[#allocation18 + $0x588] sm:$0xff] }
 0x4ea   :  { %v3640_v30 = vadd.f32 %v14245_v62, %v3587_v46  ;;  %v11972_v10 = vcombine.low %v3733_v38, %v3737_v44  ;;  %v3654_v62 = vmax.f32 %v3636_v4, 0.0  ;;  %v3821_v63 = vld [vmem:[#allocation18 + $0x4c8] sm:$0xff] }
 0x4eb   :  { %v3813_v44 = vld [vmem:[#allocation18 + $0x488] sm:$0xff] }
 0x4ec   :  { %6930 = vmatpush2.bf16.msra.mxu1 %v12402_v9  ;;  %6973 = vmatpush2.bf16.msra.mxu0 %v12020_v58  ;;  %v3853_v9 = vld [vmem:[#allocation18 + $0x5c8] sm:$0xff]  ;;  %v3658_v11 = vmax.f32 %v3640_v30, 0.0 }
 0x4ed   :  { %6931 = vmatprep.subr.bf16.mxu1 %v12395_v60  ;;  %6974 = vmatprep.subr.bf16.mxu0 %v12013_v22  ;;  %v3857_v58 = vld [vmem:[#allocation18 + $0x5e8] sm:$0xff] }
 0x4ee   :  { %v3981_v60 = vld [vmem:[#allocation18 + $0x9c8] sm:$0xff]  ;;  %v12093_v12 = vcombine.high %v3853_v9, %v3857_v58  ;;  %v14263_v51 = vpack.c.bf16 %v3658_v11, %v3654_v62 }
 0x4ef   :  { %v3985_v22 = vld [vmem:[#allocation18 + $0x9e8] sm:$0xff] }
 0x4f0   :  { %6932 = vmatpush2.bf16.msra.mxu1 %v12394_v6  ;;  %6975 = vmatpush2.bf16.msra.mxu0 %v12012_v14  ;;  %v12221_v36 = vcombine.high %v3981_v60, %v3985_v22  ;;  %v3849_v6 = vld [vmem:[#allocation18 + $0x5a8] sm:$0xff]  ;;  %v12220_v50 = vcombine.low %v3981_v60, %v3985_v22 }
 0x4f1   :  { %6933 = vmatprep.subr.bf16.mxu1 %v12387_v17  ;;  %6976 = vmatprep.subr.bf16.mxu0 %v12005_v48  ;;  %v3973_v14 = vld [vmem:[#allocation18 + $0x988] sm:$0xff]  ;;  %v12092_v48 = vcombine.low %v3853_v9, %v3857_v58  ;;  %v12085_v18 = vcombine.high %v3845_v26, %v3849_v6 }
 0x4f2   :  { %v3977_v17 = vld [vmem:[#allocation18 + $0x9a8] sm:$0xff] }
 0x4f3   :  { %v12213_v19 = vcombine.high %v3973_v14, %v3977_v17  ;;  %v12212_v34 = vcombine.low %v3973_v14, %v3977_v17  ;;  %v3817_v46 = vld [vmem:[#allocation18 + $0x4a8] sm:$0xff] }
 0x4f4   :  { %6934 = vmatpush2.bf16.msra.mxu1 %v12386_v23  ;;  %6977 = vmatpush2.bf16.msra.mxu0 %v12004_v25  ;;  %v3841_v23 = vld [vmem:[#allocation18 + $0x568] sm:$0xff]  ;;  %v12053_v30 = vcombine.high %v3813_v44, %v3817_v46  ;;  %v12052_v4 = vcombine.low %v3813_v44, %v3817_v46 }
 0x4f5   :  { %6935 = vmatprep.subr.bf16.mxu1 %v12379_v29  ;;  %6978 = vmatprep.subr.bf16.mxu0 %v11997_v32  ;;  %v3965_v25 = vld [vmem:[#allocation18 + $0x948] sm:$0xff]  ;;  %v12084_v32 = vcombine.low %v3845_v26, %v3849_v6  ;;  %v12077_v45 = vcombine.high %v3837_v20, %v3841_v23 }
 0x4f6   :  { %v3969_v29 = vld [vmem:[#allocation18 + $0x968] sm:$0xff] }
 0x4f7   :  { %v12205_v27 = vcombine.high %v3965_v25, %v3969_v29  ;;  %v12204_v61 = vcombine.low %v3965_v25, %v3969_v29  ;;  %v3805_v9 = vld [vmem:[#allocation18 + $0x448] sm:$0xff] }
 0x4f8   :  { %6936 = vmatpush2.bf16.msra.mxu1 %v12378_v49  ;;  %6979 = vmatpush2.bf16.msra.mxu0 %v11996_v55  ;;  %v3833_v49 = vld [vmem:[#allocation18 + $0x528] sm:$0xff] }
 0x4f9   :  { %6937 = vmatprep.subr.bf16.mxu1 %v12371_v56  ;;  %6980 = vmatprep.subr.bf16.mxu0 %v11989_v57  ;;  %v3957_v55 = vld [vmem:[#allocation18 + $0x908] sm:$0xff]  ;;  %v12076_v57 = vcombine.low %v3837_v20, %v3841_v23  ;;  %v12069_v37 = vcombine.high %v3829_v33, %v3833_v49 }
 0x4fa   :  { %v3961_v56 = vld [vmem:[#allocation18 + $0x928] sm:$0xff] }
 0x4fb   :  { %v12197_v54 = vcombine.high %v3957_v55, %v3961_v56  ;;  %v12196_v1 = vcombine.low %v3957_v55, %v3961_v56  ;;  %v3809_v58 = vld [vmem:[#allocation18 + $0x468] sm:$0xff] }
 0x4fc   :  { %6938 = vmatpush2.bf16.msra.mxu1 %v12370_v13  ;;  %6981 = vmatpush2.bf16.msra.mxu0 %v11988_v28  ;;  %v3825_v13 = vld [vmem:[#allocation18 + $0x4e8] sm:$0xff]  ;;  %v12044_v6 = vcombine.low %v3805_v9, %v3809_v58 }
 0x4fd   :  { %6939 = vmatprep.subr.bf16.mxu1 %v12363_v59  ;;  %6982 = vmatprep.subr.bf16.mxu0 %v11981_v0  ;;  %v3949_v28 = vld [vmem:[#allocation18 + $0x8c8] sm:$0xff]  ;;  %v12068_v0 = vcombine.low %v3829_v33, %v3833_v49  ;;  %v12061_v2 = vcombine.high %v3821_v63, %v3825_v13 }
 0x4fe   :  { %v3953_v59 = vld [vmem:[#allocation18 + $0x8e8] sm:$0xff] }
 0x4ff   :  { %v12189_v38 = vcombine.high %v3949_v28, %v3953_v59  ;;  %v12188_v7 = vcombine.low %v3949_v28, %v3953_v59  ;;  %v3933_v60 = vld [vmem:[#allocation18 + $0x848] sm:$0xff] }
 0x500   :  { %6940 = vmatpush2.bf16.msra.mxu1 %v12362_v53  ;;  %6983 = vmatpush2.bf16.msra.mxu0 %v11980_v5  ;;  %v3941_v53 = vld [vmem:[#allocation18 + $0x888] sm:$0xff] }
 0x501   :  { %6941 = vmatprep.subr.bf16.mxu1 %v12355_v3  ;;  %6984 = vmatprep.subr.bf16.mxu0 %v11973_v31  ;;  %v3945_v5 = vld [vmem:[#allocation18 + $0x8a8] sm:$0xff]  ;;  %v12060_v3 = vcombine.low %v3821_v63, %v3825_v13 }
 0x502   :  { %v12181_v31 = vcombine.high %v3941_v53, %v3945_v5  ;;  %v3937_v22 = vld [vmem:[#allocation18 + $0x868] sm:$0xff] }
 0x503   :  { %v12173_v11 = vcombine.high %v3933_v60, %v3937_v22  ;;  %v3925_v26 = vld [vmem:[#allocation18 + $0x808] sm:$0xff]  ;;  %v12172_v14 = vcombine.low %v3933_v60, %v3937_v22 }
 0x504   :  { %6942 = vmatpush2.bf16.msra.mxu1 %v12354_v8  ;;  %6985 = vmatpush2.bf16.msra.mxu0 %v11972_v10  ;;  %v12180_v8 = vcombine.low %v3941_v53, %v3945_v5  ;;  %v12045_v10 = vcombine.high %v3805_v9, %v3809_v58  ;;  %v3929_v62 = vld [vmem:[#allocation18 + $0x828] sm:$0xff] }
 0x505   :  { %6997 = vmatprep.subr.bf16.mxu1 %v12093_v12  ;;  %7040 = vmatprep.subr.bf16.mxu0 %v12221_v36  ;;  %v3797_v12 = vld [vmem:[#allocation18 + $0x408] sm:$0xff]  ;;  %v12164_v25 = vcombine.low %v3925_v26, %v3929_v62 }
 0x506   :  { %v3801_v36 = vld [vmem:[#allocation18 + $0x428] sm:$0xff] }
 0x507   :  { %6944 = vmatmul.mubr.bf16.vlgmr.msra.gmra.mxu1 %v14263_v51  ;;  %6987 = vmatmul.mubr.bf16.vlgmr.msra.gmra.mxu0 %v14207_v16  ;;  %v12037_v17 = vcombine.high %v3797_v12, %v3801_v36  ;;  %v4049_v20 = vld [vmem:[#allocation18 + $0xbe8] sm:$0xff]  ;;  %v12036_v23 = vcombine.low %v3797_v12, %v3801_v36 }
 0x508   :  { %6998 = vmatpush1.bf16.msra.mxu1 %v12092_v48  ;;  %7029 = vmatprep.mubr.bf16.mxu1 %v14239_v24  ;;  %v12165_v48 = vcombine.high %v3925_v26, %v3929_v62  ;;  %v4041_v33 = vld [vmem:[#allocation18 + $0xba8] sm:$0xff] }
 0x509   :  { %7041 = vmatpush1.bf16.msra.mxu0 %v12220_v50  ;;  %7072 = vmatprep.mubr.bf16.mxu0 %v14216_v47  ;;  %v3917_v50 = vld [vmem:[#allocation18 + $0x7c8] sm:$0xff] }
 0x50a   :  { %6999 = vmatprep.subr.bf16.mxu1 %v12085_v18  ;;  %7042 = vmatprep.subr.bf16.mxu0 %v12213_v19  ;;  %v3921_v18 = vld [vmem:[#allocation18 + $0x7e8] sm:$0xff] }
 0x50b   :  { %v4045_v19 = vld [vmem:[#allocation18 + $0xbc8] sm:$0xff]  ;;  %v12157_v29 = vcombine.high %v3917_v50, %v3921_v18  ;;  %v12156_v49 = vcombine.low %v3917_v50, %v3921_v18 }
 0x50c   :  { %7000 = vmatpush1.bf16.msra.mxu1 %v12084_v32  ;;  %v12285_v32 = vcombine.high %v4045_v19, %v4049_v20  ;;  %v12284_v55 = vcombine.low %v4045_v19, %v4049_v20  ;;  %v4033_v63 = vld [vmem:[#allocation18 + $0xb68] sm:$0xff] }
 0x50d   :  { %7043 = vmatpush1.bf16.msra.mxu0 %v12212_v34  ;;  %7001 = vmatprep.subr.bf16.mxu1 %v12077_v45  ;;  %v3909_v34 = vld [vmem:[#allocation18 + $0x788] sm:$0xff] }
 0x50e   :  { %7044 = vmatprep.subr.bf16.mxu0 %v12205_v27  ;;  %v3913_v45 = vld [vmem:[#allocation18 + $0x7a8] sm:$0xff] }
 0x50f   :  { %v4037_v27 = vld [vmem:[#allocation18 + $0xb88] sm:$0xff]  ;;  %v12149_v56 = vcombine.high %v3909_v34, %v3913_v45  ;;  %v12148_v13 = vcombine.low %v3909_v34, %v3913_v45 }
 0x510   :  { %7002 = vmatpush1.bf16.msra.mxu1 %v12076_v57  ;;  %v12277_v57 = vcombine.high %v4037_v27, %v4041_v33  ;;  %v12276_v28 = vcombine.low %v4037_v27, %v4041_v33  ;;  %v4025_v44 = vld [vmem:[#allocation18 + $0xb28] sm:$0xff] }
 0x511   :  { %7045 = vmatpush1.bf16.msra.mxu0 %v12204_v61  ;;  %7003 = vmatprep.subr.bf16.mxu1 %v12069_v37  ;;  %v3901_v61 = vld [vmem:[#allocation18 + $0x748] sm:$0xff] }
 0x512   :  { %7046 = vmatprep.subr.bf16.mxu0 %v12197_v54  ;;  %v3905_v37 = vld [vmem:[#allocation18 + $0x768] sm:$0xff] }
 0x513   :  { %v4029_v54 = vld [vmem:[#allocation18 + $0xb48] sm:$0xff]  ;;  %v12141_v59 = vcombine.high %v3901_v61, %v3905_v37  ;;  %v12140_v46 = vcombine.low %v3901_v61, %v3905_v37  ;;  %v3730_v61 = vld [vmem:[#allocation18 + $0x1f0] sm:$0xff] }
 0x514   :  { %7004 = vmatpush1.bf16.msra.mxu1 %v12068_v0  ;;  %v12269_v0 = vcombine.high %v4029_v54, %v4033_v63  ;;  %v12268_v53 = vcombine.low %v4029_v54, %v4033_v63  ;;  %v4017_v9 = vld [vmem:[#allocation18 + $0xae8] sm:$0xff] }
 0x515   :  { %7047 = vmatpush1.bf16.msra.mxu0 %v12196_v1  ;;  %7005 = vmatprep.subr.bf16.mxu1 %v12061_v2  ;;  %v3893_v1 = vld [vmem:[#allocation18 + $0x708] sm:$0xff] }
 0x516   :  { %7048 = vmatprep.subr.bf16.mxu0 %v12189_v38  ;;  %v3897_v2 = vld [vmem:[#allocation18 + $0x728] sm:$0xff] }
 0x517   :  { %v4021_v38 = vld [vmem:[#allocation18 + $0xb08] sm:$0xff]  ;;  %v12133_v5 = vcombine.high %v3893_v1, %v3897_v2  ;;  %v12132_v58 = vcombine.low %v3893_v1, %v3897_v2  ;;  %v3718_v1 = vld [vmem:[#allocation18 + $0x190] sm:$0xff] }
 0x518   :  { %7006 = vmatpush1.bf16.msra.mxu1 %v12060_v3  ;;  %v12261_v3 = vcombine.high %v4021_v38, %v4025_v44  ;;  %v12260_v60 = vcombine.low %v4021_v38, %v4025_v44  ;;  %v4009_v12 = vld [vmem:[#allocation18 + $0xaa8] sm:$0xff]  ;;  %v3722_v2 = vld [vmem:[#allocation18 + $0x1b0] sm:$0xff] }
 0x519   :  { %7049 = vmatpush1.bf16.msra.mxu0 %v12188_v7  ;;  %7007 = vmatprep.subr.bf16.mxu1 %v12053_v30  ;;  %v3885_v7 = vld [vmem:[#allocation18 + $0x6c8] sm:$0xff] }
 0x51a   :  { %7050 = vmatprep.subr.bf16.mxu0 %v12181_v31  ;;  %v3889_v30 = vld [vmem:[#allocation18 + $0x6e8] sm:$0xff] }
 0x51b   :  { %v4013_v31 = vld [vmem:[#allocation18 + $0xac8] sm:$0xff]  ;;  %v12125_v22 = vcombine.high %v3885_v7, %v3889_v30  ;;  %v12124_v36 = vcombine.low %v3885_v7, %v3889_v30  ;;  %v3714_v7 = vld [vmem:[#allocation18 + $0x170] sm:$0xff] }
 0x51c   :  { %7008 = vmatpush1.bf16.msra.mxu1 %v12052_v4  ;;  %v12253_v4 = vcombine.high %v4013_v31, %v4017_v9  ;;  %v12252_v26 = vcombine.low %v4013_v31, %v4017_v9  ;;  %v4001_v50 = vld [vmem:[#allocation18 + $0xa68] sm:$0xff]  ;;  %v11958_v31 = vcombine.low %v3718_v1, %v3722_v2 }
 0x51d   :  { %7051 = vmatpush1.bf16.msra.mxu0 %v12180_v8  ;;  %7009 = vmatprep.subr.bf16.mxu1 %v12045_v10  ;;  %v3877_v8 = vld [vmem:[#allocation18 + $0x688] sm:$0xff] }
 0x51e   :  { %7052 = vmatprep.subr.bf16.mxu0 %v12173_v11  ;;  %v3881_v10 = vld [vmem:[#allocation18 + $0x6a8] sm:$0xff] }
 0x51f   :  { %v4005_v11 = vld [vmem:[#allocation18 + $0xa88] sm:$0xff]  ;;  %v12117_v62 = vcombine.high %v3877_v8, %v3881_v10  ;;  %v12116_v18 = vcombine.low %v3877_v8, %v3881_v10  ;;  %v3706_v8 = vld [vmem:[#allocation18 + $0x130] sm:$0xff] }
 0x520   :  { %7010 = vmatpush1.bf16.msra.mxu1 %v12044_v6  ;;  %v12245_v6 = vcombine.high %v4005_v11, %v4009_v12  ;;  %v12244_v19 = vcombine.low %v4005_v11, %v4009_v12  ;;  %v3993_v34 = vld [vmem:[#allocation18 + $0xa28] sm:$0xff] }
 0x521   :  { %7053 = vmatpush1.bf16.msra.mxu0 %v12172_v14  ;;  %7011 = vmatprep.subr.bf16.mxu1 %v12037_v17  ;;  %v3869_v14 = vld [vmem:[#allocation18 + $0x648] sm:$0xff] }
 0x522   :  { %7054 = vmatprep.subr.bf16.mxu0 %v12165_v48  ;;  %v3873_v17 = vld [vmem:[#allocation18 + $0x668] sm:$0xff] }
 0x523   :  { %v3997_v48 = vld [vmem:[#allocation18 + $0xa48] sm:$0xff]  ;;  %v12109_v20 = vcombine.high %v3869_v14, %v3873_v17  ;;  %v12108_v45 = vcombine.low %v3869_v14, %v3873_v17  ;;  %v3698_v14 = vld [vmem:[#allocation18 + $0xf0] sm:$0xff] }
 0x524   :  { %7012 = vmatpush1.bf16.msra.mxu1 %v12036_v23  ;;  %v12237_v23 = vcombine.high %v3997_v48, %v4001_v50  ;;  %v12236_v27 = vcombine.low %v3997_v48, %v4001_v50 }
 0x525   :  { %7055 = vmatpush1.bf16.msra.mxu0 %v12164_v25  ;;  %7013 = vmatprep.subr.bf16.mxu1 %v12157_v29  ;;  %v3861_v25 = vld [vmem:[#allocation18 + $0x608] sm:$0xff] }
 0x526   :  { %7056 = vmatprep.subr.bf16.mxu0 %v12285_v32  ;;  %v3865_v29 = vld [vmem:[#allocation18 + $0x628] sm:$0xff] }
 0x527   :  { %v3989_v32 = vld [vmem:[#allocation18 + $0xa08] sm:$0xff]  ;;  %v12101_v33 = vcombine.high %v3861_v25, %v3865_v29  ;;  %v12100_v37 = vcombine.low %v3861_v25, %v3865_v29  ;;  %v3690_v25 = vld [vmem:[#allocation18 + $0xb0] sm:$0xff] }
 0x528   :  { %7014 = vmatpush2.bf16.msra.mxu1 %v12156_v49  ;;  %v12229_v49 = vcombine.high %v3989_v32, %v3993_v34  ;;  %v12228_v54 = vcombine.low %v3989_v32, %v3993_v34 }
 0x529   :  { %7057 = vmatpush2.bf16.msra.mxu0 %v12284_v55  ;;  %7015 = vmatprep.subr.bf16.mxu1 %v12149_v56  ;;  %v4109_v55 = vld [vmem:[#allocation18 + $0xdc8] sm:$0xff] }
 0x52a   :  { %7058 = vmatprep.subr.bf16.mxu0 %v12277_v57  ;;  %v4113_v56 = vld [vmem:[#allocation18 + $0xde8] sm:$0xff]  ;;  %v3726_v57 = vld [vmem:[#allocation18 + $0x1d0] sm:$0xff] }
 0x52b   :  { %v12349_v63 = vcombine.high %v4109_v55, %v4113_v56  ;;  %v11966_v38 = vcombine.low %v3726_v57, %v3730_v61 }
 0x52c   :  { %7016 = vmatpush2.bf16.msra.mxu1 %v12148_v13  ;;  %v11967_v13 = vcombine.high %v3726_v57, %v3730_v61 }
 0x52d   :  { %7059 = vmatpush2.bf16.msra.mxu0 %v12276_v28  ;;  %7017 = vmatprep.subr.bf16.mxu1 %v12141_v59  ;;  %v4101_v28 = vld [vmem:[#allocation18 + $0xd88] sm:$0xff] }
 0x52e   :  { %7060 = vmatprep.subr.bf16.mxu0 %v12269_v0  ;;  %v4105_v59 = vld [vmem:[#allocation18 + $0xda8] sm:$0xff]  ;;  %v12348_v0 = vcombine.low %v4109_v55, %v4113_v56  ;;  %v3682_v55 = vld [vmem:[#allocation18 + $0x70] sm:$0xff] }
 0x52f   :  { %v12341_v44 = vcombine.high %v4101_v28, %v4105_v59  ;;  %v12340_v30 = vcombine.low %v4101_v28, %v4105_v59  ;;  %v3674_v28 = vld [vmem:[#allocation18 + $0x30] sm:$0xff] }
 0x530   :  { %7018 = vmatpush2.bf16.msra.mxu1 %v12140_v46  ;;  %v4093_v46 = vld [vmem:[#allocation18 + $0xd48] sm:$0xff] }
 0x531   :  { %7061 = vmatpush2.bf16.msra.mxu0 %v12268_v53  ;;  %7019 = vmatprep.subr.bf16.mxu1 %v12133_v5  ;;  %v4097_v53 = vld [vmem:[#allocation18 + $0xd68] sm:$0xff]  ;;  %v11959_v5 = vcombine.high %v3718_v1, %v3722_v2 }
 0x532   :  { %7062 = vmatprep.subr.bf16.mxu0 %v12261_v3  ;;  %v3710_v3 = vld [vmem:[#allocation18 + $0x150] sm:$0xff]  ;;  %v12333_v9 = vcombine.high %v4093_v46, %v4097_v53  ;;  %v12332_v10 = vcombine.low %v4093_v46, %v4097_v53 }
 0x533   :  { %v11950_v11 = vcombine.low %v3710_v3, %v3714_v7  ;;  %v3790_v46 = vld [vmem:[#allocation18 + $0x3d0] sm:$0xff] }
 0x534   :  { %7020 = vmatpush2.bf16.msra.mxu1 %v12132_v58  ;;  %v11951_v58 = vcombine.high %v3710_v3, %v3714_v7  ;;  %v3794_v53 = vld [vmem:[#allocation18 + $0x3f0] sm:$0xff] }
 0x535   :  { %7063 = vmatpush2.bf16.msra.mxu0 %v12260_v60  ;;  %7021 = vmatprep.subr.bf16.mxu1 %v12125_v22  ;;  %v4085_v60 = vld [vmem:[#allocation18 + $0xd08] sm:$0xff] }
 0x536   :  { %7064 = vmatprep.subr.bf16.mxu0 %v12253_v4  ;;  %v4089_v22 = vld [vmem:[#allocation18 + $0xd28] sm:$0xff]  ;;  %v3702_v4 = vld [vmem:[#allocation18 + $0x110] sm:$0xff] }
 0x537   :  { %v12325_v12 = vcombine.high %v4085_v60, %v4089_v22  ;;  %v12324_v17 = vcombine.low %v4085_v60, %v4089_v22  ;;  %v11942_v48 = vcombine.low %v3702_v4, %v3706_v8  ;;  %v3786_v60 = vld [vmem:[#allocation18 + $0x3b0] sm:$0xff] }
 0x538   :  { %7022 = vmatpush2.bf16.msra.mxu1 %v12124_v36  ;;  %v11943_v36 = vcombine.high %v3702_v4, %v3706_v8  ;;  %v12030_v4 = vcombine.low %v3790_v46, %v3794_v53 }
 0x539   :  { %7065 = vmatpush2.bf16.msra.mxu0 %v12252_v26  ;;  %7023 = vmatprep.subr.bf16.mxu1 %v12117_v62  ;;  %v4077_v26 = vld [vmem:[#allocation18 + $0xcc8] sm:$0xff] }
 0x53a   :  { %7066 = vmatprep.subr.bf16.mxu0 %v12245_v6  ;;  %v4081_v62 = vld [vmem:[#allocation18 + $0xce8] sm:$0xff]  ;;  %v3694_v6 = vld [vmem:[#allocation18 + $0xd0] sm:$0xff] }
 0x53b   :  { %v12317_v50 = vcombine.high %v4077_v26, %v4081_v62  ;;  %v12316_v29 = vcombine.low %v4077_v26, %v4081_v62  ;;  %v11934_v32 = vcombine.low %v3694_v6, %v3698_v14  ;;  %v3778_v26 = vld [vmem:[#allocation18 + $0x370] sm:$0xff] }
 0x53c   :  { %7024 = vmatpush2.bf16.msra.mxu1 %v12116_v18  ;;  %v11935_v18 = vcombine.high %v3694_v6, %v3698_v14 }
 0x53d   :  { %7067 = vmatpush2.bf16.msra.mxu0 %v12244_v19  ;;  %7025 = vmatprep.subr.bf16.mxu1 %v12109_v20  ;;  %v4069_v19 = vld [vmem:[#allocation18 + $0xc88] sm:$0xff] }
 0x53e   :  { %7068 = vmatprep.subr.bf16.mxu0 %v12237_v23  ;;  %v4073_v20 = vld [vmem:[#allocation18 + $0xca8] sm:$0xff]  ;;  %v3686_v23 = vld [vmem:[#allocation18 + $0x90] sm:$0xff] }
 0x53f   :  { %v12309_v34 = vcombine.high %v4069_v19, %v4073_v20  ;;  %v12308_v56 = vcombine.low %v4069_v19, %v4073_v20  ;;  %v11926_v57 = vcombine.low %v3686_v23, %v3690_v25  ;;  %v3770_v19 = vld [vmem:[#allocation18 + $0x330] sm:$0xff] }
 0x540   :  { %7026 = vmatpush2.bf16.msra.mxu1 %v12108_v45  ;;  %v11927_v45 = vcombine.high %v3686_v23, %v3690_v25 }
 0x541   :  { %7069 = vmatpush2.bf16.msra.mxu0 %v12236_v27  ;;  %7027 = vmatprep.subr.bf16.mxu1 %v12101_v33  ;;  %v4061_v27 = vld [vmem:[#allocation18 + $0xc48] sm:$0xff] }
 0x542   :  { %7070 = vmatprep.subr.bf16.mxu0 %v12229_v49  ;;  %v4065_v33 = vld [vmem:[#allocation18 + $0xc68] sm:$0xff]  ;;  %v3678_v49 = vld [vmem:[#allocation18 + $0x50] sm:$0xff] }
 0x543   :  { %v12301_v61 = vcombine.high %v4061_v27, %v4065_v33  ;;  %v12300_v59 = vcombine.low %v4061_v27, %v4065_v33  ;;  %v3762_v27 = vld [vmem:[#allocation18 + $0x2f0] sm:$0xff] }
 0x544   :  { %7028 = vmatpush2.bf16.msra.mxu1 %v12100_v37  ;;  %v11919_v37 = vcombine.high %v3678_v49, %v3682_v55 }
 0x545   :  { %7071 = vmatpush2.bf16.msra.mxu0 %v12228_v54  ;;  %7083 = vmatprep.subr.bf16.mxu1 %v12349_v63  ;;  %v4053_v54 = vld [vmem:[#allocation18 + $0xc08] sm:$0xff] }
 0x546   :  { %7126 = vmatprep.subr.bf16.mxu0 %v11967_v13  ;;  %v4057_v63 = vld [vmem:[#allocation18 + $0xc28] sm:$0xff]  ;;  %v3670_v13 = vld [vmem:[#allocation18 + $0x10] sm:$0xff] }
 0x547   :  { %7030 = vmatmul.mubr.bf16.vlgmr.msra.gmra.mxu1 %v14243_v21  ;;  %v12293_v1 = vcombine.high %v4053_v54, %v4057_v63  ;;  %v11911_v2 = vcombine.high %v3670_v13, %v3674_v28  ;;  %v11910_v3 = vcombine.low %v3670_v13, %v3674_v28 }
 0x548   :  { %7073 = vmatmul.mubr.bf16.vlgmr.msra.gmra.mxu0 %v14241_v35  ;;  %7084 = vmatpush1.bf16.msra.mxu1 %v12348_v0  ;;  %v11918_v0 = vcombine.low %v3678_v49, %v3682_v55 }
 0x549   :  { %7115 = vmatprep.mubr.bf16.mxu1 %v14254_v52  ;;  %7127 = vmatpush1.bf16.msra.mxu0 %v11966_v38  ;;  %v4173_v38 = vld [vmem:[#allocation18 + $0xfc8] sm:$0xff] }
 0x54a   :  { %7158 = vmatprep.mubr.bf16.mxu0 %v14205_v15  ;;  %7085 = vmatprep.subr.bf16.mxu1 %v12341_v44  ;;  %v4177_v44 = vld [vmem:[#allocation18 + $0xfe8] sm:$0xff] }
 0x54b   :  { %7128 = vmatprep.subr.bf16.mxu0 %v11959_v5  ;;  %v12292_v5 = vcombine.low %v4053_v54, %v4057_v63  ;;  %v12413_v7 = vcombine.high %v4173_v38, %v4177_v44  ;;  %v12412_v22 = vcombine.low %v4173_v38, %v4177_v44  ;;  %v3754_v54 = vld [vmem:[#allocation18 + $0x2b0] sm:$0xff] }
 0x54c   :  { %7086 = vmatpush1.bf16.msra.mxu1 %v12340_v30  ;;  %v12031_v30 = vcombine.high %v3790_v46, %v3794_v53  ;;  %v3746_v38 = vld [vmem:[#allocation18 + $0x270] sm:$0xff]  ;;  %v6816_v46 = vpop.f32.mrf.mxu0 }
 0x54d   :  { %7129 = vmatpush1.bf16.msra.mxu0 %v11958_v31  ;;  %7087 = vmatprep.subr.bf16.mxu1 %v12333_v9  ;;  %v4165_v31 = vld [vmem:[#allocation18 + $0xf88] sm:$0xff] }
 0x54e   :  { %7130 = vmatprep.subr.bf16.mxu0 %v11951_v58  ;;  %v4169_v9 = vld [vmem:[#allocation18 + $0xfa8] sm:$0xff]  ;;  %v3782_v58 = vld [vmem:[#allocation18 + $0x390] sm:$0xff] }
 0x54f   :  { %v12405_v8 = vcombine.high %v4165_v31, %v4169_v9  ;;  %v12404_v62 = vcombine.low %v4165_v31, %v4169_v9  ;;  %v12022_v6 = vcombine.low %v3782_v58, %v3786_v60  ;;  %v3734_v31 = vld [vmem:[#allocation18 + $0x210] sm:$0xff] }
 0x550   :  { %7088 = vmatpush1.bf16.msra.mxu1 %v12332_v10  ;;  %v12023_v10 = vcombine.high %v3782_v58, %v3786_v60  ;;  %v3738_v9 = vld [vmem:[#allocation18 + $0x230] sm:$0xff]  ;;  %v14273_v60 = vpop.f32.mrf.mxu0 }
 0x551   :  { %7131 = vmatpush1.bf16.msra.mxu0 %v11950_v11  ;;  %7089 = vmatprep.subr.bf16.mxu1 %v12325_v12  ;;  %v4157_v11 = vld [vmem:[#allocation18 + $0xf48] sm:$0xff] }
 0x552   :  { %7132 = vmatprep.subr.bf16.mxu0 %v11943_v36  ;;  %v4161_v12 = vld [vmem:[#allocation18 + $0xf68] sm:$0xff]  ;;  %v3774_v36 = vld [vmem:[#allocation18 + $0x350] sm:$0xff] }
 0x553   :  { %v12397_v14 = vcombine.high %v4157_v11, %v4161_v12  ;;  %v12396_v20 = vcombine.low %v4157_v11, %v4161_v12  ;;  %v12014_v23 = vcombine.low %v3774_v36, %v3778_v26  ;;  %v3858_v11 = vld [vmem:[#allocation18 + $0x5f0] sm:$0xff]  ;;  %v14275_v12 = vld [vmem:[#allocation20] sm:$0xff] }
 0x554   :  { %7090 = vmatpush1.bf16.msra.mxu1 %v12324_v17  ;;  %v12015_v17 = vcombine.high %v3774_v36, %v3778_v26  ;;  %v3982_v36 = vld [vmem:[#allocation18 + $0x9d0] sm:$0xff] }
 0x555   :  { %7133 = vmatpush1.bf16.msra.mxu0 %v11942_v48  ;;  %7091 = vmatprep.subr.bf16.mxu1 %v12317_v50  ;;  %v4149_v48 = vld [vmem:[#allocation18 + $0xf08] sm:$0xff]  ;;  %v3986_v26 = vld [vmem:[#allocation18 + $0x9f0] sm:$0xff] }
 0x556   :  { %7134 = vmatprep.subr.bf16.mxu0 %v11935_v18  ;;  %v4153_v50 = vld [vmem:[#allocation18 + $0xf28] sm:$0xff]  ;;  %v3766_v18 = vld [vmem:[#allocation18 + $0x310] sm:$0xff] }
 0x557   :  { %v12389_v25 = vcombine.high %v4149_v48, %v4153_v50  ;;  %v12388_v33 = vcombine.low %v4149_v48, %v4153_v50  ;;  %v12006_v49 = vcombine.low %v3766_v18, %v3770_v19  ;;  %v4185_v48 = vrot.slane %v14275_v12, %v14072_v42 }
 0x558   :  { %7092 = vmatpush1.bf16.msra.mxu1 %v12316_v29  ;;  %v12007_v29 = vcombine.high %v3766_v18, %v3770_v19  ;;  %v12223_v50 = vcombine.high %v3982_v36, %v3986_v26  ;;  %v3846_v18 = vld [vmem:[#allocation18 + $0x590] sm:$0xff] }
 0x559   :  { %7135 = vmatpush1.bf16.msra.mxu0 %v11934_v32  ;;  %7093 = vmatprep.subr.bf16.mxu1 %v12309_v34  ;;  %v4141_v32 = vld [vmem:[#allocation18 + $0xec8] sm:$0xff]  ;;  %v3850_v19 = vld [vmem:[#allocation18 + $0x5b0] sm:$0xff] }
 0x55a   :  { %7136 = vmatprep.subr.bf16.mxu0 %v11927_v45  ;;  %v4145_v34 = vld [vmem:[#allocation18 + $0xee8] sm:$0xff]  ;;  %v3758_v45 = vld [vmem:[#allocation18 + $0x2d0] sm:$0xff] }
 0x55b   :  { %v12381_v55 = vcombine.high %v4141_v32, %v4145_v34  ;;  %v12380_v63 = vcombine.low %v4141_v32, %v4145_v34  ;;  %v11998_v13 = vcombine.low %v3758_v45, %v3762_v27  ;;  %v12222_v32 = vcombine.low %v3982_v36, %v3986_v26 }
 0x55c   :  { %7094 = vmatpush1.bf16.msra.mxu1 %v12308_v56  ;;  %v11999_v56 = vcombine.high %v3758_v45, %v3762_v27  ;;  %v6817_v34 = vadd.f32 %v6816_v46, %v4185_v48  ;;  %v12087_v45 = vcombine.high %v3846_v18, %v3850_v19  ;;  %v3838_v27 = vld [vmem:[#allocation18 + $0x550] sm:$0xff] }
 0x55d   :  { %7137 = vmatpush1.bf16.msra.mxu0 %v11926_v57  ;;  %7095 = vmatprep.subr.bf16.mxu1 %v12301_v61  ;;  %v4133_v57 = vld [vmem:[#allocation18 + $0xe88] sm:$0xff] }
 0x55e   :  { %7138 = vmatprep.subr.bf16.mxu0 %v11919_v37  ;;  %v4137_v61 = vld [vmem:[#allocation18 + $0xea8] sm:$0xff]  ;;  %v3750_v37 = vld [vmem:[#allocation18 + $0x290] sm:$0xff] }
 0x55f   :  { %v12373_v28 = vcombine.high %v4133_v57, %v4137_v61  ;;  %v12372_v44 = vcombine.low %v4133_v57, %v4137_v61  ;;  %v11990_v53 = vcombine.low %v3750_v37, %v3754_v54  ;;  %v3966_v57 = vld [vmem:[#allocation18 + $0x950] sm:$0xff] }
 0x560   :  { %7096 = vmatpush1.bf16.msra.mxu1 %v12300_v59  ;;  %v11991_v59 = vcombine.high %v3750_v37, %v3754_v54  ;;  %v3970_v61 = vld [vmem:[#allocation18 + $0x970] sm:$0xff]  ;;  %v12086_v54 = vcombine.low %v3846_v18, %v3850_v19 }
 0x561   :  { %7139 = vmatpush1.bf16.msra.mxu0 %v11918_v0  ;;  %7097 = vmatprep.subr.bf16.mxu1 %v12293_v1  ;;  %v4125_v0 = vld [vmem:[#allocation18 + $0xe48] sm:$0xff] }
 0x562   :  { %7140 = vmatprep.subr.bf16.mxu0 %v11911_v2  ;;  %v4129_v1 = vld [vmem:[#allocation18 + $0xe68] sm:$0xff]  ;;  %v3742_v2 = vld [vmem:[#allocation18 + $0x250] sm:$0xff] }
 0x563   :  { %v12364_v58 = vcombine.low %v4125_v0, %v4129_v1 }
 0x564   :  { %7098 = vmatpush1.bf16.msra.mxu1 %v12292_v5  ;;  %v12365_v5 = vcombine.high %v4125_v0, %v4129_v1 }
 0x565   :  { %7141 = vmatpush1.bf16.msra.mxu0 %v11910_v3  ;;  %7099 = vmatprep.subr.bf16.mxu1 %v12413_v7  ;;  %v11983_v3 = vcombine.high %v3742_v2, %v3746_v38  ;;  %v4117_v7 = vld [vmem:[#allocation18 + $0xe08] sm:$0xff] }
 0x566   :  { %7142 = vmatprep.subr.bf16.mxu0 %v12031_v30  ;;  %v4121_v30 = vld [vmem:[#allocation18 + $0xe28] sm:$0xff] }
 0x568   :  { %7100 = vmatpush2.bf16.msra.mxu1 %v12412_v22  ;;  %v11982_v22 = vcombine.low %v3742_v2, %v3746_v38  ;;  %v12207_v2 = vcombine.high %v3966_v57, %v3970_v61  ;;  %v3830_v38 = vld [vmem:[#allocation18 + $0x510] sm:$0xff] }
 0x569   :  { %7143 = vmatpush2.bf16.msra.mxu0 %v12030_v4  ;;  %7101 = vmatprep.subr.bf16.mxu1 %v12405_v8  ;;  %v12357_v4 = vcombine.high %v4117_v7, %v4121_v30  ;;  %v11975_v8 = vcombine.high %v3734_v31, %v3738_v9 }
 0x56a   :  { %7144 = vmatprep.subr.bf16.mxu0 %v12023_v10  ;;  %v3854_v10 = vld [vmem:[#allocation18 + $0x5d0] sm:$0xff] }
 0x56c   :  { %7102 = vmatpush2.bf16.msra.mxu1 %v12404_v62  ;;  %v12356_v62 = vcombine.low %v4117_v7, %v4121_v30 }
 0x56d   :  { %7145 = vmatpush2.bf16.msra.mxu0 %v12022_v6  ;;  %7103 = vmatprep.subr.bf16.mxu1 %v12397_v14  ;;  %v6820_v6 = vpop.f32.mrf.mxu0  ;;  %v11974_v14 = vcombine.low %v3734_v31, %v3738_v9  ;;  %v12206_v31 = vcombine.low %v3966_v57, %v3970_v61  ;;  %v3802_v57 = vld [vmem:[#allocation18 + $0x430] sm:$0xff] }
 0x56e   :  { %7146 = vmatprep.subr.bf16.mxu0 %v12015_v17  ;;  %v12095_v17 = vcombine.high %v3854_v10, %v3858_v11  ;;  %v6821_v0 = vadd.f32 %v6820_v6, %v4185_v48  ;;  %v3942_v48 = vld [vmem:[#allocation18 + $0x890] sm:$0xff] }
 0x56f   :  { %v3926_v61 = vld [vmem:[#allocation18 + $0x810] sm:$0xff] }
 0x570   :  { %7104 = vmatpush2.bf16.msra.mxu1 %v12396_v20  ;;  %v12094_v20 = vcombine.low %v3854_v10, %v3858_v11  ;;  %v3950_v10 = vld [vmem:[#allocation18 + $0x8d0] sm:$0xff] }
 0x571   :  { %7147 = vmatpush2.bf16.msra.mxu0 %v12014_v23  ;;  %7105 = vmatprep.subr.bf16.mxu1 %v12389_v25  ;;  %v3974_v23 = vld [vmem:[#allocation18 + $0x990] sm:$0xff] }
 0x572   :  { %7148 = vmatprep.subr.bf16.mxu0 %v12007_v29  ;;  %v3978_v25 = vld [vmem:[#allocation18 + $0x9b0] sm:$0xff]  ;;  %v14279_v29 = vpop.f32.mrf.mxu0 }
 0x573   :  { %v3954_v11 = vld [vmem:[#allocation18 + $0x8f0] sm:$0xff] }
 0x574   :  { %7106 = vmatpush2.bf16.msra.mxu1 %v12388_v33  ;;  %v3842_v33 = vld [vmem:[#allocation18 + $0x570] sm:$0xff]  ;;  %v12191_v6 = vcombine.high %v3950_v10, %v3954_v11  ;;  %v12190_v19 = vcombine.low %v3950_v10, %v3954_v11 }
 0x575   :  { %7149 = vmatpush2.bf16.msra.mxu0 %v12006_v49  ;;  %7107 = vmatprep.subr.bf16.mxu1 %v12381_v55  ;;  %v12078_v7 = vcombine.low %v3838_v27, %v3842_v33 }
 0x576   :  { %7150 = vmatprep.subr.bf16.mxu0 %v11999_v56  ;;  %v12215_v56 = vcombine.high %v3974_v23, %v3978_v25 }
 0x578   :  { %7108 = vmatpush2.bf16.msra.mxu1 %v12380_v63 }
 0x579   :  { %7151 = vmatpush2.bf16.msra.mxu0 %v11998_v13  ;;  %7109 = vmatprep.subr.bf16.mxu1 %v12373_v28  ;;  %v12214_v28 = vcombine.low %v3974_v23, %v3978_v25  ;;  %v3806_v25 = vld [vmem:[#allocation18 + $0x450] sm:$0xff] }
 0x57a   :  { %7152 = vmatprep.subr.bf16.mxu0 %v11991_v59  ;;  %v12079_v59 = vcombine.high %v3838_v27, %v3842_v33 }
 0x57c   :  { %7110 = vmatpush2.bf16.msra.mxu1 %v12372_v44  ;;  %v3834_v44 = vld [vmem:[#allocation18 + $0x530] sm:$0xff] }
 0x57d   :  { %7153 = vmatpush2.bf16.msra.mxu0 %v11990_v53  ;;  %7111 = vmatprep.subr.bf16.mxu1 %v12365_v5  ;;  %v3958_v53 = vld [vmem:[#allocation18 + $0x910] sm:$0xff]  ;;  %v12071_v9 = vcombine.high %v3830_v38, %v3834_v44  ;;  %v12070_v36 = vcombine.low %v3830_v38, %v3834_v44 }
 0x57e   :  { %7154 = vmatprep.subr.bf16.mxu0 %v11983_v3  ;;  %v3962_v5 = vld [vmem:[#allocation18 + $0x930] sm:$0xff] }
 0x57f   :  { %v12198_v26 = vcombine.low %v3958_v53, %v3962_v5  ;;  %v3922_v38 = vld [vmem:[#allocation18 + $0x7f0] sm:$0xff] }
 0x580   :  { %7112 = vmatpush2.bf16.msra.mxu1 %v12364_v58  ;;  %v4046_v44 = vld [vmem:[#allocation18 + $0xbd0] sm:$0xff] }
 0x581   :  { %7155 = vmatpush2.bf16.msra.mxu0 %v11982_v22  ;;  %7113 = vmatprep.subr.bf16.mxu1 %v12357_v4  ;;  %v12199_v22 = vcombine.high %v3958_v53, %v3962_v5  ;;  %v3822_v4 = vld [vmem:[#allocation18 + $0x4d0] sm:$0xff] }
 0x582   :  { %7156 = vmatprep.subr.bf16.mxu0 %v11975_v8  ;;  %v3826_v8 = vld [vmem:[#allocation18 + $0x4f0] sm:$0xff] }
 0x583   :  { %v12062_v18 = vcombine.low %v3822_v4, %v3826_v8 }
 0x584   :  { %7114 = vmatpush2.bf16.msra.mxu1 %v12356_v62  ;;  %v12063_v62 = vcombine.high %v3822_v4, %v3826_v8 }
 0x585   :  { %7157 = vmatpush2.bf16.msra.mxu0 %v11974_v14  ;;  %7169 = vmatprep.subr.bf16.mxu1 %v12095_v17  ;;  %v3814_v14 = vld [vmem:[#allocation18 + $0x490] sm:$0xff] }
 0x586   :  { %7212 = vmatprep.subr.bf16.mxu0 %v12223_v50  ;;  %v3818_v17 = vld [vmem:[#allocation18 + $0x4b0] sm:$0xff] }
 0x587   :  { %7116 = vmatmul.mubr.bf16.vlgmr.msra.gmra.mxu1 %v14263_v51  ;;  %v6859_v49 = vpop.f32.mrf.mxu1  ;;  %v6902_v55 = vpop.f32.mrf.mxu0  ;;  %v3946_v50 = vld [vmem:[#allocation18 + $0x8b0] sm:$0xff]  ;;  %v12054_v27 = vcombine.low %v3814_v14, %v3818_v17 }
 0x588   :  { %v6860_v37 = vadd.f32 %v6859_v49, %v6817_v34  ;;  %7159 = vmatmul.mubr.bf16.vlgmr.msra.gmra.mxu0 %v14207_v16  ;;  %7170 = vmatpush1.bf16.msra.mxu1 %v12094_v20  ;;  %v12055_v20 = vcombine.high %v3814_v14, %v3818_v17  ;;  %v12183_v23 = vcombine.high %v3942_v48, %v3946_v50  ;;  %v3934_v34 = vld [vmem:[#allocation18 + $0x850] sm:$0xff] }
 0x589   :  { %7201 = vmatprep.mubr.bf16.mxu1 %v14239_v24  ;;  %7213 = vmatpush1.bf16.msra.mxu0 %v12222_v32  ;;  %v14284_v63 = vpop.f32.mrf.mxu1  ;;  %v14286_v13 = vpop.f32.mrf.mxu0  ;;  %v3810_v32 = vld [vmem:[#allocation18 + $0x470] sm:$0xff]  ;;  %v12182_v33 = vcombine.low %v3942_v48, %v3946_v50 }
 0x58a   :  { %v14288_v1 = vadd.f32 %v6902_v55, %v6860_v37  ;;  %7244 = vmatprep.mubr.bf16.mxu0 %v14216_v47  ;;  %7171 = vmatprep.subr.bf16.mxu1 %v12087_v45  ;;  %v3938_v45 = vld [vmem:[#allocation18 + $0x870] sm:$0xff]  ;;  %v12047_v49 = vcombine.high %v3806_v25, %v3810_v32 }
 0x58b   :  { %v6863_v46 = vpop.f32.mrf.mxu1  ;;  %7214 = vmatprep.subr.bf16.mxu0 %v12215_v56  ;;  %v6906_v30 = vpop.f32.mrf.mxu0  ;;  %v12175_v55 = vcombine.high %v3934_v34, %v3938_v45  ;;  %v3798_v56 = vld [vmem:[#allocation18 + $0x410] sm:$0xff] }
 0x58c   :  { %v6864_v3 = vadd.f32 %v6863_v46, %v6821_v0  ;;  %7172 = vmatpush1.bf16.msra.mxu1 %v12086_v54  ;;  %v3930_v37 = vld [vmem:[#allocation18 + $0x830] sm:$0xff]  ;;  %v12046_v54 = vcombine.low %v3806_v25, %v3810_v32  ;;  %v12038_v53 = vcombine.low %v3798_v56, %v3802_v57 }
 0x58d   :  { %7215 = vmatpush1.bf16.msra.mxu0 %v12214_v28  ;;  %7173 = vmatprep.subr.bf16.mxu1 %v12079_v59  ;;  %v12174_v28 = vcombine.low %v3934_v34, %v3938_v45  ;;  %v12039_v59 = vcombine.high %v3798_v56, %v3802_v57  ;;  %v12167_v0 = vcombine.high %v3926_v61, %v3930_v37  ;;  %v4050_v46 = vld [vmem:[#allocation18 + $0xbf0] sm:$0xff] }
 0x58e   :  { %v14291_v58 = vadd.f32 %v6906_v30, %v6864_v3  ;;  %7216 = vmatprep.subr.bf16.mxu0 %v12207_v2  ;;  %v3918_v2 = vld [vmem:[#allocation18 + $0x7d0] sm:$0xff]  ;;  %v12166_v5 = vcombine.low %v3926_v61, %v3930_v37  ;;  %v12286_v8 = vcombine.low %v4046_v44, %v4050_v46 }
 0x58f   :  { %v12159_v3 = vcombine.high %v3918_v2, %v3922_v38  ;;  %v3910_v30 = vld [vmem:[#allocation18 + $0x790] sm:$0xff]  ;;  %v12158_v4 = vcombine.low %v3918_v2, %v3922_v38 }
 0x590   :  { %7174 = vmatpush1.bf16.msra.mxu1 %v12078_v7  ;;  %v12287_v7 = vcombine.high %v4046_v44, %v4050_v46 }
 0x591   :  { %7217 = vmatpush1.bf16.msra.mxu0 %v12206_v31  ;;  %7175 = vmatprep.subr.bf16.mxu1 %v12071_v9  ;;  %v3914_v31 = vld [vmem:[#allocation18 + $0x7b0] sm:$0xff] }
 0x592   :  { %7218 = vmatprep.subr.bf16.mxu0 %v12199_v22  ;;  %v4038_v9 = vld [vmem:[#allocation18 + $0xb90] sm:$0xff]  ;;  %v12151_v10 = vcombine.high %v3910_v30, %v3914_v31  ;;  %v12150_v14 = vcombine.low %v3910_v30, %v3914_v31 }
 0x593   :  { %v4042_v22 = vld [vmem:[#allocation18 + $0xbb0] sm:$0xff] }
 0x594   :  { %7176 = vmatpush1.bf16.msra.mxu1 %v12070_v36  ;;  %v12279_v11 = vcombine.high %v4038_v9, %v4042_v22  ;;  %v3902_v36 = vld [vmem:[#allocation18 + $0x750] sm:$0xff]  ;;  %v12278_v17 = vcombine.low %v4038_v9, %v4042_v22 }
 0x595   :  { %7219 = vmatpush1.bf16.msra.mxu0 %v12198_v26  ;;  %7177 = vmatprep.subr.bf16.mxu1 %v12063_v62  ;;  %v3906_v26 = vld [vmem:[#allocation18 + $0x770] sm:$0xff] }
 0x596   :  { %7220 = vmatprep.subr.bf16.mxu0 %v12191_v6  ;;  %v4030_v62 = vld [vmem:[#allocation18 + $0xb50] sm:$0xff]  ;;  %v12143_v48 = vcombine.high %v3902_v36, %v3906_v26  ;;  %v12142_v25 = vcombine.low %v3902_v36, %v3906_v26 }
 0x597   :  { %v4034_v6 = vld [vmem:[#allocation18 + $0xb70] sm:$0xff] }
 0x598   :  { %7178 = vmatpush1.bf16.msra.mxu1 %v12062_v18  ;;  %v12271_v50 = vcombine.high %v4030_v62, %v4034_v6  ;;  %v3894_v18 = vld [vmem:[#allocation18 + $0x710] sm:$0xff]  ;;  %v12270_v32 = vcombine.low %v4030_v62, %v4034_v6 }
 0x599   :  { %7221 = vmatpush1.bf16.msra.mxu0 %v12190_v19  ;;  %7179 = vmatprep.subr.bf16.mxu1 %v12055_v20  ;;  %v3898_v19 = vld [vmem:[#allocation18 + $0x730] sm:$0xff] }
 0x59a   :  { %7222 = vmatprep.subr.bf16.mxu0 %v12183_v23  ;;  %v4022_v20 = vld [vmem:[#allocation18 + $0xb10] sm:$0xff]  ;;  %v12135_v34 = vcombine.high %v3894_v18, %v3898_v19  ;;  %v12134_v56 = vcombine.low %v3894_v18, %v3898_v19 }
 0x59b   :  { %v4026_v23 = vld [vmem:[#allocation18 + $0xb30] sm:$0xff] }
 0x59c   :  { %7180 = vmatpush1.bf16.msra.mxu1 %v12054_v27  ;;  %v12263_v45 = vcombine.high %v4022_v20, %v4026_v23  ;;  %v3886_v27 = vld [vmem:[#allocation18 + $0x6d0] sm:$0xff]  ;;  %v12262_v57 = vcombine.low %v4022_v20, %v4026_v23 }
 0x59d   :  { %7223 = vmatpush1.bf16.msra.mxu0 %v12182_v33  ;;  %7181 = vmatprep.subr.bf16.mxu1 %v12047_v49  ;;  %v3890_v33 = vld [vmem:[#allocation18 + $0x6f0] sm:$0xff] }
 0x59e   :  { %7224 = vmatprep.subr.bf16.mxu0 %v12175_v55  ;;  %v4014_v49 = vld [vmem:[#allocation18 + $0xad0] sm:$0xff]  ;;  %v12127_v61 = vcombine.high %v3886_v27, %v3890_v33  ;;  %v12126_v2 = vcombine.low %v3886_v27, %v3890_v33  ;;  %v3723_v27 = vld [vmem:[#allocation18 + $0x1b8] sm:$0xff]  ;;  %v14293_v33 = vpop.f32.mrf.mxu1 }
 0x59f   :  { %v4018_v55 = vld [vmem:[#allocation18 + $0xaf0] sm:$0xff] }
 0x5a0   :  { %7182 = vmatpush1.bf16.msra.mxu1 %v12046_v54  ;;  %v12255_v37 = vcombine.high %v4014_v49, %v4018_v55  ;;  %v3878_v54 = vld [vmem:[#allocation18 + $0x690] sm:$0xff]  ;;  %v12254_v38 = vcombine.low %v4014_v49, %v4018_v55 }
 0x5a1   :  { %7225 = vmatpush1.bf16.msra.mxu0 %v12174_v28  ;;  %7183 = vmatprep.subr.bf16.mxu1 %v12039_v59  ;;  %v3882_v28 = vld [vmem:[#allocation18 + $0x6b0] sm:$0xff] }
 0x5a2   :  { %7226 = vmatprep.subr.bf16.mxu0 %v12167_v0  ;;  %v4006_v59 = vld [vmem:[#allocation18 + $0xa90] sm:$0xff]  ;;  %v12119_v44 = vcombine.high %v3878_v54, %v3882_v28  ;;  %v12118_v30 = vcombine.low %v3878_v54, %v3882_v28  ;;  %v3711_v54 = vld [vmem:[#allocation18 + $0x158] sm:$0xff] }
 0x5a3   :  { %v4010_v0 = vld [vmem:[#allocation18 + $0xab0] sm:$0xff]  ;;  %v3715_v28 = vld [vmem:[#allocation18 + $0x178] sm:$0xff] }
 0x5a4   :  { %7184 = vmatpush1.bf16.msra.mxu1 %v12038_v53  ;;  %v12247_v46 = vcombine.high %v4006_v59, %v4010_v0  ;;  %v3870_v53 = vld [vmem:[#allocation18 + $0x650] sm:$0xff]  ;;  %v12246_v31 = vcombine.low %v4006_v59, %v4010_v0 }
 0x5a5   :  { %7227 = vmatpush1.bf16.msra.mxu0 %v12166_v5  ;;  %7185 = vmatprep.subr.bf16.mxu1 %v12159_v3  ;;  %v3874_v5 = vld [vmem:[#allocation18 + $0x670] sm:$0xff] }
 0x5a6   :  { %7228 = vmatprep.subr.bf16.mxu0 %v12287_v7  ;;  %v3998_v3 = vld [vmem:[#allocation18 + $0xa50] sm:$0xff]  ;;  %v12111_v9 = vcombine.high %v3870_v53, %v3874_v5  ;;  %v12110_v36 = vcombine.low %v3870_v53, %v3874_v5 }
 0x5a7   :  { %v4002_v7 = vld [vmem:[#allocation18 + $0xa70] sm:$0xff] }
 0x5a8   :  { %7186 = vmatpush2.bf16.msra.mxu1 %v12158_v4  ;;  %v12239_v22 = vcombine.high %v3998_v3, %v4002_v7  ;;  %v3862_v4 = vld [vmem:[#allocation18 + $0x610] sm:$0xff]  ;;  %v12238_v26 = vcombine.low %v3998_v3, %v4002_v7  ;;  %v3707_v7 = vld [vmem:[#allocation18 + $0x138] sm:$0xff] }
 0x5a9   :  { %7229 = vmatpush2.bf16.msra.mxu0 %v12286_v8  ;;  %7187 = vmatprep.subr.bf16.mxu1 %v12151_v10  ;;  %v3866_v8 = vld [vmem:[#allocation18 + $0x630] sm:$0xff] }
 0x5aa   :  { %7230 = vmatprep.subr.bf16.mxu0 %v12279_v11  ;;  %v3990_v10 = vld [vmem:[#allocation18 + $0xa10] sm:$0xff]  ;;  %v12103_v62 = vcombine.high %v3862_v4, %v3866_v8  ;;  %v12102_v18 = vcombine.low %v3862_v4, %v3866_v8 }
 0x5ab   :  { %v3994_v11 = vld [vmem:[#allocation18 + $0xa30] sm:$0xff] }
 0x5ac   :  { %7188 = vmatpush2.bf16.msra.mxu1 %v12150_v14  ;;  %v12231_v6 = vcombine.high %v3990_v10, %v3994_v11  ;;  %v4110_v14 = vld [vmem:[#allocation18 + $0xdd0] sm:$0xff]  ;;  %v12230_v19 = vcombine.low %v3990_v10, %v3994_v11 }
 0x5ad   :  { %7231 = vmatpush2.bf16.msra.mxu0 %v12278_v17  ;;  %7189 = vmatprep.subr.bf16.mxu1 %v12143_v48  ;;  %v4114_v17 = vld [vmem:[#allocation18 + $0xdf0] sm:$0xff]  ;;  %v3727_v48 = vld [vmem:[#allocation18 + $0x1d8] sm:$0xff] }
 0x5ae   :  { %7232 = vmatprep.subr.bf16.mxu0 %v12271_v50  ;;  %v3731_v50 = vld [vmem:[#allocation18 + $0x1f8] sm:$0xff]  ;;  %v12351_v20 = vcombine.high %v4110_v14, %v4114_v17  ;;  %v4086_v53 = vld [vmem:[#allocation18 + $0xd10] sm:$0xff] }
 0x5af   :  { %v11969_v23 = vcombine.high %v3727_v48, %v3731_v50  ;;  %v11968_v49 = vcombine.low %v3727_v48, %v3731_v50  ;;  %v4090_v5 = vld [vmem:[#allocation18 + $0xd30] sm:$0xff] }
 0x5b0   :  { %7190 = vmatpush2.bf16.msra.mxu1 %v12142_v25  ;;  %v4102_v25 = vld [vmem:[#allocation18 + $0xd90] sm:$0xff] }
 0x5b1   :  { %7233 = vmatpush2.bf16.msra.mxu0 %v12270_v32  ;;  %7191 = vmatprep.subr.bf16.mxu1 %v12135_v34  ;;  %v4106_v32 = vld [vmem:[#allocation18 + $0xdb0] sm:$0xff]  ;;  %v12350_v34 = vcombine.low %v4110_v14, %v4114_v17 }
 0x5b2   :  { %7234 = vmatprep.subr.bf16.mxu0 %v12263_v45  ;;  %v3719_v45 = vld [vmem:[#allocation18 + $0x198] sm:$0xff]  ;;  %v12343_v55 = vcombine.high %v4102_v25, %v4106_v32  ;;  %v12342_v0 = vcombine.low %v4102_v25, %v4106_v32  ;;  %v4078_v10 = vld [vmem:[#allocation18 + $0xcd0] sm:$0xff] }
 0x5b3   :  { %v4082_v11 = vld [vmem:[#allocation18 + $0xcf0] sm:$0xff] }
 0x5b4   :  { %7192 = vmatpush2.bf16.msra.mxu1 %v12134_v56  ;;  %v4094_v56 = vld [vmem:[#allocation18 + $0xd50] sm:$0xff]  ;;  %v12319_v14 = vcombine.high %v4078_v10, %v4082_v11 }
 0x5b5   :  { %7235 = vmatpush2.bf16.msra.mxu0 %v12262_v57  ;;  %7193 = vmatprep.subr.bf16.mxu1 %v12127_v61  ;;  %v4098_v57 = vld [vmem:[#allocation18 + $0xd70] sm:$0xff] }
 0x5b6   :  { %7236 = vmatprep.subr.bf16.mxu0 %v12255_v37  ;;  %v11961_v37 = vcombine.high %v3719_v45, %v3723_v27  ;;  %v4070_v48 = vld [vmem:[#allocation18 + $0xc90] sm:$0xff] }
 0x5b7   :  { %v4074_v50 = vld [vmem:[#allocation18 + $0xcb0] sm:$0xff] }
 0x5b8   :  { %7194 = vmatpush2.bf16.msra.mxu1 %v12126_v2  ;;  %v12311_v25 = vcombine.high %v4070_v48, %v4074_v50 }
 0x5b9   :  { %7237 = vmatpush2.bf16.msra.mxu0 %v12254_v38  ;;  %7195 = vmatprep.subr.bf16.mxu1 %v12119_v44  ;;  %v11960_v38 = vcombine.low %v3719_v45, %v3723_v27  ;;  %v12335_v44 = vcombine.high %v4094_v56, %v4098_v57  ;;  %v4066_v45 = vld [vmem:[#allocation18 + $0xc70] sm:$0xff]  ;;  %v3679_v27 = vld [vmem:[#allocation18 + $0x58] sm:$0xff] }
 0x5ba   :  { %7238 = vmatprep.subr.bf16.mxu0 %v12247_v46  ;;  %v11953_v46 = vcombine.high %v3711_v54, %v3715_v28 }
 0x5bc   :  { %7196 = vmatpush2.bf16.msra.mxu1 %v12118_v30 }
 0x5bd   :  { %7239 = vmatpush2.bf16.msra.mxu0 %v12246_v31  ;;  %7197 = vmatprep.subr.bf16.mxu1 %v12111_v9  ;;  %v12334_v31 = vcombine.low %v4094_v56, %v4098_v57  ;;  %v11952_v9 = vcombine.low %v3711_v54, %v3715_v28  ;;  %v4058_v54 = vld [vmem:[#allocation18 + $0xc30] sm:$0xff]  ;;  %v3671_v28 = vld [vmem:[#allocation18 + $0x18] sm:$0xff] }
 0x5be   :  { %7240 = vmatprep.subr.bf16.mxu0 %v12239_v22  ;;  %v12327_v22 = vcombine.high %v4086_v53, %v4090_v5 }
 0x5c0   :  { %7198 = vmatpush2.bf16.msra.mxu1 %v12110_v36  ;;  %v3695_v36 = vld [vmem:[#allocation18 + $0xd8] sm:$0xff] }
 0x5c1   :  { %7241 = vmatpush2.bf16.msra.mxu0 %v12238_v26  ;;  %7199 = vmatprep.subr.bf16.mxu1 %v12103_v62  ;;  %v3699_v26 = vld [vmem:[#allocation18 + $0xf8] sm:$0xff] }
 0x5c2   :  { %7242 = vmatprep.subr.bf16.mxu0 %v12231_v6  ;;  %v12326_v6 = vcombine.low %v4086_v53, %v4090_v5  ;;  %v11937_v17 = vcombine.high %v3695_v36, %v3699_v26  ;;  %v4174_v53 = vld [vmem:[#allocation18 + $0xfd0] sm:$0xff] }
 0x5c3   :  { %v4178_v5 = vld [vmem:[#allocation18 + $0xff0] sm:$0xff] }
 0x5c4   :  { %7200 = vmatpush2.bf16.msra.mxu1 %v12102_v18  ;;  %v3687_v18 = vld [vmem:[#allocation18 + $0x98] sm:$0xff] }
 0x5c5   :  { %7243 = vmatpush2.bf16.msra.mxu0 %v12230_v19  ;;  %7255 = vmatprep.subr.bf16.mxu1 %v12351_v20  ;;  %v3691_v19 = vld [vmem:[#allocation18 + $0xb8] sm:$0xff]  ;;  %v12318_v20 = vcombine.low %v4078_v10, %v4082_v11  ;;  %v12414_v10 = vcombine.low %v4174_v53, %v4178_v5 }
 0x5c6   :  { %7298 = vmatprep.subr.bf16.mxu0 %v11969_v23  ;;  %v11936_v23 = vcombine.low %v3695_v36, %v3699_v26  ;;  %v11929_v32 = vcombine.high %v3687_v18, %v3691_v19  ;;  %v11928_v56 = vcombine.low %v3687_v18, %v3691_v19 }
 0x5c7   :  { %v6945_v61 = vpop.f32.mrf.mxu1  ;;  %7202 = vmatmul.mubr.bf16.vlgmr.msra.gmra.mxu1 %v14243_v21 }
 0x5c8   :  { %v6946_v59 = vadd.f32 %v6945_v61, %v14288_v1  ;;  %7245 = vmatmul.mubr.bf16.vlgmr.msra.gmra.mxu0 %v14241_v35  ;;  %7256 = vmatpush1.bf16.msra.mxu1 %v12350_v34  ;;  %v3703_v1 = vld [vmem:[#allocation18 + $0x118] sm:$0xff]  ;;  %v4062_v34 = vld [vmem:[#allocation18 + $0xc50] sm:$0xff] }
 0x5c9   :  { %7287 = vmatprep.mubr.bf16.mxu1 %v14254_v52  ;;  %v14299_v2 = vpop.f32.mrf.mxu1  ;;  %7299 = vmatpush1.bf16.msra.mxu0 %v11968_v49  ;;  %v3683_v49 = vld [vmem:[#allocation18 + $0x78] sm:$0xff]  ;;  %v12303_v57 = vcombine.high %v4062_v34, %v4066_v45 }
 0x5ca   :  { %7330 = vmatprep.mubr.bf16.mxu0 %v14205_v15  ;;  %7257 = vmatprep.subr.bf16.mxu1 %v12343_v55  ;;  %v7470_v4 = vmax.f32 %v6946_v59, 0.0  ;;  %v11945_v15 = vcombine.high %v3703_v1, %v3707_v7  ;;  %v12310_v55 = vcombine.low %v4070_v48, %v4074_v50  ;;  %v11921_v61 = vcombine.high %v3679_v27, %v3683_v49  ;;  %v3675_v59 = vld [vmem:[#allocation18 + $0x38] sm:$0xff] }
 0x5cb   :  { %v6949_v3 = vpop.f32.mrf.mxu1  ;;  %7300 = vmatprep.subr.bf16.mxu0 %v11961_v37  ;;  %v4054_v37 = vld [vmem:[#allocation18 + $0xc10] sm:$0xff] }
 0x5cc   :  { %v6950_v30 = vadd.f32 %v6949_v3, %v14291_v58  ;;  %7258 = vmatpush1.bf16.msra.mxu1 %v12342_v0  ;;  %v11944_v58 = vcombine.low %v3703_v1, %v3707_v7  ;;  %v12302_v0 = vcombine.low %v4062_v34, %v4066_v45  ;;  %v3791_v3 = vld [vmem:[#allocation18 + $0x3d8] sm:$0xff]  ;;  %v12294_v7 = vcombine.low %v4054_v37, %v4058_v54 }
 0x5cd   :  { %7301 = vmatpush1.bf16.msra.mxu0 %v11960_v38  ;;  %7259 = vmatprep.subr.bf16.mxu1 %v12335_v44  ;;  %v11920_v38 = vcombine.low %v3679_v27, %v3683_v49  ;;  %v12295_v44 = vcombine.high %v4054_v37, %v4058_v54  ;;  %v3795_v1 = vld [vmem:[#allocation18 + $0x3f8] sm:$0xff] }
 0x5ce   :  { %v7478_v8 = vmax.f32 %v6950_v30, 0.0  ;;  %7302 = vmatprep.subr.bf16.mxu0 %v11953_v46  ;;  %v11913_v46 = vcombine.high %v3671_v28, %v3675_v59  ;;  %v11912_v30 = vcombine.low %v3671_v28, %v3675_v59  ;;  %v12032_v11 = vcombine.low %v3791_v3, %v3795_v1 }
 0x5d0   :  { %v14303_v62 = vpack.c.bf16 %v7478_v8, %v7470_v4  ;;  %7260 = vmatpush1.bf16.msra.mxu1 %v12334_v31  ;;  %v12415_v31 = vcombine.high %v4174_v53, %v4178_v5  ;;  %v4170_v4 = vld [vmem:[#allocation18 + $0xfb0] sm:$0xff]  ;;  %v3783_v8 = vld [vmem:[#allocation18 + $0x398] sm:$0xff] }
 0x5d1   :  { %7303 = vmatpush1.bf16.msra.mxu0 %v11952_v9  ;;  %7261 = vmatprep.subr.bf16.mxu1 %v12327_v22  ;;  %v12033_v9 = vcombine.high %v3791_v3, %v3795_v1  ;;  %v4166_v22 = vld [vmem:[#allocation18 + $0xf90] sm:$0xff] }
 0x5d2   :  { %7304 = vmatprep.subr.bf16.mxu0 %v11945_v15  ;;  %v3787_v15 = vld [vmem:[#allocation18 + $0x3b8] sm:$0xff]  ;;  %v12407_v36 = vcombine.high %v4166_v22, %v4170_v4  ;;  %v12406_v48 = vcombine.low %v4166_v22, %v4170_v4  ;;  %v14305_v22 = vpop.f32.mrf.mxu0 }
 0x5d3   :  { %v12025_v26 = vcombine.high %v3783_v8, %v3787_v15  ;;  %v12024_v50 = vcombine.low %v3783_v8, %v3787_v15 }
 0x5d4   :  { %7262 = vmatpush1.bf16.msra.mxu1 %v12326_v6  ;;  %v4158_v6 = vld [vmem:[#allocation18 + $0xf50] sm:$0xff] }
 0x5d5   :  { %7305 = vmatpush1.bf16.msra.mxu0 %v11944_v58  ;;  %7263 = vmatprep.subr.bf16.mxu1 %v12319_v14  ;;  %v4162_v58 = vld [vmem:[#allocation18 + $0xf70] sm:$0xff]  ;;  %v3775_v14 = vld [vmem:[#allocation18 + $0x358] sm:$0xff] }
 0x5d6   :  { %7306 = vmatprep.subr.bf16.mxu0 %v11937_v17  ;;  %v3779_v17 = vld [vmem:[#allocation18 + $0x378] sm:$0xff]  ;;  %v12399_v18 = vcombine.high %v4158_v6, %v4162_v58  ;;  %v12398_v34 = vcombine.low %v4158_v6, %v4162_v58 }
 0x5d7   :  { %v12017_v19 = vcombine.high %v3775_v14, %v3779_v17  ;;  %v12016_v45 = vcombine.low %v3775_v14, %v3779_v17  ;;  %v3735_v6 = vld [vmem:[#allocation18 + $0x218] sm:$0xff] }
 0x5d8   :  { %7264 = vmatpush1.bf16.msra.mxu1 %v12318_v20  ;;  %v4150_v20 = vld [vmem:[#allocation18 + $0xf10] sm:$0xff]  ;;  %v3739_v58 = vld [vmem:[#allocation18 + $0x238] sm:$0xff] }
 0x5d9   :  { %7307 = vmatpush1.bf16.msra.mxu0 %v11936_v23  ;;  %7265 = vmatprep.subr.bf16.mxu1 %v12311_v25  ;;  %v4154_v23 = vld [vmem:[#allocation18 + $0xf30] sm:$0xff]  ;;  %v3767_v25 = vld [vmem:[#allocation18 + $0x318] sm:$0xff] }
 0x5da   :  { %7308 = vmatprep.subr.bf16.mxu0 %v11929_v32  ;;  %v3771_v32 = vld [vmem:[#allocation18 + $0x338] sm:$0xff]  ;;  %v12391_v27 = vcombine.high %v4150_v20, %v4154_v23  ;;  %v12390_v37 = vcombine.low %v4150_v20, %v4154_v23 }
 0x5db   :  { %v12009_v49 = vcombine.high %v3767_v25, %v3771_v32  ;;  %v12008_v54 = vcombine.low %v3767_v25, %v3771_v32  ;;  %v3859_v20 = vld [vmem:[#allocation18 + $0x5f8] sm:$0xff] }
 0x5dc   :  { %7266 = vmatpush1.bf16.msra.mxu1 %v12310_v55  ;;  %v4142_v55 = vld [vmem:[#allocation18 + $0xed0] sm:$0xff]  ;;  %v3983_v23 = vld [vmem:[#allocation18 + $0x9d8] sm:$0xff] }
 0x5dd   :  { %7309 = vmatpush1.bf16.msra.mxu0 %v11928_v56  ;;  %7267 = vmatprep.subr.bf16.mxu1 %v12303_v57  ;;  %v4146_v56 = vld [vmem:[#allocation18 + $0xef0] sm:$0xff]  ;;  %v3759_v57 = vld [vmem:[#allocation18 + $0x2d8] sm:$0xff] }
 0x5de   :  { %7310 = vmatprep.subr.bf16.mxu0 %v11921_v61  ;;  %v3763_v61 = vld [vmem:[#allocation18 + $0x2f8] sm:$0xff]  ;;  %v12383_v28 = vcombine.high %v4142_v55, %v4146_v56  ;;  %v12382_v53 = vcombine.low %v4142_v55, %v4146_v56 }
 0x5df   :  { %v12001_v59 = vcombine.high %v3759_v57, %v3763_v61  ;;  %v12000_v5 = vcombine.low %v3759_v57, %v3763_v61  ;;  %v3987_v25 = vld [vmem:[#allocation18 + $0x9f8] sm:$0xff] }
 0x5e0   :  { %7268 = vmatpush1.bf16.msra.mxu1 %v12302_v0  ;;  %v4134_v0 = vld [vmem:[#allocation18 + $0xe90] sm:$0xff]  ;;  %v12225_v55 = vcombine.high %v3983_v23, %v3987_v25  ;;  %v3847_v56 = vld [vmem:[#allocation18 + $0x598] sm:$0xff] }
 0x5e1   :  { %7311 = vmatpush1.bf16.msra.mxu0 %v11920_v38  ;;  %7269 = vmatprep.subr.bf16.mxu1 %v12295_v44  ;;  %v4138_v38 = vld [vmem:[#allocation18 + $0xeb0] sm:$0xff]  ;;  %v3751_v44 = vld [vmem:[#allocation18 + $0x298] sm:$0xff] }
 0x5e2   :  { %7312 = vmatprep.subr.bf16.mxu0 %v11913_v46  ;;  %v3755_v46 = vld [vmem:[#allocation18 + $0x2b8] sm:$0xff]  ;;  %v12375_v3 = vcombine.high %v4134_v0, %v4138_v38  ;;  %v12374_v4 = vcombine.low %v4134_v0, %v4138_v38 }
 0x5e3   :  { %v11993_v1 = vcombine.high %v3751_v44, %v3755_v46  ;;  %v11992_v8 = vcombine.low %v3751_v44, %v3755_v46  ;;  %v3851_v57 = vld [vmem:[#allocation18 + $0x5b8] sm:$0xff] }
 0x5e4   :  { %7270 = vmatpush1.bf16.msra.mxu1 %v12294_v7  ;;  %v4126_v7 = vld [vmem:[#allocation18 + $0xe50] sm:$0xff]  ;;  %v12089_v44 = vcombine.high %v3847_v56, %v3851_v57  ;;  %v3843_v46 = vld [vmem:[#allocation18 + $0x578] sm:$0xff] }
 0x5e5   :  { %7313 = vmatpush1.bf16.msra.mxu0 %v11912_v30  ;;  %7271 = vmatprep.subr.bf16.mxu1 %v12415_v31  ;;  %v4130_v30 = vld [vmem:[#allocation18 + $0xe70] sm:$0xff]  ;;  %v3743_v31 = vld [vmem:[#allocation18 + $0x258] sm:$0xff] }
 0x5e6   :  { %7314 = vmatprep.subr.bf16.mxu0 %v12033_v9  ;;  %v3747_v9 = vld [vmem:[#allocation18 + $0x278] sm:$0xff]  ;;  %v12367_v15 = vcombine.high %v4126_v7, %v4130_v30  ;;  %v12366_v14 = vcombine.low %v4126_v7, %v4130_v30 }
 0x5e7   :  { %v11984_v17 = vcombine.low %v3743_v31, %v3747_v9 }
 0x5e8   :  { %7272 = vmatpush2.bf16.msra.mxu1 %v12414_v10  ;;  %v6988_v10 = vpop.f32.mrf.mxu0 }
 0x5e9   :  { %7315 = vmatpush2.bf16.msra.mxu0 %v12032_v11  ;;  %7273 = vmatprep.subr.bf16.mxu1 %v12407_v36  ;;  %v11985_v11 = vcombine.high %v3743_v31, %v3747_v9  ;;  %v4118_v36 = vld [vmem:[#allocation18 + $0xe10] sm:$0xff]  ;;  %v12088_v31 = vcombine.low %v3847_v56, %v3851_v57  ;;  %v3815_v56 = vld [vmem:[#allocation18 + $0x498] sm:$0xff] }
 0x5ea   :  { %7316 = vmatprep.subr.bf16.mxu0 %v12025_v26  ;;  %v4122_v26 = vld [vmem:[#allocation18 + $0xe30] sm:$0xff]  ;;  %v3819_v57 = vld [vmem:[#allocation18 + $0x4b8] sm:$0xff] }
 0x5eb   :  { %v12358_v32 = vcombine.low %v4118_v36, %v4122_v26 }
 0x5ec   :  { %7274 = vmatpush2.bf16.msra.mxu1 %v12406_v48  ;;  %v12359_v48 = vcombine.high %v4118_v36, %v4122_v26  ;;  %v3831_v26 = vld [vmem:[#allocation18 + $0x518] sm:$0xff] }
 0x5ed   :  { %7317 = vmatpush2.bf16.msra.mxu0 %v12024_v50  ;;  %7275 = vmatprep.subr.bf16.mxu1 %v12399_v18  ;;  %v14307_v50 = vpop.f32.mrf.mxu0  ;;  %v11977_v18 = vcombine.high %v3735_v6, %v3739_v58 }
 0x5ee   :  { %7318 = vmatprep.subr.bf16.mxu0 %v12017_v19  ;;  %v3855_v19 = vld [vmem:[#allocation18 + $0x5d8] sm:$0xff] }
 0x5ef   :  { %v12096_v61 = vcombine.low %v3855_v19, %v3859_v20 }
 0x5f0   :  { %7276 = vmatpush2.bf16.msra.mxu1 %v12398_v34  ;;  %v11976_v34 = vcombine.low %v3735_v6, %v3739_v58  ;;  %v3959_v58 = vld [vmem:[#allocation18 + $0x918] sm:$0xff] }
 0x5f1   :  { %7319 = vmatpush2.bf16.msra.mxu0 %v12016_v45  ;;  %7277 = vmatprep.subr.bf16.mxu1 %v12391_v27  ;;  %v12097_v45 = vcombine.high %v3855_v19, %v3859_v20  ;;  %v4193_v27 = vrot.slane %v14275_v12, %v14075_v43  ;;  %v3839_v12 = vld [vmem:[#allocation18 + $0x558] sm:$0xff] }
 0x5f2   :  { %7320 = vmatprep.subr.bf16.mxu0 %v12009_v49  ;;  %v6992_v49 = vpop.f32.mrf.mxu0 }
 0x5f3   :  { %v6989_v0 = vadd.f32 %v6988_v10, %v4193_v27 }
 0x5f4   :  { %7278 = vmatpush2.bf16.msra.mxu1 %v12390_v37  ;;  %v3975_v37 = vld [vmem:[#allocation18 + $0x998] sm:$0xff]  ;;  %v14313_v38 = vpop.f32.mrf.mxu0 }
 0x5f5   :  { %7321 = vmatpush2.bf16.msra.mxu0 %v12008_v54  ;;  %7279 = vmatprep.subr.bf16.mxu1 %v12383_v28  ;;  %v3979_v54 = vld [vmem:[#allocation18 + $0x9b8] sm:$0xff]  ;;  %v14311_v28 = vpop.f32.mrf.mxu1 }
 0x5f6   :  { %7322 = vmatprep.subr.bf16.mxu0 %v12001_v59  ;;  %v12224_v59 = vcombine.low %v3983_v23, %v3987_v25  ;;  %v3823_v23 = vld [vmem:[#allocation18 + $0x4d8] sm:$0xff] }
 0x5f7   :  { %v3827_v25 = vld [vmem:[#allocation18 + $0x4f8] sm:$0xff] }
 0x5f8   :  { %7280 = vmatpush2.bf16.msra.mxu1 %v12382_v53 }
 0x5f9   :  { %7323 = vmatpush2.bf16.msra.mxu0 %v12000_v5  ;;  %7281 = vmatprep.subr.bf16.mxu1 %v12375_v3  ;;  %v12217_v5 = vcombine.high %v3975_v37, %v3979_v54  ;;  %v3967_v3 = vld [vmem:[#allocation18 + $0x958] sm:$0xff] }
 0x5fa   :  { %7324 = vmatprep.subr.bf16.mxu0 %v11993_v1  ;;  %v3971_v1 = vld [vmem:[#allocation18 + $0x978] sm:$0xff] }
 0x5fb   :  { %v12209_v36 = vcombine.high %v3967_v3, %v3971_v1 }
 0x5fc   :  { %7282 = vmatpush2.bf16.msra.mxu1 %v12374_v4  ;;  %v12216_v4 = vcombine.low %v3975_v37, %v3979_v54  ;;  %v3947_v37 = vld [vmem:[#allocation18 + $0x8b8] sm:$0xff]  ;;  %v12064_v54 = vcombine.low %v3823_v23, %v3827_v25 }
 0x5fd   :  { %7325 = vmatpush2.bf16.msra.mxu0 %v11992_v8  ;;  %7283 = vmatprep.subr.bf16.mxu1 %v12367_v15  ;;  %v12081_v8 = vcombine.high %v3839_v12, %v3843_v46  ;;  %v6993_v15 = vadd.f32 %v6992_v49, %v4193_v27  ;;  %v12065_v49 = vcombine.high %v3823_v23, %v3827_v25  ;;  %v3911_v23 = vld [vmem:[#allocation18 + $0x798] sm:$0xff] }
 0x5fe   :  { %7326 = vmatprep.subr.bf16.mxu0 %v11985_v11  ;;  %v3915_v25 = vld [vmem:[#allocation18 + $0x7b8] sm:$0xff] }
 0x600   :  { %7284 = vmatpush2.bf16.msra.mxu1 %v12366_v14 }
 0x601   :  { %7327 = vmatpush2.bf16.msra.mxu0 %v11984_v17  ;;  %7285 = vmatprep.subr.bf16.mxu1 %v12359_v48  ;;  %v12080_v48 = vcombine.low %v3839_v12, %v3843_v46  ;;  %v3807_v12 = vld [vmem:[#allocation18 + $0x458] sm:$0xff] }
 0x602   :  { %7328 = vmatprep.subr.bf16.mxu0 %v11977_v18  ;;  %v12208_v18 = vcombine.low %v3967_v3, %v3971_v1  ;;  %v3811_v46 = vld [vmem:[#allocation18 + $0x478] sm:$0xff]  ;;  %v12056_v3 = vcombine.low %v3815_v56, %v3819_v57 }
 0x604   :  { %7286 = vmatpush2.bf16.msra.mxu1 %v12358_v32  ;;  %v3951_v32 = vld [vmem:[#allocation18 + $0x8d8] sm:$0xff] }
 0x605   :  { %7329 = vmatpush2.bf16.msra.mxu0 %v11976_v34  ;;  %7341 = vmatprep.subr.bf16.mxu1 %v12097_v45  ;;  %v3955_v34 = vld [vmem:[#allocation18 + $0x8f8] sm:$0xff] }
 0x606   :  { %7384 = vmatprep.subr.bf16.mxu0 %v12225_v55  ;;  %v12193_v55 = vcombine.high %v3951_v32, %v3955_v34 }
 0x607   :  { %v7031_v53 = vpop.f32.mrf.mxu1  ;;  %7288 = vmatmul.mubr.bf16.vlgmr.msra.gmra.mxu1 %v14263_v51 }
 0x608   :  { %v7032_v7 = vadd.f32 %v7031_v53, %v6989_v0  ;;  %v7074_v30 = vpop.f32.mrf.mxu0  ;;  %7331 = vmatmul.mubr.bf16.vlgmr.msra.gmra.mxu0 %v14207_v16  ;;  %7342 = vmatpush1.bf16.msra.mxu1 %v12096_v61  ;;  %v3835_v16 = vld [vmem:[#allocation18 + $0x538] sm:$0xff]  ;;  %v12057_v0 = vcombine.high %v3815_v56, %v3819_v57 }
 0x609   :  { %7373 = vmatprep.mubr.bf16.mxu1 %v14239_v24  ;;  %v14318_v9 = vpop.f32.mrf.mxu1  ;;  %7385 = vmatpush1.bf16.msra.mxu0 %v12224_v59  ;;  %v3963_v24 = vld [vmem:[#allocation18 + $0x938] sm:$0xff]  ;;  %v12073_v19 = vcombine.high %v3831_v26, %v3835_v16  ;;  %v12072_v45 = vcombine.low %v3831_v26, %v3835_v16  ;;  %v12192_v59 = vcombine.low %v3951_v32, %v3955_v34 }
 0x60a   :  { %v14320_v10 = vadd.f32 %v7074_v30, %v7032_v7  ;;  %7416 = vmatprep.mubr.bf16.mxu0 %v14216_v47  ;;  %v14323_v11 = vpop.f32.mrf.mxu0  ;;  %7343 = vmatprep.subr.bf16.mxu1 %v12089_v44  ;;  %v12201_v47 = vcombine.high %v3959_v58, %v3963_v24  ;;  %v12200_v27 = vcombine.low %v3959_v58, %v3963_v24  ;;  %v3943_v61 = vld [vmem:[#allocation18 + $0x898] sm:$0xff] }
 0x60b   :  { %v7035_v6 = vpop.f32.mrf.mxu1  ;;  %7386 = vmatprep.subr.bf16.mxu0 %v12217_v5  ;;  %v12185_v44 = vcombine.high %v3943_v61, %v3947_v37  ;;  %v3935_v53 = vld [vmem:[#allocation18 + $0x858] sm:$0xff]  ;;  %v12184_v1 = vcombine.low %v3943_v61, %v3947_v37  ;;  %v12049_v7 = vcombine.high %v3807_v12, %v3811_v46 }
 0x60c   :  { %v7036_v14 = vadd.f32 %v7035_v6, %v6993_v15  ;;  %v7078_v17 = vpop.f32.mrf.mxu0  ;;  %7344 = vmatpush1.bf16.msra.mxu1 %v12088_v31  ;;  %v3939_v5 = vld [vmem:[#allocation18 + $0x878] sm:$0xff] }
 0x60d   :  { %7387 = vmatpush1.bf16.msra.mxu0 %v12216_v4  ;;  %7345 = vmatprep.subr.bf16.mxu1 %v12081_v8  ;;  %v12177_v30 = vcombine.high %v3935_v53, %v3939_v5  ;;  %v3799_v31 = vld [vmem:[#allocation18 + $0x418] sm:$0xff]  ;;  %v12176_v26 = vcombine.low %v3935_v53, %v3939_v5 }
 0x60e   :  { %v14325_v20 = vadd.f32 %v7078_v17, %v7036_v14  ;;  %7388 = vmatprep.subr.bf16.mxu0 %v12209_v36  ;;  %v3803_v4 = vld [vmem:[#allocation18 + $0x438] sm:$0xff]  ;;  %v12048_v36 = vcombine.low %v3807_v12, %v3811_v46 }
 0x60f   :  { %v3927_v8 = vld [vmem:[#allocation18 + $0x818] sm:$0xff]  ;;  %v12041_v16 = vcombine.high %v3799_v31, %v3803_v4 }
 0x610   :  { %7346 = vmatpush1.bf16.msra.mxu1 %v12080_v48  ;;  %v3931_v15 = vld [vmem:[#allocation18 + $0x838] sm:$0xff]  ;;  %v12040_v48 = vcombine.low %v3799_v31, %v3803_v4 }
 0x611   :  { %7389 = vmatpush1.bf16.msra.mxu0 %v12208_v18  ;;  %7347 = vmatprep.subr.bf16.mxu1 %v12073_v19  ;;  %v12169_v6 = vcombine.high %v3927_v8, %v3931_v15  ;;  %v3919_v58 = vld [vmem:[#allocation18 + $0x7d8] sm:$0xff]  ;;  %v12168_v18 = vcombine.low %v3927_v8, %v3931_v15 }
 0x612   :  { %7390 = vmatprep.subr.bf16.mxu0 %v12201_v47  ;;  %v3923_v24 = vld [vmem:[#allocation18 + $0x7f8] sm:$0xff] }
 0x613   :  { %v4047_v14 = vld [vmem:[#allocation18 + $0xbd8] sm:$0xff]  ;;  %v12161_v19 = vcombine.high %v3919_v58, %v3923_v24 }
 0x614   :  { %7348 = vmatpush1.bf16.msra.mxu1 %v12072_v45  ;;  %v4051_v17 = vld [vmem:[#allocation18 + $0xbf8] sm:$0xff]  ;;  %v12160_v45 = vcombine.low %v3919_v58, %v3923_v24 }
 0x615   :  { %7391 = vmatpush1.bf16.msra.mxu0 %v12200_v27  ;;  %7349 = vmatprep.subr.bf16.mxu1 %v12065_v49  ;;  %v12289_v47 = vcombine.high %v4047_v14, %v4051_v17  ;;  %v4039_v32 = vld [vmem:[#allocation18 + $0xb98] sm:$0xff]  ;;  %v12288_v27 = vcombine.low %v4047_v14, %v4051_v17  ;;  %v12153_v49 = vcombine.high %v3911_v23, %v3915_v25 }
 0x616   :  { %7392 = vmatprep.subr.bf16.mxu0 %v12193_v55  ;;  %v4043_v34 = vld [vmem:[#allocation18 + $0xbb8] sm:$0xff] }
 0x617   :  { %v12281_v55 = vcombine.high %v4039_v32, %v4043_v34  ;;  %v3903_v56 = vld [vmem:[#allocation18 + $0x758] sm:$0xff] }
 0x618   :  { %7350 = vmatpush1.bf16.msra.mxu1 %v12064_v54  ;;  %v3907_v57 = vld [vmem:[#allocation18 + $0x778] sm:$0xff]  ;;  %v12152_v54 = vcombine.low %v3911_v23, %v3915_v25 }
 0x619   :  { %7393 = vmatpush1.bf16.msra.mxu0 %v12192_v59  ;;  %7351 = vmatprep.subr.bf16.mxu1 %v12057_v0  ;;  %v4031_v61 = vld [vmem:[#allocation18 + $0xb58] sm:$0xff]  ;;  %v12280_v59 = vcombine.low %v4039_v32, %v4043_v34  ;;  %v12145_v0 = vcombine.high %v3903_v56, %v3907_v57 }
 0x61a   :  { %7394 = vmatprep.subr.bf16.mxu0 %v12185_v44  ;;  %v4035_v37 = vld [vmem:[#allocation18 + $0xb78] sm:$0xff] }
 0x61b   :  { %v12273_v44 = vcombine.high %v4031_v61, %v4035_v37  ;;  %v3895_v12 = vld [vmem:[#allocation18 + $0x718] sm:$0xff] }
 0x61c   :  { %7352 = vmatpush1.bf16.msra.mxu1 %v12056_v3  ;;  %v3899_v46 = vld [vmem:[#allocation18 + $0x738] sm:$0xff]  ;;  %v12144_v3 = vcombine.low %v3903_v56, %v3907_v57 }
 0x61d   :  { %7395 = vmatpush1.bf16.msra.mxu0 %v12184_v1  ;;  %7353 = vmatprep.subr.bf16.mxu1 %v12049_v7  ;;  %v4023_v53 = vld [vmem:[#allocation18 + $0xb18] sm:$0xff]  ;;  %v12272_v1 = vcombine.low %v4031_v61, %v4035_v37  ;;  %v12137_v7 = vcombine.high %v3895_v12, %v3899_v46 }
 0x61e   :  { %7396 = vmatprep.subr.bf16.mxu0 %v12177_v30  ;;  %v4027_v5 = vld [vmem:[#allocation18 + $0xb38] sm:$0xff] }
 0x61f   :  { %v12265_v30 = vcombine.high %v4023_v53, %v4027_v5  ;;  %v3887_v31 = vld [vmem:[#allocation18 + $0x6d8] sm:$0xff] }
 0x620   :  { %7354 = vmatpush1.bf16.msra.mxu1 %v12048_v36  ;;  %v3891_v4 = vld [vmem:[#allocation18 + $0x6f8] sm:$0xff]  ;;  %v12136_v36 = vcombine.low %v3895_v12, %v3899_v46 }
 0x621   :  { %7397 = vmatpush1.bf16.msra.mxu0 %v12176_v26  ;;  %7355 = vmatprep.subr.bf16.mxu1 %v12041_v16  ;;  %v4015_v8 = vld [vmem:[#allocation18 + $0xad8] sm:$0xff]  ;;  %v12264_v26 = vcombine.low %v4023_v53, %v4027_v5  ;;  %v12129_v16 = vcombine.high %v3887_v31, %v3891_v4 }
 0x622   :  { %7398 = vmatprep.subr.bf16.mxu0 %v12169_v6  ;;  %v4019_v15 = vld [vmem:[#allocation18 + $0xaf8] sm:$0xff] }
 0x623   :  { %v12257_v6 = vcombine.high %v4015_v8, %v4019_v15  ;;  %v3879_v58 = vld [vmem:[#allocation18 + $0x698] sm:$0xff] }
 0x624   :  { %7356 = vmatpush1.bf16.msra.mxu1 %v12040_v48  ;;  %v3883_v24 = vld [vmem:[#allocation18 + $0x6b8] sm:$0xff]  ;;  %v12128_v48 = vcombine.low %v3887_v31, %v3891_v4 }
 0x625   :  { %7399 = vmatpush1.bf16.msra.mxu0 %v12168_v18  ;;  %7357 = vmatprep.subr.bf16.mxu1 %v12161_v19  ;;  %v4007_v14 = vld [vmem:[#allocation18 + $0xa98] sm:$0xff]  ;;  %v12256_v18 = vcombine.low %v4015_v8, %v4019_v15  ;;  %v12121_v19 = vcombine.high %v3879_v58, %v3883_v24 }
 0x626   :  { %7400 = vmatprep.subr.bf16.mxu0 %v12289_v47  ;;  %v4011_v17 = vld [vmem:[#allocation18 + $0xab8] sm:$0xff]  ;;  %v14327_v47 = vld [vmem:[#allocation20] sm:$0xff] }
 0x627   :  { %v4189_v23 = vrot.slane %v14327_v47, %v14066_v40  ;;  %v12249_v25 = vcombine.high %v4007_v14, %v4011_v17  ;;  %v3871_v32 = vld [vmem:[#allocation18 + $0x658] sm:$0xff]  ;;  %v12248_v56 = vcombine.low %v4007_v14, %v4011_v17  ;;  %v7546_v14 = vld [vmem:[#allocation21 + $0x1a0] sm:$0xff] }
 0x628   :  { %7358 = vmatpush2.bf16.msra.mxu1 %v12160_v45  ;;  %v3875_v34 = vld [vmem:[#allocation18 + $0x678] sm:$0xff] }
 0x629   :  { %7401 = vmatpush2.bf16.msra.mxu0 %v12288_v27  ;;  %7359 = vmatprep.subr.bf16.mxu1 %v12153_v49  ;;  %v3999_v45 = vld [vmem:[#allocation18 + $0xa58] sm:$0xff]  ;;  %v6823_v49 = vadd.f32 %v14279_v29, %v4189_v23  ;;  %v12113_v57 = vcombine.high %v3871_v32, %v3875_v34  ;;  %v6819_v61 = vadd.f32 %v14273_v60, %v4189_v23 }
 0x62a   :  { %7402 = vmatprep.subr.bf16.mxu0 %v12281_v55  ;;  %v4003_v27 = vld [vmem:[#allocation18 + $0xa78] sm:$0xff]  ;;  %v12120_v55 = vcombine.low %v3879_v58, %v3883_v24  ;;  %v12112_v29 = vcombine.low %v3871_v32, %v3875_v34  ;;  %v7542_v24 = vld [vmem:[#allocation21 + $0x180] sm:$0xff] }
 0x62b   :  { %v6866_v37 = vadd.f32 %v14293_v33, %v6823_v49  ;;  %v3995_v12 = vld [vmem:[#allocation18 + $0xa38] sm:$0xff]  ;;  %v6862_v46 = vadd.f32 %v14284_v63, %v6819_v61  ;;  %v12240_v53 = vcombine.low %v3999_v45, %v4003_v27  ;;  %v12467_v23 = vcombine.high %v7542_v24, %v7546_v14  ;;  %v7538_v32 = vld [vmem:[#allocation21 + $0x160] sm:$0xff] }
 0x62c   :  { %7360 = vmatpush2.bf16.msra.mxu1 %v12152_v54  ;;  %v12241_v54 = vcombine.high %v3999_v45, %v4003_v27  ;;  %v4115_v33 = vld [vmem:[#allocation18 + $0xdf8] sm:$0xff] }
 0x62d   :  { %7403 = vmatpush2.bf16.msra.mxu0 %v12280_v59  ;;  %7361 = vmatprep.subr.bf16.mxu1 %v12145_v0  ;;  %v3863_v59 = vld [vmem:[#allocation18 + $0x618] sm:$0xff]  ;;  %v6905_v31 = vadd.f32 %v14286_v13, %v6862_v46  ;;  %v14339_v13 = vpop.f32.mrf.mxu1 }
 0x62e   :  { %7404 = vmatprep.subr.bf16.mxu0 %v12273_v44  ;;  %v3867_v0 = vld [vmem:[#allocation18 + $0x638] sm:$0xff] }
 0x62f   :  { %v3991_v44 = vld [vmem:[#allocation18 + $0xa18] sm:$0xff]  ;;  %v12105_v5 = vcombine.high %v3863_v59, %v3867_v0  ;;  %v12104_v63 = vcombine.low %v3863_v59, %v3867_v0 }
 0x630   :  { %7362 = vmatpush2.bf16.msra.mxu1 %v12144_v3  ;;  %v6909_v3 = vadd.f32 %v14305_v22, %v6866_v37  ;;  %v12233_v60 = vcombine.high %v3991_v44, %v3995_v12  ;;  %v12232_v8 = vcombine.low %v3991_v44, %v3995_v12  ;;  %v4091_v61 = vld [vmem:[#allocation18 + $0xd38] sm:$0xff] }
 0x631   :  { %7405 = vmatpush2.bf16.msra.mxu0 %v12272_v1  ;;  %7363 = vmatprep.subr.bf16.mxu1 %v12137_v7  ;;  %v4111_v1 = vld [vmem:[#allocation18 + $0xdd8] sm:$0xff]  ;;  %v7550_v7 = vld [vmem:[#allocation21 + $0x1c0] sm:$0xff] }
 0x632   :  { %7406 = vmatprep.subr.bf16.mxu0 %v12265_v30  ;;  %v7554_v30 = vld [vmem:[#allocation21 + $0x1e0] sm:$0xff]  ;;  %v6952_v4 = vadd.f32 %v14311_v28, %v6909_v3  ;;  %v12353_v15 = vcombine.high %v4111_v1, %v4115_v33  ;;  %v12352_v58 = vcombine.low %v4111_v1, %v4115_v33 }
 0x633   :  { %v12475_v22 = vcombine.high %v7550_v7, %v7554_v30  ;;  %v12474_v28 = vcombine.low %v7550_v7, %v7554_v30  ;;  %v7522_v3 = vld [vmem:[#allocation21 + $0xe0] sm:$0xff]  ;;  %v4071_v30 = vld [vmem:[#allocation18 + $0xc98] sm:$0xff] }
 0x634   :  { %7364 = vmatpush2.bf16.msra.mxu1 %v12136_v36  ;;  %v6948_v36 = vadd.f32 %v14299_v2, %v6905_v31  ;;  %v4075_v31 = vld [vmem:[#allocation18 + $0xcb8] sm:$0xff] }
 0x635   :  { %7407 = vmatpush2.bf16.msra.mxu0 %v12264_v26  ;;  %7365 = vmatprep.subr.bf16.mxu1 %v12129_v16  ;;  %v4103_v26 = vld [vmem:[#allocation18 + $0xd98] sm:$0xff] }
 0x636   :  { %7408 = vmatprep.subr.bf16.mxu0 %v12257_v6  ;;  %v4107_v16 = vld [vmem:[#allocation18 + $0xdb8] sm:$0xff]  ;;  %v7479_v6 = vmax.f32 %v6952_v4, 0.0  ;;  %v7471_v17 = vmax.f32 %v6948_v36, 0.0  ;;  %v7510_v4 = vld [vmem:[#allocation21 + $0x80] sm:$0xff]  ;;  %v12313_v36 = vcombine.high %v4071_v30, %v4075_v31 }
 0x637   :  { %v12344_v27 = vcombine.low %v4103_v26, %v4107_v16 }
 0x638   :  { %7366 = vmatpush2.bf16.msra.mxu1 %v12128_v48  ;;  %v12345_v48 = vcombine.high %v4103_v26, %v4107_v16  ;;  %v14342_v34 = vpack.c.bf16 %v7479_v6, %v7471_v17  ;;  %v4063_v26 = vld [vmem:[#allocation18 + $0xc58] sm:$0xff]  ;;  %v7502_v6 = vld [vmem:[#allocation21 + $0x40] sm:$0xff] }
 0x639   :  { %7409 = vmatpush2.bf16.msra.mxu0 %v12256_v18  ;;  %7367 = vmatprep.subr.bf16.mxu1 %v12121_v19  ;;  %v4095_v18 = vld [vmem:[#allocation18 + $0xd58] sm:$0xff] }
 0x63a   :  { %7410 = vmatprep.subr.bf16.mxu0 %v12249_v25  ;;  %v4099_v19 = vld [vmem:[#allocation18 + $0xd78] sm:$0xff]  ;;  %v7534_v25 = vld [vmem:[#allocation21 + $0x140] sm:$0xff] }
 0x63b   :  { %v12336_v59 = vcombine.low %v4095_v18, %v4099_v19  ;;  %v4067_v16 = vld [vmem:[#allocation18 + $0xc78] sm:$0xff] }
 0x63c   :  { %7368 = vmatpush2.bf16.msra.mxu1 %v12120_v55  ;;  %v12466_v55 = vcombine.low %v7542_v24, %v7546_v14  ;;  %v12312_v24 = vcombine.low %v4071_v30, %v4075_v31  ;;  %v4151_v30 = vld [vmem:[#allocation18 + $0xf18] sm:$0xff] }
 0x63d   :  { %7411 = vmatpush2.bf16.msra.mxu0 %v12248_v56  ;;  %7369 = vmatprep.subr.bf16.mxu1 %v12113_v57  ;;  %v12337_v56 = vcombine.high %v4095_v18, %v4099_v19  ;;  %v4087_v57 = vld [vmem:[#allocation18 + $0xd18] sm:$0xff]  ;;  %v7494_v19 = vld [vmem:[#allocation21] sm:$0xff] }
 0x63e   :  { %7412 = vmatprep.subr.bf16.mxu0 %v12241_v54  ;;  %v7530_v54 = vld [vmem:[#allocation21 + $0x120] sm:$0xff]  ;;  %v12329_v0 = vcombine.high %v4087_v57, %v4091_v61  ;;  %v12328_v1 = vcombine.low %v4087_v57, %v4091_v61  ;;  %v4059_v18 = vld [vmem:[#allocation18 + $0xc38] sm:$0xff] }
 0x63f   :  { %v4155_v31 = vld [vmem:[#allocation18 + $0xf38] sm:$0xff] }
 0x640   :  { %7370 = vmatpush2.bf16.msra.mxu1 %v12112_v29  ;;  %v4079_v29 = vld [vmem:[#allocation18 + $0xcd8] sm:$0xff] }
 0x641   :  { %7413 = vmatpush2.bf16.msra.mxu0 %v12240_v53  ;;  %7371 = vmatprep.subr.bf16.mxu1 %v12105_v5  ;;  %v4083_v53 = vld [vmem:[#allocation18 + $0xcf8] sm:$0xff]  ;;  %v7518_v5 = vld [vmem:[#allocation21 + $0xc0] sm:$0xff] }
 0x642   :  { %7414 = vmatprep.subr.bf16.mxu0 %v12233_v60  ;;  %v12321_v33 = vcombine.high %v4079_v29, %v4083_v53  ;;  %v12443_v7 = vcombine.high %v7518_v5, %v7522_v3 }
 0x644   :  { %7372 = vmatpush2.bf16.msra.mxu1 %v12104_v63  ;;  %v7514_v63 = vld [vmem:[#allocation21 + $0xa0] sm:$0xff] }
 0x645   :  { %7415 = vmatpush2.bf16.msra.mxu0 %v12232_v8  ;;  %7427 = vmatprep.subr.bf16.mxu1 %v12353_v15  ;;  %v12320_v8 = vcombine.low %v4079_v29, %v4083_v53  ;;  %v12442_v15 = vcombine.low %v7518_v5, %v7522_v3  ;;  %v12434_v14 = vcombine.low %v7510_v4, %v7514_v63  ;;  %v4159_v29 = vld [vmem:[#allocation18 + $0xf58] sm:$0xff]  ;;  %v7598_v5 = vld [vmem:[#allocation21 + $0x340] sm:$0xff] }
 0x646   :  { %10608 = vmatprep.subr.bf16.mxu0 %v12475_v22  ;;  %v12435_v22 = vcombine.high %v7510_v4, %v7514_v63  ;;  %v4163_v53 = vld [vmem:[#allocation18 + $0xf78] sm:$0xff]  ;;  %v7602_v3 = vld [vmem:[#allocation21 + $0x360] sm:$0xff] }
 0x647   :  { %v7117_v2 = vpop.f32.mrf.mxu1  ;;  %7374 = vmatmul.mubr.bf16.vlgmr.msra.gmra.mxu1 %v14243_v21  ;;  %v12459_v21 = vcombine.high %v7534_v25, %v7538_v32  ;;  %v7590_v4 = vld [vmem:[#allocation21 + $0x300] sm:$0xff] }
 0x648   :  { %v7118_v45 = vadd.f32 %v7117_v2, %v14320_v10  ;;  %7417 = vmatmul.mubr.bf16.vlgmr.msra.gmra.mxu0 %v14241_v35  ;;  %7428 = vmatpush1.bf16.msra.mxu1 %v12352_v58  ;;  %v7526_v10 = vld [vmem:[#allocation21 + $0x100] sm:$0xff] }
 0x649   :  { %7459 = vmatprep.mubr.bf16.mxu1 %v14254_v52  ;;  %v14347_v49 = vpop.f32.mrf.mxu1  ;;  %10609 = vmatpush1.bf16.msra.mxu0 %v12474_v28  ;;  %v12458_v52 = vcombine.low %v7534_v25, %v7538_v32  ;;  %v12451_v46 = vcombine.high %v7526_v10, %v7530_v54  ;;  %v7506_v58 = vld [vmem:[#allocation21 + $0x60] sm:$0xff]  ;;  %v12305_v28 = vcombine.high %v4063_v26, %v4067_v16 }
 0x64a   :  { %10640 = vmatprep.mubr.bf16.mxu0 %v14342_v34  ;;  %7429 = vmatprep.subr.bf16.mxu1 %v12345_v48  ;;  %v7472_v44 = vmax.f32 %v7118_v45, 0.0  ;;  %v12427_v17 = vcombine.high %v7502_v6, %v7506_v58  ;;  %v4055_v48 = vld [vmem:[#allocation18 + $0xc18] sm:$0xff]  ;;  %v7498_v2 = vld [vmem:[#allocation21 + $0x20] sm:$0xff]  ;;  %v12426_v25 = vcombine.low %v7502_v6, %v7506_v58 }
 0x64b   :  { %v7121_v37 = vpop.f32.mrf.mxu1  ;;  %10610 = vmatprep.subr.bf16.mxu0 %v12467_v23  ;;  %v12304_v23 = vcombine.low %v4063_v26, %v4067_v16  ;;  %v12297_v32 = vcombine.high %v4055_v48, %v4059_v18  ;;  %v12419_v45 = vcombine.high %v7494_v19, %v7498_v2  ;;  %v12296_v57 = vcombine.low %v4055_v48, %v4059_v18  ;;  %v7594_v63 = vld [vmem:[#allocation21 + $0x320] sm:$0xff]  ;;  %v4143_v26 = vld [vmem:[#allocation18 + $0xed8] sm:$0xff] }
 0x64c   :  { %v7122_v35 = vadd.f32 %v7121_v37, %v14325_v20  ;;  %7430 = vmatpush1.bf16.msra.mxu1 %v12344_v27  ;;  %v12450_v20 = vcombine.low %v7526_v10, %v7530_v54  ;;  %v4175_v27 = vld [vmem:[#allocation18 + $0xfd8] sm:$0xff]  ;;  %v12418_v61 = vcombine.low %v7494_v19, %v7498_v2  ;;  %v7582_v6 = vld [vmem:[#allocation21 + $0x2c0] sm:$0xff] }
 0x64d   :  { %10611 = vmatpush1.bf16.msra.mxu0 %v12466_v55  ;;  %7431 = vmatprep.subr.bf16.mxu1 %v12337_v56  ;;  %v4179_v55 = vld [vmem:[#allocation18 + $0xff8] sm:$0xff]  ;;  %v7614_v56 = vld [vmem:[#allocation21 + $0x3c0] sm:$0xff] }
 0x64e   :  { %v7480_v12 = vmax.f32 %v7122_v35, 0.0  ;;  %10612 = vmatprep.subr.bf16.mxu0 %v12459_v21  ;;  %v7618_v21 = vld [vmem:[#allocation21 + $0x3e0] sm:$0xff]  ;;  %v12417_v37 = vcombine.high %v4175_v27, %v4179_v55  ;;  %v4167_v54 = vld [vmem:[#allocation18 + $0xf98] sm:$0xff] }
 0x64f   :  { %v12539_v10 = vcombine.high %v7614_v56, %v7618_v21  ;;  %v4171_v35 = vld [vmem:[#allocation18 + $0xfb8] sm:$0xff]  ;;  %v7586_v58 = vld [vmem:[#allocation21 + $0x2e0] sm:$0xff] }
 0x650   :  { %v14351_v60 = vpack.c.bf16 %v7480_v12, %v7472_v44  ;;  %7432 = vmatpush1.bf16.msra.mxu1 %v12336_v59  ;;  %v7606_v59 = vld [vmem:[#allocation21 + $0x380] sm:$0xff]  ;;  %v12538_v44 = vcombine.low %v7614_v56, %v7618_v21  ;;  %v12409_v12 = vcombine.high %v4167_v54, %v4171_v35  ;;  %v4147_v16 = vld [vmem:[#allocation18 + $0xef8] sm:$0xff] }
 0x651   :  { %10613 = vmatpush1.bf16.msra.mxu0 %v12458_v52  ;;  %7433 = vmatprep.subr.bf16.mxu1 %v12329_v0  ;;  %v7610_v52 = vld [vmem:[#allocation21 + $0x3a0] sm:$0xff]  ;;  %v12416_v0 = vcombine.low %v4175_v27, %v4179_v55  ;;  %v4135_v48 = vld [vmem:[#allocation18 + $0xe98] sm:$0xff] }
 0x652   :  { %10614 = vmatprep.subr.bf16.mxu0 %v12451_v46  ;;  %v12531_v46 = vcombine.high %v7606_v59, %v7610_v52  ;;  %v4139_v18 = vld [vmem:[#allocation18 + $0xeb8] sm:$0xff]  ;;  %v7574_v19 = vld [vmem:[#allocation21 + $0x280] sm:$0xff] }
 0x653   :  { %v7578_v2 = vld [vmem:[#allocation21 + $0x2a0] sm:$0xff]  ;;  %v4127_v55 = vld [vmem:[#allocation18 + $0xe58] sm:$0xff] }
 0x654   :  { %7434 = vmatpush1.bf16.msra.mxu1 %v12328_v1  ;;  %v12408_v1 = vcombine.low %v4167_v54, %v4171_v35  ;;  %v12499_v27 = vcombine.high %v7574_v19, %v7578_v2  ;;  %v4131_v56 = vld [vmem:[#allocation18 + $0xe78] sm:$0xff]  ;;  %v12498_v35 = vcombine.low %v7574_v19, %v7578_v2  ;;  %v7790_v2 = vld [vmem:[#allocation21 + $0x940] sm:$0xff] }
 0x655   :  { %10615 = vmatpush1.bf16.msra.mxu0 %v12450_v20  ;;  %7435 = vmatprep.subr.bf16.mxu1 %v12321_v33  ;;  %v12530_v20 = vcombine.low %v7606_v59, %v7610_v52  ;;  %v12401_v33 = vcombine.high %v4159_v29, %v4163_v53  ;;  %v12369_v59 = vcombine.high %v4127_v55, %v4131_v56  ;;  %v7080_v52 = vpop.f32.mrf.mxu0 }
 0x656   :  { %10616 = vmatprep.subr.bf16.mxu0 %v12443_v7  ;;  %v12523_v7 = vcombine.high %v7598_v5, %v7602_v3 }
 0x658   :  { %7436 = vmatpush1.bf16.msra.mxu1 %v12320_v8  ;;  %v12400_v8 = vcombine.low %v4159_v29, %v4163_v53  ;;  %v7562_v29 = vld [vmem:[#allocation21 + $0x220] sm:$0xff]  ;;  %v7123_v53 = vpop.f32.mrf.mxu1 }
 0x659   :  { %10617 = vmatpush1.bf16.msra.mxu0 %v12442_v15  ;;  %7437 = vmatprep.subr.bf16.mxu1 %v12313_v36  ;;  %v12522_v15 = vcombine.low %v7598_v5, %v7602_v3  ;;  %v12393_v36 = vcombine.high %v4151_v30, %v4155_v31 }
 0x65a   :  { %10618 = vmatprep.subr.bf16.mxu0 %v12435_v22  ;;  %v12515_v22 = vcombine.high %v7590_v4, %v7594_v63 }
 0x65c   :  { %7438 = vmatpush1.bf16.msra.mxu1 %v12312_v24  ;;  %v12392_v24 = vcombine.low %v4151_v30, %v4155_v31  ;;  %v7806_v31 = vld [vmem:[#allocation21 + $0x9c0] sm:$0xff] }
 0x65d   :  { %10619 = vmatpush1.bf16.msra.mxu0 %v12434_v14  ;;  %7439 = vmatprep.subr.bf16.mxu1 %v12305_v28  ;;  %v12514_v14 = vcombine.low %v7590_v4, %v7594_v63  ;;  %v12385_v28 = vcombine.high %v4143_v26, %v4147_v16  ;;  %v7810_v4 = vld [vmem:[#allocation21 + $0x9e0] sm:$0xff] }
 0x65e   :  { %10620 = vmatprep.subr.bf16.mxu0 %v12427_v17  ;;  %v12507_v17 = vcombine.high %v7582_v6, %v7586_v58 }
 0x660   :  { %7440 = vmatpush1.bf16.msra.mxu1 %v12304_v23  ;;  %v4197_v23 = vrot.slane %v14327_v47, %v14069_v41 }
 0x661   :  { %10621 = vmatpush1.bf16.msra.mxu0 %v12426_v25  ;;  %7441 = vmatprep.subr.bf16.mxu1 %v12297_v32  ;;  %v12384_v25 = vcombine.low %v4143_v26, %v4147_v16  ;;  %v12506_v32 = vcombine.low %v7582_v6, %v7586_v58  ;;  %v12731_v26 = vcombine.high %v7806_v31, %v7810_v4  ;;  %v7798_v58 = vld [vmem:[#allocation21 + $0x980] sm:$0xff] }
 0x662   :  { %10622 = vmatprep.subr.bf16.mxu0 %v12419_v45  ;;  %v12377_v45 = vcombine.high %v4135_v48, %v4139_v18  ;;  %v6995_v21 = vadd.f32 %v14313_v38, %v4197_v23  ;;  %v7558_v38 = vld [vmem:[#allocation21 + $0x200] sm:$0xff] }
 0x664   :  { %7442 = vmatpush1.bf16.msra.mxu1 %v12296_v57  ;;  %v7566_v57 = vld [vmem:[#allocation21 + $0x240] sm:$0xff]  ;;  %v7038_v54 = vadd.f32 %v14339_v13, %v6995_v21 }
 0x665   :  { %10623 = vmatpush1.bf16.msra.mxu0 %v12418_v61  ;;  %7443 = vmatprep.subr.bf16.mxu1 %v12417_v37  ;;  %v7570_v61 = vld [vmem:[#allocation21 + $0x260] sm:$0xff]  ;;  %v6991_v37 = vadd.f32 %v14307_v50, %v4197_v23  ;;  %v12368_v50 = vcombine.low %v4127_v55, %v4131_v56 }
 0x666   :  { %10624 = vmatprep.subr.bf16.mxu0 %v12539_v10  ;;  %v12376_v10 = vcombine.low %v4135_v48, %v4139_v18  ;;  %v7081_v5 = vadd.f32 %v7080_v52, %v7038_v54  ;;  %v12490_v13 = vcombine.low %v7566_v57, %v7570_v61  ;;  %v7794_v23 = vld [vmem:[#allocation21 + $0x960] sm:$0xff] }
 0x667   :  { %v12715_v55 = vcombine.high %v7790_v2, %v7794_v23  ;;  %v7786_v21 = vld [vmem:[#allocation21 + $0x920] sm:$0xff] }
 0x668   :  { %7444 = vmatpush2.bf16.msra.mxu1 %v12416_v0  ;;  %v12491_v0 = vcombine.high %v7566_v57, %v7570_v61  ;;  %v7124_v30 = vadd.f32 %v7123_v53, %v7081_v5  ;;  %v7646_v61 = vld [vmem:[#allocation21 + $0x4c0] sm:$0xff] }
 0x669   :  { %10625 = vmatpush2.bf16.msra.mxu0 %v12538_v44  ;;  %7445 = vmatprep.subr.bf16.mxu1 %v12409_v12  ;;  %v4119_v44 = vld [vmem:[#allocation18 + $0xe18] sm:$0xff]  ;;  %v7778_v52 = vld [vmem:[#allocation21 + $0x8e0] sm:$0xff] }
 0x66a   :  { %10626 = vmatprep.subr.bf16.mxu0 %v12531_v46  ;;  %v4123_v12 = vld [vmem:[#allocation18 + $0xe38] sm:$0xff]  ;;  %v7034_v46 = vadd.f32 %v14318_v9, %v6991_v37  ;;  %v7481_v16 = vmax.f32 %v7124_v30, 0.0  ;;  %v7650_v37 = vld [vmem:[#allocation21 + $0x4e0] sm:$0xff] }
 0x66b   :  { %v12361_v3 = vcombine.high %v4119_v44, %v4123_v12  ;;  %v12360_v9 = vcombine.low %v4119_v44, %v4123_v12  ;;  %v7638_v44 = vld [vmem:[#allocation21 + $0x480] sm:$0xff] }
 0x66c   :  { %7446 = vmatpush2.bf16.msra.mxu1 %v12408_v1  ;;  %v12483_v1 = vcombine.high %v7558_v38, %v7562_v29  ;;  %v7642_v12 = vld [vmem:[#allocation21 + $0x4a0] sm:$0xff] }
 0x66d   :  { %10627 = vmatpush2.bf16.msra.mxu0 %v12530_v20  ;;  %7447 = vmatprep.subr.bf16.mxu1 %v12401_v33  ;;  %v7678_v20 = vld [vmem:[#allocation21 + $0x5c0] sm:$0xff]  ;;  %v12563_v5 = vcombine.high %v7638_v44, %v7642_v12 }
 0x66e   :  { %10628 = vmatprep.subr.bf16.mxu0 %v12523_v7  ;;  %v7682_v33 = vld [vmem:[#allocation21 + $0x5e0] sm:$0xff]  ;;  %v7077_v7 = vadd.f32 %v14323_v11, %v7034_v46 }
 0x66f   :  { %v12602_v6 = vcombine.low %v7678_v20, %v7682_v33  ;;  %v7802_v11 = vld [vmem:[#allocation21 + $0x9a0] sm:$0xff] }
 0x670   :  { %7448 = vmatpush2.bf16.msra.mxu1 %v12400_v8  ;;  %v7120_v63 = vadd.f32 %v14347_v49, %v7077_v7  ;;  %v12482_v8 = vcombine.low %v7558_v38, %v7562_v29  ;;  %v12730_v49 = vcombine.low %v7806_v31, %v7810_v4  ;;  %v12723_v18 = vcombine.high %v7798_v58, %v7802_v11  ;;  %v7766_v53 = vld [vmem:[#allocation21 + $0x880] sm:$0xff] }
 0x671   :  { %10629 = vmatpush2.bf16.msra.mxu0 %v12522_v15  ;;  %7449 = vmatprep.subr.bf16.mxu1 %v12393_v36  ;;  %v12603_v15 = vcombine.high %v7678_v20, %v7682_v33  ;;  %v7670_v36 = vld [vmem:[#allocation21 + $0x580] sm:$0xff]  ;;  %v12570_v29 = vcombine.low %v7646_v61, %v7650_v37  ;;  %v12562_v33 = vcombine.low %v7638_v44, %v7642_v12 }
 0x672   :  { %10630 = vmatprep.subr.bf16.mxu0 %v12515_v22  ;;  %v7674_v22 = vld [vmem:[#allocation21 + $0x5a0] sm:$0xff] }
 0x673   :  { %v12594_v19 = vcombine.low %v7670_v36, %v7674_v22  ;;  %v7758_v7 = vld [vmem:[#allocation21 + $0x840] sm:$0xff] }
 0x674   :  { %7450 = vmatpush2.bf16.msra.mxu1 %v12392_v24  ;;  %v7473_v24 = vmax.f32 %v7120_v63, 0.0  ;;  %v7762_v30 = vld [vmem:[#allocation21 + $0x860] sm:$0xff] }
 0x675   :  { %10631 = vmatpush2.bf16.msra.mxu0 %v12514_v14  ;;  %7451 = vmatprep.subr.bf16.mxu1 %v12385_v28  ;;  %v12595_v14 = vcombine.high %v7670_v36, %v7674_v22  ;;  %v7662_v28 = vld [vmem:[#allocation21 + $0x540] sm:$0xff] }
 0x676   :  { %10632 = vmatprep.subr.bf16.mxu0 %v12507_v17  ;;  %v7666_v17 = vld [vmem:[#allocation21 + $0x560] sm:$0xff]  ;;  %v14361_v48 = vpack.c.bf16 %v7481_v16, %v7473_v24 }
 0x677   :  { %v12586_v56 = vcombine.low %v7662_v28, %v7666_v17  ;;  %v7622_v4 = vld [vmem:[#allocation21 + $0x400] sm:$0xff] }
 0x678   :  { %7452 = vmatpush2.bf16.msra.mxu1 %v12384_v25  ;;  %v12587_v25 = vcombine.high %v7662_v28, %v7666_v17  ;;  %v7750_v36 = vld [vmem:[#allocation21 + $0x800] sm:$0xff] }
 0x679   :  { %10633 = vmatpush2.bf16.msra.mxu0 %v12506_v32  ;;  %7453 = vmatprep.subr.bf16.mxu1 %v12377_v45  ;;  %v7654_v32 = vld [vmem:[#allocation21 + $0x500] sm:$0xff] }
 0x67a   :  { %10634 = vmatprep.subr.bf16.mxu0 %v12499_v27  ;;  %v7658_v45 = vld [vmem:[#allocation21 + $0x520] sm:$0xff]  ;;  %v12722_v27 = vcombine.low %v7798_v58, %v7802_v11  ;;  %v12682_v58 = vcombine.low %v7758_v7, %v7762_v30 }
 0x67b   :  { %v12579_v57 = vcombine.high %v7654_v32, %v7658_v45  ;;  %v7754_v22 = vld [vmem:[#allocation21 + $0x820] sm:$0xff] }
 0x67c   :  { %7454 = vmatpush2.bf16.msra.mxu1 %v12376_v10  ;;  %v12714_v10 = vcombine.low %v7790_v2, %v7794_v23  ;;  %v7742_v16 = vld [vmem:[#allocation21 + $0x7c0] sm:$0xff]  ;;  %v12675_v11 = vcombine.high %v7750_v36, %v7754_v22 }
 0x67d   :  { %10635 = vmatpush2.bf16.msra.mxu0 %v12498_v35  ;;  %7455 = vmatprep.subr.bf16.mxu1 %v12369_v59  ;;  %v12578_v35 = vcombine.low %v7654_v32, %v7658_v45  ;;  %v7774_v59 = vld [vmem:[#allocation21 + $0x8c0] sm:$0xff] }
 0x67e   :  { %10636 = vmatprep.subr.bf16.mxu0 %v12491_v0  ;;  %v12571_v0 = vcombine.high %v7646_v61, %v7650_v37  ;;  %v12699_v38 = vcombine.high %v7774_v59, %v7778_v52  ;;  %v7874_v28 = vld [vmem:[#allocation21 + $0xbe0] sm:$0xff] }
 0x67f   :  { %v7866_v32 = vld [vmem:[#allocation21 + $0xba0] sm:$0xff] }
 0x680   :  { %7456 = vmatpush2.bf16.msra.mxu1 %v12368_v50  ;;  %v7770_v50 = vld [vmem:[#allocation21 + $0x8a0] sm:$0xff] }
 0x681   :  { %10637 = vmatpush2.bf16.msra.mxu0 %v12490_v13  ;;  %7457 = vmatprep.subr.bf16.mxu1 %v12361_v3  ;;  %v7630_v13 = vld [vmem:[#allocation21 + $0x440] sm:$0xff]  ;;  %v12691_v20 = vcombine.high %v7766_v53, %v7770_v50  ;;  %v12690_v63 = vcombine.low %v7766_v53, %v7770_v50  ;;  %v14366_v53 = vpop.f32.mrf.mxu0 }
 0x682   :  { %10638 = vmatprep.subr.bf16.mxu0 %v12483_v1  ;;  %v7634_v3 = vld [vmem:[#allocation21 + $0x460] sm:$0xff]  ;;  %v12698_v1 = vcombine.low %v7774_v59, %v7778_v52 }
 0x683   :  { %v12555_v31 = vcombine.high %v7630_v13, %v7634_v3  ;;  %v7858_v61 = vld [vmem:[#allocation21 + $0xb60] sm:$0xff] }
 0x684   :  { %7458 = vmatpush2.bf16.msra.mxu1 %v12360_v9  ;;  %v7626_v9 = vld [vmem:[#allocation21 + $0x420] sm:$0xff] }
 0x685   :  { %10639 = vmatpush2.bf16.msra.mxu0 %v12482_v8  ;;  %10651 = vmatprep.subr.bf16.mxu1 %v12603_v15  ;;  %v12683_v8 = vcombine.high %v7758_v7, %v7762_v30  ;;  %v12554_v15 = vcombine.low %v7630_v13, %v7634_v3  ;;  %v12546_v24 = vcombine.low %v7622_v4, %v7626_v9  ;;  %v7850_v44 = vld [vmem:[#allocation21 + $0xb20] sm:$0xff]  ;;  %v7162_v30 = vpop.f32.mrf.mxu0 }
 0x686   :  { %10694 = vmatprep.subr.bf16.mxu0 %v12731_v26  ;;  %v12547_v26 = vcombine.high %v7622_v4, %v7626_v9  ;;  %v7838_v13 = vld [vmem:[#allocation21 + $0xac0] sm:$0xff] }
 0x687   :  { %7460 = vmatmul.mubr.bf16.vlgmr.msra.gmra.mxu1 %v14263_v51  ;;  %v7782_v51 = vld [vmem:[#allocation21 + $0x900] sm:$0xff] }
 0x688   :  { %10641 = vmatmul.mubr.bf16.vlgmr.msra.gmra.mxu0 %v14303_v62  ;;  %10652 = vmatpush1.bf16.msra.mxu1 %v12602_v6  ;;  %v12707_v54 = vcombine.high %v7782_v51, %v7786_v21  ;;  %v12706_v46 = vcombine.low %v7782_v51, %v7786_v21  ;;  %v7746_v6 = vld [vmem:[#allocation21 + $0x7e0] sm:$0xff] }
 0x689   :  { %10683 = vmatprep.mubr.bf16.mxu1 %v14361_v48  ;;  %10653 = vmatprep.subr.bf16.mxu1 %v12595_v14  ;;  %v7870_v14 = vld [vmem:[#allocation21 + $0xbc0] sm:$0xff]  ;;  %v12667_v17 = vcombine.high %v7742_v16, %v7746_v6  ;;  %v12666_v23 = vcombine.low %v7742_v16, %v7746_v6 }
 0x68a   :  { %10695 = vmatpush1.bf16.msra.mxu0 %v12730_v49  ;;  %v7734_v49 = vld [vmem:[#allocation21 + $0x780] sm:$0xff]  ;;  %v12795_v2 = vcombine.high %v7870_v14, %v7874_v28 }
 0x68b   :  { %10696 = vmatprep.subr.bf16.mxu0 %v12723_v18  ;;  %v7738_v18 = vld [vmem:[#allocation21 + $0x7a0] sm:$0xff] }
 0x68c   :  { %10654 = vmatpush1.bf16.msra.mxu1 %v12594_v19  ;;  %v12674_v19 = vcombine.low %v7750_v36, %v7754_v22  ;;  %v12659_v45 = vcombine.high %v7734_v49, %v7738_v18  ;;  %v12658_v21 = vcombine.low %v7734_v49, %v7738_v18  ;;  %v7842_v3 = vld [vmem:[#allocation21 + $0xae0] sm:$0xff] }
 0x68d   :  { %10655 = vmatprep.subr.bf16.mxu1 %v12587_v25  ;;  %v7862_v25 = vld [vmem:[#allocation21 + $0xb80] sm:$0xff]  ;;  %v12762_v22 = vcombine.low %v7838_v13, %v7842_v3 }
 0x68e   :  { %10697 = vmatpush1.bf16.msra.mxu0 %v12722_v27  ;;  %v7726_v27 = vld [vmem:[#allocation21 + $0x740] sm:$0xff]  ;;  %v12787_v51 = vcombine.high %v7862_v25, %v7866_v32 }
 0x68f   :  { %10698 = vmatprep.subr.bf16.mxu0 %v12715_v55  ;;  %v7730_v55 = vld [vmem:[#allocation21 + $0x760] sm:$0xff] }
 0x690   :  { %10656 = vmatpush1.bf16.msra.mxu1 %v12586_v56  ;;  %v12794_v56 = vcombine.low %v7870_v14, %v7874_v28  ;;  %v12651_v37 = vcombine.high %v7726_v27, %v7730_v55  ;;  %v12650_v52 = vcombine.low %v7726_v27, %v7730_v55  ;;  %v7830_v9 = vld [vmem:[#allocation21 + $0xa80] sm:$0xff] }
 0x691   :  { %10657 = vmatprep.subr.bf16.mxu1 %v12579_v57  ;;  %v7854_v57 = vld [vmem:[#allocation21 + $0xb40] sm:$0xff] }
 0x692   :  { %10699 = vmatpush1.bf16.msra.mxu0 %v12714_v10  ;;  %v7718_v10 = vld [vmem:[#allocation21 + $0x700] sm:$0xff]  ;;  %v12779_v59 = vcombine.high %v7854_v57, %v7858_v61 }
 0x693   :  { %10700 = vmatprep.subr.bf16.mxu0 %v12707_v54  ;;  %v7722_v54 = vld [vmem:[#allocation21 + $0x720] sm:$0xff] }
 0x694   :  { %10658 = vmatpush1.bf16.msra.mxu1 %v12578_v35  ;;  %v12786_v35 = vcombine.low %v7862_v25, %v7866_v32  ;;  %v12643_v12 = vcombine.high %v7718_v10, %v7722_v54  ;;  %v7698_v36 = vld [vmem:[#allocation21 + $0x660] sm:$0xff] }
 0x695   :  { %10659 = vmatprep.subr.bf16.mxu1 %v12571_v0  ;;  %v7846_v0 = vld [vmem:[#allocation21 + $0xb00] sm:$0xff] }
 0x696   :  { %10701 = vmatpush1.bf16.msra.mxu0 %v12706_v46  ;;  %v7710_v46 = vld [vmem:[#allocation21 + $0x6c0] sm:$0xff]  ;;  %v12771_v50 = vcombine.high %v7846_v0, %v7850_v44  ;;  %v12770_v7 = vcombine.low %v7846_v0, %v7850_v44 }
 0x697   :  { %10702 = vmatprep.subr.bf16.mxu0 %v12699_v38  ;;  %v7714_v38 = vld [vmem:[#allocation21 + $0x6e0] sm:$0xff] }
 0x698   :  { %10660 = vmatpush1.bf16.msra.mxu1 %v12570_v29  ;;  %v12778_v29 = vcombine.low %v7854_v57, %v7858_v61  ;;  %v12634_v4 = vcombine.low %v7710_v46, %v7714_v38  ;;  %v7686_v28 = vld [vmem:[#allocation21 + $0x600] sm:$0xff] }
 0x699   :  { %10661 = vmatprep.subr.bf16.mxu1 %v12563_v5  ;;  %v12642_v5 = vcombine.low %v7718_v10, %v7722_v54  ;;  %v7814_v25 = vld [vmem:[#allocation21 + $0xa00] sm:$0xff]  ;;  %v14375_v54 = vld [vmem:[#allocation21 + $0x1c8] sm:$0xff] }
 0x69a   :  { %10703 = vmatpush1.bf16.msra.mxu0 %v12698_v1  ;;  %v12635_v1 = vcombine.high %v7710_v46, %v7714_v38  ;;  %v7818_v32 = vld [vmem:[#allocation21 + $0xa20] sm:$0xff] }
 0x69b   :  { %10704 = vmatprep.subr.bf16.mxu0 %v12691_v20  ;;  %v7702_v20 = vld [vmem:[#allocation21 + $0x680] sm:$0xff]  ;;  %v12739_v61 = vcombine.high %v7814_v25, %v7818_v32 }
 0x69c   :  { %10662 = vmatpush1.bf16.msra.mxu1 %v12562_v33  ;;  %v7706_v33 = vld [vmem:[#allocation21 + $0x6a0] sm:$0xff] }
 0x69d   :  { %10663 = vmatprep.subr.bf16.mxu1 %v12555_v31  ;;  %v12763_v31 = vcombine.high %v7838_v13, %v7842_v3  ;;  %v12626_v6 = vcombine.low %v7702_v20, %v7706_v33  ;;  %v7938_v57 = vld [vmem:[#allocation21 + $0xde0] sm:$0xff] }
 0x69e   :  { %10705 = vmatpush1.bf16.msra.mxu0 %v12690_v63  ;;  %v7834_v63 = vld [vmem:[#allocation21 + $0xaa0] sm:$0xff] }
 0x69f   :  { %10706 = vmatprep.subr.bf16.mxu0 %v12683_v8  ;;  %v12627_v8 = vcombine.high %v7702_v20, %v7706_v33  ;;  %v12755_v16 = vcombine.high %v7830_v9, %v7834_v63  ;;  %v12754_v49 = vcombine.low %v7830_v9, %v7834_v63  ;;  %v7926_v46 = vld [vmem:[#allocation21 + $0xd80] sm:$0xff] }
 0x6a0   :  { %10664 = vmatpush1.bf16.msra.mxu1 %v12554_v15  ;;  %v7694_v15 = vld [vmem:[#allocation21 + $0x640] sm:$0xff] }
 0x6a1   :  { %10665 = vmatprep.subr.bf16.mxu1 %v12547_v26  ;;  %v7164_v26 = vpop.f32.mrf.mxu0  ;;  %v12619_v14 = vcombine.high %v7694_v15, %v7698_v36  ;;  %v7930_v38 = vld [vmem:[#allocation21 + $0xda0] sm:$0xff] }
 0x6a2   :  { %10707 = vmatpush1.bf16.msra.mxu0 %v12682_v58  ;;  %v7822_v58 = vld [vmem:[#allocation21 + $0xa40] sm:$0xff]  ;;  %v12851_v20 = vcombine.high %v7926_v46, %v7930_v38 }
 0x6a3   :  { %10708 = vmatprep.subr.bf16.mxu0 %v12675_v11  ;;  %v7826_v11 = vld [vmem:[#allocation21 + $0xa60] sm:$0xff]  ;;  %v7166_v18 = vpop.f32.mrf.mxu0 }
 0x6a4   :  { %10666 = vmatpush1.bf16.msra.mxu1 %v12546_v24  ;;  %v7203_v24 = vpop.f32.mrf.mxu1  ;;  %v7922_v9 = vld [vmem:[#allocation21 + $0xd60] sm:$0xff] }
 0x6a5   :  { %10667 = vmatprep.subr.bf16.mxu1 %v12667_v17  ;;  %v7690_v17 = vld [vmem:[#allocation21 + $0x620] sm:$0xff]  ;;  %v7246_v27 = vpop.f32.mrf.mxu0 }
 0x6a6   :  { %10709 = vmatpush1.bf16.msra.mxu0 %v12674_v19  ;;  %v12747_v19 = vcombine.high %v7822_v58, %v7826_v11  ;;  %v7205_v55 = vpop.f32.mrf.mxu1  ;;  %v12610_v10 = vcombine.low %v7686_v28, %v7690_v17 }
 0x6a7   :  { %10710 = vmatprep.subr.bf16.mxu0 %v12795_v2  ;;  %v14578_v2 = vsub.s32 5, %v14063_v39 }
 0x6a8   :  { %10668 = vmatpush2.bf16.msra.mxu1 %v12666_v23  ;;  %v12618_v23 = vcombine.low %v7694_v15, %v7698_v36  ;;  %v7207_v0 = vpop.f32.mrf.mxu1  ;;  %v12850_v15 = vcombine.low %v7926_v46, %v7930_v38  ;;  %v14391_v46 = vld [vmem:[#allocation21 + $0x5e8] sm:$0xff] }
 0x6a9   :  { %10669 = vmatprep.subr.bf16.mxu1 %v12659_v45  ;;  %v14370_v45 = vsub.s32 4, %v14063_v39 }
 0x6aa   :  { %10711 = vmatpush2.bf16.msra.mxu0 %v12794_v56  ;;  %v12611_v56 = vcombine.high %v7686_v28, %v7690_v17 }
 0x6ab   :  { %10712 = vmatprep.subr.bf16.mxu0 %v12787_v51  ;;  %v12746_v51 = vcombine.low %v7822_v58, %v7826_v11  ;;  %v7914_v58 = vld [vmem:[#allocation21 + $0xd20] sm:$0xff] }
 0x6ac   :  { %10670 = vmatpush2.bf16.msra.mxu1 %v12658_v21  ;;  %v7934_v21 = vld [vmem:[#allocation21 + $0xdc0] sm:$0xff] }
 0x6ad   :  { %10671 = vmatprep.subr.bf16.mxu1 %v12651_v37  ;;  %v4205_v37 = vrot.slane %v14327_v47, %v14578_v2  ;;  %v12859_v44 = vcombine.high %v7934_v21, %v7938_v57  ;;  %v12858_v13 = vcombine.low %v7934_v21, %v7938_v57  ;;  %v7543_v57 = vld [vmem:[#allocation21 + $0x188] sm:$0xff] }
 0x6ae   :  { %10713 = vmatpush2.bf16.msra.mxu0 %v12786_v35  ;;  %v14377_v35 = vld [vmem:[#allocation21 + $0x1e8] sm:$0xff] }
 0x6af   :  { %10714 = vmatprep.subr.bf16.mxu0 %v12779_v59  ;;  %v4201_v59 = vrot.slane %v14327_v47, %v14370_v45  ;;  %v7209_v47 = vpop.f32.mrf.mxu1  ;;  %v7167_v33 = vadd.f32 %v7166_v18, %v4205_v37 }
 0x6b0   :  { %10672 = vmatpush2.bf16.msra.mxu1 %v12650_v52  ;;  %v7248_v52 = vpop.f32.mrf.mxu0 }
 0x6b1   :  { %10673 = vmatprep.subr.bf16.mxu1 %v12643_v12  ;;  %v12738_v12 = vcombine.low %v7814_v25, %v7818_v32  ;;  %v7161_v3 = vadd.f32 %v14366_v53, %v4201_v59  ;;  %v7902_v32 = vld [vmem:[#allocation21 + $0xcc0] sm:$0xff] }
 0x6b2   :  { %10715 = vmatpush2.bf16.msra.mxu0 %v12778_v29  ;;  %v12477_v29 = vcombine.high %v14375_v54, %v14377_v35 }
 0x6b3   :  { %10716 = vmatprep.subr.bf16.mxu0 %v12771_v50  ;;  %v7163_v50 = vadd.f32 %v7162_v30, %v4205_v37  ;;  %v7204_v63 = vadd.f32 %v7203_v24, %v7161_v3  ;;  %v7210_v30 = vadd.f32 %v7209_v47, %v7167_v33  ;;  %v7890_v47 = vld [vmem:[#allocation21 + $0xc60] sm:$0xff]  ;;  %v7527_v33 = vld [vmem:[#allocation21 + $0x108] sm:$0xff] }
 0x6b4   :  { %10674 = vmatpush2.bf16.msra.mxu1 %v12642_v5  ;;  %v7165_v5 = vadd.f32 %v7164_v26, %v4201_v59  ;;  %v7894_v59 = vld [vmem:[#allocation21 + $0xc80] sm:$0xff] }
 0x6b5   :  { %10675 = vmatprep.subr.bf16.mxu1 %v12635_v1  ;;  %v7250_v1 = vpop.f32.mrf.mxu0  ;;  %v7247_v11 = vadd.f32 %v7246_v27, %v7204_v63  ;;  %v7878_v63 = vld [vmem:[#allocation21 + $0xc00] sm:$0xff] }
 0x6b6   :  { %10717 = vmatpush2.bf16.msra.mxu0 %v12770_v7  ;;  %v7206_v7 = vadd.f32 %v7205_v55, %v7163_v50  ;;  %v7906_v55 = vld [vmem:[#allocation21 + $0xce0] sm:$0xff]  ;;  %v7535_v50 = vld [vmem:[#allocation21 + $0x148] sm:$0xff] }
 0x6b7   :  { %10718 = vmatprep.subr.bf16.mxu0 %v12763_v31  ;;  %v7208_v31 = vadd.f32 %v7207_v0, %v7165_v5  ;;  %v7252_v36 = vpop.f32.mrf.mxu0  ;;  %v12476_v0 = vcombine.low %v14375_v54, %v14377_v35  ;;  %v7539_v5 = vld [vmem:[#allocation21 + $0x168] sm:$0xff] }
 0x6b8   :  { %10676 = vmatpush2.bf16.msra.mxu1 %v12634_v4  ;;  %v7918_v4 = vld [vmem:[#allocation21 + $0xd40] sm:$0xff]  ;;  %v7249_v26 = vadd.f32 %v7248_v52, %v7206_v7  ;;  %v7253_v28 = vadd.f32 %v7252_v36, %v7210_v30  ;;  %v7531_v7 = vld [vmem:[#allocation21 + $0x128] sm:$0xff] }
 0x6b9   :  { %10677 = vmatprep.subr.bf16.mxu1 %v12627_v8  ;;  %v12453_v30 = vcombine.high %v7527_v33, %v7531_v7  ;;  %v7523_v36 = vld [vmem:[#allocation21 + $0xe8] sm:$0xff] }
 0x6ba   :  { %10719 = vmatpush2.bf16.msra.mxu0 %v12762_v22  ;;  %v12843_v22 = vcombine.high %v7918_v4, %v7922_v9 }
 0x6bb   :  { %10720 = vmatprep.subr.bf16.mxu0 %v12755_v16  ;;  %v7251_v16 = vadd.f32 %v7250_v1, %v7208_v31  ;;  %v7886_v1 = vld [vmem:[#allocation21 + $0xc40] sm:$0xff] }
 0x6bc   :  { %10678 = vmatpush2.bf16.msra.mxu1 %v12626_v6  ;;  %v7910_v6 = vld [vmem:[#allocation21 + $0xd00] sm:$0xff] }
 0x6bd   :  { %10679 = vmatprep.subr.bf16.mxu1 %v12619_v14  ;;  %v12834_v27 = vcombine.low %v7910_v6, %v7914_v58 }
 0x6be   :  { %10721 = vmatpush2.bf16.msra.mxu0 %v12754_v49  ;;  %v12842_v49 = vcombine.low %v7918_v4, %v7922_v9  ;;  %v12811_v4 = vcombine.high %v7886_v1, %v7890_v47  ;;  %v12460_v9 = vcombine.low %v7535_v50, %v7539_v5 }
 0x6bf   :  { %10722 = vmatprep.subr.bf16.mxu0 %v12747_v19 }
 0x6c0   :  { %10680 = vmatpush2.bf16.msra.mxu1 %v12618_v23  ;;  %v12835_v23 = vcombine.high %v7910_v6, %v7914_v58  ;;  %v8002_v6 = vld [vmem:[#allocation21 + $0xfe0] sm:$0xff] }
 0x6c1   :  { %10681 = vmatprep.subr.bf16.mxu1 %v12611_v56 }
 0x6c2   :  { %10723 = vmatpush2.bf16.msra.mxu0 %v12746_v51 }
 0x6c3   :  { %10724 = vmatprep.subr.bf16.mxu0 %v12739_v61  ;;  %v7547_v61 = vld [vmem:[#allocation21 + $0x1a8] sm:$0xff] }
 0x6c4   :  { %10682 = vmatpush2.bf16.msra.mxu1 %v12610_v10  ;;  %v12827_v10 = vcombine.high %v7902_v32, %v7906_v55  ;;  %v12468_v35 = vcombine.low %v7543_v57, %v7547_v61 }
 0x6c5   :  { %10737 = vmatprep.subr.bf16.mxu1 %v12859_v44  ;;  %v7898_v44 = vld [vmem:[#allocation21 + $0xca0] sm:$0xff] }
 0x6c6   :  { %10725 = vmatpush2.bf16.msra.mxu0 %v12738_v12  ;;  %v14389_v12 = vld [vmem:[#allocation21 + $0x5c8] sm:$0xff]  ;;  %v12819_v54 = vcombine.high %v7894_v59, %v7898_v44  ;;  %v12818_v31 = vcombine.low %v7894_v59, %v7898_v44  ;;  %v7978_v44 = vld [vmem:[#allocation21 + $0xf20] sm:$0xff] }
 0x6c7   :  { %v7289_v8 = vpop.f32.mrf.mxu1  ;;  %10684 = vmatmul.mubr.bf16.vlgmr.msra.gmra.mxu1 %v14351_v60  ;;  %10780 = vmatprep.subr.bf16.mxu0 %v12477_v29  ;;  %v12469_v29 = vcombine.high %v7543_v57, %v7547_v61  ;;  %v12604_v3 = vcombine.low %v14389_v12, %v14391_v46  ;;  %v7495_v61 = vld [vmem:[#allocation21 + $0x8] sm:$0xff] }
 0x6c8   :  { %10738 = vmatpush1.bf16.msra.mxu1 %v12858_v13  ;;  %v7290_v18 = vadd.f32 %v7289_v8, %v7247_v11  ;;  %v12826_v13 = vcombine.low %v7902_v32, %v7906_v55  ;;  %v7882_v8 = vld [vmem:[#allocation21 + $0xc20] sm:$0xff]  ;;  %v7511_v11 = vld [vmem:[#allocation21 + $0x88] sm:$0xff] }
 0x6c9   :  { %v7291_v53 = vpop.f32.mrf.mxu1  ;;  %10739 = vmatprep.subr.bf16.mxu1 %v12851_v20  ;;  %v12461_v20 = vcombine.high %v7535_v50, %v7539_v5  ;;  %v7615_v50 = vld [vmem:[#allocation21 + $0x3c8] sm:$0xff] }
 0x6ca   :  { %v7292_v17 = vadd.f32 %v7291_v53, %v7249_v26  ;;  %v7474_v37 = vmax.f32 %v7290_v18, 0.0  ;;  %v12810_v53 = vcombine.low %v7886_v1, %v7890_v47  ;;  %v12452_v26 = vcombine.low %v7527_v33, %v7531_v7  ;;  %v7994_v18 = vld [vmem:[#allocation21 + $0xfa0] sm:$0xff]  ;;  %v7619_v5 = vld [vmem:[#allocation21 + $0x3e8] sm:$0xff] }
 0x6cb   :  { %v7293_v14 = vpop.f32.mrf.mxu1  ;;  %v7966_v1 = vld [vmem:[#allocation21 + $0xec0] sm:$0xff]  ;;  %v7607_v33 = vld [vmem:[#allocation21 + $0x388] sm:$0xff] }
 0x6cc   :  { %v7294_v24 = vadd.f32 %v7293_v14, %v7251_v16  ;;  %10740 = vmatpush1.bf16.msra.mxu1 %v12850_v15  ;;  %v7475_v51 = vmax.f32 %v7292_v17, 0.0  ;;  %v7519_v15 = vld [vmem:[#allocation21 + $0xc8] sm:$0xff]  ;;  %v7998_v16 = vld [vmem:[#allocation21 + $0xfc0] sm:$0xff] }
 0x6cd   :  { %v7295_v19 = vpop.f32.mrf.mxu1  ;;  %10741 = vmatprep.subr.bf16.mxu1 %v12843_v22  ;;  %v12803_v22 = vcombine.high %v7878_v63, %v7882_v8  ;;  %v12445_v58 = vcombine.high %v7519_v15, %v7523_v36  ;;  %v7515_v14 = vld [vmem:[#allocation21 + $0xa8] sm:$0xff]  ;;  %v12923_v17 = vcombine.high %v7998_v16, %v8002_v6  ;;  %v12922_v32 = vcombine.low %v7998_v16, %v8002_v6  ;;  %v7970_v47 = vld [vmem:[#allocation21 + $0xee0] sm:$0xff] }
 0x6ce   :  { %v7296_v25 = vadd.f32 %v7295_v19, %v7253_v28  ;;  %v7482_v56 = vmax.f32 %v7294_v24, 0.0  ;;  %v12802_v28 = vcombine.low %v7878_v63, %v7882_v8  ;;  %v12444_v24 = vcombine.low %v7519_v15, %v7523_v36  ;;  %v7611_v7 = vld [vmem:[#allocation21 + $0x3a8] sm:$0xff]  ;;  %v7958_v63 = vld [vmem:[#allocation21 + $0xe80] sm:$0xff] }
 0x6cf   :  { %v12437_v19 = vcombine.high %v7511_v11, %v7515_v14  ;;  %v7962_v8 = vld [vmem:[#allocation21 + $0xea0] sm:$0xff]  ;;  %v7599_v15 = vld [vmem:[#allocation21 + $0x348] sm:$0xff] }
 0x6d0   :  { %v7483_v21 = vmax.f32 %v7296_v25, 0.0  ;;  %10742 = vmatpush1.bf16.msra.mxu1 %v12842_v49  ;;  %v14393_v38 = vpack.c.bf16 %v7482_v56, %v7474_v37  ;;  %v7990_v49 = vld [vmem:[#allocation21 + $0xf80] sm:$0xff]  ;;  %v7507_v25 = vld [vmem:[#allocation21 + $0x68] sm:$0xff]  ;;  %v12436_v56 = vcombine.low %v7511_v11, %v7515_v14 }
 0x6d1   :  { %10743 = vmatprep.subr.bf16.mxu1 %v12835_v23  ;;  %v7503_v23 = vld [vmem:[#allocation21 + $0x48] sm:$0xff]  ;;  %v12915_v55 = vcombine.high %v7990_v49, %v7994_v18  ;;  %v12914_v37 = vcombine.low %v7990_v49, %v7994_v18  ;;  %v7950_v16 = vld [vmem:[#allocation21 + $0xe40] sm:$0xff] }
 0x6d2   :  { %v14385_v52 = vpack.c.bf16 %v7483_v21, %v7475_v51  ;;  %v7982_v51 = vld [vmem:[#allocation21 + $0xf40] sm:$0xff]  ;;  %v12429_v57 = vcombine.high %v7503_v23, %v7507_v25  ;;  %v12428_v59 = vcombine.low %v7503_v23, %v7507_v25  ;;  %v7603_v36 = vld [vmem:[#allocation21 + $0x368] sm:$0xff] }
 0x6d3   :  { %v7986_v21 = vld [vmem:[#allocation21 + $0xf60] sm:$0xff]  ;;  %v7591_v11 = vld [vmem:[#allocation21 + $0x308] sm:$0xff] }
 0x6d4   :  { %10726 = vmatprep.mubr.bf16.mxu0 %v14385_v52  ;;  %10744 = vmatpush1.bf16.msra.mxu1 %v12834_v27  ;;  %v7499_v27 = vld [vmem:[#allocation21 + $0x28] sm:$0xff]  ;;  %v7954_v6 = vld [vmem:[#allocation21 + $0xe60] sm:$0xff] }
 0x6d5   :  { %10727 = vmatmul.mubr.bf16.vlgmr.msra.gmra.mxu0 %v14393_v38  ;;  %10745 = vmatprep.subr.bf16.mxu1 %v12827_v10  ;;  %v12907_v10 = vcombine.high %v7982_v51, %v7986_v21  ;;  %v7595_v14 = vld [vmem:[#allocation21 + $0x328] sm:$0xff]  ;;  %v7942_v49 = vld [vmem:[#allocation21 + $0xe00] sm:$0xff] }
 0x6d6   :  { %10781 = vmatpush1.bf16.msra.mxu0 %v12476_v0  ;;  %10812 = vmatprep.mubr.bf16.mxu0 %v14342_v34  ;;  %v7974_v0 = vld [vmem:[#allocation21 + $0xf00] sm:$0xff]  ;;  %v7583_v23 = vld [vmem:[#allocation21 + $0x2c8] sm:$0xff] }
 0x6d7   :  { %10782 = vmatprep.subr.bf16.mxu0 %v12469_v29  ;;  %v12421_v29 = vcombine.high %v7495_v61, %v7499_v27  ;;  %v7946_v18 = vld [vmem:[#allocation21 + $0xe20] sm:$0xff]  ;;  %v7587_v25 = vld [vmem:[#allocation21 + $0x2e8] sm:$0xff] }
 0x6d8   :  { %10746 = vmatpush1.bf16.msra.mxu1 %v12826_v13  ;;  %v12906_v13 = vcombine.low %v7982_v51, %v7986_v21  ;;  %v12509_v51 = vcombine.high %v7583_v23, %v7587_v25  ;;  %v7575_v21 = vld [vmem:[#allocation21 + $0x288] sm:$0xff] }
 0x6d9   :  { %10747 = vmatprep.subr.bf16.mxu1 %v12819_v54  ;;  %v12899_v54 = vcombine.high %v7974_v0, %v7978_v44 }
 0x6da   :  { %10783 = vmatpush1.bf16.msra.mxu0 %v12468_v35  ;;  %v12420_v35 = vcombine.low %v7495_v61, %v7499_v27  ;;  %v12866_v61 = vcombine.low %v7942_v49, %v7946_v18  ;;  %v12605_v27 = vcombine.high %v14389_v12, %v14391_v46 }
 0x6db   :  { %10784 = vmatprep.subr.bf16.mxu0 %v12461_v20  ;;  %v12541_v20 = vcombine.high %v7615_v50, %v7619_v5 }
 0x6dc   :  { %10748 = vmatpush1.bf16.msra.mxu1 %v12818_v31  ;;  %v12898_v31 = vcombine.low %v7974_v0, %v7978_v44  ;;  %v7571_v0 = vld [vmem:[#allocation21 + $0x268] sm:$0xff] }
 0x6dd   :  { %10749 = vmatprep.subr.bf16.mxu1 %v12811_v4  ;;  %v12891_v4 = vcombine.high %v7966_v1, %v7970_v47 }
 0x6de   :  { %10785 = vmatpush1.bf16.msra.mxu0 %v12460_v9  ;;  %v12540_v9 = vcombine.low %v7615_v50, %v7619_v5  ;;  %v7559_v50 = vld [vmem:[#allocation21 + $0x208] sm:$0xff] }
 0x6df   :  { %10786 = vmatprep.subr.bf16.mxu0 %v12453_v30  ;;  %v12533_v30 = vcombine.high %v7607_v33, %v7611_v7  ;;  %v7563_v5 = vld [vmem:[#allocation21 + $0x228] sm:$0xff] }
 0x6e0   :  { %10750 = vmatpush1.bf16.msra.mxu1 %v12810_v53  ;;  %v12890_v53 = vcombine.low %v7966_v1, %v7970_v47  ;;  %v7811_v1 = vld [vmem:[#allocation21 + $0x9e8] sm:$0xff]  ;;  %v12484_v47 = vcombine.low %v7559_v50, %v7563_v5 }
 0x6e1   :  { %10751 = vmatprep.subr.bf16.mxu1 %v12803_v22  ;;  %v12883_v22 = vcombine.high %v7958_v63, %v7962_v8 }
 0x6e2   :  { %10787 = vmatpush1.bf16.msra.mxu0 %v12452_v26  ;;  %v12532_v26 = vcombine.low %v7607_v33, %v7611_v7  ;;  %v7799_v33 = vld [vmem:[#allocation21 + $0x988] sm:$0xff] }
 0x6e3   :  { %10788 = vmatprep.subr.bf16.mxu0 %v12445_v58  ;;  %v12525_v58 = vcombine.high %v7599_v15, %v7603_v36  ;;  %v7803_v7 = vld [vmem:[#allocation21 + $0x9a8] sm:$0xff] }
 0x6e4   :  { %10752 = vmatpush1.bf16.msra.mxu1 %v12802_v28  ;;  %v12882_v28 = vcombine.low %v7958_v63, %v7962_v8  ;;  %v7795_v63 = vld [vmem:[#allocation21 + $0x968] sm:$0xff]  ;;  %v12724_v8 = vcombine.low %v7799_v33, %v7803_v7 }
 0x6e5   :  { %10753 = vmatprep.subr.bf16.mxu1 %v12923_v17  ;;  %v12875_v17 = vcombine.high %v7950_v16, %v7954_v6 }
 0x6e6   :  { %10789 = vmatpush1.bf16.msra.mxu0 %v12444_v24  ;;  %v12524_v24 = vcombine.low %v7599_v15, %v7603_v36  ;;  %v7783_v15 = vld [vmem:[#allocation21 + $0x908] sm:$0xff] }
 0x6e7   :  { %10790 = vmatprep.subr.bf16.mxu0 %v12437_v19  ;;  %v12517_v19 = vcombine.high %v7591_v11, %v7595_v14  ;;  %v7787_v36 = vld [vmem:[#allocation21 + $0x928] sm:$0xff] }
 0x6e8   :  { %10754 = vmatpush2.bf16.msra.mxu1 %v12922_v32  ;;  %v12874_v32 = vcombine.low %v7950_v16, %v7954_v6  ;;  %v7779_v16 = vld [vmem:[#allocation21 + $0x8e8] sm:$0xff]  ;;  %v12708_v6 = vcombine.low %v7783_v15, %v7787_v36 }
 0x6e9   :  { %10755 = vmatprep.subr.bf16.mxu1 %v12915_v55  ;;  %v12867_v55 = vcombine.high %v7942_v49, %v7946_v18  ;;  %v7763_v49 = vld [vmem:[#allocation21 + $0x868] sm:$0xff] }
 0x6ea   :  { %10791 = vmatpush1.bf16.msra.mxu0 %v12436_v56  ;;  %v12516_v56 = vcombine.low %v7591_v11, %v7595_v14  ;;  %v7767_v11 = vld [vmem:[#allocation21 + $0x888] sm:$0xff] }
 0x6eb   :  { %10792 = vmatprep.subr.bf16.mxu0 %v12429_v57  ;;  %v7579_v57 = vld [vmem:[#allocation21 + $0x2a8] sm:$0xff] }
 0x6ec   :  { %10756 = vmatpush2.bf16.msra.mxu1 %v12914_v37  ;;  %v12508_v37 = vcombine.low %v7583_v23, %v7587_v25  ;;  %v12500_v44 = vcombine.low %v7575_v21, %v7579_v57  ;;  %v7771_v14 = vld [vmem:[#allocation21 + $0x8a8] sm:$0xff] }
 0x6ed   :  { %10757 = vmatprep.subr.bf16.mxu1 %v12907_v10  ;;  %v12501_v10 = vcombine.high %v7575_v21, %v7579_v57  ;;  %v12692_v18 = vcombine.low %v7767_v11, %v7771_v14  ;;  %v7751_v23 = vld [vmem:[#allocation21 + $0x808] sm:$0xff]  ;;  %v7332_v57 = vpop.f32.mrf.mxu0 }
 0x6ee   :  { %10793 = vmatpush1.bf16.msra.mxu0 %v12428_v59  ;;  %v7567_v59 = vld [vmem:[#allocation21 + $0x248] sm:$0xff] }
 0x6ef   :  { %10794 = vmatprep.subr.bf16.mxu0 %v12421_v29  ;;  %v12493_v29 = vcombine.high %v7567_v59, %v7571_v0  ;;  %v7755_v25 = vld [vmem:[#allocation21 + $0x828] sm:$0xff] }
 0x6f0   :  { %10758 = vmatpush2.bf16.msra.mxu1 %v12906_v13  ;;  %v12492_v13 = vcombine.low %v7567_v59, %v7571_v0  ;;  %v12676_v21 = vcombine.low %v7751_v23, %v7755_v25  ;;  %v7334_v59 = vpop.f32.mrf.mxu0 }
 0x6f1   :  { %10759 = vmatprep.subr.bf16.mxu1 %v12899_v54  ;;  %v12485_v54 = vcombine.high %v7559_v50, %v7563_v5 }
 0x6f2   :  { %10795 = vmatpush1.bf16.msra.mxu0 %v12420_v35  ;;  %v7807_v35 = vld [vmem:[#allocation21 + $0x9c8] sm:$0xff]  ;;  %v7336_v5 = vpop.f32.mrf.mxu0 }
 0x6f3   :  { %10796 = vmatprep.subr.bf16.mxu0 %v12541_v20  ;;  %v12733_v20 = vcombine.high %v7807_v35, %v7811_v1 }
 0x6f4   :  { %10760 = vmatpush2.bf16.msra.mxu1 %v12898_v31  ;;  %v12732_v31 = vcombine.low %v7807_v35, %v7811_v1  ;;  %v7851_v35 = vld [vmem:[#allocation21 + $0xb28] sm:$0xff] }
 0x6f5   :  { %10761 = vmatprep.subr.bf16.mxu1 %v12891_v4  ;;  %v12725_v4 = vcombine.high %v7799_v33, %v7803_v7  ;;  %v14577_v7 = vsub.s32 7, %v14063_v39 }
 0x6f6   :  { %10797 = vmatpush2.bf16.msra.mxu0 %v12540_v9  ;;  %v7791_v9 = vld [vmem:[#allocation21 + $0x948] sm:$0xff] }
 0x6f7   :  { %10798 = vmatprep.subr.bf16.mxu0 %v12533_v30  ;;  %v12717_v30 = vcombine.high %v7791_v9, %v7795_v63 }
 0x6f8   :  { %10762 = vmatpush2.bf16.msra.mxu1 %v12890_v53  ;;  %v12716_v53 = vcombine.low %v7791_v9, %v7795_v63  ;;  %v14406_v9 = vsub.s32 6, %v14063_v39 }
 0x6f9   :  { %10763 = vmatprep.subr.bf16.mxu1 %v12883_v22  ;;  %v12709_v22 = vcombine.high %v7783_v15, %v7787_v36  ;;  %v13581_v36 = vld [vmem:[#allocation20] sm:$0xff] }
 0x6fa   :  { %10799 = vmatpush2.bf16.msra.mxu0 %v12532_v26  ;;  %v7775_v26 = vld [vmem:[#allocation21 + $0x8c8] sm:$0xff] }
 0x6fb   :  { %10800 = vmatprep.subr.bf16.mxu0 %v12525_v58  ;;  %v12701_v58 = vcombine.high %v7775_v26, %v7779_v16 }
 0x6fc   :  { %10764 = vmatpush2.bf16.msra.mxu1 %v12882_v28  ;;  %v12700_v28 = vcombine.low %v7775_v26, %v7779_v16  ;;  %v7835_v26 = vld [vmem:[#allocation21 + $0xaa8] sm:$0xff]  ;;  %v4209_v16 = vrot.slane %v13581_v36, %v14406_v9 }
 0x6fd   :  { %10765 = vmatprep.subr.bf16.mxu1 %v12875_v17  ;;  %v12693_v17 = vcombine.high %v7767_v11, %v7771_v14 }
 0x6fe   :  { %10801 = vmatpush2.bf16.msra.mxu0 %v12524_v24  ;;  %v7759_v24 = vld [vmem:[#allocation21 + $0x848] sm:$0xff] }
 0x6ff   :  { %10802 = vmatprep.subr.bf16.mxu0 %v12517_v19  ;;  %v12685_v19 = vcombine.high %v7759_v24, %v7763_v49 }
 0x700   :  { %10766 = vmatpush2.bf16.msra.mxu1 %v12874_v32  ;;  %v12684_v32 = vcombine.low %v7759_v24, %v7763_v49  ;;  %v7823_v24 = vld [vmem:[#allocation21 + $0xa48] sm:$0xff] }
 0x701   :  { %10767 = vmatprep.subr.bf16.mxu1 %v12867_v55  ;;  %v12677_v55 = vcombine.high %v7751_v23, %v7755_v25  ;;  %v7827_v49 = vld [vmem:[#allocation21 + $0xa68] sm:$0xff] }
 0x702   :  { %10803 = vmatpush2.bf16.msra.mxu0 %v12516_v56  ;;  %v7871_v56 = vld [vmem:[#allocation21 + $0xbc8] sm:$0xff] }
 0x703   :  { %10804 = vmatprep.subr.bf16.mxu0 %v12509_v51  ;;  %v7875_v51 = vld [vmem:[#allocation21 + $0xbe8] sm:$0xff] }
 0x704   :  { %10768 = vmatpush2.bf16.msra.mxu1 %v12866_v61  ;;  %v12797_v61 = vcombine.high %v7871_v56, %v7875_v51 }
 0x705   :  { %10823 = vmatprep.subr.bf16.mxu1 %v12605_v27  ;;  %v7863_v27 = vld [vmem:[#allocation21 + $0xb88] sm:$0xff] }
 0x706   :  { %10805 = vmatpush2.bf16.msra.mxu0 %v12508_v37  ;;  %v7867_v37 = vld [vmem:[#allocation21 + $0xba8] sm:$0xff] }
 0x707   :  { %10806 = vmatprep.subr.bf16.mxu0 %v12501_v10  ;;  %v12796_v10 = vcombine.low %v7871_v56, %v7875_v51  ;;  %v12789_v0 = vcombine.high %v7863_v27, %v7867_v37  ;;  %v12788_v50 = vcombine.low %v7863_v27, %v7867_v37  ;;  %v7375_v1 = vpop.f32.mrf.mxu1  ;;  %v7815_v37 = vld [vmem:[#allocation21 + $0xa08] sm:$0xff] }
 0x70a   :  { %10807 = vmatpush2.bf16.msra.mxu0 %v12500_v44  ;;  %v7855_v44 = vld [vmem:[#allocation21 + $0xb48] sm:$0xff] }
 0x70b   :  { %10808 = vmatprep.subr.bf16.mxu0 %v12493_v29  ;;  %v7859_v29 = vld [vmem:[#allocation21 + $0xb68] sm:$0xff] }
 0x70e   :  { %10809 = vmatpush2.bf16.msra.mxu0 %v12492_v13  ;;  %v12781_v13 = vcombine.high %v7855_v44, %v7859_v29 }
 0x70f   :  { %10810 = vmatprep.subr.bf16.mxu0 %v12485_v54  ;;  %v7847_v54 = vld [vmem:[#allocation21 + $0xb08] sm:$0xff] }
 0x710   :  { %v12773_v33 = vcombine.high %v7847_v54, %v7851_v35 }
 0x712   :  { %10811 = vmatpush2.bf16.msra.mxu0 %v12484_v47  ;;  %v12780_v47 = vcombine.low %v7855_v44, %v7859_v29 }
 0x713   :  { %10866 = vmatprep.subr.bf16.mxu0 %v12733_v20  ;;  %v7338_v20 = vpop.f32.mrf.mxu0 }
 0x715   :  { %10813 = vmatmul.mubr.bf16.vlgmr.msra.gmra.mxu0 %v14303_v62  ;;  %v7418_v63 = vpop.f32.mrf.mxu0 }
 0x716   :  { %10867 = vmatpush1.bf16.msra.mxu0 %v12732_v31  ;;  %10898 = vmatprep.mubr.bf16.mxu0 %v14385_v52  ;;  %v7839_v31 = vld [vmem:[#allocation21 + $0xac8] sm:$0xff] }
 0x717   :  { %10868 = vmatprep.subr.bf16.mxu0 %v12725_v4  ;;  %v7843_v4 = vld [vmem:[#allocation21 + $0xae8] sm:$0xff] }
 0x718   :  { %v12765_v15 = vcombine.high %v7839_v31, %v7843_v4  ;;  %v12764_v11 = vcombine.low %v7839_v31, %v7843_v4 }
 0x71a   :  { %10869 = vmatpush1.bf16.msra.mxu0 %v12724_v8  ;;  %v7377_v8 = vpop.f32.mrf.mxu1 }
 0x71b   :  { %10870 = vmatprep.subr.bf16.mxu0 %v12717_v30  ;;  %v12772_v30 = vcombine.low %v7847_v54, %v7851_v35 }
 0x71e   :  { %10871 = vmatpush1.bf16.msra.mxu0 %v12716_v53  ;;  %v4213_v53 = vrot.slane %v13581_v36, %v14577_v7 }
 0x71f   :  { %10872 = vmatprep.subr.bf16.mxu0 %v12709_v22  ;;  %v7831_v22 = vld [vmem:[#allocation21 + $0xa88] sm:$0xff] }
 0x720   :  { %v12757_v14 = vcombine.high %v7831_v22, %v7835_v26  ;;  %v7339_v25 = vadd.f32 %v7338_v20, %v4213_v53  ;;  %v12756_v56 = vcombine.low %v7831_v22, %v7835_v26  ;;  %v7556_v20 = vld [vmem:[#allocation21 + $0x1f0] sm:$0xff]  ;;  %v7671_v22 = vld [vmem:[#allocation21 + $0x588] sm:$0xff] }
 0x721   :  { %v7675_v26 = vld [vmem:[#allocation21 + $0x5a8] sm:$0xff] }
 0x722   :  { %10873 = vmatpush1.bf16.msra.mxu0 %v12708_v6  ;;  %v7420_v6 = vpop.f32.mrf.mxu0 }
 0x723   :  { %10874 = vmatprep.subr.bf16.mxu0 %v12701_v58  ;;  %v7379_v58 = vpop.f32.mrf.mxu1 }
 0x725   :  { %v7381_v23 = vpop.f32.mrf.mxu1 }
 0x726   :  { %10875 = vmatpush1.bf16.msra.mxu0 %v12700_v28  ;;  %v7335_v28 = vadd.f32 %v7334_v59, %v4213_v53  ;;  %v7382_v27 = vadd.f32 %v7381_v23, %v7339_v25  ;;  %v12596_v23 = vcombine.low %v7671_v22, %v7675_v26 }
 0x727   :  { %10876 = vmatprep.subr.bf16.mxu0 %v12693_v17  ;;  %v7337_v17 = vadd.f32 %v7336_v5, %v4209_v16 }
 0x72a   :  { %10877 = vmatpush1.bf16.msra.mxu0 %v12692_v18  ;;  %v7333_v18 = vadd.f32 %v7332_v57, %v4209_v16  ;;  %v12748_v57 = vcombine.low %v7823_v24, %v7827_v49  ;;  %v7544_v16 = vld [vmem:[#allocation21 + $0x190] sm:$0xff] }
 0x72b   :  { %10878 = vmatprep.subr.bf16.mxu0 %v12685_v19  ;;  %v7422_v19 = vpop.f32.mrf.mxu0 }
 0x72c   :  { %v7376_v51 = vadd.f32 %v7375_v1, %v7333_v18  ;;  %v7552_v1 = vld [vmem:[#allocation21 + $0x1d0] sm:$0xff] }
 0x72d   :  { %v7536_v18 = vld [vmem:[#allocation21 + $0x150] sm:$0xff] }
 0x72e   :  { %10879 = vmatpush1.bf16.msra.mxu0 %v12684_v32  ;;  %v7378_v32 = vadd.f32 %v7377_v8, %v7335_v28  ;;  %v7663_v28 = vld [vmem:[#allocation21 + $0x548] sm:$0xff] }
 0x72f   :  { %10880 = vmatprep.subr.bf16.mxu0 %v12677_v55  ;;  %v7380_v55 = vadd.f32 %v7379_v58, %v7337_v17  ;;  %v12597_v17 = vcombine.high %v7671_v22, %v7675_v26  ;;  %v7627_v26 = vld [vmem:[#allocation21 + $0x428] sm:$0xff] }
 0x730   :  { %v7421_v44 = vadd.f32 %v7420_v6, %v7378_v32  ;;  %v7548_v6 = vld [vmem:[#allocation21 + $0x1b0] sm:$0xff] }
 0x731   :  { %v7423_v29 = vadd.f32 %v7422_v19, %v7380_v55  ;;  %v7540_v19 = vld [vmem:[#allocation21 + $0x170] sm:$0xff]  ;;  %v12470_v25 = vcombine.low %v7544_v16, %v7548_v6 }
 0x732   :  { %10881 = vmatpush1.bf16.msra.mxu0 %v12676_v21  ;;  %v12463_v55 = vcombine.high %v7536_v18, %v7540_v19  ;;  %v12462_v12 = vcombine.low %v7536_v18, %v7540_v19  ;;  %v7747_v18 = vld [vmem:[#allocation21 + $0x7e8] sm:$0xff]  ;;  %v7616_v19 = vld [vmem:[#allocation21 + $0x3d0] sm:$0xff] }
 0x733   :  { %10882 = vmatprep.subr.bf16.mxu0 %v12797_v61  ;;  %v12749_v61 = vcombine.high %v7823_v24, %v7827_v49  ;;  %v12471_v24 = vcombine.high %v7544_v16, %v7548_v6  ;;  %v7667_v49 = vld [vmem:[#allocation21 + $0x568] sm:$0xff]  ;;  %v7496_v16 = vld [vmem:[#allocation21 + $0x10] sm:$0xff] }
 0x734   :  { %v12589_v32 = vcombine.high %v7663_v28, %v7667_v49  ;;  %v7500_v6 = vld [vmem:[#allocation21 + $0x30] sm:$0xff] }
 0x736   :  { %10883 = vmatpush2.bf16.msra.mxu0 %v12796_v10  ;;  %v7819_v10 = vld [vmem:[#allocation21 + $0xa28] sm:$0xff] }
 0x737   :  { %10884 = vmatprep.subr.bf16.mxu0 %v12789_v0  ;;  %v7424_v0 = vpop.f32.mrf.mxu0  ;;  %v12740_v8 = vcombine.low %v7815_v37, %v7819_v10 }
 0x738   :  { %v7425_v54 = vadd.f32 %v7424_v0, %v7382_v27  ;;  %v12588_v27 = vcombine.low %v7663_v28, %v7667_v49  ;;  %v7520_v0 = vld [vmem:[#allocation21 + $0xd0] sm:$0xff]  ;;  %v7743_v49 = vld [vmem:[#allocation21 + $0x7c8] sm:$0xff] }
 0x73a   :  { %10885 = vmatpush2.bf16.msra.mxu0 %v12788_v50  ;;  %v7419_v50 = vadd.f32 %v7418_v63, %v7376_v51  ;;  %v7659_v51 = vld [vmem:[#allocation21 + $0x528] sm:$0xff] }
 0x73b   :  { %10886 = vmatprep.subr.bf16.mxu0 %v12781_v13  ;;  %v12741_v13 = vcombine.high %v7815_v37, %v7819_v10  ;;  %v7647_v37 = vld [vmem:[#allocation21 + $0x4c8] sm:$0xff] }
 0x73c   :  { %v7651_v10 = vld [vmem:[#allocation21 + $0x4e8] sm:$0xff] }
 0x73e   :  { %10887 = vmatpush2.bf16.msra.mxu0 %v12780_v47 }
 0x73f   :  { %10888 = vmatprep.subr.bf16.mxu0 %v12773_v33 }
 0x742   :  { %10889 = vmatpush2.bf16.msra.mxu0 %v12772_v30 }
 0x743   :  { %10890 = vmatprep.subr.bf16.mxu0 %v12765_v15  ;;  %v12479_v15 = vcombine.high %v7552_v1, %v7556_v20 }
 0x746   :  { %10891 = vmatpush2.bf16.msra.mxu0 %v12764_v11  ;;  %v12478_v11 = vcombine.low %v7552_v1, %v7556_v20 }
 0x747   :  { %v7461_v21 = vpop.f32.mrf.mxu1  ;;  %10892 = vmatprep.subr.bf16.mxu0 %v12757_v14 }
 0x748   :  { %v7462_v33 = vadd.f32 %v7461_v21, %v7419_v50  ;;  %v7528_v21 = vld [vmem:[#allocation21 + $0x110] sm:$0xff] }
 0x749   :  { %v7463_v59 = vpop.f32.mrf.mxu1 }
 0x74a   :  { %10893 = vmatpush2.bf16.msra.mxu0 %v12756_v56  ;;  %v7464_v35 = vadd.f32 %v7463_v59, %v7421_v44  ;;  %v7476_v63 = vmax.f32 %v7462_v33, 0.0  ;;  %v7655_v56 = vld [vmem:[#allocation21 + $0x508] sm:$0xff]  ;;  %v7524_v59 = vld [vmem:[#allocation21 + $0xf0] sm:$0xff] }
 0x74b   :  { %v7465_v5 = vpop.f32.mrf.mxu1  ;;  %10894 = vmatprep.subr.bf16.mxu0 %v12749_v61  ;;  %v7532_v61 = vld [vmem:[#allocation21 + $0x130] sm:$0xff]  ;;  %v12581_v46 = vcombine.high %v7655_v56, %v7659_v51  ;;  %v12580_v44 = vcombine.low %v7655_v56, %v7659_v51  ;;  %v12447_v50 = vcombine.high %v7520_v0, %v7524_v59  ;;  %v12446_v1 = vcombine.low %v7520_v0, %v7524_v59  ;;  %v7735_v51 = vld [vmem:[#allocation21 + $0x788] sm:$0xff] }
 0x74c   :  { %v7466_v47 = vadd.f32 %v7465_v5, %v7423_v29  ;;  %v7477_v36 = vmax.f32 %v7464_v35, 0.0  ;;  %v12454_v29 = vcombine.low %v7528_v21, %v7532_v61  ;;  %v7639_v5 = vld [vmem:[#allocation21 + $0x488] sm:$0xff]  ;;  %v7516_v35 = vld [vmem:[#allocation21 + $0xb0] sm:$0xff] }
 0x74d   :  { %v7467_v31 = vpop.f32.mrf.mxu1  ;;  %v7731_v0 = vld [vmem:[#allocation21 + $0x768] sm:$0xff]  ;;  %v7600_v59 = vld [vmem:[#allocation21 + $0x350] sm:$0xff] }
 0x74e   :  { %v7468_v4 = vadd.f32 %v7467_v31, %v7425_v54  ;;  %10895 = vmatpush2.bf16.msra.mxu0 %v12748_v57  ;;  %v7484_v30 = vmax.f32 %v7466_v47, 0.0  ;;  %v12573_v57 = vcombine.high %v7647_v37, %v7651_v10  ;;  %v7512_v54 = vld [vmem:[#allocation21 + $0x90] sm:$0xff]  ;;  %v12572_v47 = vcombine.low %v7647_v37, %v7651_v10  ;;  %v7631_v31 = vld [vmem:[#allocation21 + $0x448] sm:$0xff] }
 0x74f   :  { %10896 = vmatprep.subr.bf16.mxu0 %v12741_v13  ;;  %v7643_v13 = vld [vmem:[#allocation21 + $0x4a8] sm:$0xff]  ;;  %v12439_v33 = vcombine.high %v7512_v54, %v7516_v35 }
 0x750   :  { %v7485_v53 = vmax.f32 %v7468_v4, 0.0  ;;  %v14413_v14 = vpack.c.bf16 %v7484_v30, %v7476_v63  ;;  %v12565_v20 = vcombine.high %v7639_v5, %v7643_v13  ;;  %v7635_v4 = vld [vmem:[#allocation21 + $0x468] sm:$0xff]  ;;  %v7508_v30 = vld [vmem:[#allocation21 + $0x70] sm:$0xff] }
 0x751   :  { %v7623_v63 = vld [vmem:[#allocation21 + $0x408] sm:$0xff] }
 0x752   :  { %v14411_v58 = vpack.c.bf16 %v7485_v53, %v7477_v36  ;;  %10897 = vmatpush2.bf16.msra.mxu0 %v12740_v8  ;;  %v7504_v8 = vld [vmem:[#allocation21 + $0x50] sm:$0xff]  ;;  %v12438_v36 = vcombine.low %v7512_v54, %v7516_v35  ;;  %v12557_v53 = vcombine.high %v7631_v31, %v7635_v4  ;;  %v7727_v10 = vld [vmem:[#allocation21 + $0x748] sm:$0xff] }
 0x753   :  { %10952 = vmatprep.subr.bf16.mxu0 %v12479_v15  ;;  %v12564_v15 = vcombine.low %v7639_v5, %v7643_v13  ;;  %v12431_v22 = vcombine.high %v7504_v8, %v7508_v30  ;;  %v12430_v28 = vcombine.low %v7504_v8, %v7508_v30  ;;  %v7719_v13 = vld [vmem:[#allocation21 + $0x708] sm:$0xff]  ;;  %v7592_v35 = vld [vmem:[#allocation21 + $0x310] sm:$0xff] }
 0x754   :  { %10769 = vmatprep.mubr.bf16.mxu1 %v14411_v58  ;;  %v7723_v54 = vld [vmem:[#allocation21 + $0x728] sm:$0xff]  ;;  %v7584_v30 = vld [vmem:[#allocation21 + $0x2d0] sm:$0xff] }
 0x755   :  { %10899 = vmatmul.mubr.bf16.vlgmr.msra.gmra.mxu0 %v14393_v38  ;;  %10770 = vmatmul.mubr.bf16.vlgmr.msra.gmra.mxu1 %v14413_v14  ;;  %v7715_v8 = vld [vmem:[#allocation21 + $0x6e8] sm:$0xff] }
 0x756   :  { %10824 = vmatpush1.bf16.msra.mxu1 %v12604_v3  ;;  %10953 = vmatpush1.bf16.msra.mxu0 %v12478_v11  ;;  %v12455_v3 = vcombine.high %v7528_v21, %v7532_v61  ;;  %v12556_v11 = vcombine.low %v7631_v31, %v7635_v4  ;;  %v7739_v21 = vld [vmem:[#allocation21 + $0x7a8] sm:$0xff]  ;;  %v7608_v61 = vld [vmem:[#allocation21 + $0x390] sm:$0xff] }
 0x757   :  { %10984 = vmatprep.mubr.bf16.mxu0 %v14342_v34  ;;  %10855 = vmatprep.mubr.bf16.mxu1 %v14361_v48  ;;  %v7711_v4 = vld [vmem:[#allocation21 + $0x6c8] sm:$0xff] }
 0x758   :  { %10825 = vmatprep.subr.bf16.mxu1 %v12597_v17  ;;  %10954 = vmatprep.subr.bf16.mxu0 %v12471_v24  ;;  %v12549_v17 = vcombine.high %v7623_v63, %v7627_v26  ;;  %v12423_v24 = vcombine.high %v7496_v16, %v7500_v6 }
 0x75a   :  { %10826 = vmatpush1.bf16.msra.mxu1 %v12596_v23  ;;  %10955 = vmatpush1.bf16.msra.mxu0 %v12470_v25  ;;  %v7620_v23 = vld [vmem:[#allocation21 + $0x3f0] sm:$0xff]  ;;  %v12548_v25 = vcombine.low %v7623_v63, %v7627_v26  ;;  %v7703_v26 = vld [vmem:[#allocation21 + $0x688] sm:$0xff] }
 0x75b   :  { %10827 = vmatprep.subr.bf16.mxu1 %v12589_v32  ;;  %10956 = vmatprep.subr.bf16.mxu0 %v12463_v55  ;;  %v12422_v32 = vcombine.low %v7496_v16, %v7500_v6  ;;  %v12669_v55 = vcombine.high %v7743_v49, %v7747_v18  ;;  %v12543_v56 = vcombine.high %v7616_v19, %v7620_v23  ;;  %v7707_v16 = vld [vmem:[#allocation21 + $0x6a8] sm:$0xff]  ;;  %v7576_v6 = vld [vmem:[#allocation21 + $0x290] sm:$0xff] }
 0x75e   :  { %10828 = vmatpush1.bf16.msra.mxu1 %v12588_v27  ;;  %10957 = vmatpush1.bf16.msra.mxu0 %v12462_v12  ;;  %v7612_v27 = vld [vmem:[#allocation21 + $0x3b0] sm:$0xff]  ;;  %v12668_v12 = vcombine.low %v7743_v49, %v7747_v18  ;;  %v7695_v18 = vld [vmem:[#allocation21 + $0x648] sm:$0xff] }
 0x75f   :  { %10829 = vmatprep.subr.bf16.mxu1 %v12581_v46  ;;  %10958 = vmatprep.subr.bf16.mxu0 %v12455_v3  ;;  %v12542_v46 = vcombine.low %v7616_v19, %v7620_v23  ;;  %v12661_v3 = vcombine.high %v7735_v51, %v7739_v21  ;;  %v12535_v37 = vcombine.high %v7608_v61, %v7612_v27  ;;  %v7699_v19 = vld [vmem:[#allocation21 + $0x668] sm:$0xff]  ;;  %v7568_v23 = vld [vmem:[#allocation21 + $0x250] sm:$0xff] }
 0x762   :  { %10830 = vmatpush1.bf16.msra.mxu1 %v12580_v44  ;;  %10959 = vmatpush1.bf16.msra.mxu0 %v12454_v29  ;;  %v7604_v44 = vld [vmem:[#allocation21 + $0x370] sm:$0xff]  ;;  %v12660_v29 = vcombine.low %v7735_v51, %v7739_v21  ;;  %v7687_v21 = vld [vmem:[#allocation21 + $0x608] sm:$0xff] }
 0x763   :  { %10831 = vmatprep.subr.bf16.mxu1 %v12573_v57  ;;  %10960 = vmatprep.subr.bf16.mxu0 %v12447_v50  ;;  %v12534_v57 = vcombine.low %v7608_v61, %v7612_v27  ;;  %v12653_v50 = vcombine.high %v7727_v10, %v7731_v0  ;;  %v12527_v5 = vcombine.high %v7600_v59, %v7604_v44  ;;  %v7691_v61 = vld [vmem:[#allocation21 + $0x628] sm:$0xff]  ;;  %v7560_v27 = vld [vmem:[#allocation21 + $0x210] sm:$0xff] }
 0x766   :  { %10832 = vmatpush1.bf16.msra.mxu1 %v12572_v47  ;;  %10961 = vmatpush1.bf16.msra.mxu0 %v12446_v1  ;;  %v7596_v47 = vld [vmem:[#allocation21 + $0x330] sm:$0xff]  ;;  %v12652_v1 = vcombine.low %v7727_v10, %v7731_v0  ;;  %v7935_v0 = vld [vmem:[#allocation21 + $0xdc8] sm:$0xff] }
 0x767   :  { %10833 = vmatprep.subr.bf16.mxu1 %v12565_v20  ;;  %10962 = vmatprep.subr.bf16.mxu0 %v12439_v33  ;;  %v12526_v20 = vcombine.low %v7600_v59, %v7604_v44  ;;  %v12645_v33 = vcombine.high %v7719_v13, %v7723_v54  ;;  %v12519_v31 = vcombine.high %v7592_v35, %v7596_v47  ;;  %v7939_v59 = vld [vmem:[#allocation21 + $0xde8] sm:$0xff]  ;;  %v7808_v44 = vld [vmem:[#allocation21 + $0x9d0] sm:$0xff] }
 0x76a   :  { %10834 = vmatpush1.bf16.msra.mxu1 %v12564_v15  ;;  %10963 = vmatpush1.bf16.msra.mxu0 %v12438_v36  ;;  %v7588_v15 = vld [vmem:[#allocation21 + $0x2f0] sm:$0xff]  ;;  %v12644_v36 = vcombine.low %v7719_v13, %v7723_v54  ;;  %v7927_v54 = vld [vmem:[#allocation21 + $0xd88] sm:$0xff] }
 0x76b   :  { %10835 = vmatprep.subr.bf16.mxu1 %v12557_v53  ;;  %10964 = vmatprep.subr.bf16.mxu0 %v12431_v22  ;;  %v12518_v53 = vcombine.low %v7592_v35, %v7596_v47  ;;  %v12637_v22 = vcombine.high %v7711_v4, %v7715_v8  ;;  %v12511_v63 = vcombine.high %v7584_v30, %v7588_v15  ;;  %v7931_v35 = vld [vmem:[#allocation21 + $0xda8] sm:$0xff]  ;;  %v7800_v47 = vld [vmem:[#allocation21 + $0x990] sm:$0xff] }
 0x76e   :  { %10836 = vmatpush1.bf16.msra.mxu1 %v12556_v11  ;;  %10965 = vmatpush1.bf16.msra.mxu0 %v12430_v28  ;;  %v7580_v11 = vld [vmem:[#allocation21 + $0x2b0] sm:$0xff]  ;;  %v12636_v28 = vcombine.low %v7711_v4, %v7715_v8  ;;  %v7919_v8 = vld [vmem:[#allocation21 + $0xd48] sm:$0xff] }
 0x76f   :  { %10837 = vmatprep.subr.bf16.mxu1 %v12549_v17  ;;  %10966 = vmatprep.subr.bf16.mxu0 %v12423_v24  ;;  %v12510_v17 = vcombine.low %v7584_v30, %v7588_v15  ;;  %v12629_v24 = vcombine.high %v7703_v26, %v7707_v16  ;;  %v12503_v49 = vcombine.high %v7576_v6, %v7580_v11  ;;  %v7923_v30 = vld [vmem:[#allocation21 + $0xd68] sm:$0xff]  ;;  %v7792_v15 = vld [vmem:[#allocation21 + $0x950] sm:$0xff] }
 0x772   :  { %10838 = vmatpush1.bf16.msra.mxu1 %v12548_v25  ;;  %10967 = vmatpush1.bf16.msra.mxu0 %v12422_v32  ;;  %v7572_v25 = vld [vmem:[#allocation21 + $0x270] sm:$0xff]  ;;  %v12628_v32 = vcombine.low %v7703_v26, %v7707_v16  ;;  %v7911_v16 = vld [vmem:[#allocation21 + $0xd08] sm:$0xff] }
 0x773   :  { %10839 = vmatprep.subr.bf16.mxu1 %v12669_v55  ;;  %10968 = vmatprep.subr.bf16.mxu0 %v12543_v56  ;;  %v12502_v55 = vcombine.low %v7576_v6, %v7580_v11  ;;  %v12621_v56 = vcombine.high %v7695_v18, %v7699_v19  ;;  %v12495_v51 = vcombine.high %v7568_v23, %v7572_v25  ;;  %v7915_v6 = vld [vmem:[#allocation21 + $0xd28] sm:$0xff]  ;;  %v7784_v11 = vld [vmem:[#allocation21 + $0x910] sm:$0xff] }
 0x776   :  { %10840 = vmatpush2.bf16.msra.mxu1 %v12668_v12  ;;  %10969 = vmatpush2.bf16.msra.mxu0 %v12542_v46  ;;  %v7564_v12 = vld [vmem:[#allocation21 + $0x230] sm:$0xff]  ;;  %v12620_v46 = vcombine.low %v7695_v18, %v7699_v19  ;;  %v7903_v19 = vld [vmem:[#allocation21 + $0xcc8] sm:$0xff] }
 0x777   :  { %10841 = vmatprep.subr.bf16.mxu1 %v12661_v3  ;;  %10970 = vmatprep.subr.bf16.mxu0 %v12535_v37  ;;  %v12494_v3 = vcombine.low %v7568_v23, %v7572_v25  ;;  %v12613_v37 = vcombine.high %v7687_v21, %v7691_v61  ;;  %v12487_v10 = vcombine.high %v7560_v27, %v7564_v12  ;;  %v7907_v23 = vld [vmem:[#allocation21 + $0xce8] sm:$0xff]  ;;  %v7776_v25 = vld [vmem:[#allocation21 + $0x8d0] sm:$0xff] }
 0x77a   :  { %10842 = vmatpush2.bf16.msra.mxu1 %v12660_v29  ;;  %10971 = vmatpush2.bf16.msra.mxu0 %v12534_v57  ;;  %v7812_v29 = vld [vmem:[#allocation21 + $0x9f0] sm:$0xff]  ;;  %v12612_v57 = vcombine.low %v7687_v21, %v7691_v61  ;;  %v7895_v61 = vld [vmem:[#allocation21 + $0xc88] sm:$0xff] }
 0x77b   :  { %10843 = vmatprep.subr.bf16.mxu1 %v12653_v50  ;;  %10972 = vmatprep.subr.bf16.mxu0 %v12527_v5  ;;  %v12486_v50 = vcombine.low %v7560_v27, %v7564_v12  ;;  %v12861_v5 = vcombine.high %v7935_v0, %v7939_v59  ;;  %v12735_v13 = vcombine.high %v7808_v44, %v7812_v29  ;;  %v7899_v27 = vld [vmem:[#allocation21 + $0xca8] sm:$0xff]  ;;  %v7768_v12 = vld [vmem:[#allocation21 + $0x890] sm:$0xff] }
 0x77e   :  { %10844 = vmatpush2.bf16.msra.mxu1 %v12652_v1  ;;  %10973 = vmatpush2.bf16.msra.mxu0 %v12526_v20  ;;  %v7804_v1 = vld [vmem:[#allocation21 + $0x9b0] sm:$0xff]  ;;  %v12860_v20 = vcombine.low %v7935_v0, %v7939_v59  ;;  %v7887_v59 = vld [vmem:[#allocation21 + $0xc48] sm:$0xff] }
 0x77f   :  { %10845 = vmatprep.subr.bf16.mxu1 %v12645_v33  ;;  %10974 = vmatprep.subr.bf16.mxu0 %v12519_v31  ;;  %v12734_v33 = vcombine.low %v7808_v44, %v7812_v29  ;;  %v12853_v31 = vcombine.high %v7927_v54, %v7931_v35  ;;  %v12727_v4 = vcombine.high %v7800_v47, %v7804_v1  ;;  %v7891_v44 = vld [vmem:[#allocation21 + $0xc68] sm:$0xff]  ;;  %v7760_v29 = vld [vmem:[#allocation21 + $0x850] sm:$0xff] }
 0x782   :  { %10846 = vmatpush2.bf16.msra.mxu1 %v12644_v36  ;;  %10975 = vmatpush2.bf16.msra.mxu0 %v12518_v53  ;;  %v7796_v36 = vld [vmem:[#allocation21 + $0x970] sm:$0xff]  ;;  %v12852_v53 = vcombine.low %v7927_v54, %v7931_v35  ;;  %v7879_v35 = vld [vmem:[#allocation21 + $0xc08] sm:$0xff] }
 0x783   :  { %10847 = vmatprep.subr.bf16.mxu1 %v12637_v22  ;;  %10976 = vmatprep.subr.bf16.mxu0 %v12511_v63  ;;  %v12726_v22 = vcombine.low %v7800_v47, %v7804_v1  ;;  %v12845_v63 = vcombine.high %v7919_v8, %v7923_v30  ;;  %v12719_v26 = vcombine.high %v7792_v15, %v7796_v36  ;;  %v7883_v47 = vld [vmem:[#allocation21 + $0xc28] sm:$0xff]  ;;  %v7752_v1 = vld [vmem:[#allocation21 + $0x810] sm:$0xff] }
 0x786   :  { %10848 = vmatpush2.bf16.msra.mxu1 %v12636_v28  ;;  %10977 = vmatpush2.bf16.msra.mxu0 %v12510_v17  ;;  %v7788_v28 = vld [vmem:[#allocation21 + $0x930] sm:$0xff]  ;;  %v12844_v17 = vcombine.low %v7919_v8, %v7923_v30  ;;  %v7999_v30 = vld [vmem:[#allocation21 + $0xfc8] sm:$0xff] }
 0x787   :  { %10849 = vmatprep.subr.bf16.mxu1 %v12629_v24  ;;  %10978 = vmatprep.subr.bf16.mxu0 %v12503_v49  ;;  %v12718_v24 = vcombine.low %v7792_v15, %v7796_v36  ;;  %v12837_v49 = vcombine.high %v7911_v16, %v7915_v6  ;;  %v12711_v18 = vcombine.high %v7784_v11, %v7788_v28  ;;  %v8003_v15 = vld [vmem:[#allocation21 + $0xfe8] sm:$0xff]  ;;  %v7872_v36 = vld [vmem:[#allocation21 + $0xbd0] sm:$0xff] }
 0x78a   :  { %10850 = vmatpush2.bf16.msra.mxu1 %v12628_v32  ;;  %10979 = vmatpush2.bf16.msra.mxu0 %v12502_v55  ;;  %v7780_v32 = vld [vmem:[#allocation21 + $0x8f0] sm:$0xff]  ;;  %v12836_v55 = vcombine.low %v7911_v16, %v7915_v6  ;;  %v7991_v6 = vld [vmem:[#allocation21 + $0xf88] sm:$0xff] }
 0x78b   :  { %10851 = vmatprep.subr.bf16.mxu1 %v12621_v56  ;;  %10980 = vmatprep.subr.bf16.mxu0 %v12495_v51  ;;  %v12710_v56 = vcombine.low %v7784_v11, %v7788_v28  ;;  %v12829_v51 = vcombine.high %v7903_v19, %v7907_v23  ;;  %v12703_v21 = vcombine.high %v7776_v25, %v7780_v32  ;;  %v7995_v11 = vld [vmem:[#allocation21 + $0xfa8] sm:$0xff]  ;;  %v7864_v28 = vld [vmem:[#allocation21 + $0xb90] sm:$0xff] }
 0x78e   :  { %10852 = vmatpush2.bf16.msra.mxu1 %v12620_v46  ;;  %10981 = vmatpush2.bf16.msra.mxu0 %v12494_v3  ;;  %v7772_v46 = vld [vmem:[#allocation21 + $0x8b0] sm:$0xff]  ;;  %v12828_v3 = vcombine.low %v7903_v19, %v7907_v23  ;;  %v7983_v23 = vld [vmem:[#allocation21 + $0xf48] sm:$0xff] }
 0x78f   :  { %10853 = vmatprep.subr.bf16.mxu1 %v12613_v37  ;;  %10982 = vmatprep.subr.bf16.mxu0 %v12487_v10  ;;  %v12702_v37 = vcombine.low %v7776_v25, %v7780_v32  ;;  %v12821_v10 = vcombine.high %v7895_v61, %v7899_v27  ;;  %v12695_v0 = vcombine.high %v7768_v12, %v7772_v46  ;;  %v7987_v25 = vld [vmem:[#allocation21 + $0xf68] sm:$0xff]  ;;  %v7856_v32 = vld [vmem:[#allocation21 + $0xb50] sm:$0xff] }
 0x792   :  { %10854 = vmatpush2.bf16.msra.mxu1 %v12612_v57  ;;  %10983 = vmatpush2.bf16.msra.mxu0 %v12486_v50  ;;  %v7764_v57 = vld [vmem:[#allocation21 + $0x870] sm:$0xff]  ;;  %v12820_v50 = vcombine.low %v7895_v61, %v7899_v27  ;;  %v7975_v27 = vld [vmem:[#allocation21 + $0xf08] sm:$0xff] }
 0x793   :  { %10909 = vmatprep.subr.bf16.mxu1 %v12861_v5  ;;  %11038 = vmatprep.subr.bf16.mxu0 %v12735_v13  ;;  %v12694_v5 = vcombine.low %v7768_v12, %v7772_v46  ;;  %v12813_v13 = vcombine.high %v7887_v59, %v7891_v44  ;;  %v12687_v54 = vcombine.high %v7760_v29, %v7764_v57  ;;  %v7979_v12 = vld [vmem:[#allocation21 + $0xf28] sm:$0xff]  ;;  %v7848_v46 = vld [vmem:[#allocation21 + $0xb10] sm:$0xff] }
 0x795   :  { %10856 = vmatmul.mubr.bf16.vlgmr.msra.gmra.mxu1 %v14351_v60  ;;  %10985 = vmatmul.mubr.bf16.vlgmr.msra.gmra.mxu0 %v14303_v62 }
 0x796   :  { %10910 = vmatpush1.bf16.msra.mxu1 %v12860_v20  ;;  %10941 = vmatprep.mubr.bf16.mxu1 %v14411_v58  ;;  %v7756_v20 = vld [vmem:[#allocation21 + $0x830] sm:$0xff] }
 0x797   :  { %11039 = vmatpush1.bf16.msra.mxu0 %v12734_v33  ;;  %11070 = vmatprep.mubr.bf16.mxu0 %v14385_v52  ;;  %v12812_v33 = vcombine.low %v7887_v59, %v7891_v44  ;;  %v12679_v8 = vcombine.high %v7752_v1, %v7756_v20  ;;  %v7967_v44 = vld [vmem:[#allocation21 + $0xec8] sm:$0xff] }
 0x798   :  { %10911 = vmatprep.subr.bf16.mxu1 %v12853_v31  ;;  %11040 = vmatprep.subr.bf16.mxu0 %v12727_v4  ;;  %v12686_v31 = vcombine.low %v7760_v29, %v7764_v57  ;;  %v12805_v4 = vcombine.high %v7879_v35, %v7883_v47  ;;  %v7971_v29 = vld [vmem:[#allocation21 + $0xee8] sm:$0xff]  ;;  %v7840_v57 = vld [vmem:[#allocation21 + $0xad0] sm:$0xff] }
 0x79a   :  { %10912 = vmatpush1.bf16.msra.mxu1 %v12852_v53  ;;  %v7876_v53 = vld [vmem:[#allocation21 + $0xbf0] sm:$0xff] }
 0x79b   :  { %11041 = vmatpush1.bf16.msra.mxu0 %v12726_v22  ;;  %10913 = vmatprep.subr.bf16.mxu1 %v12845_v63  ;;  %v12804_v22 = vcombine.low %v7879_v35, %v7883_v47  ;;  %v12678_v63 = vcombine.low %v7752_v1, %v7756_v20  ;;  %v12799_v16 = vcombine.high %v7872_v36, %v7876_v53  ;;  %v7959_v47 = vld [vmem:[#allocation21 + $0xe88] sm:$0xff]  ;;  %v7832_v20 = vld [vmem:[#allocation21 + $0xa90] sm:$0xff] }
 0x79c   :  { %11042 = vmatprep.subr.bf16.mxu0 %v12719_v26  ;;  %v12925_v26 = vcombine.high %v7999_v30, %v8003_v15  ;;  %v7963_v1 = vld [vmem:[#allocation21 + $0xea8] sm:$0xff] }
 0x79e   :  { %10914 = vmatpush1.bf16.msra.mxu1 %v12844_v17  ;;  %v7868_v17 = vld [vmem:[#allocation21 + $0xbb0] sm:$0xff] }
 0x79f   :  { %11043 = vmatpush1.bf16.msra.mxu0 %v12718_v24  ;;  %10915 = vmatprep.subr.bf16.mxu1 %v12837_v49  ;;  %v12924_v24 = vcombine.low %v7999_v30, %v8003_v15  ;;  %v12798_v49 = vcombine.low %v7872_v36, %v7876_v53  ;;  %v12791_v19 = vcombine.high %v7864_v28, %v7868_v17  ;;  %v7951_v15 = vld [vmem:[#allocation21 + $0xe48] sm:$0xff]  ;;  %v7824_v53 = vld [vmem:[#allocation21 + $0xa50] sm:$0xff] }
 0x7a0   :  { %11044 = vmatprep.subr.bf16.mxu0 %v12711_v18  ;;  %v12917_v18 = vcombine.high %v7991_v6, %v7995_v11  ;;  %v7955_v36 = vld [vmem:[#allocation21 + $0xe68] sm:$0xff] }
 0x7a2   :  { %10916 = vmatpush1.bf16.msra.mxu1 %v12836_v55  ;;  %v7860_v55 = vld [vmem:[#allocation21 + $0xb70] sm:$0xff] }
 0x7a3   :  { %11045 = vmatpush1.bf16.msra.mxu0 %v12710_v56  ;;  %10917 = vmatprep.subr.bf16.mxu1 %v12829_v51  ;;  %v12916_v56 = vcombine.low %v7991_v6, %v7995_v11  ;;  %v12790_v51 = vcombine.low %v7864_v28, %v7868_v17  ;;  %v12783_v61 = vcombine.high %v7856_v32, %v7860_v55  ;;  %v7943_v11 = vld [vmem:[#allocation21 + $0xe08] sm:$0xff]  ;;  %v7816_v17 = vld [vmem:[#allocation21 + $0xa10] sm:$0xff] }
 0x7a4   :  { %11046 = vmatprep.subr.bf16.mxu0 %v12703_v21  ;;  %v12909_v21 = vcombine.high %v7983_v23, %v7987_v25  ;;  %v7947_v28 = vld [vmem:[#allocation21 + $0xe28] sm:$0xff] }
 0x7a6   :  { %10918 = vmatpush1.bf16.msra.mxu1 %v12828_v3  ;;  %v7852_v3 = vld [vmem:[#allocation21 + $0xb30] sm:$0xff] }
 0x7a7   :  { %11047 = vmatpush1.bf16.msra.mxu0 %v12702_v37  ;;  %10919 = vmatprep.subr.bf16.mxu1 %v12821_v10  ;;  %v12908_v37 = vcombine.low %v7983_v23, %v7987_v25  ;;  %v12782_v10 = vcombine.low %v7856_v32, %v7860_v55  ;;  %v12775_v59 = vcombine.high %v7848_v46, %v7852_v3  ;;  %v7680_v25 = vld [vmem:[#allocation21 + $0x5d0] sm:$0xff]  ;;  %v7553_v55 = vld [vmem:[#allocation21 + $0x1d8] sm:$0xff] }
 0x7a8   :  { %11048 = vmatprep.subr.bf16.mxu0 %v12695_v0  ;;  %v12901_v0 = vcombine.high %v7975_v27, %v7979_v12  ;;  %v7684_v32 = vld [vmem:[#allocation21 + $0x5f0] sm:$0xff] }
 0x7aa   :  { %10920 = vmatpush1.bf16.msra.mxu1 %v12820_v50  ;;  %v7844_v50 = vld [vmem:[#allocation21 + $0xaf0] sm:$0xff] }
 0x7ab   :  { %11049 = vmatpush1.bf16.msra.mxu0 %v12694_v5  ;;  %10921 = vmatprep.subr.bf16.mxu1 %v12813_v13  ;;  %v12900_v5 = vcombine.low %v7975_v27, %v7979_v12  ;;  %v12774_v13 = vcombine.low %v7848_v46, %v7852_v3  ;;  %v12767_v35 = vcombine.high %v7840_v57, %v7844_v50  ;;  %v7672_v12 = vld [vmem:[#allocation21 + $0x590] sm:$0xff] }
 0x7ac   :  { %11050 = vmatprep.subr.bf16.mxu0 %v12687_v54  ;;  %v12893_v54 = vcombine.high %v7967_v44, %v7971_v29  ;;  %v7676_v46 = vld [vmem:[#allocation21 + $0x5b0] sm:$0xff]  ;;  %v12606_v3 = vcombine.low %v7680_v25, %v7684_v32 }
 0x7ae   :  { %10922 = vmatpush1.bf16.msra.mxu1 %v12812_v33  ;;  %v7836_v33 = vld [vmem:[#allocation21 + $0xab0] sm:$0xff] }
 0x7af   :  { %11051 = vmatpush1.bf16.msra.mxu0 %v12686_v31  ;;  %10923 = vmatprep.subr.bf16.mxu1 %v12805_v4  ;;  %v12892_v31 = vcombine.low %v7967_v44, %v7971_v29  ;;  %v12766_v4 = vcombine.low %v7840_v57, %v7844_v50  ;;  %v12759_v30 = vcombine.high %v7832_v20, %v7836_v33  ;;  %v7664_v44 = vld [vmem:[#allocation21 + $0x550] sm:$0xff]  ;;  %v7537_v50 = vld [vmem:[#allocation21 + $0x158] sm:$0xff] }
 0x7b0   :  { %11052 = vmatprep.subr.bf16.mxu0 %v12679_v8  ;;  %v12885_v8 = vcombine.high %v7959_v47, %v7963_v1  ;;  %v7668_v29 = vld [vmem:[#allocation21 + $0x570] sm:$0xff] }
 0x7b2   :  { %10924 = vmatpush1.bf16.msra.mxu1 %v12804_v22  ;;  %v7828_v22 = vld [vmem:[#allocation21 + $0xa70] sm:$0xff] }
 0x7b3   :  { %11053 = vmatpush1.bf16.msra.mxu0 %v12678_v63  ;;  %10925 = vmatprep.subr.bf16.mxu1 %v12925_v26  ;;  %v12884_v63 = vcombine.low %v7959_v47, %v7963_v1  ;;  %v12758_v26 = vcombine.low %v7832_v20, %v7836_v33  ;;  %v12751_v6 = vcombine.high %v7824_v53, %v7828_v22  ;;  %v7656_v1 = vld [vmem:[#allocation21 + $0x510] sm:$0xff]  ;;  %v7529_v33 = vld [vmem:[#allocation21 + $0x118] sm:$0xff] }
 0x7b4   :  { %11054 = vmatprep.subr.bf16.mxu0 %v12799_v16  ;;  %v12877_v16 = vcombine.high %v7951_v15, %v7955_v36  ;;  %v7660_v20 = vld [vmem:[#allocation21 + $0x530] sm:$0xff] }
 0x7b6   :  { %10926 = vmatpush2.bf16.msra.mxu1 %v12924_v24  ;;  %v7820_v24 = vld [vmem:[#allocation21 + $0xa30] sm:$0xff] }
 0x7b7   :  { %11055 = vmatpush2.bf16.msra.mxu0 %v12798_v49  ;;  %10927 = vmatprep.subr.bf16.mxu1 %v12917_v18  ;;  %v12876_v49 = vcombine.low %v7951_v15, %v7955_v36  ;;  %v12750_v18 = vcombine.low %v7824_v53, %v7828_v22  ;;  %v12743_v23 = vcombine.high %v7816_v17, %v7820_v24  ;;  %v7648_v36 = vld [vmem:[#allocation21 + $0x4d0] sm:$0xff]  ;;  %v7521_v22 = vld [vmem:[#allocation21 + $0xd8] sm:$0xff] }
 0x7b8   :  { %11056 = vmatprep.subr.bf16.mxu0 %v12791_v19  ;;  %v12869_v19 = vcombine.high %v7943_v11, %v7947_v28  ;;  %v7652_v53 = vld [vmem:[#allocation21 + $0x4f0] sm:$0xff] }
 0x7ba   :  { %10928 = vmatpush2.bf16.msra.mxu1 %v12916_v56  ;;  %v7557_v56 = vld [vmem:[#allocation21 + $0x1f8] sm:$0xff] }
 0x7bb   :  { %11057 = vmatpush2.bf16.msra.mxu0 %v12790_v51  ;;  %10929 = vmatprep.subr.bf16.mxu1 %v12909_v21  ;;  %v12868_v51 = vcombine.low %v7943_v11, %v7947_v28  ;;  %v12742_v21 = vcombine.low %v7816_v17, %v7820_v24  ;;  %v12481_v27 = vcombine.high %v7553_v55, %v7557_v56  ;;  %v7640_v11 = vld [vmem:[#allocation21 + $0x490] sm:$0xff]  ;;  %v7513_v17 = vld [vmem:[#allocation21 + $0x98] sm:$0xff] }
 0x7bc   :  { %11058 = vmatprep.subr.bf16.mxu0 %v12783_v61  ;;  %v12607_v61 = vcombine.high %v7680_v25, %v7684_v32  ;;  %v7644_v28 = vld [vmem:[#allocation21 + $0x4b0] sm:$0xff]  ;;  %v7517_v24 = vld [vmem:[#allocation21 + $0xb8] sm:$0xff] }
 0x7bd   :  { %v7632_v25 = vld [vmem:[#allocation21 + $0x450] sm:$0xff] }
 0x7be   :  { %10930 = vmatpush2.bf16.msra.mxu1 %v12908_v37  ;;  %v7545_v37 = vld [vmem:[#allocation21 + $0x198] sm:$0xff]  ;;  %v7636_v32 = vld [vmem:[#allocation21 + $0x470] sm:$0xff] }
 0x7bf   :  { %11059 = vmatpush2.bf16.msra.mxu0 %v12782_v10  ;;  %10931 = vmatprep.subr.bf16.mxu1 %v12901_v0  ;;  %v7549_v10 = vld [vmem:[#allocation21 + $0x1b8] sm:$0xff]  ;;  %v12480_v0 = vcombine.low %v7553_v55, %v7557_v56 }
 0x7c0   :  { %11060 = vmatprep.subr.bf16.mxu0 %v12775_v59  ;;  %v12599_v59 = vcombine.high %v7672_v12, %v7676_v46  ;;  %v12473_v57 = vcombine.high %v7545_v37, %v7549_v10  ;;  %v7505_v55 = vld [vmem:[#allocation21 + $0x58] sm:$0xff] }
 0x7c1   :  { %v7509_v56 = vld [vmem:[#allocation21 + $0x78] sm:$0xff] }
 0x7c2   :  { %10932 = vmatpush2.bf16.msra.mxu1 %v12900_v5  ;;  %v7541_v5 = vld [vmem:[#allocation21 + $0x178] sm:$0xff] }
 0x7c3   :  { %11061 = vmatpush2.bf16.msra.mxu0 %v12774_v13  ;;  %10933 = vmatprep.subr.bf16.mxu1 %v12893_v54  ;;  %v12598_v13 = vcombine.low %v7672_v12, %v7676_v46  ;;  %v12472_v54 = vcombine.low %v7545_v37, %v7549_v10  ;;  %v12465_v47 = vcombine.high %v7537_v50, %v7541_v5  ;;  %v7624_v12 = vld [vmem:[#allocation21 + $0x410] sm:$0xff]  ;;  %v7501_v37 = vld [vmem:[#allocation21 + $0x38] sm:$0xff] }
 0x7c4   :  { %11062 = vmatprep.subr.bf16.mxu0 %v12767_v35  ;;  %v12591_v35 = vcombine.high %v7664_v44, %v7668_v29  ;;  %v7628_v46 = vld [vmem:[#allocation21 + $0x430] sm:$0xff]  ;;  %v12558_v10 = vcombine.low %v7632_v25, %v7636_v32 }
 0x7c6   :  { %10934 = vmatpush2.bf16.msra.mxu1 %v12892_v31  ;;  %v7533_v31 = vld [vmem:[#allocation21 + $0x138] sm:$0xff] }
 0x7c7   :  { %11063 = vmatpush2.bf16.msra.mxu0 %v12766_v4  ;;  %10935 = vmatprep.subr.bf16.mxu1 %v12885_v8  ;;  %v12590_v4 = vcombine.low %v7664_v44, %v7668_v29  ;;  %v12464_v8 = vcombine.low %v7537_v50, %v7541_v5  ;;  %v12457_v15 = vcombine.high %v7529_v33, %v7533_v31  ;;  %v7744_v29 = vld [vmem:[#allocation21 + $0x7d0] sm:$0xff]  ;;  %v7617_v50 = vld [vmem:[#allocation21 + $0x3d8] sm:$0xff] }
 0x7c8   :  { %11064 = vmatprep.subr.bf16.mxu0 %v12759_v30  ;;  %v12583_v30 = vcombine.high %v7656_v1, %v7660_v20  ;;  %v7621_v5 = vld [vmem:[#allocation21 + $0x3f8] sm:$0xff] }
 0x7ca   :  { %10936 = vmatpush2.bf16.msra.mxu1 %v12884_v63  ;;  %v7525_v63 = vld [vmem:[#allocation21 + $0xf8] sm:$0xff] }
 0x7cb   :  { %11065 = vmatpush2.bf16.msra.mxu0 %v12758_v26  ;;  %10937 = vmatprep.subr.bf16.mxu1 %v12877_v16  ;;  %v12456_v26 = vcombine.low %v7529_v33, %v7533_v31  ;;  %v12575_v16 = vcombine.high %v7648_v36, %v7652_v53  ;;  %v7609_v33 = vld [vmem:[#allocation21 + $0x398] sm:$0xff] }
 0x7cc   :  { %11066 = vmatprep.subr.bf16.mxu0 %v12751_v6  ;;  %v12449_v6 = vcombine.high %v7521_v22, %v7525_v63  ;;  %v7613_v31 = vld [vmem:[#allocation21 + $0x3b8] sm:$0xff] }
 0x7ce   :  { %10938 = vmatpush2.bf16.msra.mxu1 %v12876_v49  ;;  %v12574_v49 = vcombine.low %v7648_v36, %v7652_v53  ;;  %v7728_v36 = vld [vmem:[#allocation21 + $0x750] sm:$0xff] }
 0x7cf   :  { %11067 = vmatpush2.bf16.msra.mxu0 %v12750_v18  ;;  %10939 = vmatprep.subr.bf16.mxu1 %v12869_v19  ;;  %v12448_v18 = vcombine.low %v7521_v22, %v7525_v63  ;;  %v12567_v19 = vcombine.high %v7640_v11, %v7644_v28  ;;  %v7732_v53 = vld [vmem:[#allocation21 + $0x770] sm:$0xff]  ;;  %v7601_v22 = vld [vmem:[#allocation21 + $0x358] sm:$0xff] }
 0x7d0   :  { %11068 = vmatprep.subr.bf16.mxu0 %v12743_v23  ;;  %v12441_v23 = vcombine.high %v7513_v17, %v7517_v24  ;;  %v7605_v63 = vld [vmem:[#allocation21 + $0x378] sm:$0xff] }
 0x7d2   :  { %10940 = vmatpush2.bf16.msra.mxu1 %v12868_v51  ;;  %v12566_v51 = vcombine.low %v7640_v11, %v7644_v28  ;;  %v7720_v11 = vld [vmem:[#allocation21 + $0x710] sm:$0xff] }
 0x7d3   :  { %11069 = vmatpush2.bf16.msra.mxu0 %v12742_v21  ;;  %10995 = vmatprep.subr.bf16.mxu1 %v12607_v61  ;;  %v12440_v21 = vcombine.low %v7513_v17, %v7517_v24  ;;  %v12559_v61 = vcombine.high %v7632_v25, %v7636_v32  ;;  %v7724_v28 = vld [vmem:[#allocation21 + $0x730] sm:$0xff]  ;;  %v7593_v17 = vld [vmem:[#allocation21 + $0x318] sm:$0xff] }
 0x7d4   :  { %11124 = vmatprep.subr.bf16.mxu0 %v12481_v27  ;;  %v12433_v27 = vcombine.high %v7505_v55, %v7509_v56  ;;  %v7597_v24 = vld [vmem:[#allocation21 + $0x338] sm:$0xff]  ;;  %v7712_v25 = vld [vmem:[#allocation21 + $0x6d0] sm:$0xff] }
 0x7d5   :  { %10942 = vmatmul.mubr.bf16.vlgmr.msra.gmra.mxu1 %v14413_v14  ;;  %v7716_v32 = vld [vmem:[#allocation21 + $0x6f0] sm:$0xff] }
 0x7d6   :  { %11071 = vmatmul.mubr.bf16.vlgmr.msra.gmra.mxu0 %v14393_v38  ;;  %10996 = vmatpush1.bf16.msra.mxu1 %v12606_v3  ;;  %v7497_v3 = vld [vmem:[#allocation21 + $0x18] sm:$0xff] }
 0x7d7   :  { %11027 = vmatprep.mubr.bf16.mxu1 %v14361_v48  ;;  %11125 = vmatpush1.bf16.msra.mxu0 %v12480_v0  ;;  %v12432_v0 = vcombine.low %v7505_v55, %v7509_v56  ;;  %v12425_v44 = vcombine.high %v7497_v3, %v7501_v37  ;;  %v7585_v55 = vld [vmem:[#allocation21 + $0x2d8] sm:$0xff] }
 0x7d8   :  { %11156 = vmatprep.mubr.bf16.mxu0 %v14342_v34  ;;  %10997 = vmatprep.subr.bf16.mxu1 %v12599_v59  ;;  %v12582_v34 = vcombine.low %v7656_v1, %v7660_v20  ;;  %v12551_v59 = vcombine.high %v7624_v12, %v7628_v46  ;;  %v7736_v1 = vld [vmem:[#allocation21 + $0x790] sm:$0xff]  ;;  %v7589_v56 = vld [vmem:[#allocation21 + $0x2f8] sm:$0xff] }
 0x7d9   :  { %11126 = vmatprep.subr.bf16.mxu0 %v12473_v57  ;;  %v7748_v57 = vld [vmem:[#allocation21 + $0x7f0] sm:$0xff] }
 0x7da   :  { %10998 = vmatpush1.bf16.msra.mxu1 %v12598_v13  ;;  %v12550_v13 = vcombine.low %v7624_v12, %v7628_v46  ;;  %v7740_v20 = vld [vmem:[#allocation21 + $0x7b0] sm:$0xff] }
 0x7db   :  { %11127 = vmatpush1.bf16.msra.mxu0 %v12472_v54  ;;  %10999 = vmatprep.subr.bf16.mxu1 %v12591_v35  ;;  %v12424_v54 = vcombine.low %v7497_v3, %v7501_v37  ;;  %v12671_v35 = vcombine.high %v7744_v29, %v7748_v57  ;;  %v7704_v12 = vld [vmem:[#allocation21 + $0x690] sm:$0xff]  ;;  %v7577_v3 = vld [vmem:[#allocation21 + $0x298] sm:$0xff] }
 0x7dc   :  { %11128 = vmatprep.subr.bf16.mxu0 %v12465_v47  ;;  %v12545_v47 = vcombine.high %v7617_v50, %v7621_v5  ;;  %v7708_v46 = vld [vmem:[#allocation21 + $0x6b0] sm:$0xff]  ;;  %v7581_v37 = vld [vmem:[#allocation21 + $0x2b8] sm:$0xff] }
 0x7de   :  { %11000 = vmatpush1.bf16.msra.mxu1 %v12590_v4  ;;  %v12670_v4 = vcombine.low %v7744_v29, %v7748_v57  ;;  %v7696_v29 = vld [vmem:[#allocation21 + $0x650] sm:$0xff] }
 0x7df   :  { %11129 = vmatpush1.bf16.msra.mxu0 %v12464_v8  ;;  %11001 = vmatprep.subr.bf16.mxu1 %v12583_v30  ;;  %v12544_v8 = vcombine.low %v7617_v50, %v7621_v5  ;;  %v12663_v30 = vcombine.high %v7736_v1, %v7740_v20  ;;  %v7700_v57 = vld [vmem:[#allocation21 + $0x670] sm:$0xff]  ;;  %v7569_v50 = vld [vmem:[#allocation21 + $0x258] sm:$0xff] }
 0x7e0   :  { %11130 = vmatprep.subr.bf16.mxu0 %v12457_v15  ;;  %v12537_v15 = vcombine.high %v7609_v33, %v7613_v31  ;;  %v7573_v5 = vld [vmem:[#allocation21 + $0x278] sm:$0xff] }
 0x7e2   :  { %11002 = vmatpush1.bf16.msra.mxu1 %v12582_v34  ;;  %v12662_v34 = vcombine.low %v7736_v1, %v7740_v20  ;;  %v7688_v1 = vld [vmem:[#allocation21 + $0x610] sm:$0xff] }
 0x7e3   :  { %11131 = vmatpush1.bf16.msra.mxu0 %v12456_v26  ;;  %11003 = vmatprep.subr.bf16.mxu1 %v12575_v16  ;;  %v12536_v26 = vcombine.low %v7609_v33, %v7613_v31  ;;  %v12655_v16 = vcombine.high %v7728_v36, %v7732_v53  ;;  %v7692_v20 = vld [vmem:[#allocation21 + $0x630] sm:$0xff]  ;;  %v7561_v33 = vld [vmem:[#allocation21 + $0x218] sm:$0xff] }
 0x7e4   :  { %11132 = vmatprep.subr.bf16.mxu0 %v12449_v6  ;;  %v12529_v6 = vcombine.high %v7601_v22, %v7605_v63  ;;  %v7565_v31 = vld [vmem:[#allocation21 + $0x238] sm:$0xff] }
 0x7e6   :  { %11004 = vmatpush1.bf16.msra.mxu1 %v12574_v49  ;;  %v12654_v49 = vcombine.low %v7728_v36, %v7732_v53  ;;  %v7936_v36 = vld [vmem:[#allocation21 + $0xdd0] sm:$0xff] }
 0x7e7   :  { %11133 = vmatpush1.bf16.msra.mxu0 %v12448_v18  ;;  %11005 = vmatprep.subr.bf16.mxu1 %v12567_v19  ;;  %v12528_v18 = vcombine.low %v7601_v22, %v7605_v63  ;;  %v12647_v19 = vcombine.high %v7720_v11, %v7724_v28  ;;  %v7940_v53 = vld [vmem:[#allocation21 + $0xdf0] sm:$0xff]  ;;  %v7809_v22 = vld [vmem:[#allocation21 + $0x9d8] sm:$0xff] }
 0x7e8   :  { %11134 = vmatprep.subr.bf16.mxu0 %v12441_v23  ;;  %v12521_v23 = vcombine.high %v7593_v17, %v7597_v24  ;;  %v7813_v63 = vld [vmem:[#allocation21 + $0x9f8] sm:$0xff] }
 0x7ea   :  { %11006 = vmatpush1.bf16.msra.mxu1 %v12566_v51  ;;  %v12646_v51 = vcombine.low %v7720_v11, %v7724_v28  ;;  %v7928_v11 = vld [vmem:[#allocation21 + $0xd90] sm:$0xff] }
 0x7eb   :  { %11135 = vmatpush1.bf16.msra.mxu0 %v12440_v21  ;;  %11007 = vmatprep.subr.bf16.mxu1 %v12559_v61  ;;  %v12520_v21 = vcombine.low %v7593_v17, %v7597_v24  ;;  %v12639_v61 = vcombine.high %v7712_v25, %v7716_v32  ;;  %v7932_v28 = vld [vmem:[#allocation21 + $0xdb0] sm:$0xff]  ;;  %v12862_v17 = vcombine.low %v7936_v36, %v7940_v53  ;;  %v7801_v24 = vld [vmem:[#allocation21 + $0x998] sm:$0xff] }
 0x7ec   :  { %11136 = vmatprep.subr.bf16.mxu0 %v12433_v27  ;;  %v12513_v27 = vcombine.high %v7585_v55, %v7589_v56 }
 0x7ee   :  { %11008 = vmatpush1.bf16.msra.mxu1 %v12558_v10  ;;  %v12638_v10 = vcombine.low %v7712_v25, %v7716_v32  ;;  %v7924_v25 = vld [vmem:[#allocation21 + $0xd70] sm:$0xff] }
 0x7ef   :  { %11137 = vmatpush1.bf16.msra.mxu0 %v12432_v0  ;;  %11009 = vmatprep.subr.bf16.mxu1 %v12551_v59  ;;  %v12512_v0 = vcombine.low %v7585_v55, %v7589_v56  ;;  %v12631_v59 = vcombine.high %v7704_v12, %v7708_v46  ;;  %v7793_v55 = vld [vmem:[#allocation21 + $0x958] sm:$0xff] }
 0x7f0   :  { %11138 = vmatprep.subr.bf16.mxu0 %v12425_v44  ;;  %v12505_v44 = vcombine.high %v7577_v3, %v7581_v37  ;;  %v7797_v56 = vld [vmem:[#allocation21 + $0x978] sm:$0xff] }
 0x7f2   :  { %11010 = vmatpush1.bf16.msra.mxu1 %v12550_v13  ;;  %v12630_v13 = vcombine.low %v7704_v12, %v7708_v46  ;;  %v7912_v12 = vld [vmem:[#allocation21 + $0xd10] sm:$0xff] }
 0x7f3   :  { %11139 = vmatpush1.bf16.msra.mxu0 %v12424_v54  ;;  %11011 = vmatprep.subr.bf16.mxu1 %v12671_v35  ;;  %v12504_v54 = vcombine.low %v7577_v3, %v7581_v37  ;;  %v12623_v35 = vcombine.high %v7696_v29, %v7700_v57  ;;  %v7916_v46 = vld [vmem:[#allocation21 + $0xd30] sm:$0xff]  ;;  %v7785_v3 = vld [vmem:[#allocation21 + $0x918] sm:$0xff] }
 0x7f4   :  { %11140 = vmatprep.subr.bf16.mxu0 %v12545_v47  ;;  %v12497_v47 = vcombine.high %v7569_v50, %v7573_v5  ;;  %v7789_v37 = vld [vmem:[#allocation21 + $0x938] sm:$0xff] }
 0x7f6   :  { %11012 = vmatpush2.bf16.msra.mxu1 %v12670_v4  ;;  %v12622_v4 = vcombine.low %v7696_v29, %v7700_v57  ;;  %v7908_v29 = vld [vmem:[#allocation21 + $0xcf0] sm:$0xff]  ;;  %v7777_v57 = vld [vmem:[#allocation21 + $0x8d8] sm:$0xff] }
 0x7f7   :  { %11141 = vmatpush2.bf16.msra.mxu0 %v12544_v8  ;;  %11013 = vmatprep.subr.bf16.mxu1 %v12663_v30  ;;  %v12496_v8 = vcombine.low %v7569_v50, %v7573_v5  ;;  %v12615_v30 = vcombine.high %v7688_v1, %v7692_v20  ;;  %v7781_v50 = vld [vmem:[#allocation21 + $0x8f8] sm:$0xff]  ;;  %v12712_v5 = vcombine.low %v7785_v3, %v7789_v37 }
 0x7f8   :  { %11142 = vmatprep.subr.bf16.mxu0 %v12537_v15  ;;  %v12489_v15 = vcombine.high %v7561_v33, %v7565_v31 }
 0x7fa   :  { %11014 = vmatpush2.bf16.msra.mxu1 %v12662_v34  ;;  %v12614_v34 = vcombine.low %v7688_v1, %v7692_v20  ;;  %v7769_v1 = vld [vmem:[#allocation21 + $0x898] sm:$0xff] }
 0x7fb   :  { %11143 = vmatpush2.bf16.msra.mxu0 %v12536_v26  ;;  %11015 = vmatprep.subr.bf16.mxu1 %v12655_v16  ;;  %v12488_v26 = vcombine.low %v7561_v33, %v7565_v31  ;;  %v12863_v16 = vcombine.high %v7936_v36, %v7940_v53  ;;  %v7773_v20 = vld [vmem:[#allocation21 + $0x8b8] sm:$0xff]  ;;  %v12704_v31 = vcombine.low %v7777_v57, %v7781_v50 }
 0x7fc   :  { %11144 = vmatprep.subr.bf16.mxu0 %v12529_v6  ;;  %v12737_v6 = vcombine.high %v7809_v22, %v7813_v63  ;;  %v7761_v36 = vld [vmem:[#allocation21 + $0x858] sm:$0xff] }
 0x7fd   :  { %v7765_v53 = vld [vmem:[#allocation21 + $0x878] sm:$0xff] }
 0x7fe   :  { %11016 = vmatpush2.bf16.msra.mxu1 %v12654_v49  ;;  %v7805_v49 = vld [vmem:[#allocation21 + $0x9b8] sm:$0xff] }
 0x7ff   :  { %11145 = vmatpush2.bf16.msra.mxu0 %v12528_v18  ;;  %11017 = vmatprep.subr.bf16.mxu1 %v12647_v19  ;;  %v12736_v18 = vcombine.low %v7809_v22, %v7813_v63  ;;  %v12855_v19 = vcombine.high %v7928_v11, %v7932_v28  ;;  %v12729_v32 = vcombine.high %v7801_v24, %v7805_v49 }
 0x800   :  { %11146 = vmatprep.subr.bf16.mxu0 %v12521_v23  ;;  %v7920_v23 = vld [vmem:[#allocation21 + $0xd50] sm:$0xff]  ;;  %v12696_v63 = vcombine.low %v7769_v1, %v7773_v20 }
 0x802   :  { %11018 = vmatpush2.bf16.msra.mxu1 %v12646_v51  ;;  %v12854_v51 = vcombine.low %v7928_v11, %v7932_v28  ;;  %v7753_v11 = vld [vmem:[#allocation21 + $0x818] sm:$0xff] }
 0x803   :  { %11147 = vmatpush2.bf16.msra.mxu0 %v12520_v21  ;;  %11019 = vmatprep.subr.bf16.mxu1 %v12639_v61  ;;  %v12728_v21 = vcombine.low %v7801_v24, %v7805_v49  ;;  %v12847_v61 = vcombine.high %v7920_v23, %v7924_v25  ;;  %v7757_v28 = vld [vmem:[#allocation21 + $0x838] sm:$0xff]  ;;  %v12688_v24 = vcombine.low %v7761_v36, %v7765_v53 }
 0x804   :  { %11148 = vmatprep.subr.bf16.mxu0 %v12513_v27  ;;  %v12721_v27 = vcombine.high %v7793_v55, %v7797_v56 }
 0x806   :  { %11020 = vmatpush2.bf16.msra.mxu1 %v12638_v10  ;;  %v12846_v10 = vcombine.low %v7920_v23, %v7924_v25  ;;  %v8004_v23 = vld [vmem:[#allocation21 + $0xff0] sm:$0xff]  ;;  %v7873_v25 = vld [vmem:[#allocation21 + $0xbd8] sm:$0xff] }
 0x807   :  { %11149 = vmatpush2.bf16.msra.mxu0 %v12512_v0  ;;  %11021 = vmatprep.subr.bf16.mxu1 %v12631_v59  ;;  %v12839_v0 = vcombine.high %v7912_v12, %v7916_v46  ;;  %v12713_v59 = vcombine.high %v7785_v3, %v7789_v37 }
 0x808   :  { %11150 = vmatprep.subr.bf16.mxu0 %v12505_v44  ;;  %v7904_v44 = vld [vmem:[#allocation21 + $0xcd0] sm:$0xff] }
 0x809   :  { %v12830_v33 = vcombine.low %v7904_v44, %v7908_v29 }
 0x80a   :  { %11022 = vmatpush2.bf16.msra.mxu1 %v12630_v13  ;;  %v12831_v13 = vcombine.high %v7904_v44, %v7908_v29  ;;  %v7857_v44 = vld [vmem:[#allocation21 + $0xb58] sm:$0xff] }
 0x80b   :  { %11151 = vmatpush2.bf16.msra.mxu0 %v12504_v54  ;;  %11023 = vmatprep.subr.bf16.mxu1 %v12623_v35  ;;  %v12705_v54 = vcombine.high %v7777_v57, %v7781_v50  ;;  %v7896_v35 = vld [vmem:[#allocation21 + $0xc90] sm:$0xff]  ;;  %v7861_v29 = vld [vmem:[#allocation21 + $0xb78] sm:$0xff] }
 0x80c   :  { %11152 = vmatprep.subr.bf16.mxu0 %v12497_v47  ;;  %v7900_v47 = vld [vmem:[#allocation21 + $0xcb0] sm:$0xff] }
 0x80d   :  { %v12822_v22 = vcombine.low %v7896_v35, %v7900_v47 }
 0x80e   :  { %11024 = vmatpush2.bf16.msra.mxu1 %v12622_v4  ;;  %v12823_v4 = vcombine.high %v7896_v35, %v7900_v47  ;;  %v7849_v35 = vld [vmem:[#allocation21 + $0xb18] sm:$0xff] }
 0x80f   :  { %11153 = vmatpush2.bf16.msra.mxu0 %v12496_v8  ;;  %11025 = vmatprep.subr.bf16.mxu1 %v12615_v30  ;;  %v12697_v8 = vcombine.high %v7769_v1, %v7773_v20  ;;  %v7888_v30 = vld [vmem:[#allocation21 + $0xc50] sm:$0xff]  ;;  %v7853_v47 = vld [vmem:[#allocation21 + $0xb38] sm:$0xff]  ;;  %v12784_v20 = vcombine.low %v7857_v44, %v7861_v29 }
 0x810   :  { %11154 = vmatprep.subr.bf16.mxu0 %v12489_v15  ;;  %v7892_v15 = vld [vmem:[#allocation21 + $0xc70] sm:$0xff] }
 0x812   :  { %11026 = vmatpush2.bf16.msra.mxu1 %v12614_v34  ;;  %v12815_v34 = vcombine.high %v7888_v30, %v7892_v15 }
 0x813   :  { %11155 = vmatpush2.bf16.msra.mxu0 %v12488_v26  ;;  %11081 = vmatprep.subr.bf16.mxu1 %v12863_v16  ;;  %v12689_v26 = vcombine.high %v7761_v36, %v7765_v53  ;;  %v7880_v16 = vld [vmem:[#allocation21 + $0xc10] sm:$0xff]  ;;  %v12776_v53 = vcombine.low %v7849_v35, %v7853_v47 }
 0x814   :  { %11210 = vmatprep.subr.bf16.mxu0 %v12737_v6  ;;  %v7884_v6 = vld [vmem:[#allocation21 + $0xc30] sm:$0xff] }
 0x815   :  { %11028 = vmatmul.mubr.bf16.vlgmr.msra.gmra.mxu1 %v14351_v60  ;;  %v12807_v49 = vcombine.high %v7880_v16, %v7884_v6 }
 0x816   :  { %11157 = vmatmul.mubr.bf16.vlgmr.msra.gmra.mxu0 %v14303_v62  ;;  %11082 = vmatpush1.bf16.msra.mxu1 %v12862_v17  ;;  %v12720_v62 = vcombine.low %v7793_v55, %v7797_v56  ;;  %v12814_v17 = vcombine.low %v7888_v30, %v7892_v15  ;;  %v12806_v55 = vcombine.low %v7880_v16, %v7884_v6  ;;  %v7841_v30 = vld [vmem:[#allocation21 + $0xad8] sm:$0xff] }
 0x817   :  { %11113 = vmatprep.mubr.bf16.mxu1 %v14411_v58  ;;  %11211 = vmatpush1.bf16.msra.mxu0 %v12736_v18  ;;  %v12681_v18 = vcombine.high %v7753_v11, %v7757_v28  ;;  %v12680_v56 = vcombine.low %v7753_v11, %v7757_v28  ;;  %v7845_v15 = vld [vmem:[#allocation21 + $0xaf8] sm:$0xff] }
 0x818   :  { %11242 = vmatprep.mubr.bf16.mxu0 %v14385_v52  ;;  %11083 = vmatprep.subr.bf16.mxu1 %v12855_v19  ;;  %v12838_v52 = vcombine.low %v7912_v12, %v7916_v46  ;;  %v8000_v19 = vld [vmem:[#allocation21 + $0xfd0] sm:$0xff]  ;;  %v7865_v12 = vld [vmem:[#allocation21 + $0xb98] sm:$0xff]  ;;  %v12768_v28 = vcombine.low %v7841_v30, %v7845_v15 }
 0x819   :  { %11212 = vmatprep.subr.bf16.mxu0 %v12729_v32  ;;  %v7877_v32 = vld [vmem:[#allocation21 + $0xbf8] sm:$0xff]  ;;  %v12926_v3 = vcombine.low %v8000_v19, %v8004_v23 }
 0x81a   :  { %11084 = vmatpush1.bf16.msra.mxu1 %v12854_v51  ;;  %v12927_v51 = vcombine.high %v8000_v19, %v8004_v23  ;;  %v7869_v46 = vld [vmem:[#allocation21 + $0xbb8] sm:$0xff]  ;;  %v12800_v37 = vcombine.low %v7873_v25, %v7877_v32 }
 0x81b   :  { %11213 = vmatpush1.bf16.msra.mxu0 %v12728_v21  ;;  %11085 = vmatprep.subr.bf16.mxu1 %v12847_v61  ;;  %v12801_v21 = vcombine.high %v7873_v25, %v7877_v32  ;;  %v7992_v61 = vld [vmem:[#allocation21 + $0xf90] sm:$0xff]  ;;  %v12792_v50 = vcombine.low %v7865_v12, %v7869_v46  ;;  %v7833_v16 = vld [vmem:[#allocation21 + $0xa98] sm:$0xff] }
 0x81c   :  { %11214 = vmatprep.subr.bf16.mxu0 %v12721_v27  ;;  %v7996_v27 = vld [vmem:[#allocation21 + $0xfb0] sm:$0xff]  ;;  %v7837_v6 = vld [vmem:[#allocation21 + $0xab8] sm:$0xff] }
 0x81d   :  { %v12918_v57 = vcombine.low %v7992_v61, %v7996_v27  ;;  %v7825_v19 = vld [vmem:[#allocation21 + $0xa58] sm:$0xff]  ;;  %v12760_v32 = vcombine.low %v7833_v16, %v7837_v6 }
 0x81e   :  { %11086 = vmatpush1.bf16.msra.mxu1 %v12846_v10  ;;  %v12919_v10 = vcombine.high %v7992_v61, %v7996_v27  ;;  %v7829_v23 = vld [vmem:[#allocation21 + $0xa78] sm:$0xff] }
 0x81f   :  { %11215 = vmatpush1.bf16.msra.mxu0 %v12720_v62  ;;  %11087 = vmatprep.subr.bf16.mxu1 %v12839_v0  ;;  %v12793_v62 = vcombine.high %v7865_v12, %v7869_v46  ;;  %v7984_v0 = vld [vmem:[#allocation21 + $0xf50] sm:$0xff]  ;;  %v7817_v61 = vld [vmem:[#allocation21 + $0xa18] sm:$0xff]  ;;  %v12752_v46 = vcombine.low %v7825_v19, %v7829_v23 }
 0x820   :  { %11216 = vmatprep.subr.bf16.mxu0 %v12713_v59  ;;  %v7988_v59 = vld [vmem:[#allocation21 + $0xf70] sm:$0xff]  ;;  %v7821_v27 = vld [vmem:[#allocation21 + $0xa38] sm:$0xff] }
 0x821   :  { %v12910_v1 = vcombine.low %v7984_v0, %v7988_v59 }
 0x822   :  { %11088 = vmatpush1.bf16.msra.mxu1 %v12838_v52  ;;  %v12911_v52 = vcombine.high %v7984_v0, %v7988_v59  ;;  %v12744_v59 = vcombine.low %v7817_v61, %v7821_v27 }
 0x823   :  { %11217 = vmatpush1.bf16.msra.mxu0 %v12712_v5  ;;  %11089 = vmatprep.subr.bf16.mxu1 %v12831_v13  ;;  %v12785_v5 = vcombine.high %v7857_v44, %v7861_v29  ;;  %v7976_v13 = vld [vmem:[#allocation21 + $0xf10] sm:$0xff]  ;;  %v7673_v29 = vld [vmem:[#allocation21 + $0x598] sm:$0xff] }
 0x824   :  { %11218 = vmatprep.subr.bf16.mxu0 %v12705_v54  ;;  %v7980_v54 = vld [vmem:[#allocation21 + $0xf30] sm:$0xff] }
 0x825   :  { %v12902_v36 = vcombine.low %v7976_v13, %v7980_v54 }
 0x826   :  { %11090 = vmatpush1.bf16.msra.mxu1 %v12830_v33  ;;  %v12903_v33 = vcombine.high %v7976_v13, %v7980_v54  ;;  %v7669_v13 = vld [vmem:[#allocation21 + $0x578] sm:$0xff] }
 0x827   :  { %11219 = vmatpush1.bf16.msra.mxu0 %v12704_v31  ;;  %11091 = vmatprep.subr.bf16.mxu1 %v12823_v4  ;;  %v12777_v31 = vcombine.high %v7849_v35, %v7853_v47  ;;  %v7968_v4 = vld [vmem:[#allocation21 + $0xed0] sm:$0xff]  ;;  %v7657_v47 = vld [vmem:[#allocation21 + $0x518] sm:$0xff] }
 0x828   :  { %11220 = vmatprep.subr.bf16.mxu0 %v12697_v8  ;;  %v7972_v8 = vld [vmem:[#allocation21 + $0xef0] sm:$0xff] }
 0x829   :  { %v12894_v11 = vcombine.low %v7968_v4, %v7972_v8 }
 0x82a   :  { %11092 = vmatpush1.bf16.msra.mxu1 %v12822_v22  ;;  %v12895_v22 = vcombine.high %v7968_v4, %v7972_v8  ;;  %v7653_v4 = vld [vmem:[#allocation21 + $0x4f8] sm:$0xff] }
 0x82b   :  { %11221 = vmatpush1.bf16.msra.mxu0 %v12696_v63  ;;  %11093 = vmatprep.subr.bf16.mxu1 %v12815_v34  ;;  %v12769_v63 = vcombine.high %v7841_v30, %v7845_v15  ;;  %v7960_v34 = vld [vmem:[#allocation21 + $0xe90] sm:$0xff]  ;;  %v7641_v15 = vld [vmem:[#allocation21 + $0x498] sm:$0xff] }
 0x82c   :  { %11222 = vmatprep.subr.bf16.mxu0 %v12689_v26  ;;  %v7964_v26 = vld [vmem:[#allocation21 + $0xeb0] sm:$0xff] }
 0x82d   :  { %v12886_v25 = vcombine.low %v7960_v34, %v7964_v26 }
 0x82e   :  { %11094 = vmatpush1.bf16.msra.mxu1 %v12814_v17  ;;  %v12887_v17 = vcombine.high %v7960_v34, %v7964_v26  ;;  %v7625_v26 = vld [vmem:[#allocation21 + $0x418] sm:$0xff] }
 0x82f   :  { %11223 = vmatpush1.bf16.msra.mxu0 %v12688_v24  ;;  %11095 = vmatprep.subr.bf16.mxu1 %v12807_v49  ;;  %v12761_v24 = vcombine.high %v7833_v16, %v7837_v6  ;;  %v7952_v49 = vld [vmem:[#allocation21 + $0xe50] sm:$0xff]  ;;  %v7629_v16 = vld [vmem:[#allocation21 + $0x438] sm:$0xff] }
 0x830   :  { %11224 = vmatprep.subr.bf16.mxu0 %v12681_v18  ;;  %v7956_v18 = vld [vmem:[#allocation21 + $0xe70] sm:$0xff] }
 0x831   :  { %v12878_v12 = vcombine.low %v7952_v49, %v7956_v18 }
 0x832   :  { %11096 = vmatpush1.bf16.msra.mxu1 %v12806_v55  ;;  %v12879_v55 = vcombine.high %v7952_v49, %v7956_v18  ;;  %v7737_v18 = vld [vmem:[#allocation21 + $0x798] sm:$0xff] }
 0x833   :  { %11225 = vmatpush1.bf16.msra.mxu0 %v12680_v56  ;;  %11097 = vmatprep.subr.bf16.mxu1 %v12927_v51  ;;  %v12753_v56 = vcombine.high %v7825_v19, %v7829_v23  ;;  %v7944_v51 = vld [vmem:[#allocation21 + $0xe10] sm:$0xff]  ;;  %v7741_v19 = vld [vmem:[#allocation21 + $0x7b8] sm:$0xff] }
 0x834   :  { %11226 = vmatprep.subr.bf16.mxu0 %v12801_v21  ;;  %v7948_v21 = vld [vmem:[#allocation21 + $0xe30] sm:$0xff] }
 0x835   :  { %v12870_v0 = vcombine.low %v7944_v51, %v7948_v21 }
 0x836   :  { %11098 = vmatpush2.bf16.msra.mxu1 %v12926_v3  ;;  %v12871_v3 = vcombine.high %v7944_v51, %v7948_v21  ;;  %v7721_v21 = vld [vmem:[#allocation21 + $0x718] sm:$0xff] }
 0x837   :  { %11227 = vmatpush2.bf16.msra.mxu0 %v12800_v37  ;;  %11099 = vmatprep.subr.bf16.mxu1 %v12919_v10  ;;  %v12745_v37 = vcombine.high %v7817_v61, %v7821_v27  ;;  %v7681_v10 = vld [vmem:[#allocation21 + $0x5d8] sm:$0xff] }
 0x838   :  { %11228 = vmatprep.subr.bf16.mxu0 %v12793_v62  ;;  %v7685_v62 = vld [vmem:[#allocation21 + $0x5f8] sm:$0xff] }
 0x839   :  { %v12609_v44 = vcombine.high %v7681_v10, %v7685_v62  ;;  %v7725_v61 = vld [vmem:[#allocation21 + $0x738] sm:$0xff] }
 0x83a   :  { %11100 = vmatpush2.bf16.msra.mxu1 %v12918_v57  ;;  %v7677_v57 = vld [vmem:[#allocation21 + $0x5b8] sm:$0xff] }
 0x83b   :  { %11229 = vmatpush2.bf16.msra.mxu0 %v12792_v50  ;;  %11101 = vmatprep.subr.bf16.mxu1 %v12911_v52  ;;  %v12608_v50 = vcombine.low %v7681_v10, %v7685_v62  ;;  %v12601_v52 = vcombine.high %v7673_v29, %v7677_v57  ;;  %v12600_v54 = vcombine.low %v7673_v29, %v7677_v57  ;;  %v7705_v62 = vld [vmem:[#allocation21 + $0x698] sm:$0xff] }
 0x83c   :  { %11230 = vmatprep.subr.bf16.mxu0 %v12785_v5  ;;  %v7665_v5 = vld [vmem:[#allocation21 + $0x558] sm:$0xff] }
 0x83d   :  { %v12593_v35 = vcombine.high %v7665_v5, %v7669_v13  ;;  %v7697_v29 = vld [vmem:[#allocation21 + $0x658] sm:$0xff] }
 0x83e   :  { %11102 = vmatpush2.bf16.msra.mxu1 %v12910_v1  ;;  %v7661_v1 = vld [vmem:[#allocation21 + $0x538] sm:$0xff] }
 0x83f   :  { %11231 = vmatpush2.bf16.msra.mxu0 %v12784_v20  ;;  %11103 = vmatprep.subr.bf16.mxu1 %v12903_v33  ;;  %v12592_v20 = vcombine.low %v7665_v5, %v7669_v13  ;;  %v12585_v33 = vcombine.high %v7657_v47, %v7661_v1  ;;  %v12584_v8 = vcombine.low %v7657_v47, %v7661_v1  ;;  %v7701_v57 = vld [vmem:[#allocation21 + $0x678] sm:$0xff] }
 0x840   :  { %11232 = vmatprep.subr.bf16.mxu0 %v12777_v31  ;;  %v7649_v31 = vld [vmem:[#allocation21 + $0x4d8] sm:$0xff] }
 0x841   :  { %v12577_v30 = vcombine.high %v7649_v31, %v7653_v4  ;;  %v7689_v5 = vld [vmem:[#allocation21 + $0x618] sm:$0xff] }
 0x842   :  { %11104 = vmatpush2.bf16.msra.mxu1 %v12902_v36  ;;  %v12576_v36 = vcombine.low %v7649_v31, %v7653_v4  ;;  %v7693_v13 = vld [vmem:[#allocation21 + $0x638] sm:$0xff] }
 0x843   :  { %11233 = vmatpush2.bf16.msra.mxu0 %v12776_v53  ;;  %11105 = vmatprep.subr.bf16.mxu1 %v12895_v22  ;;  %v7633_v53 = vld [vmem:[#allocation21 + $0x458] sm:$0xff] }
 0x844   :  { %11234 = vmatprep.subr.bf16.mxu0 %v12769_v63  ;;  %v7637_v22 = vld [vmem:[#allocation21 + $0x478] sm:$0xff] }
 0x845   :  { %v12561_v34 = vcombine.high %v7633_v53, %v7637_v22  ;;  %v12560_v6 = vcombine.low %v7633_v53, %v7637_v22  ;;  %v7937_v47 = vld [vmem:[#allocation21 + $0xdd8] sm:$0xff] }
 0x846   :  { %11106 = vmatpush2.bf16.msra.mxu1 %v12894_v11  ;;  %v12553_v11 = vcombine.high %v7625_v26, %v7629_v16  ;;  %v7941_v1 = vld [vmem:[#allocation21 + $0xdf8] sm:$0xff] }
 0x847   :  { %11235 = vmatpush2.bf16.msra.mxu0 %v12768_v28  ;;  %11107 = vmatprep.subr.bf16.mxu1 %v12887_v17  ;;  %v7745_v28 = vld [vmem:[#allocation21 + $0x7d8] sm:$0xff] }
 0x848   :  { %11236 = vmatprep.subr.bf16.mxu0 %v12761_v24  ;;  %v7749_v17 = vld [vmem:[#allocation21 + $0x7f8] sm:$0xff]  ;;  %v12552_v24 = vcombine.low %v7625_v26, %v7629_v16 }
 0x849   :  { %v12673_v49 = vcombine.high %v7745_v28, %v7749_v17  ;;  %v12672_v23 = vcombine.low %v7745_v28, %v7749_v17  ;;  %v7929_v31 = vld [vmem:[#allocation21 + $0xd98] sm:$0xff] }
 0x84a   :  { %11108 = vmatpush2.bf16.msra.mxu1 %v12886_v25  ;;  %v12665_v25 = vcombine.high %v7737_v18, %v7741_v19  ;;  %v7933_v4 = vld [vmem:[#allocation21 + $0xdb8] sm:$0xff] }
 0x84b   :  { %11237 = vmatpush2.bf16.msra.mxu0 %v12760_v32  ;;  %11109 = vmatprep.subr.bf16.mxu1 %v12879_v55  ;;  %v7729_v32 = vld [vmem:[#allocation21 + $0x758] sm:$0xff] }
 0x84c   :  { %11238 = vmatprep.subr.bf16.mxu0 %v12753_v56  ;;  %v7733_v55 = vld [vmem:[#allocation21 + $0x778] sm:$0xff]  ;;  %v12664_v56 = vcombine.low %v7737_v18, %v7741_v19 }
 0x84d   :  { %v12657_v51 = vcombine.high %v7729_v32, %v7733_v55  ;;  %v12656_v27 = vcombine.low %v7729_v32, %v7733_v55  ;;  %v7913_v53 = vld [vmem:[#allocation21 + $0xd18] sm:$0xff] }
 0x84e   :  { %11110 = vmatpush2.bf16.msra.mxu1 %v12878_v12  ;;  %v12649_v12 = vcombine.high %v7721_v21, %v7725_v61  ;;  %v7917_v22 = vld [vmem:[#allocation21 + $0xd38] sm:$0xff] }
 0x84f   :  { %11239 = vmatpush2.bf16.msra.mxu0 %v12752_v46  ;;  %11111 = vmatprep.subr.bf16.mxu1 %v12871_v3  ;;  %v7713_v46 = vld [vmem:[#allocation21 + $0x6d8] sm:$0xff] }
 0x850   :  { %11240 = vmatprep.subr.bf16.mxu0 %v12745_v37  ;;  %v7717_v3 = vld [vmem:[#allocation21 + $0x6f8] sm:$0xff]  ;;  %v12648_v37 = vcombine.low %v7721_v21, %v7725_v61 }
 0x851   :  { %v12641_v10 = vcombine.high %v7713_v46, %v7717_v3  ;;  %v7905_v26 = vld [vmem:[#allocation21 + $0xcd8] sm:$0xff] }
 0x852   :  { %11112 = vmatpush2.bf16.msra.mxu1 %v12870_v0  ;;  %v7709_v0 = vld [vmem:[#allocation21 + $0x6b8] sm:$0xff] }
 0x853   :  { %11241 = vmatpush2.bf16.msra.mxu0 %v12744_v59  ;;  %11167 = vmatprep.subr.bf16.mxu1 %v12609_v44  ;;  %v12640_v59 = vcombine.low %v7713_v46, %v7717_v3  ;;  %v12633_v44 = vcombine.high %v7705_v62, %v7709_v0  ;;  %v7909_v16 = vld [vmem:[#allocation21 + $0xcf8] sm:$0xff] }
 0x854   :  { %v7897_v28 = vld [vmem:[#allocation21 + $0xc98] sm:$0xff]  ;;  %v12832_v17 = vcombine.low %v7905_v26, %v7909_v16 }
 0x855   :  { %11114 = vmatmul.mubr.bf16.vlgmr.msra.gmra.mxu1 %v14413_v14 }
 0x856   :  { %11243 = vmatmul.mubr.bf16.vlgmr.msra.gmra.mxu0 %v14393_v38  ;;  %11168 = vmatpush1.bf16.msra.mxu1 %v12608_v50  ;;  %v7645_v38 = vld [vmem:[#allocation21 + $0x4b8] sm:$0xff]  ;;  %v12632_v50 = vcombine.low %v7705_v62, %v7709_v0 }
 0x857   :  { %11199 = vmatprep.mubr.bf16.mxu1 %v14361_v48  ;;  %11169 = vmatprep.subr.bf16.mxu1 %v12601_v52  ;;  %v12569_v48 = vcombine.high %v7641_v15, %v7645_v38  ;;  %v12568_v63 = vcombine.low %v7641_v15, %v7645_v38  ;;  %v12625_v52 = vcombine.high %v7697_v29, %v7701_v57  ;;  %v7921_v15 = vld [vmem:[#allocation21 + $0xd58] sm:$0xff] }
 0x858   :  { %v7925_v38 = vld [vmem:[#allocation21 + $0xd78] sm:$0xff] }
 0x85a   :  { %11170 = vmatpush1.bf16.msra.mxu1 %v12600_v54  ;;  %v12624_v54 = vcombine.low %v7697_v29, %v7701_v57 }
 0x85b   :  { %11171 = vmatprep.subr.bf16.mxu1 %v12593_v35  ;;  %v12617_v35 = vcombine.high %v7689_v5, %v7693_v13 }
 0x85e   :  { %11172 = vmatpush1.bf16.msra.mxu1 %v12592_v20  ;;  %v12616_v20 = vcombine.low %v7689_v5, %v7693_v13 }
 0x85f   :  { %11173 = vmatprep.subr.bf16.mxu1 %v12585_v33  ;;  %v12865_v33 = vcombine.high %v7937_v47, %v7941_v1 }
 0x862   :  { %11174 = vmatpush1.bf16.msra.mxu1 %v12584_v8  ;;  %v12864_v8 = vcombine.low %v7937_v47, %v7941_v1 }
 0x863   :  { %11175 = vmatprep.subr.bf16.mxu1 %v12577_v30  ;;  %v12857_v30 = vcombine.high %v7929_v31, %v7933_v4 }
 0x866   :  { %11176 = vmatpush1.bf16.msra.mxu1 %v12576_v36  ;;  %v12856_v36 = vcombine.low %v7929_v31, %v7933_v4 }
 0x867   :  { %11177 = vmatprep.subr.bf16.mxu1 %v12569_v48  ;;  %v12849_v48 = vcombine.high %v7921_v15, %v7925_v38 }
 0x86a   :  { %11178 = vmatpush1.bf16.msra.mxu1 %v12568_v63  ;;  %v12848_v63 = vcombine.low %v7921_v15, %v7925_v38 }
 0x86b   :  { %11179 = vmatprep.subr.bf16.mxu1 %v12561_v34  ;;  %v12841_v34 = vcombine.high %v7913_v53, %v7917_v22 }
 0x86e   :  { %11180 = vmatpush1.bf16.msra.mxu1 %v12560_v6  ;;  %v12840_v6 = vcombine.low %v7913_v53, %v7917_v22 }
 0x86f   :  { %11181 = vmatprep.subr.bf16.mxu1 %v12553_v11  ;;  %v12833_v11 = vcombine.high %v7905_v26, %v7909_v16 }
 0x872   :  { %11182 = vmatpush1.bf16.msra.mxu1 %v12552_v24  ;;  %v7889_v24 = vld [vmem:[#allocation21 + $0xc58] sm:$0xff] }
 0x873   :  { %11183 = vmatprep.subr.bf16.mxu1 %v12673_v49  ;;  %v7893_v49 = vld [vmem:[#allocation21 + $0xc78] sm:$0xff] }
 0x874   :  { %v12817_v19 = vcombine.high %v7889_v24, %v7893_v49  ;;  %v12816_v32 = vcombine.low %v7889_v24, %v7893_v49 }
 0x876   :  { %11184 = vmatpush2.bf16.msra.mxu1 %v12672_v23  ;;  %v7881_v23 = vld [vmem:[#allocation21 + $0xc18] sm:$0xff] }
 0x877   :  { %11185 = vmatprep.subr.bf16.mxu1 %v12665_v25  ;;  %v7885_v25 = vld [vmem:[#allocation21 + $0xc38] sm:$0xff] }
 0x878   :  { %v12809_v55 = vcombine.high %v7881_v23, %v7885_v25  ;;  %v12808_v21 = vcombine.low %v7881_v23, %v7885_v25 }
 0x87a   :  { %11186 = vmatpush2.bf16.msra.mxu1 %v12664_v56  ;;  %v8001_v56 = vld [vmem:[#allocation21 + $0xfd8] sm:$0xff] }
 0x87b   :  { %11187 = vmatprep.subr.bf16.mxu1 %v12657_v51  ;;  %v8005_v51 = vld [vmem:[#allocation21 + $0xff8] sm:$0xff] }
 0x87c   :  { %v12929_v61 = vcombine.high %v8001_v56, %v8005_v51  ;;  %v12928_v46 = vcombine.low %v8001_v56, %v8005_v51 }
 0x87e   :  { %11188 = vmatpush2.bf16.msra.mxu1 %v12656_v27  ;;  %v7993_v27 = vld [vmem:[#allocation21 + $0xf98] sm:$0xff] }
 0x87f   :  { %11189 = vmatprep.subr.bf16.mxu1 %v12649_v12  ;;  %v7997_v12 = vld [vmem:[#allocation21 + $0xfb8] sm:$0xff] }
 0x880   :  { %v12921_v3 = vcombine.high %v7993_v27, %v7997_v12  ;;  %v12920_v62 = vcombine.low %v7993_v27, %v7997_v12 }
 0x882   :  { %11190 = vmatpush2.bf16.msra.mxu1 %v12648_v37  ;;  %v7985_v37 = vld [vmem:[#allocation21 + $0xf58] sm:$0xff] }
 0x883   :  { %11191 = vmatprep.subr.bf16.mxu1 %v12641_v10  ;;  %v7989_v10 = vld [vmem:[#allocation21 + $0xf78] sm:$0xff] }
 0x884   :  { %v12913_v0 = vcombine.high %v7985_v37, %v7989_v10  ;;  %v12912_v29 = vcombine.low %v7985_v37, %v7989_v10 }
 0x886   :  { %11192 = vmatpush2.bf16.msra.mxu1 %v12640_v59  ;;  %v7977_v59 = vld [vmem:[#allocation21 + $0xf18] sm:$0xff] }
 0x887   :  { %11193 = vmatprep.subr.bf16.mxu1 %v12633_v44  ;;  %v7981_v44 = vld [vmem:[#allocation21 + $0xf38] sm:$0xff] }
 0x888   :  { %v12905_v57 = vcombine.high %v7977_v59, %v7981_v44  ;;  %v12904_v5 = vcombine.low %v7977_v59, %v7981_v44 }
 0x88a   :  { %11194 = vmatpush2.bf16.msra.mxu1 %v12632_v50  ;;  %v7969_v50 = vld [vmem:[#allocation21 + $0xed8] sm:$0xff] }
 0x88b   :  { %11195 = vmatprep.subr.bf16.mxu1 %v12625_v52  ;;  %v7973_v52 = vld [vmem:[#allocation21 + $0xef8] sm:$0xff] }
 0x88c   :  { %v12897_v13 = vcombine.high %v7969_v50, %v7973_v52  ;;  %v12896_v47 = vcombine.low %v7969_v50, %v7973_v52  ;;  %v14471_v52 = vld [vmem:[#allocation23] sm:$0xff] }
 0x88e   :  { %11196 = vmatpush2.bf16.msra.mxu1 %v12624_v54  ;;  %v7961_v54 = vld [vmem:[#allocation21 + $0xe98] sm:$0xff] }
 0x88f   :  { %11197 = vmatprep.subr.bf16.mxu1 %v12617_v35  ;;  %v7965_v35 = vld [vmem:[#allocation21 + $0xeb8] sm:$0xff] }
 0x890   :  { %v12889_v1 = vcombine.high %v7961_v54, %v7965_v35  ;;  %v12888_v31 = vcombine.low %v7961_v54, %v7965_v35  ;;  %v8015_v54 = vrot.slane %v14471_v52, %v14066_v40  ;;  %v8023_v40 = vrot.slane %v14471_v52, %v14069_v41 }
 0x892   :  { %11198 = vmatpush2.bf16.msra.mxu1 %v12616_v20  ;;  %v7953_v20 = vld [vmem:[#allocation21 + $0xe58] sm:$0xff] }
 0x893   :  { %11253 = vmatprep.subr.bf16.mxu1 %v12865_v33  ;;  %v7957_v33 = vld [vmem:[#allocation21 + $0xe78] sm:$0xff] }
 0x894   :  { %v12881_v4 = vcombine.high %v7953_v20, %v7957_v33  ;;  %v12880_v15 = vcombine.low %v7953_v20, %v7957_v33 }
 0x895   :  { %11200 = vmatmul.mubr.bf16.vlgmr.msra.gmra.mxu1 %v14351_v60  ;;  %v7901_v60 = vld [vmem:[#allocation21 + $0xcb8] sm:$0xff] }
 0x896   :  { %11254 = vmatpush1.bf16.msra.mxu1 %v12864_v8  ;;  %11285 = vmatprep.mubr.bf16.mxu1 %v14411_v58  ;;  %v12825_v58 = vcombine.high %v7897_v28, %v7901_v60  ;;  %v12824_v18 = vcombine.low %v7897_v28, %v7901_v60  ;;  %v7945_v8 = vld [vmem:[#allocation21 + $0xe18] sm:$0xff] }
 0x897   :  { %11255 = vmatprep.subr.bf16.mxu1 %v12857_v30  ;;  %v7949_v30 = vld [vmem:[#allocation21 + $0xe38] sm:$0xff] }
 0x898   :  { %v12873_v38 = vcombine.high %v7945_v8, %v7949_v30 }
 0x89a   :  { %11256 = vmatpush1.bf16.msra.mxu1 %v12856_v36  ;;  %v12872_v36 = vcombine.low %v7945_v8, %v7949_v30 }
 0x89b   :  { %11257 = vmatprep.subr.bf16.mxu1 %v12849_v48  ;;  %v10642_v48 = vpop.f32.mrf.mxu0 }
 0x89d   :  { %v10644_v53 = vpop.f32.mrf.mxu0 }
 0x89e   :  { %11258 = vmatpush1.bf16.msra.mxu1 %v12848_v63  ;;  %v10685_v63 = vpop.f32.mrf.mxu1 }
 0x89f   :  { %11259 = vmatprep.subr.bf16.mxu1 %v12841_v34  ;;  %v10646_v22 = vpop.f32.mrf.mxu0 }
 0x8a0   :  { %v10687_v26 = vpop.f32.mrf.mxu1 }
 0x8a1   :  { %v10648_v34 = vpop.f32.mrf.mxu0 }
 0x8a2   :  { %11260 = vmatpush1.bf16.msra.mxu1 %v12840_v6  ;;  %v10689_v6 = vpop.f32.mrf.mxu1  ;;  %v10649_v2 = vadd.f32 %v10648_v34, %v8015_v54 }
 0x8a3   :  { %11261 = vmatprep.subr.bf16.mxu1 %v12833_v11  ;;  %v10728_v16 = vpop.f32.mrf.mxu0 }
 0x8a4   :  { %v10691_v28 = vpop.f32.mrf.mxu1 }
 0x8a5   :  { %v10730_v11 = vpop.f32.mrf.mxu0 }
 0x8a6   :  { %11262 = vmatpush1.bf16.msra.mxu1 %v12832_v17  ;;  %v10771_v17 = vpop.f32.mrf.mxu1 }
 0x8a7   :  { %11263 = vmatprep.subr.bf16.mxu1 %v12825_v58  ;;  %v14441_v60 = vpop.f32.mrf.mxu0 }
 0x8a8   :  { %v10773_v24 = vpop.f32.mrf.mxu1 }
 0x8a9   :  { %v14443_v58 = vpop.f32.mrf.mxu0 }
 0x8aa   :  { %11264 = vmatpush1.bf16.msra.mxu1 %v12824_v18  ;;  %v14445_v18 = vpop.f32.mrf.mxu1 }
 0x8ab   :  { %11265 = vmatprep.subr.bf16.mxu1 %v12817_v19  ;;  %v10814_v49 = vpop.f32.mrf.mxu0 }
 0x8ac   :  { %v14447_v19 = vpop.f32.mrf.mxu1 }
 0x8ae   :  { %11266 = vmatpush1.bf16.msra.mxu1 %v12816_v32  ;;  %v10857_v25 = vpop.f32.mrf.mxu1 }
 0x8af   :  { %11267 = vmatprep.subr.bf16.mxu1 %v12809_v55 }
 0x8b0   :  { %v10859_v55 = vpop.f32.mrf.mxu1 }
 0x8b2   :  { %11268 = vmatpush1.bf16.msra.mxu1 %v12808_v21  ;;  %v10861_v51 = vpop.f32.mrf.mxu1 }
 0x8b3   :  { %11269 = vmatprep.subr.bf16.mxu1 %v12929_v61 }
 0x8b4   :  { %v14451_v61 = vpop.f32.mrf.mxu1 }
 0x8b6   :  { %11270 = vmatpush2.bf16.msra.mxu1 %v12928_v46  ;;  %v10943_v12 = vpop.f32.mrf.mxu1 }
 0x8b7   :  { %11271 = vmatprep.subr.bf16.mxu1 %v12921_v3 }
 0x8b8   :  { %v14457_v3 = vpop.f32.mrf.mxu1 }
 0x8ba   :  { %11272 = vmatpush2.bf16.msra.mxu1 %v12920_v62  ;;  %v14459_v10 = vpop.f32.mrf.mxu1 }
 0x8bb   :  { %11273 = vmatprep.subr.bf16.mxu1 %v12913_v0 }
 0x8bc   :  { %v14463_v0 = vpop.f32.mrf.mxu1 }
 0x8bd   :  { %14580 = vst [vmem:[#allocation37_spill] sm:$0xff] %v14463_v0 }
 0x8be   :  { %11274 = vmatpush2.bf16.msra.mxu1 %v12912_v29 }
 0x8bf   :  { %11275 = vmatprep.subr.bf16.mxu1 %v12905_v57 }
 0x8c2   :  { %11276 = vmatpush2.bf16.msra.mxu1 %v12904_v5 }
 0x8c3   :  { %11277 = vmatprep.subr.bf16.mxu1 %v12897_v13  ;;  %v8011_v13 = vrot.slane %v14471_v52, %v14072_v42 }
 0x8c5   :  { %v10643_v33 = vadd.f32 %v10642_v48, %v8011_v13  ;;  %v10647_v7 = vadd.f32 %v10646_v22, %v8011_v13 }
 0x8c6   :  { %11278 = vmatpush2.bf16.msra.mxu1 %v12896_v47  ;;  %v8019_v47 = vrot.slane %v14471_v52, %v14075_v43 }
 0x8c7   :  { %11279 = vmatprep.subr.bf16.mxu1 %v12889_v1  ;;  %v11312_v1 = vld [vmem:[#allocation24] sm:$0xff] }
 0x8ca   :  { %11280 = vmatpush2.bf16.msra.mxu1 %v12888_v31  ;;  %v10645_v31 = vadd.f32 %v10644_v53, %v8015_v54  ;;  %v8027_v53 = vrot.slane %v14471_v52, %v14370_v45 }
 0x8cb   :  { %11281 = vmatprep.subr.bf16.mxu1 %v12881_v4  ;;  %v14485_v4 = vunpack.c.l.bf16 %v11312_v1 }
 0x8cd   :  { %v11320_v48 = vrot.slane %v14485_v4, %v14072_v42  ;;  %v11324_v22 = vrot.slane %v14485_v4, %v14075_v43 }
 0x8ce   :  { %11282 = vmatpush2.bf16.msra.mxu1 %v12880_v15  ;;  %v10815_v15 = vadd.f32 %v10814_v49, %v8019_v47  ;;  %v10690_v49 = vadd.f32 %v10689_v6, %v10647_v7  ;;  %v14585_v6 = vsub.s32 5, %v14063_v39 }
 0x8cf   :  { %11283 = vmatprep.subr.bf16.mxu1 %v12873_v38  ;;  %v10686_v38 = vadd.f32 %v10685_v63, %v10643_v33  ;;  %v10692_v63 = vadd.f32 %v10691_v28, %v10649_v2  ;;  %v11364_v28 = vrot.slane %v11324_v22, %v14072_v42 }
 0x8d1   :  { %v10729_v0 = vadd.f32 %v10728_v16, %v10686_v38  ;;  %v10735_v33 = vadd.f32 %v14443_v58, %v10692_v63 }
 0x8d2   :  { %11284 = vmatpush2.bf16.msra.mxu1 %v12872_v36  ;;  %v10688_v36 = vadd.f32 %v10687_v26, %v10645_v31  ;;  %v11360_v31 = vrot.slane %v11320_v48, %v14072_v42 }
 0x8d3   :  { %v10772_v34 = vadd.f32 %v10771_v17, %v10729_v0  ;;  %v11332_v0 = vrot.slane %v14485_v4, %v14406_v9 }
 0x8d5   :  { %11286 = vmatmul.mubr.bf16.vlgmr.msra.gmra.mxu1 %v14413_v14  ;;  %v10816_v14 = vpop.f32.mrf.mxu0  ;;  %v11029_v44 = vpop.f32.mrf.mxu1  ;;  %v11372_v48 = vrot.slane %v11332_v0, %v14072_v42 }
 0x8d7   :  { %v10818_v23 = vpop.f32.mrf.mxu0  ;;  %v14467_v57 = vpop.f32.mrf.mxu1 }
 0x8d8   :  { %v10819_v41 = vadd.f32 %v10818_v23, %v8019_v47 }
 0x8d9   :  { %v10820_v32 = vpop.f32.mrf.mxu0  ;;  %v14473_v5 = vpop.f32.mrf.mxu1 }
 0x8da   :  { %v10862_v13 = vadd.f32 %v10861_v51, %v10819_v41  ;;  %v10821_v2 = vadd.f32 %v10820_v32, %v8023_v40 }
 0x8db   :  { %v10900_v56 = vpop.f32.mrf.mxu0  ;;  %v14483_v20 = vpop.f32.mrf.mxu1 }
 0x8dc   :  { %14582 = vst [vmem:[#allocation39_spill] sm:$0xff] %v14483_v20  ;;  %v10864_v47 = vadd.f32 %v14451_v61, %v10821_v2 }
 0x8dd   :  { %v14449_v21 = vpop.f32.mrf.mxu0 }
 0x8df   :  { %v14453_v27 = vpop.f32.mrf.mxu0 }
 0x8e0   :  { %v10905_v32 = vadd.f32 %v14453_v27, %v10862_v13 }
 0x8e1   :  { %v14455_v46 = vpop.f32.mrf.mxu0 }
 0x8e2   :  { %14579 = vst [vmem:[#allocation36_spill] sm:$0xff] %v14455_v46  ;;  %v10731_v46 = vadd.f32 %v10730_v11, %v10688_v36  ;;  %v10733_v11 = vadd.f32 %v14441_v60, %v10690_v49  ;;  %v11328_v60 = vrot.slane %v14485_v4, %v14370_v45 }
 0x8e3   :  { %v10986_v37 = vpop.f32.mrf.mxu0 }
 0x8e4   :  { %v10774_v26 = vadd.f32 %v10773_v24, %v10731_v46  ;;  %v10987_v7 = vadd.f32 %v10986_v37, %v8027_v53  ;;  %v11296_v24 = vmax.f32 %v10772_v34, 0.0  ;;  %v10778_v46 = vadd.f32 %v14447_v19, %v10735_v33  ;;  %v14588_v34 = vld [vmem:[#allocation37_spill] sm:$0xff] }
 0x8e5   :  { %v14461_v62 = vpop.f32.mrf.mxu0 }
 0x8e6   :  { %v11030_v58 = vadd.f32 %v11029_v44, %v10987_v7  ;;  %v11368_v44 = vrot.slane %v11328_v60, %v14072_v42  ;;  %v11305_v36 = vmax.f32 %v10778_v46, 0.0 }
 0x8e7   :  { %v10990_v59 = vpop.f32.mrf.mxu0 }
 0x8e8   :  { %v11398_v2 = vmul.f32 %v11364_v28, %v11305_v36 }
 0x8e9   :  { %v14465_v29 = vpop.f32.mrf.mxu0  ;;  %v14586_v49 = vld [vmem:[#allocation36_spill] sm:$0xff] }
 0x8eb   :  { %v14469_v50 = vpop.f32.mrf.mxu0 }
 0x8ed   :  { %v14479_v35 = vpop.f32.mrf.mxu0 }
 0x8ee   :  { %14581 = vst [vmem:[#allocation38_spill] sm:$0xff] %v14479_v35  ;;  %v10858_v35 = vadd.f32 %v10857_v25, %v10815_v15 }
 0x8ef   :  { %v14487_v8 = vpop.f32.mrf.mxu0 }
 0x8f0   :  { %14583 = vst [vmem:[#allocation40_spill] sm:$0xff] %v14487_v8  ;;  %v10901_v54 = vadd.f32 %v10900_v56, %v10858_v35  ;;  %v10776_v56 = vadd.f32 %v14445_v18, %v10733_v11  ;;  %v10991_v35 = vadd.f32 %v10990_v59, %v8027_v53  ;;  %v14589_v11 = vld [vmem:[#allocation39_spill] sm:$0xff] }
 0x8f1   :  { %v14497_v8 = vpop.f32.mrf.mxu0 }
 0x8f2   :  { %v10944_v17 = vadd.f32 %v10943_v12, %v10901_v54  ;;  %v11034_v27 = vadd.f32 %v14473_v5, %v10991_v35 }
 0x8f3   :  { %v14503_v16 = vpop.f32.mrf.mxu0 }
 0x8f4   :  { %v11298_v18 = vmax.f32 %v10944_v17, 0.0  ;;  %v14592_v17 = vsub.s32 7, %v14063_v39 }
 0x8f5   :  { %v11160_v51 = vpop.f32.mrf.mxu0  ;;  %v14590_v54 = vld [vmem:[#allocation38_spill] sm:$0xff] }
 0x8f6   :  { %v11391_v22 = vmul.f32 %v11368_v44, %v11298_v18  ;;  %v8039_v60 = vrot.slane %v14471_v52, %v14592_v17 }
 0x8f7   :  { %v11162_v38 = vpop.f32.mrf.mxu0  ;;  %v14591_v33 = vld [vmem:[#allocation40_spill] sm:$0xff] }
 0x8f8   :  { %v11077_v7 = vadd.f32 %v14591_v33, %v11034_v27 }
 0x8f9   :  { %v11164_v13 = vpop.f32.mrf.mxu0 }
 0x8fa   :  { %v11165_v36 = vadd.f32 %v11164_v13, %v8039_v60 }
 0x915   :  { %v14489_v30 = vpop.f32.mrf.mxu1 }
 0x916   :  { %14584 = vst [vmem:[#allocation41_spill] sm:$0xff] %v14489_v30  ;;  %v10817_v30 = vadd.f32 %v10816_v14, %v8023_v40  ;;  %v8031_v14 = vrot.slane %v14471_v52, %v14585_v6  ;;  %v11389_v40 = vmul.f32 %v11360_v31, %v11296_v24 }
 0x917   :  { %v14499_v20 = vpop.f32.mrf.mxu1 }
 0x918   :  { %v10860_v25 = vadd.f32 %v10859_v55, %v10817_v30  ;;  %v11297_v55 = vmax.f32 %v10774_v26, 0.0  ;;  %v10989_v12 = vadd.f32 %v14461_v62, %v8031_v14  ;;  %v14522_v30 = vunpack.c.h.bf16 %v11312_v1 }
 0x919   :  { %v11119_v23 = vpop.f32.mrf.mxu1  ;;  %v11073_v62 = vadd.f32 %v14469_v50, %v11030_v58  ;;  %v11304_v1 = vmax.f32 %v10776_v56, 0.0  ;;  %v10993_v53 = vadd.f32 %v14465_v29, %v8031_v14  ;;  %v8035_v50 = vrot.slane %v14471_v52, %v14406_v9  ;;  %v11244_v58 = vpop.f32.mrf.mxu0 }
 0x91a   :  { %v10903_v37 = vadd.f32 %v14449_v21, %v10860_v25  ;;  %v10948_v21 = vadd.f32 %v14459_v10, %v10905_v32  ;;  %v11032_v4 = vadd.f32 %v14467_v57, %v10989_v12  ;;  %v11390_v61 = vmul.f32 %v11364_v28, %v11297_v55 }
 0x91b   :  { %v11121_v15 = vpop.f32.mrf.mxu1  ;;  %v11336_v57 = vrot.slane %v14522_v30, %v14072_v42  ;;  %v11036_v25 = vadd.f32 %v14589_v11, %v10993_v53  ;;  %v11340_v24 = vrot.slane %v14522_v30, %v14075_v43  ;;  %v11397_v0 = vmul.f32 %v11360_v31, %v11304_v1  ;;  %v11246_v27 = vpop.f32.mrf.mxu0 }
 0x91c   :  { %v10946_v19 = vadd.f32 %v14457_v3, %v10903_v37  ;;  %v10907_v3 = vadd.f32 %v14586_v49, %v10864_v47  ;;  %v11306_v63 = vmax.f32 %v10948_v21, 0.0  ;;  %v11075_v29 = vadd.f32 %v14590_v54, %v11032_v4 }
 0x91d   :  { %v14587_v41 = vld [vmem:[#allocation41_spill] sm:$0xff]  ;;  %v11405_v14 = vadd.f32 %v11390_v61, %v11389_v40  ;;  %v11376_v56 = vrot.slane %v11336_v57, %v14072_v42  ;;  %v11120_v37 = vadd.f32 %v11119_v23, %v11077_v7  ;;  %v11159_v12 = vadd.f32 %v14503_v16, %v8035_v50 }
 0x91e   :  { %v11116_v10 = vadd.f32 %v14587_v41, %v11073_v62  ;;  %v11299_v5 = vmax.f32 %v10946_v19, 0.0  ;;  %v10950_v26 = vadd.f32 %v14588_v34, %v10907_v3  ;;  %v11118_v46 = vadd.f32 %v14499_v20, %v11075_v29 }
 0x91f   :  { %v11406_v32 = vadd.f32 %v11405_v14, %v11391_v22  ;;  %v11399_v28 = vmul.f32 %v11368_v44, %v11306_v63  ;;  %v11079_v39 = vadd.f32 %v14497_v8, %v11036_v25  ;;  %v11414_v18 = vadd.f32 %v11398_v2, %v11397_v0 }
 0x920   :  { %v11300_v55 = vmax.f32 %v11116_v10, 0.0  ;;  %v11392_v35 = vmul.f32 %v11372_v48, %v11299_v5  ;;  %v11307_v47 = vmax.f32 %v10950_v26, 0.0  ;;  %v11161_v19 = vadd.f32 %v11160_v51, %v8039_v60  ;;  %v11248_v10 = vpop.f32.mrf.mxu0 }
 0x921   :  { %v11380_v43 = vrot.slane %v11340_v24, %v14072_v42  ;;  %v11301_v4 = vmax.f32 %v11118_v46, 0.0  ;;  %v11308_v20 = vmax.f32 %v11120_v37, 0.0  ;;  %v11122_v23 = vadd.f32 %v11121_v15, %v11079_v39 }
 0x922   :  { %v11393_v40 = vmul.f32 %v11376_v56, %v11300_v55  ;;  %v11163_v31 = vadd.f32 %v11162_v38, %v8035_v50  ;;  %v11344_v16 = vrot.slane %v14522_v30, %v14370_v45  ;;  %v11407_v44 = vadd.f32 %v11406_v32, %v11392_v35  ;;  %v12930_v32 = vld [vmem:[#allocation2] ss:$0 sm:$0xff] }
 0x923   :  { %v11415_v61 = vadd.f32 %v11414_v18, %v11399_v28  ;;  %v11400_v1 = vmul.f32 %v11372_v48, %v11307_v47  ;;  %v11394_v3 = vmul.f32 %v11380_v43, %v11301_v4  ;;  %v11401_v41 = vmul.f32 %v11376_v56, %v11308_v20 }
 0x924   :  { %v11408_v49 = vadd.f32 %v11407_v44, %v11393_v40  ;;  %v11309_v15 = vmax.f32 %v11122_v23, 0.0  ;;  %v11384_v45 = vrot.slane %v11344_v16, %v14072_v42 }
 0x925   :  { %v11416_v63 = vadd.f32 %v11415_v61, %v11400_v1 }
 0x926   :  { %v11409_v54 = vadd.f32 %v11408_v49, %v11394_v3 }
 0x927   :  { %v11417_v25 = vadd.f32 %v11416_v63, %v11401_v41 }
 0x955   :  { %v11201_v59 = vpop.f32.mrf.mxu1 }
 0x956   :  { %v11202_v21 = vadd.f32 %v11201_v59, %v11159_v12  ;;  %v11348_v59 = vrot.slane %v14522_v30, %v14406_v9  ;;  %v11402_v9 = vmul.f32 %v11380_v43, %v11309_v15  ;;  %v11250_v30 = vpop.f32.mrf.mxu0 }
 0x957   :  { %v11203_v6 = vpop.f32.mrf.mxu1 }
 0x958   :  { %v11204_v62 = vadd.f32 %v11203_v6, %v11161_v19  ;;  %v11245_v51 = vadd.f32 %v11244_v58, %v11202_v21  ;;  %v11388_v11 = vrot.slane %v11348_v59, %v14072_v42  ;;  %v11418_v55 = vadd.f32 %v11417_v25, %v11402_v9 }
 0x959   :  { %v11205_v52 = vpop.f32.mrf.mxu1 }
 0x95a   :  { %v11206_v53 = vadd.f32 %v11205_v52, %v11163_v31  ;;  %v11247_v5 = vadd.f32 %v11246_v27, %v11204_v62 }
 0x95b   :  { %v11207_v8 = vpop.f32.mrf.mxu1 }
 0x95c   :  { %v11208_v57 = vadd.f32 %v11207_v8, %v11165_v36  ;;  %v11249_v26 = vadd.f32 %v11248_v10, %v11206_v53 }
 0x95e   :  { %v11251_v6 = vadd.f32 %v11250_v30, %v11208_v57 }
 0x995   :  { %v11287_v38 = vpop.f32.mrf.mxu1 }
 0x996   :  { %v11288_v22 = vadd.f32 %v11287_v38, %v11245_v51 }
 0x997   :  { %v11289_v48 = vpop.f32.mrf.mxu1 }
 0x998   :  { %v11302_v50 = vmax.f32 %v11288_v22, 0.0  ;;  %v11290_v34 = vadd.f32 %v11289_v48, %v11247_v5 }
 0x999   :  { %v11291_v13 = vpop.f32.mrf.mxu1 }
 0x99a   :  { %v11395_v29 = vmul.f32 %v11384_v45, %v11302_v50  ;;  %v11303_v33 = vmax.f32 %v11290_v34, 0.0  ;;  %v11292_v7 = vadd.f32 %v11291_v13, %v11249_v26 }
 0x99b   :  { %v11293_v14 = vpop.f32.mrf.mxu1 }
 0x99c   :  { %v11310_v2 = vmax.f32 %v11292_v7, 0.0  ;;  %v11294_v17 = vadd.f32 %v11293_v14, %v11251_v6  ;;  %v11396_v60 = vmul.f32 %v11388_v11, %v11303_v33  ;;  %v11410_v24 = vadd.f32 %v11409_v54, %v11395_v29 }
 0x99e   :  { %v11403_v56 = vmul.f32 %v11384_v45, %v11310_v2  ;;  %v11311_v58 = vmax.f32 %v11294_v17, 0.0  ;;  %v11411_v46 = vadd.f32 %v11410_v24, %v11396_v60 }
 0x9a0   :  { %v11404_v37 = vmul.f32 %v11388_v11, %v11311_v58  ;;  %11412 = vadd.xlane.f32.xlu0 %v11411_v46  ;;  %v11419_v42 = vadd.f32 %v11418_v55, %v11403_v56 }
 0x9a2   :  { %v11420_v0 = vadd.f32 %v11419_v42, %v11404_v37 }
 0x9a4   :  { %11421 = vadd.xlane.f32.xlu0 %v11420_v0 }
 0xa29   :  { %v11413_v12 = vpop.xlane.xlu0 %11412 }
 0xa2a   :  { %v11430_v35 = vadd.f32 %v12930_v32, %v11413_v12 }
 0xa2c   :  { %11432 = vxpose.xlu1.b32.start [1/2] (short) (narrow) %v11430_v35, 8 }
 0xa2d   :  { %v11422_v28 = vpop.xlane.xlu0 %11421 }
 0xa2e   :  { %v11431_v47 = vadd.f32 %v12930_v32, %v11422_v28 }
 0xa30   :  { %11433 = vxpose.xlu1.b32.end [2/2] (short) (narrow) %v11431_v47, 8 }
 0xaa8   :  { %v11448_v39 = vpop.trf.xlu1 }
 0xaa9   :  { %11465 = vst.msk [vmem:[#allocation26] sm:$0x1] %vm11464_vm0, %v11448_v39 }
 0xaaa   :  { %13873 = shalt.err (!%p13870_p4)
}
 0xaab   :  { %11475 = dma.vmem_to_hbm [thread:$0]  %s11473_s13, 16, %s14576_s15, [#allocation5]  }
 0xaac   :  { %13898 = dma.done.wait [#allocation5], 16  }
 0xaad   :  { %13899 = vsyncadd [#allocation5], 4294967280 }
 0xaae   :  { %11479 = vsyncpa [#allocation4], 1 }
 0xaaf   :  { %11480 = vsyncpa [#allocation7], 1 }
 0xab0   :  { %11481 = vsyncpa [#allocation10], 1 }
 0xab1   :  { %11482 = vsyncpa [#allocation13], 1 }
 0xab2   :  { %11483 = vsyncpa [#allocation16], 1 }
 0xab3   :  { %11484 = vsyncpa [#allocation19], 1 }
 0xab4   :  { %11485 = vsyncpa [#allocation22], 1 }
 0xab5   :  { %11486 = vsyncpa [#allocation25], 1 }
 0xab6   :  { %11487 = vsyncpa [#allocation5], 1 }

</bundles_post_ra>
